<compile_context>
chip_gen: v5e
topology: v5e:2x2
jax: 0.10.0
libtpu: 0.0.40
codegen_flags: <defaults>
</compile_context>

<pallas_src>
import functools

import jax
import jax.numpy as jnp
from jax.experimental import pallas as pl
from jax.experimental.pallas import tpu as pltpu

C = 32            # hidden width (conv1's input is zero-padded 2 -> 32 channels)
NEG_SLOPE = 0.2   # LeakyReLU negative slope


def _fused_adjustnet_kernel(ratio_ref, x_ref,
                            w1_ref, b1_ref, w2_ref, b2_ref,
                            w3_ref, b3_ref, w4_ref, b4_ref,
                            o_ref, act_ref, *, H, W):
    """Whole AdjustNet forward for one image; activations stay in VMEM.

    ratio_ref: (1,)           SMEM  input_ratio scalar
    x_ref:     (1, H, W)      VMEM  single-channel input image
    wN_ref:    (9*C, C)       VMEM  im2col-packed weights (w4: (1, 9*C) row)
    bN_ref:    (1, C)/(1, 1)  VMEM  biases
    o_ref:     (1, H*W, 1)    VMEM  sigmoid output
    act_ref:   (H+2, W+2, C)  VMEM  zero-bordered padded-activation scratch
    """
    HW = H * W

    def im2col():
        # 3x3 patches from the zero-padded scratch: 3 column slices + 9
        # sublane-offset slices, concatenated along lanes -> (HW, 9*C).
        act = act_ref[...]
        taps = []
        for dx in range(3):
            col = act[:, dx:dx + W, :].reshape((H + 2) * W, C)
            for dy in range(3):
                taps.append(col[dy * W:dy * W + HW, :])
        return jnp.concatenate(taps, axis=-1)

    def conv_leaky(w_ref, b_ref):
        y = jnp.dot(im2col(), w_ref[...], preferred_element_type=jnp.float32)
        y = y + b_ref[...]
        return jnp.maximum(y, NEG_SLOPE * y)               # LeakyReLU(0.2)

    # --- synthesize the padded 2-channel conv1 input in-kernel -------------
    # channel 0 = x, channel 1 = input_ratio, channels 2..31 = 0 (their packed
    # conv1 weights are zero, so they contribute nothing; border stays zero,
    # exactly matching Conv2d(padding=1) on the concatenated input).
    act_ref[...] = jnp.zeros_like(act_ref)
    ratio = ratio_ref[0]
    ch = jax.lax.broadcasted_iota(jnp.int32, (H, W, C), 2)
    x_img = x_ref[0][:, :, None]                            # (H, W, 1)
    act_ref[1:H + 1, 1:W + 1, :] = jnp.where(
        ch == 0, x_img, jnp.where(ch == 1, ratio, 0.0))

    # --- conv1..conv3 (+ LeakyReLU); intermediates never leave VMEM --------
    act_ref[1:H + 1, 1:W + 1, :] = conv_leaky(w1_ref, b1_ref).reshape(H, W, C)
    act_ref[1:H + 1, 1:W + 1, :] = conv_leaky(w2_ref, b2_ref).reshape(H, W, C)
    act_ref[1:H + 1, 1:W + 1, :] = conv_leaky(w3_ref, b3_ref).reshape(H, W, C)

    # --- conv4 (32 -> 1): VPU multiply + lane reduction ---------------------
    y = jnp.sum(im2col() * w4_ref[...], axis=-1, keepdims=True) + b4_ref[...]
    y = jnp.maximum(y, NEG_SLOPE * y)                       # LeakyReLU(0.2)
    y = 1.0 / (1.0 + jnp.exp(-y))                           # Sigmoid (exp on EUP)
    o_ref[...] = y.reshape(1, HW, 1)


def _pack_conv_weights(w_hwio):
    """(3, 3, Cin, Cout) HWIO -> (9*Cin, Cout); tap order matches im2col()."""
    return jnp.concatenate(
        [w_hwio[dy, dx] for dx in range(3) for dy in range(3)], axis=0)


def adjust_net_forward(params, x_nchw, input_ratio):
    """x_nchw: (N, 1, H, W) f32; input_ratio: scalar. Returns (N, 1, H, W)."""
    N, cin, H, W = x_nchw.shape
    assert cin == 1, "AdjustNet expects a 1-channel input (ratio is channel 2)"
    x = x_nchw[:, 0, :, :].astype(jnp.float32)              # (N, H, W)
    ratio = jnp.asarray(input_ratio, jnp.float32).reshape(1)

    w1, b1 = params["conv1"]
    w2, b2 = params["conv2"]
    w3, b3 = params["conv3"]
    w4, b4 = params["conv4"]
    # conv1: zero-pad Cin 2 -> 32 so every layer shares the same im2col path.
    w1p = _pack_conv_weights(
        jnp.pad(w1, ((0, 0), (0, 0), (0, C - w1.shape[2]), (0, 0))))
    w2p = _pack_conv_weights(w2)
    w3p = _pack_conv_weights(w3)
    w4p = _pack_conv_weights(w4).reshape(1, 9 * C)          # row vector (VPU path)
    b1r, b2r, b3r = b1.reshape(1, C), b2.reshape(1, C), b3.reshape(1, C)
    b4r = b4.reshape(1, 1)

    kernel = functools.partial(_fused_adjustnet_kernel, H=H, W=W)
    full = lambda n: (0, 0)
    out = pl.pallas_call(
        kernel,
        out_shape=jax.ShapeDtypeStruct((N, H * W, 1), jnp.float32),
        grid_spec=pltpu.PrefetchScalarGridSpec(
            num_scalar_prefetch=0,
            grid=(N,),
            in_specs=[
                pl.BlockSpec(memory_space=pltpu.MemorySpace.SMEM),  # input_ratio
                pl.BlockSpec((1, H, W), lambda n: (n, 0, 0)),       # x
                pl.BlockSpec((9 * C, C), full),                     # conv1 w
                pl.BlockSpec((1, C), full),                         # conv1 b
                pl.BlockSpec((9 * C, C), full),                     # conv2 w
                pl.BlockSpec((1, C), full),                         # conv2 b
                pl.BlockSpec((9 * C, C), full),                     # conv3 w
                pl.BlockSpec((1, C), full),                         # conv3 b
                pl.BlockSpec((1, 9 * C), full),                     # conv4 w (row)
                pl.BlockSpec((1, 1), full),                         # conv4 b
            ],
            out_specs=pl.BlockSpec((1, H * W, 1), lambda n: (n, 0, 0)),
            scratch_shapes=[pltpu.VMEM((H + 2, W + 2, C), jnp.float32)],
        ),
        compiler_params=pltpu.CompilerParams(
            dimension_semantics=("parallel",),          # both TCs on v7x
            vmem_limit_bytes=32 * 1024 * 1024,
        ),
    )(ratio, x, w1p, b1r, w2p, b2r, w3p, b3r, w4p, b4r)
    # TODO(synk): for large H, W tile rows (with a 1-row halo) per grid step so
    # the padded scratch fits v7x's 64 MiB / v5e's scoped VMEM.
    return out.reshape(N, 1, H, W)


def init_params(key):
    """Deterministic Xavier-uniform HWIO weights + Conv2d-default-style biases."""
    layer_chans = [(2, C), (C, C), (C, C), (C, 1)]
    keys = jax.random.split(key, 2 * len(layer_chans))
    params = {}
    for i, (cin, cout) in enumerate(layer_chans):
        fan_in, fan_out = cin * 9, cout * 9
        w_bound = (6.0 / (fan_in + fan_out)) ** 0.5          # xavier_uniform_
        w = jax.random.uniform(keys[2 * i], (3, 3, cin, cout),
                               jnp.float32, -w_bound, w_bound)
        b_bound = 1.0 / (fan_in ** 0.5)                       # Conv2d bias default
        b = jax.random.uniform(keys[2 * i + 1], (cout,),
                               jnp.float32, -b_bound, b_bound)
        params[f"conv{i + 1}"] = (w, b)
    return params


def _reference_forward(params, x_nchw, input_ratio):
    """Pure-XLA reference (lax.conv) used only for validation."""
    ratio = jnp.full(x_nchw.shape, input_ratio, jnp.float32)
    h = jnp.concatenate([x_nchw, ratio], axis=1)             # (N, 2, H, W)
    h = jnp.transpose(h, (0, 2, 3, 1))                       # NHWC
    for name in ("conv1", "conv2", "conv3", "conv4"):
        w, b = params[name]
        h = jax.lax.conv_general_dilated(
            h, w, window_strides=(1, 1), padding="SAME",
            dimension_numbers=("NHWC", "HWIO", "NHWC"),
            precision=jax.lax.Precision.HIGHEST) + b
        h = jnp.maximum(h, NEG_SLOPE * h)                     # LeakyReLU(0.2)
    h = 1.0 / (1.0 + jnp.exp(-h))                             # final Sigmoid
    return jnp.transpose(h, (0, 3, 1, 2))                     # NCHW


if __name__ == "__main__":
    key = jax.random.PRNGKey(0)
    pkey, xkey = jax.random.split(key)
    params = init_params(pkey)

    # x is (N, 1, H, W) so that cat(x, ratio) gives conv1's 2 input channels.
    x = jax.random.normal(xkey, (2, 1, 16, 16), jnp.float32)
    input_ratio = 0.5

    fwd = jax.jit(adjust_net_forward)
    out = jax.block_until_ready(fwd(params, x, input_ratio))

    assert out.shape == (2, 1, 16, 16), out.shape
    assert bool(jnp.all(jnp.isfinite(out)))
    ref = _reference_forward(params, x, input_ratio)
    assert bool(jnp.allclose(out, ref, atol=2e-2, rtol=2e-2)), (
        float(jnp.max(jnp.abs(out - ref))))
    print("KERNEL_OK")
</pallas_src>

<mosaic_0001>
module attributes {stable_mosaic.version = 11 : i64} {
  func.func @_fused_adjustnet_kernel(%arg0: i32, %arg1: memref<1xf32, #tpu.memory_space<smem>>, %arg2: memref<1x16x16xf32, #tpu.memory_space<vmem>>, %arg3: memref<288x32xf32, #tpu.memory_space<vmem>>, %arg4: memref<1x32xf32, #tpu.memory_space<vmem>>, %arg5: memref<288x32xf32, #tpu.memory_space<vmem>>, %arg6: memref<1x32xf32, #tpu.memory_space<vmem>>, %arg7: memref<288x32xf32, #tpu.memory_space<vmem>>, %arg8: memref<1x32xf32, #tpu.memory_space<vmem>>, %arg9: memref<1x288xf32, #tpu.memory_space<vmem>>, %arg10: memref<1x1xf32, #tpu.memory_space<vmem>>, %arg11: memref<1x256x1xf32, #tpu.memory_space<vmem>>, %arg12: memref<18x18x32xf32, #tpu.memory_space<vmem>>) attributes {dimension_semantics = [#tpu.dimension_semantics<parallel>], iteration_bounds = array<i64: 2>, scalar_prefetch = 0 : i64, scratch_operands = 1 : i64, tpu.core_type = #tpu.core_type<tc>, window_params = [{transform_indices = @transform_0, window_bounds = array<i64: 1>}, {transform_indices = @transform_1, window_bounds = array<i64: 1, 16, 16>}, {pipeline_mode = #tpu.pipeline_mode<synchronous>, transform_indices = @transform_2, window_bounds = array<i64: 288, 32>}, {pipeline_mode = #tpu.pipeline_mode<synchronous>, transform_indices = @transform_3, window_bounds = array<i64: 1, 32>}, {pipeline_mode = #tpu.pipeline_mode<synchronous>, transform_indices = @transform_4, window_bounds = array<i64: 288, 32>}, {pipeline_mode = #tpu.pipeline_mode<synchronous>, transform_indices = @transform_5, window_bounds = array<i64: 1, 32>}, {pipeline_mode = #tpu.pipeline_mode<synchronous>, transform_indices = @transform_6, window_bounds = array<i64: 288, 32>}, {pipeline_mode = #tpu.pipeline_mode<synchronous>, transform_indices = @transform_7, window_bounds = array<i64: 1, 32>}, {pipeline_mode = #tpu.pipeline_mode<synchronous>, transform_indices = @transform_8, window_bounds = array<i64: 1, 288>}, {pipeline_mode = #tpu.pipeline_mode<synchronous>, transform_indices = @transform_9, window_bounds = array<i64: 1, 1>}, {transform_indices = @transform_10, window_bounds = array<i64: 1, 256, 1>}]} {
    %cst = arith.constant 0.000000e+00 : f32
    %0 = vector.broadcast %cst : f32 to vector<18x18x32xf32>
    %c0 = arith.constant 0 : index
    %c0_0 = arith.constant 0 : index
    %c0_1 = arith.constant 0 : index
    %1 = vector.load %arg12[%c0, %c0_0, %c0_1] : memref<18x18x32xf32, #tpu.memory_space<vmem>>, vector<18x18x32xf32>
    tpu.vector_store %arg12[%c0, %c0_0, %c0_1], %0 {strides = array<i32>} : memref<18x18x32xf32, #tpu.memory_space<vmem>>, vector<18x18x32xf32>,
    %c0_2 = arith.constant 0 : index
    %2 = memref.load %arg1[%c0_2] : memref<1xf32, #tpu.memory_space<smem>>
    %3 = tpu.iota {dimensions = array<i32: 2>} : vector<16x16x32xi32>
    %c0_3 = arith.constant 0 : index
    %c0_4 = arith.constant 0 : index
    %c0_5 = arith.constant 0 : index
    %4 = vector.load %arg2[%c0_3, %c0_4, %c0_5] : memref<1x16x16xf32, #tpu.memory_space<vmem>>, vector<1x16x16xf32>
    %5 = vector.shape_cast %4 : vector<1x16x16xf32> to vector<16x16xf32>
    %6 = vector.shape_cast %5 : vector<16x16xf32> to vector<16x16x1xf32>
    %c0_i32 = arith.constant 0 : i32
    %7 = vector.broadcast %c0_i32 : i32 to vector<16x16x32xi32>
    %8 = arith.cmpi eq, %3, %7 : vector<16x16x32xi32>
    %c1_i32 = arith.constant 1 : i32
    %9 = vector.broadcast %c1_i32 : i32 to vector<16x16x32xi32>
    %10 = arith.cmpi eq, %3, %9 : vector<16x16x32xi32>
    %cst_6 = arith.constant 0.000000e+00 : f32
    %11 = vector.broadcast %2 : f32 to vector<16x16x32xf32>
    %12 = vector.broadcast %cst_6 : f32 to vector<16x16x32xf32>
    %13 = arith.select %10, %11, %12 : vector<16x16x32xi1>, vector<16x16x32xf32>
    %14 = vector.shape_cast %6 : vector<16x16x1xf32> to vector<16x16x1xf32>
    %15 = vector.broadcast %14 : vector<16x16x1xf32> to vector<16x16x32xf32>
    %16 = arith.select %8, %15, %13 : vector<16x16x32xi1>, vector<16x16x32xf32>
    %c1 = arith.constant 1 : index
    %c1_7 = arith.constant 1 : index
    %c0_8 = arith.constant 0 : index
    %17 = vector.load %arg12[%c1, %c1_7, %c0_8] : memref<18x18x32xf32, #tpu.memory_space<vmem>>, vector<16x16x32xf32>
    tpu.vector_store %arg12[%c1, %c1_7, %c0_8], %16 {strides = array<i32>} : memref<18x18x32xf32, #tpu.memory_space<vmem>>, vector<16x16x32xf32>,
    %c0_9 = arith.constant 0 : index
    %c0_10 = arith.constant 0 : index
    %c0_11 = arith.constant 0 : index
    %18 = vector.load %arg12[%c0_9, %c0_10, %c0_11] : memref<18x18x32xf32, #tpu.memory_space<vmem>>, vector<18x18x32xf32>
    %19 = vector.extract_strided_slice %18 {offsets = [0, 0, 0], sizes = [18, 16, 32], strides = [1, 1, 1]} : vector<18x18x32xf32> to vector<18x16x32xf32>
    %20 = vector.shape_cast %19 : vector<18x16x32xf32> to vector<288x32xf32>
    %21 = vector.extract_strided_slice %20 {offsets = [0, 0], sizes = [256, 32], strides = [1, 1]} : vector<288x32xf32> to vector<256x32xf32>
    %22 = vector.extract_strided_slice %20 {offsets = [16, 0], sizes = [256, 32], strides = [1, 1]} : vector<288x32xf32> to vector<256x32xf32>
    %23 = vector.extract_strided_slice %20 {offsets = [32, 0], sizes = [256, 32], strides = [1, 1]} : vector<288x32xf32> to vector<256x32xf32>
    %24 = vector.extract_strided_slice %18 {offsets = [0, 1, 0], sizes = [18, 16, 32], strides = [1, 1, 1]} : vector<18x18x32xf32> to vector<18x16x32xf32>
    %25 = vector.shape_cast %24 : vector<18x16x32xf32> to vector<288x32xf32>
    %26 = vector.extract_strided_slice %25 {offsets = [0, 0], sizes = [256, 32], strides = [1, 1]} : vector<288x32xf32> to vector<256x32xf32>
    %27 = vector.extract_strided_slice %25 {offsets = [16, 0], sizes = [256, 32], strides = [1, 1]} : vector<288x32xf32> to vector<256x32xf32>
    %28 = vector.extract_strided_slice %25 {offsets = [32, 0], sizes = [256, 32], strides = [1, 1]} : vector<288x32xf32> to vector<256x32xf32>
    %29 = vector.extract_strided_slice %18 {offsets = [0, 2, 0], sizes = [18, 16, 32], strides = [1, 1, 1]} : vector<18x18x32xf32> to vector<18x16x32xf32>
    %30 = vector.shape_cast %29 : vector<18x16x32xf32> to vector<288x32xf32>
    %31 = vector.extract_strided_slice %30 {offsets = [0, 0], sizes = [256, 32], strides = [1, 1]} : vector<288x32xf32> to vector<256x32xf32>
    %32 = vector.extract_strided_slice %30 {offsets = [16, 0], sizes = [256, 32], strides = [1, 1]} : vector<288x32xf32> to vector<256x32xf32>
    %33 = vector.extract_strided_slice %30 {offsets = [32, 0], sizes = [256, 32], strides = [1, 1]} : vector<288x32xf32> to vector<256x32xf32>
    %34 = tpu.concatenate %21, %22, %23, %26, %27, %28, %31, %32, %33 in 1 : vector<256x32xf32>, vector<256x32xf32>, vector<256x32xf32>, vector<256x32xf32>, vector<256x32xf32>, vector<256x32xf32>, vector<256x32xf32>, vector<256x32xf32>, vector<256x32xf32> -> vector<256x288xf32>
    %c0_12 = arith.constant 0 : index
    %c0_13 = arith.constant 0 : index
    %35 = vector.load %arg3[%c0_12, %c0_13] : memref<288x32xf32, #tpu.memory_space<vmem>>, vector<288x32xf32>
    %cst_14 = arith.constant dense<0.000000e+00> : vector<256x32xf32>
    %36 = tpu.matmul %34, %35, %cst_14 {dimension_numbers = #tpu.dot_dimension_numbers<[1], [0], [0], [1], [0, 0, 1, 1], [], []>} : vector<256x288xf32>, vector<288x32xf32>, vector<256x32xf32> -> vector<256x32xf32>
    %c0_15 = arith.constant 0 : index
    %c0_16 = arith.constant 0 : index
    %37 = vector.load %arg4[%c0_15, %c0_16] : memref<1x32xf32, #tpu.memory_space<vmem>>, vector<1x32xf32>
    %38 = vector.broadcast %37 : vector<1x32xf32> to vector<256x32xf32>
    %39 = arith.addf %36, %38 : vector<256x32xf32>
    %cst_17 = arith.constant 2.000000e-01 : f32
    %40 = vector.broadcast %cst_17 : f32 to vector<256x32xf32>
    %41 = arith.mulf %40, %39 : vector<256x32xf32>
    %42 = arith.maximumf %39, %41 : vector<256x32xf32>
    %43 = vector.shape_cast %42 : vector<256x32xf32> to vector<16x16x32xf32>
    %c1_18 = arith.constant 1 : index
    %c1_19 = arith.constant 1 : index
    %c0_20 = arith.constant 0 : index
    %44 = vector.load %arg12[%c1_18, %c1_19, %c0_20] : memref<18x18x32xf32, #tpu.memory_space<vmem>>, vector<16x16x32xf32>
    tpu.vector_store %arg12[%c1_18, %c1_19, %c0_20], %43 {strides = array<i32>} : memref<18x18x32xf32, #tpu.memory_space<vmem>>, vector<16x16x32xf32>,
    %c0_21 = arith.constant 0 : index
    %c0_22 = arith.constant 0 : index
    %c0_23 = arith.constant 0 : index
    %45 = vector.load %arg12[%c0_21, %c0_22, %c0_23] : memref<18x18x32xf32, #tpu.memory_space<vmem>>, vector<18x18x32xf32>
    %46 = vector.extract_strided_slice %45 {offsets = [0, 0, 0], sizes = [18, 16, 32], strides = [1, 1, 1]} : vector<18x18x32xf32> to vector<18x16x32xf32>
    %47 = vector.shape_cast %46 : vector<18x16x32xf32> to vector<288x32xf32>
    %48 = vector.extract_strided_slice %47 {offsets = [0, 0], sizes = [256, 32], strides = [1, 1]} : vector<288x32xf32> to vector<256x32xf32>
    %49 = vector.extract_strided_slice %47 {offsets = [16, 0], sizes = [256, 32], strides = [1, 1]} : vector<288x32xf32> to vector<256x32xf32>
    %50 = vector.extract_strided_slice %47 {offsets = [32, 0], sizes = [256, 32], strides = [1, 1]} : vector<288x32xf32> to vector<256x32xf32>
    %51 = vector.extract_strided_slice %45 {offsets = [0, 1, 0], sizes = [18, 16, 32], strides = [1, 1, 1]} : vector<18x18x32xf32> to vector<18x16x32xf32>
    %52 = vector.shape_cast %51 : vector<18x16x32xf32> to vector<288x32xf32>
    %53 = vector.extract_strided_slice %52 {offsets = [0, 0], sizes = [256, 32], strides = [1, 1]} : vector<288x32xf32> to vector<256x32xf32>
    %54 = vector.extract_strided_slice %52 {offsets = [16, 0], sizes = [256, 32], strides = [1, 1]} : vector<288x32xf32> to vector<256x32xf32>
    %55 = vector.extract_strided_slice %52 {offsets = [32, 0], sizes = [256, 32], strides = [1, 1]} : vector<288x32xf32> to vector<256x32xf32>
    %56 = vector.extract_strided_slice %45 {offsets = [0, 2, 0], sizes = [18, 16, 32], strides = [1, 1, 1]} : vector<18x18x32xf32> to vector<18x16x32xf32>
    %57 = vector.shape_cast %56 : vector<18x16x32xf32> to vector<288x32xf32>
    %58 = vector.extract_strided_slice %57 {offsets = [0, 0], sizes = [256, 32], strides = [1, 1]} : vector<288x32xf32> to vector<256x32xf32>
    %59 = vector.extract_strided_slice %57 {offsets = [16, 0], sizes = [256, 32], strides = [1, 1]} : vector<288x32xf32> to vector<256x32xf32>
    %60 = vector.extract_strided_slice %57 {offsets = [32, 0], sizes = [256, 32], strides = [1, 1]} : vector<288x32xf32> to vector<256x32xf32>
    %61 = tpu.concatenate %48, %49, %50, %53, %54, %55, %58, %59, %60 in 1 : vector<256x32xf32>, vector<256x32xf32>, vector<256x32xf32>, vector<256x32xf32>, vector<256x32xf32>, vector<256x32xf32>, vector<256x32xf32>, vector<256x32xf32>, vector<256x32xf32> -> vector<256x288xf32>
    %c0_24 = arith.constant 0 : index
    %c0_25 = arith.constant 0 : index
    %62 = vector.load %arg5[%c0_24, %c0_25] : memref<288x32xf32, #tpu.memory_space<vmem>>, vector<288x32xf32>
    %cst_26 = arith.constant dense<0.000000e+00> : vector<256x32xf32>
    %63 = tpu.matmul %61, %62, %cst_26 {dimension_numbers = #tpu.dot_dimension_numbers<[1], [0], [0], [1], [0, 0, 1, 1], [], []>} : vector<256x288xf32>, vector<288x32xf32>, vector<256x32xf32> -> vector<256x32xf32>
    %c0_27 = arith.constant 0 : index
    %c0_28 = arith.constant 0 : index
    %64 = vector.load %arg6[%c0_27, %c0_28] : memref<1x32xf32, #tpu.memory_space<vmem>>, vector<1x32xf32>
    %65 = vector.broadcast %64 : vector<1x32xf32> to vector<256x32xf32>
    %66 = arith.addf %63, %65 : vector<256x32xf32>
    %cst_29 = arith.constant 2.000000e-01 : f32
    %67 = vector.broadcast %cst_29 : f32 to vector<256x32xf32>
    %68 = arith.mulf %67, %66 : vector<256x32xf32>
    %69 = arith.maximumf %66, %68 : vector<256x32xf32>
    %70 = vector.shape_cast %69 : vector<256x32xf32> to vector<16x16x32xf32>
    %c1_30 = arith.constant 1 : index
    %c1_31 = arith.constant 1 : index
    %c0_32 = arith.constant 0 : index
    %71 = vector.load %arg12[%c1_30, %c1_31, %c0_32] : memref<18x18x32xf32, #tpu.memory_space<vmem>>, vector<16x16x32xf32>
    tpu.vector_store %arg12[%c1_30, %c1_31, %c0_32], %70 {strides = array<i32>} : memref<18x18x32xf32, #tpu.memory_space<vmem>>, vector<16x16x32xf32>,
    %c0_33 = arith.constant 0 : index
    %c0_34 = arith.constant 0 : index
    %c0_35 = arith.constant 0 : index
    %72 = vector.load %arg12[%c0_33, %c0_34, %c0_35] : memref<18x18x32xf32, #tpu.memory_space<vmem>>, vector<18x18x32xf32>
    %73 = vector.extract_strided_slice %72 {offsets = [0, 0, 0], sizes = [18, 16, 32], strides = [1, 1, 1]} : vector<18x18x32xf32> to vector<18x16x32xf32>
    %74 = vector.shape_cast %73 : vector<18x16x32xf32> to vector<288x32xf32>
    %75 = vector.extract_strided_slice %74 {offsets = [0, 0], sizes = [256, 32], strides = [1, 1]} : vector<288x32xf32> to vector<256x32xf32>
    %76 = vector.extract_strided_slice %74 {offsets = [16, 0], sizes = [256, 32], strides = [1, 1]} : vector<288x32xf32> to vector<256x32xf32>
    %77 = vector.extract_strided_slice %74 {offsets = [32, 0], sizes = [256, 32], strides = [1, 1]} : vector<288x32xf32> to vector<256x32xf32>
    %78 = vector.extract_strided_slice %72 {offsets = [0, 1, 0], sizes = [18, 16, 32], strides = [1, 1, 1]} : vector<18x18x32xf32> to vector<18x16x32xf32>
    %79 = vector.shape_cast %78 : vector<18x16x32xf32> to vector<288x32xf32>
    %80 = vector.extract_strided_slice %79 {offsets = [0, 0], sizes = [256, 32], strides = [1, 1]} : vector<288x32xf32> to vector<256x32xf32>
    %81 = vector.extract_strided_slice %79 {offsets = [16, 0], sizes = [256, 32], strides = [1, 1]} : vector<288x32xf32> to vector<256x32xf32>
    %82 = vector.extract_strided_slice %79 {offsets = [32, 0], sizes = [256, 32], strides = [1, 1]} : vector<288x32xf32> to vector<256x32xf32>
    %83 = vector.extract_strided_slice %72 {offsets = [0, 2, 0], sizes = [18, 16, 32], strides = [1, 1, 1]} : vector<18x18x32xf32> to vector<18x16x32xf32>
    %84 = vector.shape_cast %83 : vector<18x16x32xf32> to vector<288x32xf32>
    %85 = vector.extract_strided_slice %84 {offsets = [0, 0], sizes = [256, 32], strides = [1, 1]} : vector<288x32xf32> to vector<256x32xf32>
    %86 = vector.extract_strided_slice %84 {offsets = [16, 0], sizes = [256, 32], strides = [1, 1]} : vector<288x32xf32> to vector<256x32xf32>
    %87 = vector.extract_strided_slice %84 {offsets = [32, 0], sizes = [256, 32], strides = [1, 1]} : vector<288x32xf32> to vector<256x32xf32>
    %88 = tpu.concatenate %75, %76, %77, %80, %81, %82, %85, %86, %87 in 1 : vector<256x32xf32>, vector<256x32xf32>, vector<256x32xf32>, vector<256x32xf32>, vector<256x32xf32>, vector<256x32xf32>, vector<256x32xf32>, vector<256x32xf32>, vector<256x32xf32> -> vector<256x288xf32>
    %c0_36 = arith.constant 0 : index
    %c0_37 = arith.constant 0 : index
    %89 = vector.load %arg7[%c0_36, %c0_37] : memref<288x32xf32, #tpu.memory_space<vmem>>, vector<288x32xf32>
    %cst_38 = arith.constant dense<0.000000e+00> : vector<256x32xf32>
    %90 = tpu.matmul %88, %89, %cst_38 {dimension_numbers = #tpu.dot_dimension_numbers<[1], [0], [0], [1], [0, 0, 1, 1], [], []>} : vector<256x288xf32>, vector<288x32xf32>, vector<256x32xf32> -> vector<256x32xf32>
    %c0_39 = arith.constant 0 : index
    %c0_40 = arith.constant 0 : index
    %91 = vector.load %arg8[%c0_39, %c0_40] : memref<1x32xf32, #tpu.memory_space<vmem>>, vector<1x32xf32>
    %92 = vector.broadcast %91 : vector<1x32xf32> to vector<256x32xf32>
    %93 = arith.addf %90, %92 : vector<256x32xf32>
    %cst_41 = arith.constant 2.000000e-01 : f32
    %94 = vector.broadcast %cst_41 : f32 to vector<256x32xf32>
    %95 = arith.mulf %94, %93 : vector<256x32xf32>
    %96 = arith.maximumf %93, %95 : vector<256x32xf32>
    %97 = vector.shape_cast %96 : vector<256x32xf32> to vector<16x16x32xf32>
    %c1_42 = arith.constant 1 : index
    %c1_43 = arith.constant 1 : index
    %c0_44 = arith.constant 0 : index
    %98 = vector.load %arg12[%c1_42, %c1_43, %c0_44] : memref<18x18x32xf32, #tpu.memory_space<vmem>>, vector<16x16x32xf32>
    tpu.vector_store %arg12[%c1_42, %c1_43, %c0_44], %97 {strides = array<i32>} : memref<18x18x32xf32, #tpu.memory_space<vmem>>, vector<16x16x32xf32>,
    %c0_45 = arith.constant 0 : index
    %c0_46 = arith.constant 0 : index
    %c0_47 = arith.constant 0 : index
    %99 = vector.load %arg12[%c0_45, %c0_46, %c0_47] : memref<18x18x32xf32, #tpu.memory_space<vmem>>, vector<18x18x32xf32>
    %100 = vector.extract_strided_slice %99 {offsets = [0, 0, 0], sizes = [18, 16, 32], strides = [1, 1, 1]} : vector<18x18x32xf32> to vector<18x16x32xf32>
    %101 = vector.shape_cast %100 : vector<18x16x32xf32> to vector<288x32xf32>
    %102 = vector.extract_strided_slice %101 {offsets = [0, 0], sizes = [256, 32], strides = [1, 1]} : vector<288x32xf32> to vector<256x32xf32>
    %103 = vector.extract_strided_slice %101 {offsets = [16, 0], sizes = [256, 32], strides = [1, 1]} : vector<288x32xf32> to vector<256x32xf32>
    %104 = vector.extract_strided_slice %101 {offsets = [32, 0], sizes = [256, 32], strides = [1, 1]} : vector<288x32xf32> to vector<256x32xf32>
    %105 = vector.extract_strided_slice %99 {offsets = [0, 1, 0], sizes = [18, 16, 32], strides = [1, 1, 1]} : vector<18x18x32xf32> to vector<18x16x32xf32>
    %106 = vector.shape_cast %105 : vector<18x16x32xf32> to vector<288x32xf32>
    %107 = vector.extract_strided_slice %106 {offsets = [0, 0], sizes = [256, 32], strides = [1, 1]} : vector<288x32xf32> to vector<256x32xf32>
    %108 = vector.extract_strided_slice %106 {offsets = [16, 0], sizes = [256, 32], strides = [1, 1]} : vector<288x32xf32> to vector<256x32xf32>
    %109 = vector.extract_strided_slice %106 {offsets = [32, 0], sizes = [256, 32], strides = [1, 1]} : vector<288x32xf32> to vector<256x32xf32>
    %110 = vector.extract_strided_slice %99 {offsets = [0, 2, 0], sizes = [18, 16, 32], strides = [1, 1, 1]} : vector<18x18x32xf32> to vector<18x16x32xf32>
    %111 = vector.shape_cast %110 : vector<18x16x32xf32> to vector<288x32xf32>
    %112 = vector.extract_strided_slice %111 {offsets = [0, 0], sizes = [256, 32], strides = [1, 1]} : vector<288x32xf32> to vector<256x32xf32>
    %113 = vector.extract_strided_slice %111 {offsets = [16, 0], sizes = [256, 32], strides = [1, 1]} : vector<288x32xf32> to vector<256x32xf32>
    %114 = vector.extract_strided_slice %111 {offsets = [32, 0], sizes = [256, 32], strides = [1, 1]} : vector<288x32xf32> to vector<256x32xf32>
    %115 = tpu.concatenate %102, %103, %104, %107, %108, %109, %112, %113, %114 in 1 : vector<256x32xf32>, vector<256x32xf32>, vector<256x32xf32>, vector<256x32xf32>, vector<256x32xf32>, vector<256x32xf32>, vector<256x32xf32>, vector<256x32xf32>, vector<256x32xf32> -> vector<256x288xf32>
    %c0_48 = arith.constant 0 : index
    %c0_49 = arith.constant 0 : index
    %116 = vector.load %arg9[%c0_48, %c0_49] : memref<1x288xf32, #tpu.memory_space<vmem>>, vector<1x288xf32>
    %117 = vector.broadcast %116 : vector<1x288xf32> to vector<256x288xf32>
    %118 = arith.mulf %115, %117 : vector<256x288xf32>
    %cst_50 = arith.constant dense<0.000000e+00> : vector<256xf32>
    %119 = vector.multi_reduction <add>, %118, %cst_50 [1] : vector<256x288xf32> to vector<256xf32>
    %120 = vector.shape_cast %119 : vector<256xf32> to vector<256x1xf32>
    %c0_51 = arith.constant 0 : index
    %c0_52 = arith.constant 0 : index
    %121 = vector.load %arg10[%c0_51, %c0_52] : memref<1x1xf32, #tpu.memory_space<vmem>>, vector<1x1xf32>
    %122 = vector.broadcast %121 : vector<1x1xf32> to vector<256x1xf32>
    %123 = arith.addf %120, %122 : vector<256x1xf32>
    %cst_53 = arith.constant 2.000000e-01 : f32
    %124 = vector.broadcast %cst_53 : f32 to vector<256x1xf32>
    %125 = arith.mulf %124, %123 : vector<256x1xf32>
    %126 = arith.maximumf %123, %125 : vector<256x1xf32>
    %cst_54 = arith.constant 0.000000e+00 : f32
    %127 = vector.broadcast %cst_54 : f32 to vector<256x1xf32>
    %128 = arith.subf %127, %126 : vector<256x1xf32>
    %129 = math.exp %128 : vector<256x1xf32>
    %cst_55 = arith.constant 1.000000e+00 : f32
    %130 = vector.broadcast %cst_55 : f32 to vector<256x1xf32>
    %131 = arith.addf %130, %129 : vector<256x1xf32>
    %cst_56 = arith.constant 1.000000e+00 : f32
    %132 = vector.broadcast %cst_56 : f32 to vector<256x1xf32>
    %133 = arith.divf %132, %131 : vector<256x1xf32>
    %134 = vector.shape_cast %133 : vector<256x1xf32> to vector<1x256x1xf32>
    %c0_57 = arith.constant 0 : index
    %c0_58 = arith.constant 0 : index
    %c0_59 = arith.constant 0 : index
    %135 = vector.load %arg11[%c0_57, %c0_58, %c0_59] : memref<1x256x1xf32, #tpu.memory_space<vmem>>, vector<1x256x1xf32>
    tpu.vector_store %arg11[%c0_57, %c0_58, %c0_59], %134 {strides = array<i32>} : memref<1x256x1xf32, #tpu.memory_space<vmem>>, vector<1x256x1xf32>,
    return
  }
  func.func @transform_0(%arg0: i32) -> i32 {
    %c0_i32 = arith.constant 0 : i32
    %c0_i32_0 = arith.constant 0 : i32
    return %c0_i32 : i32
  }
  func.func @transform_1(%arg0: i32) -> (i32, i32, i32) {
    %c0_i32 = arith.constant 0 : i32
    %c0_i32_0 = arith.constant 0 : i32
    %c0_i32_1 = arith.constant 0 : i32
    return %arg0, %c0_i32, %c0_i32_0 : i32, i32, i32
  }
  func.func @transform_2(%arg0: i32) -> (i32, i32) {
    %c0_i32 = arith.constant 0 : i32
    %c0_i32_0 = arith.constant 0 : i32
    %c0_i32_1 = arith.constant 0 : i32
    return %c0_i32, %c0_i32_0 : i32, i32
  }
  func.func @transform_3(%arg0: i32) -> (i32, i32) {
    %c0_i32 = arith.constant 0 : i32
    %c0_i32_0 = arith.constant 0 : i32
    %c0_i32_1 = arith.constant 0 : i32
    return %c0_i32, %c0_i32_0 : i32, i32
  }
  func.func @transform_4(%arg0: i32) -> (i32, i32) {
    %c0_i32 = arith.constant 0 : i32
    %c0_i32_0 = arith.constant 0 : i32
    %c0_i32_1 = arith.constant 0 : i32
    return %c0_i32, %c0_i32_0 : i32, i32
  }
  func.func @transform_5(%arg0: i32) -> (i32, i32) {
    %c0_i32 = arith.constant 0 : i32
    %c0_i32_0 = arith.constant 0 : i32
    %c0_i32_1 = arith.constant 0 : i32
    return %c0_i32, %c0_i32_0 : i32, i32
  }
  func.func @transform_6(%arg0: i32) -> (i32, i32) {
    %c0_i32 = arith.constant 0 : i32
    %c0_i32_0 = arith.constant 0 : i32
    %c0_i32_1 = arith.constant 0 : i32
    return %c0_i32, %c0_i32_0 : i32, i32
  }
  func.func @transform_7(%arg0: i32) -> (i32, i32) {
    %c0_i32 = arith.constant 0 : i32
    %c0_i32_0 = arith.constant 0 : i32
    %c0_i32_1 = arith.constant 0 : i32
    return %c0_i32, %c0_i32_0 : i32, i32
  }
  func.func @transform_8(%arg0: i32) -> (i32, i32) {
    %c0_i32 = arith.constant 0 : i32
    %c0_i32_0 = arith.constant 0 : i32
    %c0_i32_1 = arith.constant 0 : i32
    return %c0_i32, %c0_i32_0 : i32, i32
  }
  func.func @transform_9(%arg0: i32) -> (i32, i32) {
    %c0_i32 = arith.constant 0 : i32
    %c0_i32_0 = arith.constant 0 : i32
    %c0_i32_1 = arith.constant 0 : i32
    return %c0_i32, %c0_i32_0 : i32, i32
  }
  func.func @transform_10(%arg0: i32) -> (i32, i32, i32) {
    %c0_i32 = arith.constant 0 : i32
    %c0_i32_0 = arith.constant 0 : i32
    %c0_i32_1 = arith.constant 0 : i32
    return %arg0, %c0_i32, %c0_i32_0 : i32, i32, i32
  }
}

</mosaic_0001>

<bundles_post_ra>
// kernel: adjust_net_forward.1
= control target key start
LH: loop header
LB: loop body
LE: loop exit
PB: predicated region body
PF: predicated region fallthrough
CT: control target
= control target key end

     0   :  { %s9705_s17 = smov 0   ;;  %s16168_s0 = inlined_call_operand.<no memory space> [shape: f32[1], index: 0, kind: input, shape index: {}]   ;;  %s16169_s1 = inlined_call_operand.vmem [shape: f32[2,16,16], index: 1, kind: input, shape index: {}]   ;;  %s16170_s2 = inlined_call_operand.vmem [shape: f32[288,32], index: 2, kind: input, shape index: {}]   ;;  %s16171_s3 = inlined_call_operand.vmem [shape: f32[1,32], index: 3, kind: input, shape index: {}]   ;;  %s16172_s4 = inlined_call_operand.vmem [shape: f32[288,32], index: 4, kind: input, shape index: {}]   ;;  %s16173_s5 = inlined_call_operand.vmem [shape: f32[1,32], index: 5, kind: input, shape index: {}]   ;;  %s16174_s6 = inlined_call_operand.vmem [shape: f32[288,32], index: 6, kind: input, shape index: {}]   ;;  %s16175_s7 = inlined_call_operand.vmem [shape: f32[1,32], index: 7, kind: input, shape index: {}]   ;;  %s16176_s8 = inlined_call_operand.vmem [shape: f32[1,288], index: 8, kind: input, shape index: {}]   ;;  %s16177_s9 = inlined_call_operand.<no memory space> [shape: f32[1,1], index: 9, kind: input, shape index: {}]   ;;  %s16178_s10 = inlined_call_operand.vmem [shape: f32[2,256,1], index: 10, kind: output, shape index: {}]  }
   0x1   :  { %15 = sst [smem:[#allocation3]] %s16168_s0  ;;  %v16_v0 = vstv %s16177_s9 }
   0x2   :  { %17 = vst [vmem:[#allocation4] sm:$0x1] %v16_v0 }
   0x3 LB: > { %s7766_s18 = sadd.s32 4294967295, %s9638_s17   ;;  %p7770_p0 = scmp.ge.s32.totalorder %s9638_s17, 1  ;;  %s9638_s17 = sphi %s9705_s17, %s23_s17  }
   0x4   : > { %p315_p1 = scmp.lt.s32.totalorder %s9638_s17, 3 }
   0x6   : > { %p316_p2 = pnand %p7770_p0, %p315_p1 }
   0x8   : > { %319 = sbr.rel (%p316_p2) target bundleno = 2272 (0x8e0), region = 60 }
   0xd   : > { %v420_v1 = vlaneseq  ;;  %p353_p3 = scmp.lt.s32.totalorder %s7766_s18, 1  ;;  %vm363_vm0 = vcmask 261120   ;;  %v9640_v17 = vmov 0.0   ;;  %s419_s21 = sld [smem:[#allocation3]]  ;;  %vm366_vm3 = vcmask 254976  }
   0xe   : > { %371 = vst.msk [vmem:[#allocation2 + $0x30] sm:$0xff] %vm363_vm0, %v9640_v17  ;;  %s9641_s22 = smov 32   ;;  %vm932_vm4 = vcmask 1045504   ;;  %s9642_s11 = smov 64   ;;  %vm809_vm5 = vcmask 1046528   ;;  %vm1631_vm6 = vcmask 523264  }
   0xf   : > { %v9714_v2 = vshrl.u32 %v420_v1, 7  ;;  %s16842_s18 = smov (!%p353_p3, %s7766_s18), 1  ;;  %372 = vst.msk [vmem:[#allocation2 + $0x38] sm:$0xff] %vm363_vm0, %v9640_v17  ;;  %v9798_v21 = vand.u32 127, %v420_v1  ;;  %s9643_s12 = smov 96   ;;  %vm1664_vm7 = vcmask 785408  }
  0x10   : > { %s7873_s0 = sshll.u32 %s16842_s18, 4  ;;  %364 = vst.msk [vmem:[#allocation2] sm:$0xff] %vm363_vm0, %v9640_v17  ;;  %vm7678_vm8 = vcmask 7168  }
  0x11   : > { %7924 = vset.pattern.permute.xlu1 %v9714_v2  ;;  %v9720_v3 = vadd.s32 8, %v9714_v2  ;;  %7925 = vset.pattern.permute.xlu2 %v9714_v2  ;;  %s357_s20 = scalar_lea.vmem %s16169_s1, %s7873_s0  ;;  %365 = vst.msk [vmem:[#allocation2 + $0x8] sm:$0xff] %vm363_vm0, %v9640_v17  ;;  %vm633_vm1 = vcmp.eq.s32.totalorder %v9798_v21, 1  ;;  %vm632_vm2 = vcmp.eq.s32.totalorder %v9798_v21, 0 }
  0x12   : > { %v422_v4 = vld [vmem:[%s357_s20] sm:$0xff]  ;;  %v9730_v9 = vld [vmem:[%s357_s20 + $0x8] sm:$0xff]  ;;  %368 = vst.msk [vmem:[#allocation2 + $0x18] sm:$0xff] %vm363_vm0, %v9640_v17 }
  0x13   : > { %7923 = vset.pattern.permute.xlu0 %v9720_v3  ;;  %v437_v5 = vperm.slane %v422_v4, 1  ;;  %v450_v6 = vperm.slane %v422_v4, 2  ;;  %v424_v7 = vperm.slane %v422_v4, 0  ;;  %v502_v8 = vperm.slane %v422_v4, 6  ;;  %369 = vst.msk [vmem:[#allocation2 + $0x20] sm:$0xff] %vm363_vm0, %v9640_v17 }
  0x14   : > { %v567_v10 = vperm.slane %v9730_v9, 3  ;;  %v463_v11 = vperm.slane %v422_v4, 3  ;;  %v489_v12 = vperm.slane %v422_v4, 5  ;;  %v476_v13 = vperm.slane %v422_v4, 4  ;;  %374 = vst.msk [vmem:[#allocation2 + $0x48] sm:$0xff] %vm363_vm0, %v9640_v17 }
  0x15   : > { %v541_v14 = vperm.slane %v9730_v9, 1  ;;  %v515_v15 = vperm.slane %v422_v4, 7  ;;  %v528_v16 = vperm.slane %v9730_v9, 0  ;;  %v554_v18 = vperm.slane %v9730_v9, 2  ;;  %375 = vst.msk [vmem:[#allocation2 + $0x50] sm:$0xff] %vm363_vm0, %v9640_v17 }
  0x16   : > { %v606_v19 = vperm.slane %v9730_v9, 6  ;;  %377 = vst.msk [vmem:[#allocation2 + $0x60] sm:$0xff] %vm363_vm0, %v9640_v17  ;;  %v634_v22 = vstv %s419_s21  ;;  %v580_v23 = vperm.slane %v9730_v9, 4  ;;  %v593_v30 = vperm.slane %v9730_v9, 5 }
  0x17   : > { %378 = vst.msk [vmem:[#allocation2 + $0x68] sm:$0xff] %vm363_vm0, %v9640_v17  ;;  %v9817_v24 = vsel %vm633_vm1, %v634_v22, 0.0  ;;  %v619_v35 = vperm.slane %v9730_v9, 7 }
  0x18   : > { %380 = vst.msk [vmem:[#allocation2 + $0x78] sm:$0xff] %vm363_vm0, %v9640_v17 }
  0x19   : > { %442 = vperm.xlu1 %7924, %v437_v5   ;;  %455 = vperm.xlu2 %7925, %v450_v6   ;;  %381 = vst.msk [vmem:[#allocation2 + $0x80] sm:$0xff] %vm363_vm0, %v9640_v17 }
  0x1a   : > { %383 = vst.msk [vmem:[#allocation2 + $0x90] sm:$0xff] %vm363_vm0, %v9640_v17 }
  0x1b   : > { %435 = vperm.xlu0 %7923, %v424_v7   ;;  %384 = vst.msk [vmem:[#allocation2 + $0x98] sm:$0xff] %vm363_vm0, %v9640_v17 }
  0x1c   : > { %386 = vst.msk [vmem:[#allocation2 + $0xa8] sm:$0xff] %vm363_vm0, %v9640_v17 }
  0x1d   : > { %387 = vst.msk [vmem:[#allocation2 + $0xb0] sm:$0xff] %vm363_vm0, %v9640_v17 }
  0x1e   : > { %389 = vst.msk [vmem:[#allocation2 + $0xc0] sm:$0xff] %vm363_vm0, %v9640_v17 }
  0x1f   : > { %390 = vst.msk [vmem:[#allocation2 + $0xc8] sm:$0xff] %vm363_vm0, %v9640_v17 }
  0x20   : > { %392 = vst.msk [vmem:[#allocation2 + $0xd8] sm:$0xff] %vm363_vm0, %v9640_v17 }
  0x21   : > { %7926 = vset.pattern.permute.xlu1 %v9720_v3  ;;  %7928 = vset.pattern.permute.xlu2 %v9720_v3  ;;  %393 = vst.msk [vmem:[#allocation2 + $0xe0] sm:$0xff] %vm363_vm0, %v9640_v17 }
  0x22   : > { %395 = vst.msk [vmem:[#allocation2 + $0xf0] sm:$0xff] %vm363_vm0, %v9640_v17 }
  0x23   : > { %513 = vperm.xlu0 %7923, %v502_v8   ;;  %396 = vst.msk [vmem:[#allocation2 + $0xf8] sm:$0xff] %vm363_vm0, %v9640_v17 }
  0x24   : > { %398 = vst.msk [vmem:[#allocation2 + $0x108] sm:$0xff] %vm363_vm0, %v9640_v17 }
  0x25   : > { %399 = vst.msk [vmem:[#allocation2 + $0x110] sm:$0xff] %vm363_vm0, %v9640_v17 }
  0x26   : > { %401 = vst.msk [vmem:[#allocation2 + $0x120] sm:$0xff] %vm363_vm0, %v9640_v17 }
  0x27   : > { %402 = vst.msk [vmem:[#allocation2 + $0x128] sm:$0xff] %vm363_vm0, %v9640_v17 }
  0x28   : > { %404 = vst.msk [vmem:[#allocation2 + $0x138] sm:$0xff] %vm363_vm0, %v9640_v17 }
  0x29   : > { %448 = vperm.xlu1 %7926, %v437_v5   ;;  %461 = vperm.xlu2 %7928, %v450_v6   ;;  %405 = vst.msk [vmem:[#allocation2 + $0x140] sm:$0xff] %vm363_vm0, %v9640_v17 }
  0x2a   : > { %407 = vst.msk [vmem:[#allocation2 + $0x150] sm:$0xff] %vm363_vm0, %v9640_v17 }
  0x2b   : > { %578 = vperm.xlu0 %7923, %v567_v10   ;;  %408 = vst.msk [vmem:[#allocation2 + $0x158] sm:$0xff] %vm363_vm0, %v9640_v17 }
  0x2c   : > { %410 = vst.msk [vmem:[#allocation2 + $0x168] sm:$0xff] %vm363_vm0, %v9640_v17 }
  0x2d   : > { %411 = vst.msk [vmem:[#allocation2 + $0x170] sm:$0xff] %vm363_vm0, %v9640_v17 }
  0x2e   : > { %413 = vst.msk [vmem:[#allocation2 + $0x180] sm:$0xff] %vm363_vm0, %v9640_v17 }
  0x2f   : > { %414 = vst.msk [vmem:[#allocation2 + $0x188] sm:$0xff] %vm363_vm0, %v9640_v17 }
  0x30   : > { %416 = vst.msk [vmem:[#allocation2 + $0x198] sm:$0xff] %vm363_vm0, %v9640_v17 }
  0x31   : > { %7927 = vset.pattern.permute.xlu1 %v9714_v2  ;;  %474 = vperm.xlu2 %7928, %v463_v11   ;;  %417 = vst.msk [vmem:[#allocation2 + $0x1a0] sm:$0xff] %vm363_vm0, %v9640_v17 }
  0x32   : > { %370 = vst.msk [vmem:[#allocation2 + $0x28] sm:$0x3] %vm366_vm3, %v9640_v17 }
  0x33   : > { %7935 = vset.pattern.permute.xlu0 %v9714_v2  ;;  %367 = vst.msk [vmem:[#allocation2 + $0x10] sm:$0x3] %vm366_vm3, %v9640_v17 }
  0x34   : > { %373 = vst.msk [vmem:[#allocation2 + $0x40] sm:$0x3] %vm366_vm3, %v9640_v17 }
  0x35   : > { %376 = vst.msk [vmem:[#allocation2 + $0x58] sm:$0x3] %vm366_vm3, %v9640_v17 }
  0x36   : > { %379 = vst.msk [vmem:[#allocation2 + $0x70] sm:$0x3] %vm366_vm3, %v9640_v17 }
  0x37   : > { %382 = vst.msk [vmem:[#allocation2 + $0x88] sm:$0x3] %vm366_vm3, %v9640_v17 }
  0x38   : > { %385 = vst.msk [vmem:[#allocation2 + $0xa0] sm:$0x3] %vm366_vm3, %v9640_v17 }
  0x39   : > { %468 = vperm.xlu1 %7927, %v463_v11   ;;  %7930 = vset.pattern.permute.xlu2 %v9714_v2  ;;  %388 = vst.msk [vmem:[#allocation2 + $0xb8] sm:$0x3] %vm366_vm3, %v9640_v17 }
  0x3a   : > { %391 = vst.msk [vmem:[#allocation2 + $0xd0] sm:$0x3] %vm366_vm3, %v9640_v17 }
  0x3b   : > { %429 = vperm.xlu0 %7935, %v424_v7   ;;  %394 = vst.msk [vmem:[#allocation2 + $0xe8] sm:$0x3] %vm366_vm3, %v9640_v17 }
  0x3c   : > { %397 = vst.msk [vmem:[#allocation2 + $0x100] sm:$0x3] %vm366_vm3, %v9640_v17 }
  0x3d   : > { %400 = vst.msk [vmem:[#allocation2 + $0x118] sm:$0x3] %vm366_vm3, %v9640_v17 }
  0x3e   : > { %403 = vst.msk [vmem:[#allocation2 + $0x130] sm:$0x3] %vm366_vm3, %v9640_v17 }
  0x3f   : > { %406 = vst.msk [vmem:[#allocation2 + $0x148] sm:$0x3] %vm366_vm3, %v9640_v17 }
  0x40   : > { %409 = vst.msk [vmem:[#allocation2 + $0x160] sm:$0x3] %vm366_vm3, %v9640_v17 }
  0x41   : > { %7929 = vset.pattern.permute.xlu1 %v9720_v3  ;;  %494 = vperm.xlu2 %7930, %v489_v12   ;;  %412 = vst.msk [vmem:[#allocation2 + $0x178] sm:$0x3] %vm366_vm3, %v9640_v17 }
  0x42   : > { %415 = vst.msk [vmem:[#allocation2 + $0x190] sm:$0x3] %vm366_vm3, %v9640_v17 }
  0x43   : > { %481 = vperm.xlu0 %7935, %v476_v13   ;;  %418 = vst.msk [vmem:[#allocation2 + $0x1a8] sm:$0x3] %vm366_vm3, %v9640_v17 }
  0x49   : > { %487 = vperm.xlu1 %7929, %v476_v13   ;;  %507 = vperm.xlu2 %7930, %v502_v8  }
  0x4b   : > { %546 = vperm.xlu0 %7935, %v541_v14  }
  0x51   : > { %500 = vperm.xlu1 %7929, %v489_v12   ;;  %7932 = vset.pattern.permute.xlu2 %v9720_v3 }
  0x53   : > { %611 = vperm.xlu0 %7935, %v606_v19  }
  0x59   : > { %7931 = vset.pattern.permute.xlu1 %v9714_v2  ;;  %526 = vperm.xlu2 %7932, %v515_v15  }
  0x5b   : > { %9380 = vset.pattern.permute.xlu0 %v9720_v3 }
  0x61   : > { %520 = vperm.xlu1 %7931, %v515_v15   ;;  %539 = vperm.xlu2 %7932, %v528_v16   ;;  %v10003_v15 = vld [vmem:[%s16170_s2 + $0x110] sm:$0xff] }
  0x69   : > { %533 = vperm.xlu1 %7931, %v528_v16   ;;  %7934 = vset.pattern.permute.xlu2 %v9714_v2 }
  0x71   : > { %7933 = vset.pattern.permute.xlu1 %v9720_v3  ;;  %559 = vperm.xlu2 %7934, %v554_v18  }
  0x73   : > { %v456_v20 = vpop.permute.xlu2 %455 }
  0x74   : > { %v640_v36 = vsel %vm632_vm2, %v456_v20, %v9817_v24 }
  0x75   : > { %673 = vst.msk [vmem:[#allocation2 + $0x49] sm:$0xff] %vm363_vm0, %v640_v36 }
  0x79   : > { %552 = vperm.xlu1 %7933, %v541_v14   ;;  %572 = vperm.xlu2 %7934, %v567_v10   ;;  %v9998_v14 = vld [vmem:[%s16170_s2 + $0x118] sm:$0xff] }
  0x7a   : > { %7907 = vmatpush.msra.mxu2 %v9998_v14 }
  0x7c   : > { %v9930_v53 = vld [vmem:[#allocation2 + $0x48] sm:$0xff]  ;;  %7908 = vmatpush.msra.mxu2 %v10003_v15 }
  0x81   : > { %565 = vperm.xlu1 %7933, %v554_v18   ;;  %7937 = vset.pattern.permute.xlu2 %v9720_v3 }
  0x83   : > { %v462_v25 = vpop.permute.xlu2 %461 }
  0x84   : > { %v641_v39 = vsel %vm632_vm2, %v462_v25, %v9817_v24  ;;  %v10029_v25 = vld [vmem:[%s16170_s2 + $0x100] sm:$0xff] }
  0x85   : > { %674 = vst.msk [vmem:[#allocation2 + $0x51] sm:$0xff] %vm363_vm0, %v641_v39 }
  0x86   : > { %16345 = vst [vmem:[#allocation9_spill] sm:$0xff] %v10029_v25 }
  0x89   : > { %7936 = vset.pattern.permute.xlu1 %v9714_v2  ;;  %591 = vperm.xlu2 %7937, %v580_v23  }
  0x8b   : > { %v443_v26 = vpop.permute.xlu1 %442  ;;  %v475_v31 = vpop.permute.xlu2 %474 }
  0x8c   : > { %v638_v27 = vsel %vm632_vm2, %v443_v26, %v9817_v24  ;;  %v643_v43 = vsel %vm632_vm2, %v475_v31, %v9817_v24  ;;  %v9932_v54 = vld [vmem:[#allocation2 + $0x50] sm:$0xff] }
  0x8d   : > { %671 = vst.msk [vmem:[#allocation2 + $0x31] sm:$0xff] %vm363_vm0, %v638_v27  ;;  %v436_v28 = vpop.permute.xlu0 %435  ;;  %v9939_v57 = vpack.i.bf16 %v9932_v54, %v9930_v53 }
  0x8e   : > { %v637_v29 = vsel %vm632_vm2, %v436_v28, %v9817_v24  ;;  %676 = vst.msk [vmem:[#allocation2 + $0x69] sm:$0xff] %vm363_vm0, %v643_v43 }
  0x8f   : > { %670 = vst.msk [vmem:[#allocation2 + $0x21] sm:$0xff] %vm363_vm0, %v637_v29 }
  0x91   : > { %585 = vperm.xlu1 %7936, %v580_v23   ;;  %604 = vperm.xlu2 %7937, %v593_v30   ;;  %v10024_v23 = vld [vmem:[%s16170_s2 + $0x108] sm:$0xff] }
  0x92   : > { %16344 = vst [vmem:[#allocation8_spill] sm:$0xff] %v10024_v23  ;;  %7909 = vmatpush.msra.mxu2 %v10024_v23  ;;  %v10309_v23 = vld [vmem:[#allocation2 + $0x58] sm:$0x3] }
  0x94   : > { %v9912_v46 = vld [vmem:[#allocation2 + $0x30] sm:$0xff]  ;;  %7910 = vmatpush.msra.mxu2 %v10029_v25 }
  0x95   : > { %v514_v32 = vpop.permute.xlu0 %513 }
  0x96   : > { %v649_v38 = vsel %vm632_vm2, %v514_v32, %v9817_v24 }
  0x97   : > { %682 = vst.msk [vmem:[#allocation2 + $0xb1] sm:$0xff] %vm363_vm0, %v649_v38 }
  0x99   : > { %598 = vperm.xlu1 %7936, %v593_v30   ;;  %7939 = vset.pattern.permute.xlu2 %v9714_v2 }
  0x9b   : > { %v495_v33 = vpop.permute.xlu2 %494  ;;  %v449_v34 = vpop.permute.xlu1 %448 }
  0x9c   : > { %v639_v37 = vsel %vm632_vm2, %v449_v34, %v9817_v24  ;;  %v646_v44 = vsel %vm632_vm2, %v495_v33, %v9817_v24 }
  0x9d   : > { %v579_v40 = vpop.permute.xlu0 %578  ;;  %672 = vst.msk [vmem:[#allocation2 + $0x39] sm:$0xff] %vm363_vm0, %v639_v37 }
  0x9e   : > { %v659_v41 = vsel %vm632_vm2, %v579_v40, %v9817_v24  ;;  %679 = vst.msk [vmem:[#allocation2 + $0x91] sm:$0xff] %vm363_vm0, %v646_v44 }
  0x9f   : > { %692 = vst.msk [vmem:[#allocation2 + $0x129] sm:$0xff] %vm363_vm0, %v659_v41 }
  0xa1   : > { %7938 = vset.pattern.permute.xlu1 %v9720_v3  ;;  %624 = vperm.xlu2 %7939, %v619_v35  }
  0xa3   : > { %v508_v42 = vpop.permute.xlu2 %507 }
  0xa4   : > { %v648_v45 = vsel %vm632_vm2, %v508_v42, %v9817_v24  ;;  %v9914_v47 = vld [vmem:[#allocation2 + $0x38] sm:$0xff] }
  0xa5   : > { %681 = vst.msk [vmem:[#allocation2 + $0xa9] sm:$0xff] %vm363_vm0, %v648_v45  ;;  %v9918_v48 = vpack.i.bf16 %v9914_v47, %v9912_v46  ;;  %v10008_v16 = vld [vmem:[#allocation2 + $0x90] sm:$0xff] }
  0xa6   : > { %v10047_v31 = vld [vmem:[#allocation2 + $0x130] sm:$0x3] }
  0xa7   : > { %7946 = vrot.lane.b32.xlu0 %v9918_v48, %s9641_s22  ;;  %v996_v36 = vrot.slane %v10047_v31, 2 }
  0xa9   : > { %617 = vperm.xlu1 %7938, %v606_v19  }
  0xab   : > { %v469_v49 = vpop.permute.xlu1 %468 }
  0xac   : > { %v642_v50 = vsel %vm632_vm2, %v469_v49, %v9817_v24  ;;  %v9975_v7 = vld [vmem:[#allocation2 + $0xa8] sm:$0xff]  ;;  %v9977_v8 = vld [vmem:[#allocation2 + $0xb0] sm:$0xff] }
  0xad   : > { %675 = vst.msk [vmem:[#allocation2 + $0x61] sm:$0xff] %vm363_vm0, %v642_v50  ;;  %v430_v51 = vpop.permute.xlu0 %429  ;;  %v9991_v13 = vpack.i.bf16 %v9977_v8, %v9975_v7 }
  0xae   : > { %v636_v52 = vsel %vm632_vm2, %v430_v51, %v9817_v24  ;;  %16341 = vst [vmem:[#allocation5_spill] sm:$0xff] %v9975_v7 }
  0xaf   : > { %669 = vst.msk [vmem:[#allocation2 + $0x19] sm:$0xff] %vm363_vm0, %v636_v52 }
  0xb0   : > { %16342 = vst [vmem:[#allocation6_spill] sm:$0xff] %v9977_v8 }
  0xb1   : > { %630 = vperm.xlu1 %7938, %v619_v35  }
  0xb3   : > { %v527_v55 = vpop.permute.xlu2 %526 }
  0xb4   : > { %v651_v56 = vsel %vm632_vm2, %v527_v55, %v9817_v24  ;;  %v9958_v2 = vld [vmem:[#allocation2 + $0x60] sm:$0xff]  ;;  %v9960_v3 = vld [vmem:[#allocation2 + $0x68] sm:$0xff] }
  0xb5   : > { %v482_v58 = vpop.permute.xlu0 %481  ;;  %684 = vst.msk [vmem:[#allocation2 + $0xc9] sm:$0xff] %vm363_vm0, %v651_v56  ;;  %v9969_v5 = vpack.i.bf16 %v9960_v3, %v9958_v2 }
  0xb6   : > { %v9942_v59 = vld [vmem:[#allocation2 + $0x18] sm:$0xff]  ;;  %v9944_v60 = vld [vmem:[#allocation2 + $0x20] sm:$0xff]  ;;  %v644_v61 = vsel %vm632_vm2, %v482_v58, %v9817_v24 }
  0xb7   : > { %v7940_v62 = vpack.i.bf16 %v9944_v60, %v9942_v59  ;;  %677 = vst.msk [vmem:[#allocation2 + $0x79] sm:$0xff] %vm363_vm0, %v644_v61 }
  0xb9   : > { %7951 = vrot.lane.b32.xlu1 %v9939_v57, %s9641_s22  ;;  %7941 = vrot.lane.b32.xlu2 %v7940_v62, %s9641_s22 }
  0xbb   : > { %v488_v63 = vpop.permute.xlu1 %487  ;;  %v540_v0 = vpop.permute.xlu2 %539 }
  0xbc   : > { %v645_v1 = vsel %vm632_vm2, %v488_v63, %v9817_v24  ;;  %v653_v4 = vsel %vm632_vm2, %v540_v0, %v9817_v24 }
  0xbd   : > { %678 = vst.msk [vmem:[#allocation2 + $0x81] sm:$0xff] %vm363_vm0, %v645_v1  ;;  %v547_v22 = vpop.permute.xlu0 %546 }
  0xbe   : > { %686 = vst.msk [vmem:[#allocation2 + $0xe1] sm:$0xff] %vm363_vm0, %v653_v4  ;;  %v9973_v6 = vld [vmem:[#allocation2 + $0x78] sm:$0xff]  ;;  %v654_v26 = vsel %vm632_vm2, %v547_v22, %v9817_v24 }
  0xbf   : > { %687 = vst.msk [vmem:[#allocation2 + $0xf1] sm:$0xff] %vm363_vm0, %v654_v26 }
  0xc1   : > { %7956 = vrot.lane.b32.xlu2 %v9969_v5, %s9641_s22 }
  0xc3   : > { %v501_v9 = vpop.permute.xlu1 %500 }
  0xc4   : > { %v647_v10 = vsel %vm632_vm2, %v501_v9, %v9817_v24  ;;  %v9982_v11 = vld [vmem:[#allocation2 + $0x80] sm:$0xff] }
  0xc5   : > { %16343 = vst [vmem:[#allocation7_spill] sm:$0xff] %v9982_v11  ;;  %v9987_v12 = vpack.i.bf16 %v9982_v11, %v9973_v6  ;;  %v612_v49 = vpop.permute.xlu0 %611 }
  0xc6   : > { %680 = vst.msk [vmem:[#allocation2 + $0x99] sm:$0xff] %vm363_vm0, %v647_v10  ;;  %v664_v50 = vsel %vm632_vm2, %v612_v49, %v9817_v24  ;;  %v10108_v62 = vld [vmem:[#allocation2 + $0xf0] sm:$0xff] }
  0xc7   : > { %7961 = vrot.lane.b32.xlu0 %v9987_v12, %s9641_s22  ;;  %697 = vst.msk [vmem:[#allocation2 + $0x169] sm:$0xff] %vm363_vm0, %v664_v50 }
  0xc9   : > { %7971 = vrot.lane.b32.xlu2 %v9991_v13, %s9641_s22 }
  0xcb   : > { %v560_v17 = vpop.permute.xlu2 %559 }
  0xcc   : > { %v656_v19 = vsel %vm632_vm2, %v560_v17, %v9817_v24 }
  0xcd   : > { %v10011_v18 = vld [vmem:[#allocation2 + $0x98] sm:$0xff]  ;;  %689 = vst.msk [vmem:[#allocation2 + $0x109] sm:$0xff] %vm363_vm0, %v656_v19 }
  0xce   : > { %v10018_v20 = vpack.i.bf16 %v10011_v18, %v10008_v16 }
  0xd0   : > { %7966 = vrot.lane.b32.xlu1 %v10018_v20, %s9641_s22 }
  0xd3   : > { %v521_v27 = vpop.permute.xlu1 %520  ;;  %v573_v28 = vpop.permute.xlu2 %572 }
  0xd4   : > { %v650_v29 = vsel %vm632_vm2, %v521_v27, %v9817_v24  ;;  %v658_v30 = vsel %vm632_vm2, %v573_v28, %v9817_v24  ;;  %v10122_v9 = vld [vmem:[#allocation2 + $0x108] sm:$0xff] }
  0xd5   : > { %683 = vst.msk [vmem:[#allocation2 + $0xc1] sm:$0xff] %vm363_vm0, %v650_v29 }
  0xd6   : > { %691 = vst.msk [vmem:[#allocation2 + $0x121] sm:$0xff] %vm363_vm0, %v658_v30 }
  0xd7   : > { %16349 = vst [vmem:[#allocation13_spill] sm:$0xff] %v10122_v9 }
  0xdb   : > { %v534_v32 = vpop.permute.xlu1 %533 }
  0xdc   : > { %v652_v33 = vsel %vm632_vm2, %v534_v32, %v9817_v24  ;;  %v10052_v34 = vld [vmem:[#allocation2 + $0xc0] sm:$0xff]  ;;  %v10054_v35 = vld [vmem:[#allocation2 + $0xc8] sm:$0xff] }
  0xdd   : > { %16346 = vst [vmem:[#allocation10_spill] sm:$0xff] %v10052_v34  ;;  %v10060_v37 = vpack.i.bf16 %v10054_v35, %v10052_v34  ;;  %v10062_v38 = vld [vmem:[#allocation2 + $0x128] sm:$0xff]  ;;  %v10092_v51 = vld [vmem:[#allocation2 + $0x120] sm:$0xff] }
  0xde   : > { %16347 = vst [vmem:[#allocation11_spill] sm:$0xff] %v10054_v35  ;;  %v16179_v39 = vrot.slane %v10062_v38, 2  ;;  %v10096_v55 = vpack.i.bf16 %v10062_v38, %v10092_v51 }
  0xdf   : > { %685 = vst.msk [vmem:[#allocation2 + $0xd9] sm:$0xff] %vm363_vm0, %v652_v33  ;;  %7976 = vrot.lane.b32.xlu0 %v10060_v37, %s9641_s22 }
  0xe0   : > { %v10070_v40 = vsel %vm932_vm4, %v16179_v39, %v996_v36 }
  0xe1   : > { %16348 = vst [vmem:[#allocation12_spill] sm:$0xff] %v10070_v40  ;;  %7796 = vmatmul.msk.f32.vlgmr.msra.gmra.mxu2 %vm363_vm0, %v10070_v40  ;;  %v10307_v40 = vld [vmem:[#allocation2 + $0x28] sm:$0x3] }
  0xe3   : > { %v592_v41 = vpop.permute.xlu2 %591 }
  0xe4   : > { %v661_v44 = vsel %vm632_vm2, %v592_v41, %v9817_v24 }
  0xe5   : > { %694 = vst.msk [vmem:[#allocation2 + $0x141] sm:$0xff] %vm363_vm0, %v661_v44 }
  0xe6   : > { %v10074_v42 = vld [vmem:[#allocation2 + $0xd8] sm:$0xff]  ;;  %v10076_v43 = vld [vmem:[#allocation2 + $0xe0] sm:$0xff] }
  0xe7   : > { %v10083_v45 = vpack.i.bf16 %v10076_v43, %v10074_v42 }
  0xe9   : > { %7981 = vrot.lane.b32.xlu1 %v10083_v45, %s9641_s22 }
  0xeb   : > { %v553_v52 = vpop.permute.xlu1 %552  ;;  %v605_v56 = vpop.permute.xlu2 %604 }
  0xec   : > { %v655_v58 = vsel %vm632_vm2, %v553_v52, %v9817_v24  ;;  %v663_v61 = vsel %vm632_vm2, %v605_v56, %v9817_v24  ;;  %v10140_v28 = vld [vmem:[#allocation2 + $0x148] sm:$0x3] }
  0xed   : > { %688 = vst.msk [vmem:[#allocation2 + $0xf9] sm:$0xff] %vm363_vm0, %v655_v58  ;;  %v1001_v30 = vrot.slane %v10140_v28, 2 }
  0xee   : > { %696 = vst.msk [vmem:[#allocation2 + $0x159] sm:$0xff] %vm363_vm0, %v663_v61 }
  0xf1   : > { %7996 = vrot.lane.b32.xlu1 %v10096_v55, %s9641_s22 }
  0xf3   : > { %v566_v63 = vpop.permute.xlu1 %565 }
  0xf4   : > { %v657_v0 = vsel %vm632_vm2, %v566_v63, %v9817_v24  ;;  %v10113_v1 = vld [vmem:[#allocation2 + $0xf8] sm:$0xff] }
  0xf5   : > { %690 = vst.msk [vmem:[#allocation2 + $0x111] sm:$0xff] %vm363_vm0, %v657_v0  ;;  %v10118_v4 = vpack.i.bf16 %v10113_v1, %v10108_v62  ;;  %v10162_v56 = vld [vmem:[#allocation2 + $0x160] sm:$0x3] }
  0xf6   : > { %v1006_v61 = vrot.slane %v10162_v56, 2 }
  0xf7   : > { %7986 = vrot.lane.b32.xlu2 %v10118_v4, %s9641_s22 }
  0xfb   : > { %v625_v10 = vpop.permute.xlu2 %624 }
  0xfc   : > { %v10124_v17 = vld [vmem:[#allocation2 + $0x110] sm:$0xff]  ;;  %v666_v19 = vsel %vm632_vm2, %v625_v10, %v9817_v24 }
  0xfd   : > { %16350 = vst [vmem:[#allocation14_spill] sm:$0xff] %v10124_v17  ;;  %v10131_v22 = vpack.i.bf16 %v10124_v17, %v10122_v9 }
  0xfe   : > { %699 = vst.msk [vmem:[#allocation2 + $0x181] sm:$0xff] %vm363_vm0, %v666_v19 }
  0xff   : > { %7991 = vrot.lane.b32.xlu0 %v10131_v22, %s9641_s22 }
 0x103   : > { %v586_v26 = vpop.permute.xlu1 %585 }
 0x104   : > { %v660_v27 = vsel %vm632_vm2, %v586_v26, %v9817_v24 }
 0x105   : > { %693 = vst.msk [vmem:[#allocation2 + $0x139] sm:$0xff] %vm363_vm0, %v660_v27 }
 0x10b   : > { %v599_v29 = vpop.permute.xlu1 %598 }
 0x10c   : > { %v662_v32 = vsel %vm632_vm2, %v599_v29, %v9817_v24  ;;  %v10146_v33 = vld [vmem:[#allocation2 + $0x138] sm:$0xff]  ;;  %v10148_v36 = vld [vmem:[#allocation2 + $0x140] sm:$0xff] }
 0x10d   : > { %695 = vst.msk [vmem:[#allocation2 + $0x151] sm:$0xff] %vm363_vm0, %v662_v32  ;;  %v10153_v41 = vpack.i.bf16 %v10148_v36, %v10146_v33  ;;  %v998_v44 = vrot.slane %v10146_v33, 2  ;;  %v999_v49 = vrot.slane %v10148_v36, 2 }
 0x10f   : > { %8001 = vrot.lane.b32.xlu2 %v10153_v41, %s9641_s22  ;;  %v1000_v50 = vsel %vm932_vm4, %v998_v44, %v999_v49  ;;  %v1002_v52 = vsel %vm932_vm4, %v999_v49, %v1001_v30  ;;  %v10188_v49 = vld [vmem:[#allocation2 + $0x168] sm:$0xff] }
 0x110   : > { %7797 = vmatmul.msk.f32.gmra.mxu2 %vm363_vm0, %v1000_v50  ;;  %v10164_v58 = vpack.i.bf16 %v1002_v52, %v1000_v50 }
 0x112   : > { %16351 = vst [vmem:[#allocation15_spill] sm:$0xff] %v10164_v58 }
 0x114   : > { %v10167_v63 = vld [vmem:[#allocation2 + $0x150] sm:$0xff]  ;;  %v10169_v0 = vld [vmem:[#allocation2 + $0x158] sm:$0xff] }
 0x115   : > { %16352 = vst [vmem:[#allocation16_spill] sm:$0xff] %v10167_v63  ;;  %v8005_v10 = vpack.i.bf16 %v10169_v0, %v10167_v63  ;;  %v1003_v19 = vrot.slane %v10167_v63, 2  ;;  %v1004_v26 = vrot.slane %v10169_v0, 2 }
 0x117   : > { %8006 = vrot.lane.b32.xlu0 %v8005_v10, %s9641_s22  ;;  %v1005_v27 = vsel %vm932_vm4, %v1003_v19, %v1004_v26  ;;  %v1007_v29 = vsel %vm932_vm4, %v1004_v26, %v1006_v61 }
 0x118   : > { %7798 = vmatmul.msk.f32.gmra.mxu2 %vm363_vm0, %v1002_v52  ;;  %v10179_v30 = vpack.i.bf16 %v1007_v29, %v1005_v27 }
 0x11a   : > { %16353 = vst [vmem:[#allocation17_spill] sm:$0xff] %v10179_v30 }
 0x11b   : > { %v618_v32 = vpop.permute.xlu1 %617 }
 0x11c   : > { %v665_v44 = vsel %vm632_vm2, %v618_v32, %v9817_v24 }
 0x11d   : > { %698 = vst.msk [vmem:[#allocation2 + $0x171] sm:$0xff] %vm363_vm0, %v665_v44  ;;  %v10209_v44 = vld [vmem:[#allocation2 + $0x180] sm:$0xff] }
 0x11f   : > { %8021 = vrot.lane.b32.xlu0 %v9918_v48, %s9642_s11  ;;  %v1008_v48 = vrot.slane %v10188_v49, 2 }
 0x120   : > { %7799 = vmatmul.msk.f32.gmra.mxu2 %vm363_vm0, %v1005_v27 }
 0x123   : > { %v631_v50 = vpop.permute.xlu1 %630 }
 0x124   : > { %v667_v52 = vsel %vm632_vm2, %v631_v50, %v9817_v24  ;;  %v10193_v61 = vld [vmem:[#allocation2 + $0x170] sm:$0xff]  ;;  %v10195_v19 = vld [vmem:[#allocation2 + $0x178] sm:$0x3] }
 0x125   : > { %700 = vst.msk [vmem:[#allocation2 + $0x189] sm:$0xff] %vm363_vm0, %v667_v52  ;;  %v8010_v26 = vpack.i.bf16 %v10193_v61, %v10188_v49  ;;  %v1009_v27 = vrot.slane %v10193_v61, 2  ;;  %v1011_v32 = vrot.slane %v10195_v19, 2  ;;  %v1013_v52 = vrot.slane %v10209_v44, 2 }
 0x127   : > { %8036 = vrot.lane.b32.xlu0 %v9987_v12, %s9642_s11  ;;  %8011 = vrot.lane.b32.xlu1 %v8010_v26, %s9641_s22  ;;  %v1010_v21 = vsel %vm932_vm4, %v1008_v48, %v1009_v27  ;;  %v1012_v24 = vsel %vm932_vm4, %v1009_v27, %v1011_v32 }
 0x128   : > { %7800 = vmatmul.msk.f32.gmra.mxu2 %vm363_vm0, %v1007_v29  ;;  %v10211_v50 = vpack.i.bf16 %v1012_v24, %v1010_v21 }
 0x12a   : > { %16354 = vst [vmem:[#allocation18_spill] sm:$0xff] %v10211_v50  ;;  %v10305_v50 = vld [vmem:[#allocation2 + $0xd0] sm:$0x3] }
 0x12b   : > { %16362 = vst [vmem:[#allocation26_spill] sm:$0xff] %v10305_v50 }
 0x12c   : > { %v10214_v39 = vld [vmem:[#allocation2 + $0x188] sm:$0xff]  ;;  %v10216_v30 = vld [vmem:[#allocation2 + $0x190] sm:$0x3] }
 0x12d   : > { %v8015_v12 = vpack.i.bf16 %v10214_v39, %v10209_v44  ;;  %v1014_v58 = vrot.slane %v10214_v39, 2  ;;  %v1016_v48 = vrot.slane %v10216_v30, 2 }
 0x12f   : > { %8051 = vrot.lane.b32.xlu0 %v10060_v37, %s9642_s11  ;;  %8016 = vrot.lane.b32.xlu2 %v8015_v12, %s9641_s22  ;;  %v10226_v29 = vsel %vm932_vm4, %v1013_v52, %v1014_v58  ;;  %v10229_v27 = vsel %vm932_vm4, %v1014_v58, %v1016_v48  ;;  %v10252_v37 = vld [vmem:[#allocation2 + $0x1a0] sm:$0xff] }
 0x130   : > { %16355 = vst [vmem:[#allocation19_spill] sm:$0xff] %v10226_v29  ;;  %8026 = vrot.lane.b32.xlu1 %v9939_v57, %s9642_s11  ;;  %7801 = vmatmul.msk.f32.gmra.mxu2 %vm363_vm0, %v1010_v21  ;;  %v10250_v57 = vld [vmem:[#allocation2 + $0x198] sm:$0xff]  ;;  %v10274_v21 = vld [vmem:[#allocation2 + $0x10] sm:$0x3]  ;;  %v10282_v52 = vld [vmem:[#allocation2] sm:$0xff] }
 0x131   : > { %16356 = vst [vmem:[#allocation20_spill] sm:$0xff] %v10229_v27  ;;  %v810_v48 = vrot.slane %v10282_v52, 1 }
 0x137   : > { %8066 = vrot.lane.b32.xlu0 %v10131_v22, %s9642_s11  ;;  %8031 = vrot.lane.b32.xlu2 %v9969_v5, %s9642_s11  ;;  %v10254_v5 = vld [vmem:[#allocation2 + $0x40] sm:$0x3]  ;;  %v821_v22 = vrot.slane %v9914_v47, 1 }
 0x138   : > { %8041 = vrot.lane.b32.xlu1 %v10018_v20, %s9642_s11  ;;  %7802 = vmatmul.msk.f32.gmra.mxu2 %vm363_vm0, %v1012_v24  ;;  %v8095_v20 = vpack.i.bf16 %v10252_v37, %v10250_v57  ;;  %v823_v58 = vrot.slane %v10254_v5, 1  ;;  %v10276_v24 = vld [vmem:[#allocation2 + $0x88] sm:$0x3] }
 0x139   : > { %16359 = vst [vmem:[#allocation23_spill] sm:$0xff] %v10276_v24  ;;  %v838_v32 = vrot.slane %v10276_v24, 1 }
 0x13f   : > { %8081 = vrot.lane.b32.xlu0 %v8005_v10, %s9642_s11  ;;  %8046 = vrot.lane.b32.xlu2 %v9991_v13, %s9642_s11  ;;  %v820_v13 = vrot.slane %v9912_v46, 1  ;;  %v10272_v10 = vsel %vm809_vm5, %v821_v22, %v823_v58  ;;  %v836_v58 = vrot.slane %v9982_v11, 1  ;;  %v10351_v11 = vld [vmem:[#allocation2 + $0xa0] sm:$0x3] }
 0x140   : > { %8056 = vrot.lane.b32.xlu1 %v10083_v45, %s9642_s11  ;;  %7803 = vmatmul.msk.f32.gmra.mxu2 %vm363_vm0, %v10226_v29  ;;  %16358 = vst [vmem:[#allocation22_spill] sm:$0xff] %v10272_v10 }
 0x141   : > { %v10269_v45 = vsel %vm809_vm5, %v820_v13, %v821_v22  ;;  %v813_v13 = vrot.slane %v10274_v21, 1  ;;  %v835_v22 = vrot.slane %v9973_v6, 1 }
 0x142   : > { %16357 = vst [vmem:[#allocation21_spill] sm:$0xff] %v10269_v45 }
 0x143   : > { %v10300_v29 = vsel %vm809_vm5, %v835_v22, %v836_v58  ;;  %v818_v22 = vrot.slane %v10307_v40, 1 }
 0x144   : > { %16360 = vst [vmem:[#allocation24_spill] sm:$0xff] %v10300_v29 }
 0x147   : > { %8096 = vrot.lane.b32.xlu0 %v8095_v20, %s9642_s11  ;;  %8061 = vrot.lane.b32.xlu2 %v10118_v4, %s9642_s11  ;;  %v10280_v4 = vpack.i.bf16 %v10272_v10, %v10269_v45 }
 0x148   : > { %8071 = vrot.lane.b32.xlu1 %v10096_v55, %s9642_s11  ;;  %7804 = vmatmul.msk.f32.gmra.mxu2 %vm363_vm0, %v10229_v27  ;;  %v10284_v55 = vld [vmem:[#allocation2 + $0x8] sm:$0xff]  ;;  %v10303_v27 = vsel %vm809_vm5, %v836_v58, %v838_v32  ;;  %v851_v32 = vrot.slane %v10054_v35, 1  ;;  %v828_v58 = vrot.slane %v10309_v23, 1 }
 0x149   : > { %v811_v20 = vrot.slane %v10284_v55, 1  ;;  %16361 = vst [vmem:[#allocation25_spill] sm:$0xff] %v10303_v27 }
 0x14b   : > { %v812_v10 = vsel %vm809_vm5, %v810_v48, %v811_v20  ;;  %v814_v45 = vsel %vm809_vm5, %v811_v20, %v813_v13  ;;  %v815_v48 = vrot.slane %v9942_v59, 1  ;;  %v850_v20 = vrot.slane %v10052_v34, 1 }
 0x14c   : > { %v8100_v25 = vpack.i.bf16 %v814_v45, %v812_v10  ;;  %v816_v13 = vrot.slane %v9944_v60, 1  ;;  %v825_v45 = vrot.slane %v9930_v53, 1  ;;  %v826_v10 = vrot.slane %v9932_v54, 1 }
 0x14e   : > { %v10337_v35 = vsel %vm809_vm5, %v815_v48, %v816_v13  ;;  %v10343_v34 = vsel %vm809_vm5, %v825_v45, %v826_v10  ;;  %v10346_v24 = vsel %vm809_vm5, %v826_v10, %v828_v58  ;;  %v865_v10 = vrot.slane %v10122_v9, 1 }
 0x14f   : > { %8111 = vrot.lane.b32.xlu0 %v10280_v4, %s9643_s12  ;;  %8076 = vrot.lane.b32.xlu2 %v10153_v41, %s9642_s11  ;;  %v10313_v41 = vpack.i.bf16 %v10303_v27, %v10300_v29  ;;  %v10328_v27 = vld [vmem:[#allocation2 + $0x70] sm:$0x3]  ;;  %v10331_v29 = vsel %vm809_vm5, %v850_v20, %v851_v32  ;;  %16365 = vst [vmem:[#allocation29_spill] sm:$0xff] %v10337_v35  ;;  %v866_v58 = vrot.slane %v10124_v17, 1 }
 0x150   : > { %8086 = vrot.lane.b32.xlu1 %v8010_v26, %s9642_s11  ;;  %v853_v26 = vrot.slane %v10305_v50, 1  ;;  %16363 = vst [vmem:[#allocation27_spill] sm:$0xff] %v10331_v29  ;;  %v833_v20 = vrot.slane %v10328_v27, 1  ;;  %v10365_v45 = vpack.i.bf16 %v10346_v24, %v10343_v34 }
 0x151   : > { %16367 = vst [vmem:[#allocation31_spill] sm:$0xff] %v10343_v34 }
 0x152   : > { %v10334_v50 = vsel %vm809_vm5, %v851_v32, %v853_v26  ;;  %16368 = vst [vmem:[#allocation32_spill] sm:$0xff] %v10346_v24  ;;  %v10353_v26 = vpop.permute.xlu2 %7941 }
 0x153   : > { %16364 = vst [vmem:[#allocation28_spill] sm:$0xff] %v10334_v50  ;;  %v10357_v48 = vpack.i.bf16 %v10334_v50, %v10331_v29  ;;  %v840_v50 = vrot.slane %v10008_v16, 1  ;;  %v841_v29 = vrot.slane %v10011_v18, 1 }
 0x154   : > { %16370 = vst [vmem:[#allocation34_spill] sm:$0xff] %v10353_v26 }
 0x155   : > { %v10393_v17 = vsel %vm809_vm5, %v840_v50, %v841_v29 }
 0x156   : > { %16376 = vst [vmem:[#allocation40_spill] sm:$0xff] %v10393_v17 }
 0x157   : > { %8126 = vrot.lane.b32.xlu0 %v10313_v41, %s9643_s12  ;;  %8091 = vrot.lane.b32.xlu2 %v8015_v12, %s9642_s11  ;;  %v10340_v12 = vsel %vm809_vm5, %v816_v13, %v818_v22  ;;  %v830_v13 = vrot.slane %v9958_v2, 1  ;;  %v831_v22 = vrot.slane %v9960_v3, 1 }
 0x158   : > { %8101 = vrot.lane.b32.xlu1 %v8100_v25, %s9643_s12  ;;  %16366 = vst [vmem:[#allocation30_spill] sm:$0xff] %v10340_v12  ;;  %v10348_v25 = vld [vmem:[#allocation2 + $0x118] sm:$0x3]  ;;  %v8105_v32 = vpack.i.bf16 %v10340_v12, %v10337_v35  ;;  %v843_v12 = vrot.slane %v10351_v11, 1  ;;  %v10385_v35 = vsel %vm809_vm5, %v865_v10, %v866_v58  ;;  %v846_v10 = vrot.slane %v9977_v8, 1 }
 0x159   : > { %16369 = vst [vmem:[#allocation33_spill] sm:$0xff] %v10348_v25  ;;  %v868_v26 = vrot.slane %v10348_v25, 1  ;;  %v10379_v24 = vsel %vm809_vm5, %v830_v13, %v831_v22  ;;  %v10382_v34 = vsel %vm809_vm5, %v831_v22, %v833_v20  ;;  %v10390_v25 = vld [vmem:[#allocation2 + $0xb8] sm:$0x3]  ;;  %v10402_v20 = vld [vmem:[#allocation2 + $0xe8] sm:$0x3] }
 0x15a   : > { %16371 = vst [vmem:[#allocation35_spill] sm:$0xff] %v10379_v24  ;;  %v10396_v9 = vsel %vm809_vm5, %v841_v29, %v843_v12  ;;  %v10400_v13 = vpack.i.bf16 %v10382_v34, %v10379_v24  ;;  %v848_v50 = vrot.slane %v10390_v25, 1  ;;  %v880_v12 = vrot.slane %v10167_v63, 1  ;;  %v10416_v24 = vpop.permute.xlu2 %7956 }
 0x15b   : > { %16372 = vst [vmem:[#allocation36_spill] sm:$0xff] %v10382_v34  ;;  %v8130_v29 = vpack.i.bf16 %v10396_v9, %v10393_v17  ;;  %v883_v34 = vrot.slane %v10162_v56, 1  ;;  %v10426_v17 = vpop.permute.xlu0 %7946 }
 0x15c   : > { %16373 = vst [vmem:[#allocation37_spill] sm:$0xff] %v10385_v35  ;;  %v10438_v63 = vsel %vm809_vm5, %v846_v10, %v848_v50 }
 0x15d   : > { %16375 = vst [vmem:[#allocation39_spill] sm:$0xff] %v10390_v25 }
 0x15e   : > { %16377 = vst [vmem:[#allocation41_spill] sm:$0xff] %v10396_v9  ;;  %v858_v9 = vrot.slane %v10402_v20, 1 }
 0x15f   : > { %8141 = vrot.lane.b32.xlu0 %v10357_v48, %s9643_s12  ;;  %8106 = vrot.lane.b32.xlu2 %v8105_v32, %s9643_s12  ;;  %v10388_v32 = vsel %vm809_vm5, %v866_v58, %v868_v26  ;;  %v845_v26 = vrot.slane %v9975_v7, 1  ;;  %v881_v58 = vrot.slane %v10169_v0, 1  ;;  %16378 = vst [vmem:[#allocation42_spill] sm:$0xff] %v10416_v24  ;;  %v10446_v7 = vld [vmem:[#allocation2 + $0x100] sm:$0x3] }
 0x160   : > { %8116 = vrot.lane.b32.xlu1 %v10365_v45, %s9643_s12  ;;  %16374 = vst [vmem:[#allocation38_spill] sm:$0xff] %v10388_v32  ;;  %v10406_v22 = vpack.i.bf16 %v10388_v32, %v10385_v35  ;;  %v855_v32 = vrot.slane %v10074_v42, 1  ;;  %v856_v35 = vrot.slane %v10076_v43, 1  ;;  %v863_v50 = vrot.slane %v10446_v7, 1 }
 0x161   : > { %16379 = vst [vmem:[#allocation43_spill] sm:$0xff] %v10426_v17  ;;  %v10429_v56 = vsel %vm809_vm5, %v880_v12, %v881_v58  ;;  %v10432_v0 = vsel %vm809_vm5, %v881_v58, %v883_v34  ;;  %v10435_v24 = vsel %vm809_vm5, %v845_v26, %v846_v10  ;;  %v860_v10 = vrot.slane %v10108_v62, 1  ;;  %v10484_v17 = vpop.permute.xlu1 %7951 }
 0x162   : > { %16380 = vst [vmem:[#allocation44_spill] sm:$0xff] %v10429_v56  ;;  %v10441_v25 = vsel %vm809_vm5, %v855_v32, %v856_v35  ;;  %v10444_v8 = vsel %vm809_vm5, %v856_v35, %v858_v9  ;;  %v10450_v12 = vpack.i.bf16 %v10432_v0, %v10429_v56  ;;  %v8135_v34 = vpack.i.bf16 %v10438_v63, %v10435_v24 }
 0x163   : > { %16381 = vst [vmem:[#allocation45_spill] sm:$0xff] %v10432_v0  ;;  %v8145_v26 = vpack.i.bf16 %v10444_v8, %v10441_v25  ;;  %v861_v32 = vrot.slane %v10113_v1, 1  ;;  %v870_v35 = vrot.slane %v10092_v51, 1  ;;  %v871_v9 = vrot.slane %v10062_v38, 1  ;;  %v10466_v0 = vpop.permute.xlu2 %7971  ;;  %v10468_v56 = vpop.permute.xlu0 %7961 }
 0x164   : > { %16382 = vst [vmem:[#allocation46_spill] sm:$0xff] %v10435_v24  ;;  %v873_v58 = vrot.slane %v10047_v31, 1 }
 0x165   : > { %16383 = vst [vmem:[#allocation47_spill] sm:$0xff] %v10438_v63  ;;  %v10477_v63 = vsel %vm809_vm5, %v870_v35, %v871_v9  ;;  %v888_v35 = vrot.slane %v10195_v19, 1 }
 0x166   : > { %16384 = vst [vmem:[#allocation48_spill] sm:$0xff] %v10441_v25  ;;  %v10474_v25 = vsel %vm809_vm5, %v861_v32, %v863_v50  ;;  %v10480_v24 = vsel %vm809_vm5, %v871_v9, %v873_v58  ;;  %v886_v50 = vrot.slane %v10193_v61, 1 }
 0x167   : > { %8156 = vrot.lane.b32.xlu0 %v10406_v22, %s9643_s12  ;;  %8121 = vrot.lane.b32.xlu2 %v10400_v13, %s9643_s12  ;;  %16385 = vst [vmem:[#allocation49_spill] sm:$0xff] %v10444_v8  ;;  %v10471_v8 = vsel %vm809_vm5, %v860_v10, %v861_v32  ;;  %v875_v10 = vrot.slane %v10146_v33, 1  ;;  %v878_v32 = vrot.slane %v10140_v28, 1  ;;  %v885_v33 = vrot.slane %v10188_v49, 1 }
 0x168   : > { %8131 = vrot.lane.b32.xlu1 %v8130_v29, %s9643_s12  ;;  %16386 = vst [vmem:[#allocation50_spill] sm:$0xff] %v10466_v0  ;;  %v8150_v31 = vpack.i.bf16 %v10474_v25, %v10471_v8  ;;  %v8160_v0 = vpack.i.bf16 %v10480_v24, %v10477_v63  ;;  %v10512_v61 = vsel %vm809_vm5, %v886_v50, %v888_v35  ;;  %v1808_v35 = vld [vmem:[%s16170_s2 + $0x78] sm:$0xff] }
 0x169   : > { %16387 = vst [vmem:[#allocation51_spill] sm:$0xff] %v10468_v56  ;;  %v876_v56 = vrot.slane %v10148_v36, 1  ;;  %1897 = vmatpush.msra.mxu0 %v1808_v35  ;;  %7876 = vmatpush.msra.mxu3 %v1808_v35 }
 0x16a   : > { %16388 = vst [vmem:[#allocation52_spill] sm:$0xff] %v10471_v8  ;;  %7875 = vmatpush.msra.mxu1 %v1808_v35  ;;  %v934_v35 = vrot.slane %v10284_v55, 2  ;;  %v941_v8 = vrot.slane %v10307_v40, 2 }
 0x16b   : > { %16389 = vst [vmem:[#allocation53_spill] sm:$0xff] %v10474_v25  ;;  %v10497_v9 = vpop.permute.xlu2 %7986  ;;  %v10499_v58 = vpop.permute.xlu0 %7976  ;;  %v10506_v28 = vsel %vm809_vm5, %v876_v56, %v878_v32  ;;  %v893_v25 = vrot.slane %v10216_v30, 1 }
 0x16c   : > { %16390 = vst [vmem:[#allocation54_spill] sm:$0xff] %v10477_v63  ;;  %v10518_v63 = vpop.permute.xlu1 %7966 }
 0x16d   : > { %16391 = vst [vmem:[#allocation55_spill] sm:$0xff] %v10480_v24  ;;  %v10503_v24 = vsel %vm809_vm5, %v875_v10, %v876_v56 }
 0x16e   : > { %16392 = vst [vmem:[#allocation56_spill] sm:$0xff] %v10503_v24  ;;  %v10516_v19 = vpack.i.bf16 %v10506_v28, %v10503_v24 }
 0x16f   : > { %8171 = vrot.lane.b32.xlu0 %v10450_v12, %s9643_s12  ;;  %8136 = vrot.lane.b32.xlu2 %v8135_v34, %s9643_s12  ;;  %16393 = vst [vmem:[#allocation57_spill] sm:$0xff] %v10506_v28  ;;  %v1803_v28 = vld [vmem:[%s16170_s2 + $0x50] sm:$0xff] }
 0x170   : > { %8146 = vrot.lane.b32.xlu1 %v8145_v26, %s9643_s12  ;;  %16395 = vst [vmem:[#allocation59_spill] sm:$0xff] %v10512_v61 }
 0x173   : > { %v10526_v56 = vpop.permute.xlu2 %8001  ;;  %v10528_v10 = vpop.permute.xlu0 %7991 }
 0x174   : > { %v10530_v32 = vpop.permute.xlu1 %7981 }
 0x175   : > { %16396 = vst [vmem:[#allocation60_spill] sm:$0xff] %v10530_v32 }
 0x177   : > { %8186 = vrot.lane.b32.xlu0 %v10365_v45, %s9641_s22  ;;  %8151 = vrot.lane.b32.xlu2 %v8150_v31, %s9643_s12  ;;  %v10509_v45 = vsel %vm809_vm5, %v885_v33, %v886_v50 }
 0x178   : > { %8161 = vrot.lane.b32.xlu1 %v8160_v0, %s9643_s12  ;;  %16394 = vst [vmem:[#allocation58_spill] sm:$0xff] %v10509_v45  ;;  %v8175_v49 = vpack.i.bf16 %v10512_v61, %v10509_v45  ;;  %v936_v61 = vrot.slane %v10274_v21, 2 }
 0x17a   : > { %v937_v21 = vsel %vm932_vm4, %v934_v35, %v936_v61  ;;  %v1801_v61 = vld [vmem:[%s16170_s2 + $0x40] sm:$0xff] }
 0x17f   : > { %8201 = vrot.lane.b32.xlu0 %v8130_v29, %s9641_s22  ;;  %8166 = vrot.lane.b32.xlu2 %v10516_v19, %s9643_s12 }
 0x180   : > { %8176 = vrot.lane.b32.xlu1 %v8175_v49, %s9643_s12 }
 0x187   : > { %8216 = vrot.lane.b32.xlu0 %v8145_v26, %s9641_s22  ;;  %8181 = vrot.lane.b32.xlu2 %v10280_v4, %s9641_s22  ;;  %v10547_v4 = vpop.permute.xlu1 %7996 }
 0x188   : > { %8191 = vrot.lane.b32.xlu1 %v10400_v13, %s9641_s22  ;;  %v1807_v13 = vld [vmem:[%s16170_s2 + $0x70] sm:$0xff] }
 0x189   : > { %v10537_v29 = vpop.permute.xlu2 %8016  ;;  %v10539_v50 = vpop.permute.xlu0 %8006  ;;  %1898 = vmatpush.msra.mxu0 %v1807_v13  ;;  %7878 = vmatpush.msra.mxu3 %v1807_v13 }
 0x18a   : > { %7877 = vmatpush.msra.mxu1 %v1807_v13  ;;  %v1804_v13 = vld [vmem:[%s16170_s2 + $0x58] sm:$0xff] }
 0x18f   : > { %8231 = vrot.lane.b32.xlu0 %v8160_v0, %s9641_s22  ;;  %8196 = vrot.lane.b32.xlu2 %v10313_v41, %s9641_s22  ;;  %v1806_v0 = vld [vmem:[%s16170_s2 + $0x68] sm:$0xff]  ;;  %v1805_v41 = vld [vmem:[%s16170_s2 + $0x60] sm:$0xff] }
 0x190   : > { %8206 = vrot.lane.b32.xlu1 %v8135_v34, %s9641_s22  ;;  %v933_v34 = vrot.slane %v10282_v52, 2  ;;  %1899 = vmatpush.msra.mxu0 %v1806_v0 }
 0x191   : > { %v10553_v26 = vpop.permute.xlu2 %8031  ;;  %v10555_v33 = vpop.permute.xlu0 %8021  ;;  %7880 = vmatpush.msra.mxu3 %v1806_v0  ;;  %7879 = vmatpush.msra.mxu1 %v1806_v0 }
 0x192   : > { %1900 = vmatpush.msra.mxu0 %v1805_v41  ;;  %v935_v45 = vsel %vm932_vm4, %v933_v34, %v934_v35  ;;  %v1800_v34 = vld [vmem:[%s16170_s2 + $0x38] sm:$0xff]  ;;  %v951_v35 = vrot.slane %v10309_v23, 2  ;;  %v754_v23 = vld [vmem:[#allocation2 + $0x1a8] sm:$0x3] }
 0x193   : > { %7882 = vmatpush.msra.mxu3 %v1805_v41  ;;  %7881 = vmatpush.msra.mxu1 %v1805_v41  ;;  %v948_v41 = vrot.slane %v9930_v53, 2  ;;  %v1799_v53 = vld [vmem:[%s16170_s2 + $0x30] sm:$0xff] }
 0x194   : > { %1901 = vmatpush.msra.mxu0 %v1804_v13 }
 0x195   : > { %7884 = vmatpush.msra.mxu3 %v1804_v13  ;;  %7883 = vmatpush.msra.mxu1 %v1804_v13  ;;  %v890_v13 = vrot.slane %v10209_v44, 1 }
 0x196   : > { %1902 = vmatpush.msra.mxu0 %v1803_v28 }
 0x197   : > { %8211 = vrot.lane.b32.xlu2 %v10357_v48, %s9641_s22  ;;  %8246 = vrot.lane.b32.xlu0 %v8175_v49, %s9641_s22  ;;  %v8260_v49 = vpack.i.bf16 %v937_v21, %v935_v45  ;;  %v949_v45 = vrot.slane %v9932_v54, 2  ;;  %v891_v21 = vrot.slane %v10214_v39, 1 }
 0x198   : > { %8221 = vrot.lane.b32.xlu1 %v8150_v31, %s9641_s22  ;;  %v1802_v31 = vld [vmem:[%s16170_s2 + $0x48] sm:$0xff]  ;;  %7886 = vmatpush.msra.mxu3 %v1803_v28 }
 0x199   : > { %v10578_v24 = vpop.permute.xlu2 %8046  ;;  %v10580_v0 = vpop.permute.xlu1 %8011  ;;  %1903 = vmatpush.msra.mxu0 %v1802_v31  ;;  %7885 = vmatpush.msra.mxu1 %v1803_v28  ;;  %v10614_v39 = vsel %vm932_vm4, %v948_v41, %v949_v45  ;;  %v10617_v30 = vsel %vm932_vm4, %v949_v45, %v951_v35  ;;  %v10620_v28 = vsel %vm809_vm5, %v890_v13, %v891_v21  ;;  %v896_v41 = vrot.slane %v10252_v37, 1  ;;  %v1796_v13 = vld [vmem:[%s16170_s2 + $0x18] sm:$0xff] }
 0x19a   : > { %v10582_v48 = vpop.permute.xlu0 %8036  ;;  %7888 = vmatpush.msra.mxu3 %v1802_v31  ;;  %16398 = vst [vmem:[#allocation62_spill] sm:$0xff] %v10614_v39  ;;  %v895_v45 = vrot.slane %v10250_v57, 1  ;;  %v898_v35 = vrot.slane %v754_v23, 1  ;;  %v964_v37 = vrot.slane %v10011_v18, 2  ;;  %v966_v57 = vrot.slane %v10351_v11, 2  ;;  %v1795_v11 = vld [vmem:[%s16170_s2 + $0x10] sm:$0xff] }
 0x19b   : > { %1904 = vmatpush.msra.mxu0 %v1801_v61  ;;  %7887 = vmatpush.msra.mxu1 %v1802_v31  ;;  %16399 = vst [vmem:[#allocation63_spill] sm:$0xff] %v10617_v30  ;;  %v1797_v31 = vld [vmem:[%s16170_s2 + $0x20] sm:$0xff]  ;;  %v938_v23 = vrot.slane %v9942_v59, 2  ;;  %v8013_v32 = vunpack.i.l.bf16 %v10580_v0 }
 0x19c   : > { %7890 = vmatpush.msra.mxu3 %v1801_v61  ;;  %16400 = vst [vmem:[#allocation64_spill] sm:$0xff] %v10620_v28  ;;  %v899_v18 = vsel %vm809_vm5, %v896_v41, %v898_v35 }
 0x19d   : > { %1905 = vmatpush.msra.mxu0 %v1800_v34  ;;  %7889 = vmatpush.msra.mxu1 %v1801_v61  ;;  %v963_v61 = vrot.slane %v10008_v16, 2  ;;  %v897_v16 = vsel %vm809_vm5, %v895_v45, %v896_v41  ;;  %v10668_v45 = vsel %vm932_vm4, %v964_v37, %v966_v57 }
 0x19e   : > { %7892 = vmatpush.msra.mxu3 %v1800_v34  ;;  %16403 = vst [vmem:[#allocation67_spill] sm:$0xff] %v10668_v45  ;;  %v8255_v41 = vpack.i.bf16 %v899_v18, %v897_v16 }
 0x19f   : > { %8226 = vrot.lane.b32.xlu2 %v10406_v22, %s9641_s22  ;;  %8261 = vrot.lane.b32.xlu0 %v8260_v49, %s9642_s11  ;;  %v1798_v49 = vld [vmem:[%s16170_s2 + $0x28] sm:$0xff]  ;;  %v10665_v40 = vsel %vm932_vm4, %v963_v61, %v964_v37  ;;  %v944_v61 = vrot.slane %v9914_v47, 2  ;;  %v946_v37 = vrot.slane %v10254_v5, 2  ;;  %v979_v47 = vrot.slane %v10076_v43, 2 }
 0x1a0   : > { %8236 = vrot.lane.b32.xlu1 %v10516_v19, %s9641_s22  ;;  %1906 = vmatpush.msra.mxu0 %v1799_v53  ;;  %v10623_v19 = vsel %vm809_vm5, %v891_v21, %v893_v25  ;;  %v10635_v25 = vpack.i.bf16 %v10617_v30, %v10614_v39  ;;  %16402 = vst [vmem:[#allocation66_spill] sm:$0xff] %v10665_v40  ;;  %v981_v5 = vrot.slane %v10402_v20, 2 }
 0x1a1   : > { %v10607_v54 = vpop.permute.xlu2 %8061  ;;  %16401 = vst [vmem:[#allocation65_spill] sm:$0xff] %v10623_v19  ;;  %7894 = vmatpush.msra.mxu3 %v1799_v53  ;;  %7891 = vmatpush.msra.mxu1 %v1800_v34  ;;  %v8250_v21 = vpack.i.bf16 %v10623_v19, %v10620_v28  ;;  %v939_v34 = vrot.slane %v9944_v60, 2  ;;  %v1793_v19 = vld [vmem:[%s16170_s2] sm:$0xff]  ;;  %v10682_v57 = vpack.i.bf16 %v10668_v45, %v10665_v40  ;;  %v16431_v45 = vld [vmem:[#allocation13_spill] sm:$0xff] }
 0x1a2   : > { %16397 = vst [vmem:[#allocation61_spill] sm:$0xff] %v10607_v54  ;;  %v10609_v22 = vpop.permute.xlu1 %8026  ;;  %v10611_v44 = vpop.permute.xlu0 %8051  ;;  %1907 = vmatpush.msra.mxu0 %v1798_v49  ;;  %v10704_v43 = vsel %vm932_vm4, %v944_v61, %v946_v37  ;;  %v16411_v37 = vld [vmem:[#allocation23_spill] sm:$0xff]  ;;  %v16432_v40 = vld [vmem:[#allocation14_spill] sm:$0xff]  ;;  %v7989_v54 = vunpack.i.h.bf16 %v10497_v9 }
 0x1a3   : > { %7896 = vmatpush.msra.mxu3 %v1798_v49  ;;  %7893 = vmatpush.msra.mxu1 %v1799_v53  ;;  %v940_v35 = vsel %vm932_vm4, %v938_v23, %v939_v34  ;;  %v1794_v53 = vld [vmem:[%s16170_s2 + $0x8] sm:$0xff]  ;;  %v954_v23 = vrot.slane %v9960_v3, 2  ;;  %16405 = vst [vmem:[#allocation69_spill] sm:$0xff] %v10704_v43 }
 0x1a4   : > { %1908 = vmatpush.msra.mxu0 %v1797_v31 }
 0x1a5   : > { %7898 = vmatpush.msra.mxu3 %v1797_v31  ;;  %7895 = vmatpush.msra.mxu1 %v1798_v49  ;;  %v978_v49 = vrot.slane %v10074_v42, 2 }
 0x1a6   : > { %1909 = vmatpush.msra.mxu0 %v1796_v13 }
 0x1a7   : > { %8241 = vrot.lane.b32.xlu2 %v10450_v12, %s9641_s22  ;;  %8276 = vrot.lane.b32.xlu0 %v10635_v25, %s9642_s11 }
 0x1a8   : > { %8251 = vrot.lane.b32.xlu1 %v8250_v21, %s9641_s22  ;;  %1910 = vmatpush.msra.mxu0 %v1795_v11  ;;  %v942_v21 = vsel %vm932_vm4, %v939_v34, %v941_v8  ;;  %v953_v8 = vrot.slane %v9958_v2, 2  ;;  %v956_v34 = vrot.slane %v10328_v27, 2  ;;  %v943_v2 = vrot.slane %v9912_v46, 2 }
 0x1a9   : > { %v10658_v12 = vpop.permute.xlu2 %8076  ;;  %7900 = vmatpush.msra.mxu3 %v1796_v13  ;;  %7897 = vmatpush.msra.mxu1 %v1797_v31  ;;  %v10687_v16 = vpack.i.bf16 %v942_v21, %v940_v35  ;;  %v10712_v46 = vsel %vm932_vm4, %v978_v49, %v979_v47  ;;  %v10715_v31 = vsel %vm932_vm4, %v979_v47, %v981_v5  ;;  %v958_v21 = vrot.slane %v9973_v6, 2  ;;  %v16414_v47 = vld [vmem:[#allocation6_spill] sm:$0xff]  ;;  %v16415_v5 = vld [vmem:[#allocation39_spill] sm:$0xff] }
 0x1aa   : > { %v10660_v59 = vpop.permute.xlu1 %8041  ;;  %v10662_v60 = vpop.permute.xlu0 %8066  ;;  %1911 = vmatpush.msra.mxu0 %v1794_v53  ;;  %v10701_v42 = vsel %vm932_vm4, %v943_v2, %v944_v61  ;;  %16406 = vst [vmem:[#allocation70_spill] sm:$0xff] %v10712_v46  ;;  %v10718_v18 = vsel %vm932_vm4, %v953_v8, %v954_v23  ;;  %v16410_v61 = vld [vmem:[#allocation7_spill] sm:$0xff]  ;;  %v993_v8 = vrot.slane %v10092_v51, 2  ;;  %v971_v6 = vrot.slane %v16415_v5, 2  ;;  %v16416_v51 = vld [vmem:[#allocation9_spill] sm:$0xff] }
 0x1ab   : > { %7902 = vmatpush.msra.mxu3 %v1795_v11  ;;  %16404 = vst [vmem:[#allocation68_spill] sm:$0xff] %v10701_v42  ;;  %7899 = vmatpush.msra.mxu1 %v1796_v13  ;;  %v10730_v13 = vpack.i.bf16 %v10715_v31, %v10712_v46 }
 0x1ac   : > { %1912 = vmatpush.msra.mxu0 %v1793_v19  ;;  %16407 = vst [vmem:[#allocation71_spill] sm:$0xff] %v10715_v31 }
 0x1ad   : > { %16408 = vst [vmem:[#allocation72_spill] sm:$0xff] %v10718_v18  ;;  %7904 = vmatpush.msra.mxu3 %v1794_v53  ;;  %7901 = vmatpush.msra.mxu1 %v1795_v11  ;;  %v959_v11 = vrot.slane %v16410_v61, 2 }
 0x1ae   : > { %2135 = vmatpush.msrb.mxu0 %v9998_v14  ;;  %v10726_v14 = vpack.i.bf16 %v10704_v43, %v10701_v42 }
 0x1af   : > { %8256 = vrot.lane.b32.xlu2 %v8255_v41, %s9641_s22  ;;  %8291 = vrot.lane.b32.xlu0 %v10682_v57, %s9642_s11  ;;  %v10721_v41 = vsel %vm932_vm4, %v954_v23, %v956_v34  ;;  %v16412_v23 = vld [vmem:[#allocation8_spill] sm:$0xff]  ;;  %v16413_v34 = vld [vmem:[#allocation5_spill] sm:$0xff] }
 0x1b0   : > { %8266 = vrot.lane.b32.xlu1 %v10687_v16, %s9642_s11  ;;  %16409 = vst [vmem:[#allocation73_spill] sm:$0xff] %v10721_v41  ;;  %2136 = vmatpush.msrb.mxu0 %v10003_v15  ;;  %v10734_v35 = vpack.i.bf16 %v10721_v41, %v10718_v18  ;;  %v961_v15 = vrot.slane %v16411_v37, 2  ;;  %v968_v49 = vrot.slane %v16413_v34, 2 }
 0x1b1   : > { %v10698_v3 = vpop.permute.xlu2 %8091  ;;  %7906 = vmatpush.msra.mxu3 %v1793_v19  ;;  %7903 = vmatpush.msra.mxu1 %v1794_v53  ;;  %v969_v53 = vrot.slane %v16414_v47, 2  ;;  %v16419_v47 = vrot.slane %v10062_v38, 2 }
 0x1b2   : > { %v10707_v27 = vpop.permute.xlu1 %8056  ;;  %v10709_v20 = vpop.permute.xlu0 %8081  ;;  %2137 = vmatpush.msrb.mxu0 %v16412_v23  ;;  %v10758_v23 = vsel %vm932_vm4, %v958_v21, %v959_v11  ;;  %v10761_v34 = vsel %vm932_vm4, %v959_v11, %v961_v15  ;;  %v16423_v21 = vld [vmem:[#allocation12_spill] sm:$0xff]  ;;  %v16424_v11 = vld [vmem:[#allocation10_spill] sm:$0xff] }
 0x1b3   : > { %7905 = vmatpush.msra.mxu1 %v1793_v19  ;;  %16417 = vst [vmem:[#allocation7_spill] sm:$0xff] %v10758_v23  ;;  %v10766_v5 = vsel %vm932_vm4, %v993_v8, %v16419_v47  ;;  %v10769_v19 = vsel %vm932_vm4, %v968_v49, %v969_v53  ;;  %v10776_v28 = vpack.i.bf16 %v10761_v34, %v10758_v23  ;;  %v973_v15 = vrot.slane %v16424_v11, 2  ;;  %v16425_v8 = vld [vmem:[#allocation11_spill] sm:$0xff]  ;;  %v16426_v47 = vld [vmem:[#allocation26_spill] sm:$0xff] }
 0x1b4   : > { %2138 = vmatpush.msrb.mxu0 %v16416_v51  ;;  %16418 = vst [vmem:[#allocation23_spill] sm:$0xff] %v10761_v34  ;;  %v10772_v51 = vsel %vm932_vm4, %v969_v53, %v971_v6  ;;  %v10780_v31 = vpack.i.bf16 %v16423_v21, %v10766_v5  ;;  %v974_v49 = vrot.slane %v16425_v8, 2  ;;  %v976_v46 = vrot.slane %v16426_v47, 2  ;;  %v16434_v23 = vld [vmem:[#allocation34_spill] sm:$0xff] }
 0x1b5   : > { %16420 = vst [vmem:[#allocation8_spill] sm:$0xff] %v10766_v5  ;;  %v10784_v38 = vpack.i.bf16 %v10772_v51, %v10769_v19  ;;  %v983_v53 = vrot.slane %v10108_v62, 2  ;;  %v984_v6 = vrot.slane %v10113_v1, 2  ;;  %v986_v21 = vrot.slane %v10446_v7, 2 }
 0x1b6   : > { %16421 = vst [vmem:[#allocation5_spill] sm:$0xff] %v10769_v19  ;;  %v10805_v5 = vsel %vm932_vm4, %v973_v15, %v974_v49  ;;  %v988_v15 = vrot.slane %v16431_v45, 2  ;;  %v989_v34 = vrot.slane %v16432_v40, 2 }
 0x1b7   : > { %8271 = vrot.lane.b32.xlu2 %v10726_v14, %s9642_s11  ;;  %8306 = vrot.lane.b32.xlu0 %v10730_v13, %s9642_s11  ;;  %16422 = vst [vmem:[#allocation6_spill] sm:$0xff] %v10772_v51  ;;  %v10808_v51 = vsel %vm932_vm4, %v974_v49, %v976_v46  ;;  %v10811_v62 = vsel %vm932_vm4, %v983_v53, %v984_v6  ;;  %v16433_v46 = vld [vmem:[#allocation33_spill] sm:$0xff]  ;;  %v7943_v53 = vunpack.i.l.bf16 %v16434_v23 }
 0x1b8   : > { %8281 = vrot.lane.b32.xlu1 %v10734_v35, %s9642_s11  ;;  %16427 = vst [vmem:[#allocation39_spill] sm:$0xff] %v10805_v5  ;;  %v10814_v7 = vsel %vm932_vm4, %v984_v6, %v986_v21  ;;  %v10818_v1 = vpack.i.bf16 %v10808_v51, %v10805_v5  ;;  %v991_v49 = vrot.slane %v16433_v46, 2  ;;  %v16435_v6 = vld [vmem:[#allocation18_spill] sm:$0xff]  ;;  %v8023_v21 = vunpack.i.l.bf16 %v10555_v33 }
 0x1b9   : > { %v10750_v2 = vpop.permute.xlu2 %8106  ;;  %16428 = vst [vmem:[#allocation9_spill] sm:$0xff] %v10808_v51  ;;  %v10822_v19 = vpack.i.bf16 %v10814_v7, %v10811_v62  ;;  %v10840_v46 = vsel %vm932_vm4, %v988_v15, %v989_v34  ;;  %v1599_v5 = vsel %vm363_vm0, %v10282_v52, %v7943_v53  ;;  %v7944_v15 = vunpack.i.h.bf16 %v16434_v23 }
 0x1ba   : > { %v10753_v61 = vpop.permute.xlu1 %8071  ;;  %v10755_v37 = vpop.permute.xlu0 %8096  ;;  %16429 = vst [vmem:[#allocation12_spill] sm:$0xff] %v10811_v62  ;;  %v10843_v62 = vsel %vm932_vm4, %v989_v34, %v991_v49  ;;  %v1632_v41 = vsel %vm1631_vm6, %v1599_v5, %v8023_v21  ;;  %v8024_v52 = vunpack.i.h.bf16 %v10555_v33  ;;  %v16438_v34 = vld [vmem:[#allocation15_spill] sm:$0xff] }
 0x1bb   : > { %16430 = vst [vmem:[#allocation10_spill] sm:$0xff] %v10814_v7  ;;  %v10851_v30 = vpack.i.bf16 %v10843_v62, %v10840_v46  ;;  %v16440_v33 = vld [vmem:[#allocation43_spill] sm:$0xff] }
 0x1bc   : > { %16436 = vst [vmem:[#allocation11_spill] sm:$0xff] %v10840_v46  ;;  %v7948_v21 = vunpack.i.l.bf16 %v16440_v33  ;;  %v8028_v46 = vunpack.i.l.bf16 %v10609_v22 }
 0x1bd   : > { %16437 = vst [vmem:[#allocation26_spill] sm:$0xff] %v10843_v62  ;;  %v16441_v62 = vld [vmem:[#allocation17_spill] sm:$0xff] }
 0x1bf   : > { %8286 = vrot.lane.b32.xlu2 %v10776_v28, %s9642_s11  ;;  %8321 = vrot.lane.b32.xlu0 %v10780_v31, %s9642_s11 }
 0x1c0   : > { %8296 = vrot.lane.b32.xlu1 %v10784_v38, %s9642_s11 }
 0x1c1   : > { %v10798_v11 = vpop.permute.xlu2 %8121 }
 0x1c2   : > { %v10800_v8 = vpop.permute.xlu1 %8086  ;;  %v10802_v47 = vpop.permute.xlu0 %8111 }
 0x1c7   : > { %8301 = vrot.lane.b32.xlu2 %v10818_v1, %s9642_s11  ;;  %8336 = vrot.lane.b32.xlu0 %v16435_v6, %s9642_s11 }
 0x1c8   : > { %8311 = vrot.lane.b32.xlu1 %v10822_v19, %s9642_s11 }
 0x1c9   : > { %v10835_v7 = vpop.permute.xlu2 %8136 }
 0x1ca   : > { %v8102_v45 = vpop.permute.xlu1 %8101  ;;  %v10837_v40 = vpop.permute.xlu0 %8126 }
 0x1cb   : > { %v8103_v51 = vunpack.i.l.bf16 %v8102_v45  ;;  %v8104_v5 = vunpack.i.h.bf16 %v8102_v45  ;;  %v8089_v45 = vunpack.i.h.bf16 %v10800_v8 }
 0x1cd   : > { %v1665_v18 = vsel %vm1664_vm7, %v1632_v41, %v8103_v51 }
 0x1ce   : > { %1913 = vmatmul.f32.vlgmr.msra.gmra.mxu0 %v1665_v18  ;;  %v1600_v18 = vsel %vm363_vm0, %v10284_v55, %v7944_v15  ;;  %v8108_v55 = vunpack.i.l.bf16 %v10750_v2 }
 0x1cf   : > { %8316 = vrot.lane.b32.xlu2 %v10851_v30, %s9642_s11  ;;  %8351 = vrot.lane.b32.xlu0 %v10635_v25, %s9643_s12  ;;  %v1633_v23 = vsel %vm1631_vm6, %v1600_v18, %v8024_v52  ;;  %v8009_v25 = vunpack.i.h.bf16 %v10539_v50 }
 0x1d0   : > { %8326 = vrot.lane.b32.xlu1 %v16438_v34, %s9642_s11  ;;  %v1666_v53 = vsel %vm1664_vm7, %v1633_v23, %v8104_v5 }
 0x1d1   : > { %v10861_v41 = vpop.permute.xlu2 %8151  ;;  %v1626_v23 = vsel %vm363_vm0, %v10148_v36, %v8009_v25  ;;  %v8029_v36 = vunpack.i.h.bf16 %v10609_v22 }
 0x1d2   : > { %v10863_v51 = vpop.permute.xlu1 %8116  ;;  %v10865_v49 = vpop.permute.xlu0 %8141  ;;  %v1659_v39 = vsel %vm1631_vm6, %v1626_v23, %v8089_v45  ;;  %v9515_v45 = vld [vmem:[#allocation2 + $0xe0] sm:$0xff] }
 0x1d3   : > { %16439 = vst [vmem:[#allocation13_spill] sm:$0xff] %v10865_v49  ;;  %v7949_v49 = vunpack.i.h.bf16 %v16440_v33  ;;  %v9514_v33 = vld [vmem:[#allocation2 + $0x20] sm:$0xff]  ;;  %v1618_v22 = vsel %vm363_vm0, %v9515_v45, %v7989_v54  ;;  %v7993_v54 = vunpack.i.l.bf16 %v10528_v10  ;;  %v9517_v45 = vld [vmem:[#allocation2 + $0xf0] sm:$0xff] }
 0x1d6   : > { %1916 = vmatmul.f32.gmra.mxu0 %v1666_v53  ;;  %v9513_v53 = vld [vmem:[#allocation2 + $0x18] sm:$0xff] }
 0x1d7   : > { %8331 = vrot.lane.b32.xlu2 %v16441_v62, %s9642_s11  ;;  %8366 = vrot.lane.b32.xlu0 %v10682_v57, %s9643_s12  ;;  %v1601_v57 = vsel %vm363_vm0, %v9513_v53, %v7948_v21 }
 0x1d8   : > { %8341 = vrot.lane.b32.xlu1 %v10687_v16, %s9643_s12  ;;  %v1634_v16 = vsel %vm1631_vm6, %v1601_v57, %v8028_v46  ;;  %v8093_v46 = vunpack.i.l.bf16 %v10698_v3 }
 0x1d9   : > { %v10882_v15 = vpop.permute.xlu2 %8166  ;;  %v1667_v42 = vsel %vm1664_vm7, %v1634_v16, %v8108_v55  ;;  %v16442_v55 = vld [vmem:[#allocation16_spill] sm:$0xff]  ;;  %v7953_v16 = vunpack.i.l.bf16 %v10484_v17 }
 0x1da   : > { %v8169_v52 = vunpack.i.h.bf16 %v10882_v15  ;;  %v10885_v5 = vpop.permute.xlu1 %8131  ;;  %v10887_v18 = vpop.permute.xlu0 %8156 }
 0x1dc   : > { %v1692_v43 = vsel %vm1664_vm7, %v1659_v39, %v8169_v52  ;;  %v8069_v39 = vunpack.i.h.bf16 %v10662_v60  ;;  %v1627_v52 = vsel %vm363_vm0, %v16442_v55, %v8013_v32  ;;  %v8033_v32 = vunpack.i.l.bf16 %v10553_v26 }
 0x1dd   : > { %1994 = vmatmul.f32.vlgmr.msra.gmra.mxu3 %v1692_v43 }
 0x1de   : > { %1919 = vmatmul.f32.gmra.mxu0 %v1667_v42  ;;  %v8109_v42 = vunpack.i.h.bf16 %v10750_v2  ;;  %v1660_v2 = vsel %vm1631_vm6, %v1627_v52, %v8093_v46 }
 0x1df   : > { %8346 = vrot.lane.b32.xlu2 %v10726_v14, %s9643_s12  ;;  %8381 = vrot.lane.b32.xlu0 %v10730_v13, %s9643_s12  ;;  %v1602_v14 = vsel %vm363_vm0, %v9514_v33, %v7949_v49  ;;  %v8113_v33 = vunpack.i.l.bf16 %v10802_v47 }
 0x1e0   : > { %8356 = vrot.lane.b32.xlu1 %v10734_v35, %s9643_s12  ;;  %v1635_v23 = vsel %vm1631_vm6, %v1602_v14, %v8029_v36  ;;  %v1651_v35 = vsel %vm1631_vm6, %v1618_v22, %v8069_v39  ;;  %v8014_v36 = vunpack.i.h.bf16 %v10580_v0  ;;  %v8073_v39 = vunpack.i.l.bf16 %v10753_v61  ;;  %v9516_v0 = vld [vmem:[#allocation2 + $0x30] sm:$0xff] }
 0x1e1   : > { %v1668_v53 = vsel %vm1664_vm7, %v1635_v23, %v8109_v42  ;;  %v10929_v46 = vpop.permute.xlu2 %8181  ;;  %v8094_v42 = vunpack.i.h.bf16 %v10698_v3  ;;  %v1619_v22 = vsel %vm363_vm0, %v9517_v45, %v7993_v54  ;;  %v8074_v54 = vunpack.i.h.bf16 %v10753_v61 }
 0x1e2   : > { %v10909_v43 = vpop.permute.xlu1 %8146  ;;  %v8172_v25 = vpop.permute.xlu0 %8171  ;;  %v1652_v55 = vsel %vm1631_vm6, %v1619_v22, %v8073_v39  ;;  %v9519_v39 = vld [vmem:[#allocation2 + $0x38] sm:$0xff]  ;;  %v1822_v22 = vld [vmem:[%s16170_s2 + $0xe8] sm:$0xff] }
 0x1e3   : > { %v8149_v21 = vunpack.i.h.bf16 %v10909_v43  ;;  %v8173_v13 = vunpack.i.l.bf16 %v8172_v25  ;;  %v8174_v14 = vunpack.i.h.bf16 %v8172_v25 }
 0x1e5   : > { %v1684_v57 = vsel %vm1664_vm7, %v1651_v35, %v8149_v21  ;;  %v1693_v49 = vsel %vm1664_vm7, %v1660_v2, %v8173_v13  ;;  %v1603_v13 = vsel %vm363_vm0, %v9516_v0, %v7953_v16  ;;  %v1824_v2 = vld [vmem:[%s16170_s2 + $0xf8] sm:$0xff]  ;;  %v8034_v16 = vunpack.i.h.bf16 %v10553_v26 }
 0x1e6   : > { %1922 = vmatmul.f32.gmra.mxu0 %v1668_v53  ;;  %1970 = vmatmul.f32.vlgmr.msra.gmra.mxu1 %v1684_v57  ;;  %v7954_v53 = vunpack.i.h.bf16 %v10484_v17  ;;  %v7994_v57 = vunpack.i.h.bf16 %v10528_v10  ;;  %v1823_v17 = vld [vmem:[%s16170_s2 + $0xf0] sm:$0xff]  ;;  %v8114_v10 = vunpack.i.h.bf16 %v10802_v47 }
 0x1e7   : > { %1997 = vmatmul.f32.gmra.mxu3 %v1693_v49  ;;  %8361 = vrot.lane.b32.xlu2 %v10776_v28, %s9643_s12  ;;  %v8153_v28 = vunpack.i.l.bf16 %v10861_v41  ;;  %v8018_v49 = vunpack.i.l.bf16 %v10537_v29 }
 0x1e8   : > { %8396 = vrot.lane.b32.xlu0 %v10780_v31, %s9643_s12  ;;  %8371 = vrot.lane.b32.xlu1 %v10784_v38, %s9643_s12  ;;  %v1636_v31 = vsel %vm1631_vm6, %v1603_v13, %v8033_v32  ;;  %v9518_v38 = vld [vmem:[#allocation2 + $0x158] sm:$0xff]  ;;  %v8098_v32 = vunpack.i.l.bf16 %v10755_v37 }
 0x1e9   : > { %v1628_v3 = vsel %vm363_vm0, %v9518_v38, %v8014_v36  ;;  %v1669_v52 = vsel %vm1664_vm7, %v1636_v31, %v8113_v33  ;;  %v1685_v23 = vsel %vm1664_vm7, %v1652_v55, %v8153_v28  ;;  %2010 = vmatpush.msrb.mxu1 %v1824_v2  ;;  %v10969_v26 = vpop.permute.xlu2 %8196  ;;  %v16443_v31 = vld [vmem:[#allocation42_spill] sm:$0xff]  ;;  %v7998_v38 = vunpack.i.l.bf16 %v10547_v4 }
 0x1ea   : > { %v10938_v21 = vpop.permute.xlu1 %8161  ;;  %v1661_v25 = vsel %vm1631_vm6, %v1628_v3, %v8094_v42  ;;  %v1604_v42 = vsel %vm363_vm0, %v9519_v39, %v7954_v53  ;;  %v7958_v55 = vunpack.i.l.bf16 %v16443_v31  ;;  %v1821_v3 = vld [vmem:[%s16170_s2 + $0xe0] sm:$0xff]  ;;  %v8099_v2 = vunpack.i.h.bf16 %v10755_v37 }
 0x1eb   : > { %v1694_v35 = vsel %vm1664_vm7, %v1661_v25, %v8174_v14  ;;  %2011 = vmatpush.msrb.mxu1 %v1823_v17  ;;  %v1637_v14 = vsel %vm1631_vm6, %v1604_v42, %v8034_v16  ;;  %v8078_v25 = vunpack.i.l.bf16 %v10658_v12  ;;  %v8158_v53 = vunpack.i.l.bf16 %v10887_v18 }
 0x1ec   : > { %v1670_v0 = vsel %vm1664_vm7, %v1637_v14, %v8114_v10  ;;  %v9524_v10 = vld [vmem:[#allocation2 + $0x170] sm:$0xff]  ;;  %v8039_v14 = vunpack.i.h.bf16 %v10582_v48 }
 0x1ed   : > { %2012 = vmatpush.msrb.mxu1 %v1822_v22 }
 0x1ee   : > { %1925 = vmatmul.f32.gmra.mxu0 %v1669_v52  ;;  %1973 = vmatmul.f32.gmra.mxu1 %v1685_v23  ;;  %v8019_v52 = vunpack.i.h.bf16 %v10537_v29  ;;  %v8038_v23 = vunpack.i.l.bf16 %v10582_v48  ;;  %v9522_v29 = vld [vmem:[#allocation2 + $0x48] sm:$0xff] }
 0x1ef   : > { %2000 = vmatmul.f32.gmra.mxu3 %v1694_v35  ;;  %8376 = vrot.lane.b32.xlu2 %v10818_v1, %s9643_s12  ;;  %v8154_v1 = vunpack.i.h.bf16 %v10861_v41  ;;  %v10993_v35 = vpop.permute.xlu0 %8186  ;;  %v1605_v16 = vsel %vm363_vm0, %v9522_v29, %v7958_v55  ;;  %v9526_v55 = vld [vmem:[#allocation2 + $0x110] sm:$0xff]  ;;  %v8083_v29 = vunpack.i.l.bf16 %v10709_v20 }
 0x1f0   : > { %8411 = vrot.lane.b32.xlu0 %v16435_v6, %s9643_s12  ;;  %8386 = vrot.lane.b32.xlu1 %v10822_v19, %s9643_s12  ;;  %v9520_v6 = vld [vmem:[#allocation2 + $0xf8] sm:$0xff]  ;;  %v9521_v19 = vld [vmem:[#allocation2 + $0x168] sm:$0xff] }
 0x1f1   : > { %v1620_v33 = vsel %vm363_vm0, %v9520_v6, %v7994_v57  ;;  %v1629_v28 = vsel %vm363_vm0, %v9521_v19, %v8018_v49  ;;  %2013 = vmatpush.msrb.mxu1 %v1821_v3  ;;  %v11004_v17 = vpop.permute.xlu2 %8211  ;;  %v1820_v6 = vld [vmem:[%s16170_s2 + $0xd8] sm:$0xff]  ;;  %v7999_v19 = vunpack.i.h.bf16 %v10547_v4  ;;  %v8119_v4 = vunpack.i.h.bf16 %v10863_v51 }
 0x1f2   : > { %v8177_v61 = vpop.permute.xlu1 %8176  ;;  %v1653_v47 = vsel %vm1631_vm6, %v1620_v33, %v8074_v54  ;;  %v1662_v41 = vsel %vm1631_vm6, %v1629_v28, %v8098_v32  ;;  %v9523_v54 = vld [vmem:[#allocation2 + $0x108] sm:$0xff]  ;;  %v7959_v33 = vunpack.i.h.bf16 %v16443_v31  ;;  %v1819_v28 = vld [vmem:[%s16170_s2 + $0xd0] sm:$0xff] }
 0x1f3   : > { %v8178_v36 = vunpack.i.l.bf16 %v8177_v61  ;;  %v1686_v13 = vsel %vm1664_vm7, %v1653_v47, %v8154_v1  ;;  %v8179_v57 = vunpack.i.h.bf16 %v8177_v61  ;;  %v1621_v32 = vsel %vm363_vm0, %v9523_v54, %v7998_v38  ;;  %2014 = vmatpush.msrb.mxu1 %v1820_v6  ;;  %v9525_v31 = vld [vmem:[#allocation2 + $0x50] sm:$0xff] }
 0x1f4   : > { %v1654_v37 = vsel %vm1631_vm6, %v1621_v32, %v8078_v25  ;;  %v1630_v1 = vsel %vm363_vm0, %v9524_v10, %v8019_v52  ;;  %v8079_v47 = vunpack.i.h.bf16 %v10658_v12  ;;  %v1606_v48 = vsel %vm363_vm0, %v9525_v31, %v7959_v33  ;;  %v1817_v25 = vld [vmem:[%s16170_s2 + $0xc0] sm:$0xff]  ;;  %v1816_v33 = vld [vmem:[%s16170_s2 + $0xb8] sm:$0xff]  ;;  %v9529_v31 = vld [vmem:[#allocation2 + $0x68] sm:$0xff] }
 0x1f5   : > { %v1695_v45 = vsel %vm1664_vm7, %v1662_v41, %v8178_v36  ;;  %v1687_v36 = vsel %vm1664_vm7, %v1654_v37, %v8158_v53  ;;  %v1663_v39 = vsel %vm1631_vm6, %v1630_v1, %v8099_v2  ;;  %v16444_v41 = vld [vmem:[#allocation20_spill] sm:$0xff]  ;;  %2015 = vmatpush.msrb.mxu1 %v1819_v28  ;;  %v1622_v12 = vsel %vm363_vm0, %v9526_v55, %v7999_v19  ;;  %v16447_v2 = vld [vmem:[#allocation51_spill] sm:$0xff] }
 0x1f6   : > { %1928 = vmatmul.f32.gmra.mxu0 %v1670_v0  ;;  %1976 = vmatmul.f32.gmra.mxu1 %v1686_v13  ;;  %v1696_v42 = vsel %vm1664_vm7, %v1663_v39, %v8179_v57  ;;  %v16445_v0 = vld [vmem:[#allocation19_spill] sm:$0xff]  ;;  %v1639_v38 = vsel %vm1631_vm6, %v1606_v48, %v8039_v14  ;;  %v1655_v3 = vsel %vm1631_vm6, %v1622_v12, %v8079_v47  ;;  %v8003_v53 = vunpack.i.l.bf16 %v10526_v56  ;;  %v1815_v19 = vld [vmem:[%s16170_s2 + $0xb0] sm:$0xff] }
 0x1f7   : > { %2003 = vmatmul.f32.gmra.mxu3 %v1695_v45  ;;  %8391 = vrot.lane.b32.xlu2 %v10851_v30, %s9643_s12  ;;  %v8118_v30 = vunpack.i.l.bf16 %v10863_v51  ;;  %v16446_v13 = vpack.i.bf16 %v16444_v41, %v16445_v0  ;;  %v8159_v45 = vunpack.i.h.bf16 %v10887_v18  ;;  %v11031_v22 = vpop.permute.xlu0 %8201  ;;  %v1672_v52 = vsel %vm1664_vm7, %v1639_v38, %v8119_v4  ;;  %v9528_v10 = vld [vmem:[#allocation2 + $0x120] sm:$0xff]  ;;  %v9530_v55 = vld [vmem:[#allocation2 + $0x128] sm:$0xff] }
 0x1f8   : > { %8401 = vrot.lane.b32.xlu1 %v16438_v34, %s9643_s12  ;;  %v1638_v34 = vsel %vm1631_vm6, %v1605_v16, %v8038_v23  ;;  %v1818_v23 = vld [vmem:[%s16170_s2 + $0xc8] sm:$0xff]  ;;  %v8043_v57 = vunpack.i.l.bf16 %v10660_v59  ;;  %v8123_v16 = vunpack.i.l.bf16 %v10798_v11  ;;  %v8163_v54 = vunpack.i.l.bf16 %v10938_v21 }
 0x1f9   : > { %v1671_v61 = vsel %vm1664_vm7, %v1638_v34, %v8118_v30  ;;  %v1688_v51 = vsel %vm1664_vm7, %v1655_v3, %v8159_v45  ;;  %v11041_v18 = vpop.permute.xlu2 %8226  ;;  %v7963_v30 = vunpack.i.l.bf16 %v16447_v2  ;;  %2016 = vmatpush.msrb.mxu1 %v1818_v23  ;;  %v9527_v34 = vld [vmem:[#allocation2 + $0x60] sm:$0xff]  ;;  %v1623_v1 = vsel %vm363_vm0, %v9528_v10, %v8003_v53 }
 0x1fa   : > { %v11000_v49 = vpop.permute.xlu1 %8191  ;;  %v1656_v39 = vsel %vm1631_vm6, %v1623_v1, %v8083_v29  ;;  %v7964_v28 = vunpack.i.h.bf16 %v16447_v2  ;;  %v8004_v14 = vunpack.i.h.bf16 %v10526_v56  ;;  %v8044_v47 = vunpack.i.h.bf16 %v10660_v59  ;;  %v1813_v3 = vld [vmem:[%s16170_s2 + $0xa0] sm:$0xff]  ;;  %v9531_v29 = vld [vmem:[#allocation2 + $0x78] sm:$0xff]  ;;  %v1811_v1 = vld [vmem:[%s16170_s2 + $0x90] sm:$0xff] }
 0x1fb   : > { %2017 = vmatpush.msrb.mxu1 %v1817_v25  ;;  %v1607_v37 = vsel %vm363_vm0, %v9527_v34, %v7963_v30  ;;  %v1689_v6 = vsel %vm1664_vm7, %v1656_v39, %v8163_v54  ;;  %v8084_v41 = vunpack.i.h.bf16 %v10709_v20  ;;  %v8164_v4 = vunpack.i.h.bf16 %v10938_v21  ;;  %v1814_v21 = vld [vmem:[%s16170_s2 + $0xa8] sm:$0xff]  ;;  %v9532_v54 = vld [vmem:[#allocation2 + $0x138] sm:$0xff] }
 0x1fc   : > { %v1608_v48 = vsel %vm363_vm0, %v9529_v31, %v7964_v28  ;;  %v1624_v56 = vsel %vm363_vm0, %v9530_v55, %v8004_v14  ;;  %v8048_v23 = vunpack.i.l.bf16 %v10578_v24  ;;  %v8088_v25 = vunpack.i.l.bf16 %v10800_v8 }
 0x1fd   : > { %2018 = vmatpush.msrb.mxu1 %v1816_v33  ;;  %v1641_v12 = vsel %vm1631_vm6, %v1608_v48, %v8044_v47  ;;  %v1657_v59 = vsel %vm1631_vm6, %v1624_v56, %v8084_v41  ;;  %v8128_v2 = vunpack.i.l.bf16 %v10837_v40  ;;  %v8168_v30 = vunpack.i.l.bf16 %v10882_v15  ;;  %v1812_v15 = vld [vmem:[%s16170_s2 + $0x98] sm:$0xff]  ;;  %v9534_v56 = vld [vmem:[#allocation2 + $0x90] sm:$0xff] }
 0x1fe   : > { %1931 = vmatmul.f32.gmra.mxu0 %v1671_v61  ;;  %1979 = vmatmul.f32.gmra.mxu1 %v1687_v36  ;;  %v1640_v36 = vsel %vm1631_vm6, %v1607_v37, %v8043_v57  ;;  %v1690_v38 = vsel %vm1664_vm7, %v1657_v59, %v8164_v4  ;;  %v8049_v39 = vunpack.i.h.bf16 %v10578_v24  ;;  %v1809_v24 = vld [vmem:[%s16170_s2 + $0x80] sm:$0xff]  ;;  %v8053_v4 = vunpack.i.l.bf16 %v10611_v44 }
 0x1ff   : > { %2006 = vmatmul.f32.gmra.mxu3 %v1696_v42  ;;  %8406 = vrot.lane.b32.xlu2 %v16441_v62, %s9643_s12  ;;  %v11059_v61 = vpop.permute.xlu0 %8216  ;;  %v1673_v42 = vsel %vm1664_vm7, %v1640_v36, %v8123_v16  ;;  %v7969_v36 = vunpack.i.h.bf16 %v10518_v63  ;;  %v8133_v31 = vunpack.i.l.bf16 %v10885_v5 }
 0x200   : > { %8416 = vrot.lane.b32.xlu1 %v16446_v13, %s9643_s12  ;;  %v8124_v13 = vunpack.i.h.bf16 %v10798_v11  ;;  %2019 = vmatpush.msrb.mxu1 %v1815_v19  ;;  %v9533_v19 = vld [vmem:[#allocation2 + $0x80] sm:$0xff] }
 0x201   : > { %v11075_v0 = vpop.permute.xlu2 %8241  ;;  %v1610_v28 = vsel %vm363_vm0, %v9533_v19, %v7969_v36  ;;  %v8059_v36 = vunpack.i.h.bf16 %v10707_v27 }
 0x202   : > { %v11033_v62 = vpop.permute.xlu1 %8206  ;;  %v1674_v20 = vsel %vm1664_vm7, %v1641_v12, %v8124_v13  ;;  %2020 = vmatpush.msrb.mxu1 %v1814_v21  ;;  %v1643_v47 = vsel %vm1631_vm6, %v1610_v28, %v8049_v39  ;;  %v8139_v39 = vunpack.i.h.bf16 %v10835_v7  ;;  %v9537_v28 = vld [vmem:[#allocation2 + $0xb0] sm:$0xff] }
 0x204   : > { %2021 = vmatpush.msrb.mxu1 %v1813_v3  ;;  %v8054_v3 = vunpack.i.h.bf16 %v10611_v44  ;;  %v8138_v44 = vunpack.i.l.bf16 %v10835_v7 }
 0x206   : > { %1934 = vmatmul.f32.gmra.mxu0 %v1672_v52  ;;  %1982 = vmatmul.f32.gmra.mxu1 %v1688_v51  ;;  %v7968_v52 = vunpack.i.l.bf16 %v10518_v63  ;;  %v8008_v51 = vunpack.i.l.bf16 %v10539_v50  ;;  %v1810_v63 = vld [vmem:[%s16170_s2 + $0x88] sm:$0xff] }
 0x207   : > { %v11087_v11 = vpop.permute.xlu0 %8231  ;;  %2022 = vmatpush.msrb.mxu1 %v1812_v15 }
 0x208   : > { %v1609_v16 = vsel %vm363_vm0, %v9531_v29, %v7968_v52  ;;  %v1625_v50 = vsel %vm363_vm0, %v9532_v54, %v8008_v51  ;;  %v8134_v52 = vunpack.i.h.bf16 %v10885_v5  ;;  %v8058_v54 = vunpack.i.l.bf16 %v10707_v27 }
 0x209   : > { %v11101_v53 = vpop.permute.xlu2 %8256  ;;  %v1642_v34 = vsel %vm1631_vm6, %v1609_v16, %v8048_v23  ;;  %v1658_v37 = vsel %vm1631_vm6, %v1625_v50, %v8088_v25  ;;  %2023 = vmatpush.msrb.mxu1 %v1811_v1  ;;  %v9535_v23 = vld [vmem:[#allocation2 + $0x98] sm:$0xff]  ;;  %v7978_v16 = vunpack.i.l.bf16 %v10499_v58  ;;  %v7979_v1 = vunpack.i.h.bf16 %v10499_v58 }
 0x20a   : > { %v11055_v32 = vpop.permute.xlu1 %8221  ;;  %v1675_v8 = vsel %vm1664_vm7, %v1642_v34, %v8128_v2  ;;  %v1691_v10 = vsel %vm1664_vm7, %v1658_v37, %v8168_v30  ;;  %v9536_v34 = vld [vmem:[#allocation2 + $0xa8] sm:$0xff]  ;;  %v8183_v58 = vunpack.i.l.bf16 %v10929_v46 }
 0x20b   : > { %2024 = vmatpush.msrb.mxu1 %v1810_v63  ;;  %v1613_v37 = vsel %vm363_vm0, %v9536_v34, %v7978_v16  ;;  %v8184_v34 = vunpack.i.h.bf16 %v10929_v46 }
 0x20d   : > { %2025 = vmatpush.msrb.mxu1 %v1809_v24  ;;  %v16449_v24 = vld [vmem:[#allocation60_spill] sm:$0xff] }
 0x20e   : > { %1937 = vmatmul.f32.gmra.mxu0 %v1673_v42  ;;  %1985 = vmatmul.f32.gmra.mxu1 %v1689_v6  ;;  %v8129_v6 = vunpack.i.h.bf16 %v10837_v40  ;;  %v16448_v40 = vld [vmem:[#allocation50_spill] sm:$0xff] }
 0x20f   : > { %v11119_v42 = vpop.permute.xlu0 %8246  ;;  %v7973_v13 = vunpack.i.l.bf16 %v16448_v40  ;;  %v7974_v21 = vunpack.i.h.bf16 %v16448_v40  ;;  %v7983_v40 = vunpack.i.l.bf16 %v16449_v24 }
 0x210   : > { %v1676_v41 = vsel %vm1664_vm7, %v1643_v47, %v8129_v6  ;;  %v1614_v47 = vsel %vm363_vm0, %v9537_v28, %v7979_v1  ;;  %v9539_v28 = vld [vmem:[#allocation2 + $0xc8] sm:$0xff] }
 0x211   : > { %v11125_v14 = vpop.permute.xlu2 %8271  ;;  %v1611_v12 = vsel %vm363_vm0, %v9534_v56, %v7973_v13  ;;  %v1612_v25 = vsel %vm363_vm0, %v9535_v23, %v7974_v21  ;;  %v16450_v13 = vld [vmem:[#allocation61_spill] sm:$0xff]  ;;  %v9538_v21 = vld [vmem:[#allocation2 + $0xc0] sm:$0xff] }
 0x212   : > { %v11079_v45 = vpop.permute.xlu1 %8236  ;;  %v1644_v59 = vsel %vm1631_vm6, %v1611_v12, %v8053_v4  ;;  %v1645_v30 = vsel %vm1631_vm6, %v1612_v25, %v8054_v3  ;;  %v8063_v27 = vunpack.i.l.bf16 %v16450_v13  ;;  %v1615_v3 = vsel %vm363_vm0, %v9538_v21, %v7983_v40  ;;  %v9540_v21 = vld [vmem:[#allocation2 + $0xd8] sm:$0xff] }
 0x213   : > { %v1678_v29 = vsel %vm1664_vm7, %v1645_v30, %v8134_v52  ;;  %v16452_v52 = vld [vmem:[#allocation29_spill] sm:$0xff] }
 0x214   : > { %v1697_v23 = vsel %vm363_vm0, %v16452_v52, %v8183_v58  ;;  %v1648_v30 = vsel %vm1631_vm6, %v1615_v3, %v8063_v27  ;;  %v8188_v27 = vunpack.i.l.bf16 %v10993_v35  ;;  %v16454_v52 = vld [vmem:[#allocation21_spill] sm:$0xff] }
 0x216   : > { %1940 = vmatmul.f32.gmra.mxu0 %v1674_v20  ;;  %1988 = vmatmul.f32.gmra.mxu1 %v1690_v38  ;;  %v1677_v20 = vsel %vm1664_vm7, %v1644_v59, %v8133_v31  ;;  %v16451_v31 = vld [vmem:[#allocation13_spill] sm:$0xff] }
 0x217   : > { %v11138_v48 = vpop.permute.xlu0 %8261  ;;  %v8143_v56 = vunpack.i.l.bf16 %v16451_v31 }
 0x218   : > { %v8263_v7 = vunpack.i.l.bf16 %v11138_v48 }
 0x219   : > { %v11145_v38 = vpop.permute.xlu2 %8286  ;;  %v1681_v16 = vsel %vm1664_vm7, %v1648_v30, %v8143_v56  ;;  %v8148_v56 = vunpack.i.l.bf16 %v10909_v43  ;;  %v8189_v43 = vunpack.i.h.bf16 %v10993_v35  ;;  %v8273_v35 = vunpack.i.l.bf16 %v11125_v14 }
 0x21a   : > { %v11103_v57 = vpop.permute.xlu1 %8251 }
 0x21e   : > { %1943 = vmatmul.f32.gmra.mxu0 %v1675_v8  ;;  %1991 = vmatmul.f32.gmra.mxu1 %v1691_v10  ;;  %v1646_v8 = vsel %vm1631_vm6, %v1613_v37, %v8058_v54  ;;  %v8064_v37 = vunpack.i.h.bf16 %v16450_v13  ;;  %v7988_v13 = vunpack.i.l.bf16 %v10497_v9 }
 0x21f   : > { %v11153_v2 = vpop.permute.xlu0 %8276  ;;  %v1679_v10 = vsel %vm1664_vm7, %v1646_v8, %v8138_v44  ;;  %v7984_v44 = vunpack.i.h.bf16 %v16449_v24  ;;  %v8264_v8 = vunpack.i.h.bf16 %v11138_v48 }
 0x220   : > { %v1617_v3 = vsel %vm363_vm0, %v9540_v21, %v7988_v13  ;;  %v8194_v13 = vunpack.i.h.bf16 %v11000_v49 }
 0x221   : > { %v11159_v50 = vpop.permute.xlu2 %8301 }
 0x222   : > { %v11122_v33 = vpop.permute.xlu1 %8266 }
 0x226   : > { %1946 = vmatmul.f32.gmra.mxu0 %v1676_v41  ;;  %v1647_v41 = vsel %vm1631_vm6, %v1614_v47, %v8059_v36  ;;  %v1616_v47 = vsel %vm363_vm0, %v9539_v28, %v7984_v44 }
 0x227   : > { %v11167_v15 = vpop.permute.xlu0 %8291  ;;  %v1680_v63 = vsel %vm1664_vm7, %v1647_v41, %v8139_v39  ;;  %v16453_v41 = vld [vmem:[#allocation30_spill] sm:$0xff]  ;;  %v1649_v24 = vsel %vm1631_vm6, %v1616_v47, %v8064_v37  ;;  %v16456_v47 = vld [vmem:[#allocation68_spill] sm:$0xff] }
 0x228   : > { %v16455_v37 = vld [vmem:[#allocation22_spill] sm:$0xff] }
 0x229   : > { %v11172_v6 = vpop.permute.xlu2 %8316 }
 0x22a   : > { %v11140_v55 = vpop.permute.xlu1 %8281 }
 0x22e   : > { %1949 = vmatmul.f32.gmra.mxu0 %v1677_v20 }
 0x22f   : > { %v11183_v4 = vpop.permute.xlu0 %8306 }
 0x231   : > { %v11191_v25 = vpop.permute.xlu2 %8331 }
 0x232   : > { %v11150_v51 = vpop.permute.xlu1 %8296 }
 0x236   : > { %1952 = vmatmul.f32.gmra.mxu0 %v1678_v29  ;;  %v1729_v29 = vsel %vm1631_vm6, %v1697_v23, %v8263_v7  ;;  %v8068_v7 = vunpack.i.l.bf16 %v10662_v60  ;;  %v1699_v23 = vsel %vm363_vm0, %v16454_v52, %v8188_v27  ;;  %v8274_v27 = vunpack.i.h.bf16 %v11125_v14 }
 0x237   : > { %v11202_v36 = vpop.permute.xlu0 %8321 }
 0x238   : > { %v1650_v9 = vsel %vm1631_vm6, %v1617_v3, %v8068_v7 }
 0x239   : > { %v8347_v58 = vpop.permute.xlu2 %8346  ;;  %v1683_v60 = vsel %vm1664_vm7, %v1650_v9, %v8148_v56  ;;  %v16459_v56 = vld [vmem:[#allocation32_spill] sm:$0xff]  ;;  %v8198_v9 = vunpack.i.l.bf16 %v10969_v26 }
 0x23a   : > { %v11162_v5 = vpop.permute.xlu1 %8311  ;;  %v8349_v44 = vunpack.i.h.bf16 %v8347_v58 }
 0x23e   : > { %1955 = vmatmul.f32.gmra.mxu0 %v1679_v10  ;;  %v8144_v10 = vunpack.i.h.bf16 %v16451_v31  ;;  %v8268_v31 = vunpack.i.l.bf16 %v11122_v33 }
 0x23f   : > { %v11223_v30 = vpop.permute.xlu0 %8336 }
 0x240   : > { %v1682_v40 = vsel %vm1664_vm7, %v1649_v24, %v8144_v10  ;;  %v16457_v24 = vld [vmem:[#allocation31_spill] sm:$0xff] }
 0x242   : > { %v11174_v19 = vpop.permute.xlu1 %8326 }
 0x246   : > { %1958 = vmatmul.f32.gmra.mxu0 %v1680_v63  ;;  %v1698_v63 = vsel %vm363_vm0, %v16453_v41, %v8184_v34  ;;  %v8193_v41 = vunpack.i.l.bf16 %v11000_v49  ;;  %v8278_v49 = vunpack.i.l.bf16 %v11153_v2 }
 0x247   : > { %v1730_v46 = vsel %vm1631_vm6, %v1698_v63, %v8264_v8  ;;  %v1700_v8 = vsel %vm363_vm0, %v16455_v37, %v8189_v43  ;;  %v8352_v28 = vpop.permute.xlu0 %8351  ;;  %v16462_v37 = vld [vmem:[#allocation63_spill] sm:$0xff] }
 0x248   : > { %v8354_v7 = vunpack.i.h.bf16 %v8352_v28 }
 0x24a   : > { %v8342_v12 = vpop.permute.xlu1 %8341 }
 0x24b   : > { %v8343_v59 = vunpack.i.l.bf16 %v8342_v12  ;;  %v11186_v20 = vpop.f32.mrf.mxu0  ;;  %v8344_v1 = vunpack.i.h.bf16 %v8342_v12  ;;  %v8348_v12 = vunpack.i.l.bf16 %v8347_v58  ;;  %v16458_v58 = vld [vmem:[#allocation69_spill] sm:$0xff] }
 0x24d   : > { %v1761_v54 = vsel %vm1664_vm7, %v1729_v29, %v8343_v59  ;;  %v1762_v48 = vsel %vm1664_vm7, %v1730_v46, %v8344_v1  ;;  %v1731_v29 = vsel %vm1631_vm6, %v1699_v23, %v8268_v31  ;;  %v1701_v46 = vsel %vm363_vm0, %v16457_v24, %v8193_v41  ;;  %v16460_v23 = vld [vmem:[#allocation62_spill] sm:$0xff]  ;;  %v8362_v24 = vpop.permute.xlu2 %8361 }
 0x24e   : > { %1961 = vmatmul.f32.gmra.mxu0 %v1681_v16  ;;  %2026 = vmatmul.f32.vlgmr.msrb.gmra.mxu1 %v1761_v54  ;;  %v1763_v16 = vsel %vm1664_vm7, %v1731_v29, %v8348_v12  ;;  %v8269_v54 = vunpack.i.h.bf16 %v11122_v33  ;;  %v8353_v33 = vunpack.i.l.bf16 %v8352_v28  ;;  %v1702_v12 = vsel %vm363_vm0, %v16459_v56, %v8194_v13  ;;  %v16465_v13 = vld [vmem:[#allocation24_spill] sm:$0xff] }
 0x24f   : > { %v1734_v21 = vsel %vm1631_vm6, %v1702_v12, %v8274_v27  ;;  %v16466_v12 = vld [vmem:[#allocation73_spill] sm:$0xff] }
 0x250   : > { %v1732_v10 = vsel %vm1631_vm6, %v1700_v8, %v8269_v54  ;;  %v1766_v3 = vsel %vm1664_vm7, %v1734_v21, %v8354_v7  ;;  %v8199_v8 = vunpack.i.h.bf16 %v10969_v26  ;;  %v8204_v21 = vunpack.i.h.bf16 %v11031_v22 }
 0x251   : > { %v1764_v1 = vsel %vm1664_vm7, %v1732_v10, %v8349_v44  ;;  %v8279_v10 = vunpack.i.h.bf16 %v11153_v2  ;;  %v8283_v2 = vunpack.i.l.bf16 %v11140_v55 }
 0x252   : > { %v8357_v52 = vpop.permute.xlu1 %8356 }
 0x253   : > { %v11204_v39 = vpop.f32.mrf.mxu0  ;;  %v8358_v14 = vunpack.i.l.bf16 %v8357_v52 }
 0x256   : > { %1964 = vmatmul.f32.gmra.mxu0 %v1682_v40  ;;  %2029 = vmatmul.f32.gmra.mxu1 %v1762_v48  ;;  %v1733_v40 = vsel %vm1631_vm6, %v1701_v46, %v8273_v35  ;;  %v16464_v46 = vld [vmem:[#allocation72_spill] sm:$0xff] }
 0x257   : > { %v1765_v48 = vsel %vm1664_vm7, %v1733_v40, %v8353_v33  ;;  %v8203_v40 = vunpack.i.l.bf16 %v11031_v22  ;;  %v8208_v22 = vunpack.i.l.bf16 %v11033_v62 }
 0x259   : > { %v1705_v27 = vsel %vm363_vm0, %v16465_v13, %v8203_v40 }
 0x25a   : > { %v1737_v7 = vsel %vm1631_vm6, %v1705_v27, %v8283_v2 }
 0x25b   : > { %v11218_v59 = vpop.f32.mrf.mxu0 }
 0x25e   : > { %1967 = vmatmul.f32.gmra.mxu0 %v1683_v60  ;;  %2032 = vmatmul.f32.gmra.mxu1 %v1763_v16  ;;  %v16461_v60 = vld [vmem:[#allocation35_spill] sm:$0xff] }
 0x25f   : > { %v1703_v16 = vsel %vm363_vm0, %v16461_v60, %v8198_v9 }
 0x260   : > { %v1735_v43 = vsel %vm1631_vm6, %v1703_v16, %v8278_v49  ;;  %v16467_v49 = vld [vmem:[#allocation25_spill] sm:$0xff] }
 0x261   : > { %v1767_v44 = vsel %vm1664_vm7, %v1735_v43, %v8358_v14  ;;  %v1706_v14 = vsel %vm363_vm0, %v16467_v49, %v8204_v21  ;;  %v8367_v43 = vpop.permute.xlu0 %8366  ;;  %v16472_v21 = vld [vmem:[#allocation66_spill] sm:$0xff] }
 0x262   : > { %v8369_v40 = vunpack.i.h.bf16 %v8367_v43  ;;  %v16473_v49 = vld [vmem:[#allocation46_spill] sm:$0xff] }
 0x263   : > { %v11231_v34 = vpop.f32.mrf.mxu0  ;;  %v11266_v54 = vpop.f32.mrf.mxu1 }
 0x266   : > { %2035 = vmatmul.f32.gmra.mxu1 %v1764_v1  ;;  %7775 = vmatmul.msk.f32.vlgmr.msrb.gmra.mxu0 %vm363_vm0, %v16456_v47  ;;  %v8359_v1 = vunpack.i.h.bf16 %v8357_v52  ;;  %v16463_v47 = vld [vmem:[#allocation36_spill] sm:$0xff]  ;;  %v8364_v52 = vunpack.i.h.bf16 %v8362_v24 }
 0x267   : > { %v1704_v41 = vsel %vm363_vm0, %v16463_v47, %v8199_v8 }
 0x268   : > { %v1736_v35 = vsel %vm1631_vm6, %v1704_v41, %v8279_v10 }
 0x269   : > { %v1768_v33 = vsel %vm1664_vm7, %v1736_v35, %v8359_v1  ;;  %v16469_v1 = vld [vmem:[#allocation40_spill] sm:$0xff] }
 0x26a   : > { %v1707_v47 = vsel %vm363_vm0, %v16469_v1, %v8208_v22 }
 0x26b   : > { %v11241_v63 = vpop.f32.mrf.mxu0  ;;  %v11282_v26 = vpop.f32.mrf.mxu1 }
 0x26e   : > { %2038 = vmatmul.f32.gmra.mxu1 %v1765_v48  ;;  %7776 = vmatmul.msk.f32.gmra.mxu0 %vm363_vm0, %v16458_v58  ;;  %v8363_v48 = vunpack.i.l.bf16 %v8362_v24  ;;  %v8209_v24 = vunpack.i.h.bf16 %v11033_v62  ;;  %v8213_v62 = vunpack.i.l.bf16 %v11004_v17 }
 0x270   : > { %v1769_v56 = vsel %vm1664_vm7, %v1737_v7, %v8363_v48  ;;  %v16471_v48 = vld [vmem:[#allocation41_spill] sm:$0xff] }
 0x271   : > { %v1708_v13 = vsel %vm363_vm0, %v16471_v48, %v8209_v24  ;;  %v2384_v24 = vld [vmem:[#allocation2 + $0x1a0] sm:$0xff] }
 0x272   : > { %v11352_v48 = vrot.slane %v2384_v24, 1 }
 0x273   : > { %v11251_v31 = vpop.f32.mrf.mxu0 }
 0x276   : > { %2041 = vmatmul.f32.gmra.mxu1 %v1766_v3  ;;  %7777 = vmatmul.msk.f32.gmra.mxu0 %vm363_vm0, %v16460_v23  ;;  %v8284_v3 = vunpack.i.h.bf16 %v11140_v55  ;;  %v11295_v23 = vpop.f32.mrf.mxu1  ;;  %v8288_v55 = vunpack.i.l.bf16 %v11145_v38 }
 0x278   : > { %v1738_v60 = vsel %vm1631_vm6, %v1706_v14, %v8284_v3  ;;  %v1739_v41 = vsel %vm1631_vm6, %v1707_v47, %v8288_v55  ;;  %v1709_v14 = vsel %vm363_vm0, %v16473_v49, %v8213_v62  ;;  %v8294_v55 = vunpack.i.h.bf16 %v11167_v15  ;;  %v16476_v47 = vld [vmem:[#allocation47_spill] sm:$0xff]  ;;  %v2334_v62 = vld [vmem:[#allocation2 + $0x10] sm:$0x3] }
 0x279   : > { %v1770_v16 = vsel %vm1664_vm7, %v1738_v60, %v8364_v52 }
 0x27b   : > { %v11261_v29 = vpop.f32.mrf.mxu0 }
 0x27e   : > { %2044 = vmatmul.f32.gmra.mxu1 %v1767_v44  ;;  %7778 = vmatmul.msk.f32.gmra.mxu0 %vm363_vm0, %v16462_v37  ;;  %v16468_v44 = vld [vmem:[#allocation7_spill] sm:$0xff]  ;;  %v8368_v37 = vunpack.i.l.bf16 %v8367_v43  ;;  %v11307_v8 = vpop.f32.mrf.mxu1 }
 0x27f   : > { %v16474_v43 = vld [vmem:[#allocation67_spill] sm:$0xff] }
 0x280   : > { %v1771_v35 = vsel %vm1664_vm7, %v1739_v41, %v8368_v37 }
 0x283   : > { %v11273_v28 = vpop.f32.mrf.mxu0 }
 0x286   : > { %2047 = vmatmul.f32.gmra.mxu1 %v1768_v33  ;;  %7779 = vmatmul.msk.f32.gmra.mxu0 %vm363_vm0, %v16464_v46  ;;  %v16470_v33 = vld [vmem:[#allocation23_spill] sm:$0xff]  ;;  %v8289_v46 = vunpack.i.h.bf16 %v11145_v38  ;;  %v11324_v7 = vpop.f32.mrf.mxu1  ;;  %v8293_v38 = vunpack.i.l.bf16 %v11167_v15  ;;  %v8218_v15 = vunpack.i.l.bf16 %v11059_v61 }
 0x288   : > { %v1740_v27 = vsel %vm1631_vm6, %v1708_v13, %v8289_v46  ;;  %v1741_v60 = vsel %vm1631_vm6, %v1709_v14, %v8293_v38  ;;  %v2385_v46 = vld [vmem:[#allocation2 + $0x1a8] sm:$0x3] }
 0x289   : > { %v2528_v13 = vrot.slane %v2385_v46, 1 }
 0x28b   : > { %v11285_v58 = vpop.f32.mrf.mxu0 }
 0x28e   : > { %2050 = vmatmul.f32.gmra.mxu1 %v1769_v56  ;;  %7780 = vmatmul.msk.f32.gmra.mxu0 %vm363_vm0, %v16466_v12  ;;  %v1772_v56 = vsel %vm1664_vm7, %v1740_v27, %v8369_v40  ;;  %v8372_v12 = vpop.permute.xlu1 %8371  ;;  %v11340_v22 = vpop.f32.mrf.mxu1 }
 0x28f   : > { %v8373_v3 = vunpack.i.l.bf16 %v8372_v12  ;;  %16475 = vst [vmem:[#allocation14_spill] sm:$0xff] %v11340_v22  ;;  %v8374_v37 = vunpack.i.h.bf16 %v8372_v12  ;;  %v8377_v27 = vpop.permute.xlu2 %8376  ;;  %v2332_v12 = vld [vmem:[#allocation2] sm:$0xff] }
 0x290   : > { %v2440_v49 = vrot.slane %v2332_v12, 1 }
 0x293   : > { %v11297_v9 = vpop.f32.mrf.mxu0 }
 0x296   : > { %2053 = vmatmul.f32.gmra.mxu1 %v1770_v16  ;;  %7781 = vmatmul.msk.f32.gmra.mxu0 %vm363_vm0, %v16468_v44  ;;  %v1773_v16 = vsel %vm1664_vm7, %v1741_v60, %v8373_v3  ;;  %v8214_v44 = vunpack.i.h.bf16 %v11004_v17  ;;  %v2529_v3 = vsel %vm809_vm5, %v11352_v48, %v2528_v13  ;;  %v8298_v60 = vunpack.i.l.bf16 %v11150_v51  ;;  %v4012_v13 = vld [vmem:[#allocation2 + $0x1a8] sm:$0x3] }
 0x298   : > { %v1710_v41 = vsel %vm363_vm0, %v16476_v47, %v8214_v44  ;;  %v8378_v44 = vunpack.i.l.bf16 %v8377_v27 }
 0x29b   : > { %v11309_v10 = vpop.f32.mrf.mxu0 }
 0x29e   : > { %2056 = vmatmul.f32.gmra.mxu1 %v1771_v35  ;;  %7782 = vmatmul.msk.f32.gmra.mxu0 %vm363_vm0, %v16470_v33  ;;  %v1742_v35 = vsel %vm1631_vm6, %v1710_v41, %v8294_v55  ;;  %v11348_v33 = vld [vmem:[#allocation2 + $0x198] sm:$0xff]  ;;  %v11367_v55 = vpop.f32.mrf.mxu1 }
 0x29f   : > { %v1774_v40 = vsel %vm1664_vm7, %v1742_v35, %v8374_v37  ;;  %v2525_v17 = vrot.slane %v11348_v33, 1  ;;  %16478 = vst [vmem:[#allocation33_spill] sm:$0xff] %v11367_v55  ;;  %v16479_v35 = vld [vmem:[#allocation27_spill] sm:$0xff]  ;;  %v2565_v55 = vrot.slane %v2334_v62, 2 }
 0x2a0   : > { %v1711_v46 = vsel %vm363_vm0, %v16479_v35, %v8218_v15  ;;  %v8219_v15 = vunpack.i.h.bf16 %v11059_v61 }
 0x2a1   : > { %v11359_v38 = vsel %vm809_vm5, %v2525_v17, %v11352_v48  ;;  %v1743_v17 = vsel %vm1631_vm6, %v1711_v46, %v8298_v60  ;;  %v8379_v46 = vunpack.i.h.bf16 %v8377_v27  ;;  %v8382_v27 = vpop.permute.xlu0 %8381 }
 0x2a2   : > { %v8383_v22 = vunpack.i.l.bf16 %v8382_v27 }
 0x2a3   : > { %v11319_v2 = vpop.f32.mrf.mxu0 }
 0x2a6   : > { %2059 = vmatmul.f32.gmra.mxu1 %v1772_v56  ;;  %7783 = vmatmul.msk.f32.gmra.mxu0 %vm363_vm0, %v16472_v21  ;;  %v16477_v56 = vld [vmem:[#allocation5_spill] sm:$0xff]  ;;  %v2333_v21 = vld [vmem:[#allocation2 + $0x8] sm:$0xff]  ;;  %v11400_v61 = vpop.f32.mrf.mxu1 }
 0x2a7   : > { %v11363_v14 = vrot.slane %v2333_v21, 1  ;;  %16481 = vst [vmem:[#allocation34_spill] sm:$0xff] %v11400_v61  ;;  %v2563_v61 = vrot.slane %v2333_v21, 2  ;;  %v8224_v21 = vunpack.i.h.bf16 %v11055_v32 }
 0x2a9   : > { %v11371_v37 = vsel %vm809_vm5, %v2440_v49, %v11363_v14  ;;  %v4155_v49 = vrot.slane %v4012_v13, 1 }
 0x2ab   : > { %v11331_v52 = vpop.f32.mrf.mxu0 }
 0x2ae   : > { %2062 = vmatmul.f32.gmra.mxu1 %v1773_v16  ;;  %7784 = vmatmul.msk.f32.gmra.mxu0 %vm363_vm0, %v16474_v43  ;;  %v8430_v16 = vpack.i.bf16 %v2529_v3, %v11359_v38  ;;  %v2443_v43 = vrot.slane %v2334_v62, 1  ;;  %v1775_v3 = vsel %vm1664_vm7, %v1743_v17, %v8378_v44  ;;  %v8299_v44 = vunpack.i.h.bf16 %v11150_v51 }
 0x2af   : > { %v8304_v62 = vunpack.i.h.bf16 %v11159_v50 }
 0x2b0   : > { %8431 = vrot.lane.b32.xlu2 %v8430_v16, %s9641_s22  ;;  %v2444_v47 = vsel %vm809_vm5, %v11363_v14, %v2443_v43  ;;  %v16480_v16 = vld [vmem:[#allocation6_spill] sm:$0xff]  ;;  %v11387_v43 = vld [vmem:[#allocation2 + $0x10] sm:$0x3] }
 0x2b1   : > { %v4070_v60 = vrot.slane %v11387_v43, 1 }
 0x2b3   : > { %v11343_v1 = vpop.f32.mrf.mxu0 }
 0x2b6   : > { %2065 = vmatmul.f32.gmra.mxu1 %v1774_v40  ;;  %7785 = vmatmul.msk.f32.gmra.mxu0 %vm363_vm0, %v16477_v56  ;;  %v8425_v40 = vpack.i.bf16 %v2444_v47, %v11371_v37  ;;  %v8420_v56 = vpack.i.bf16 %v2384_v24, %v11348_v33  ;;  %v4156_v47 = vsel %vm809_vm5, %v11352_v48, %v4155_v49 }
 0x2b7   : > { %v8450_v35 = vpack.i.bf16 %v4156_v47, %v11359_v38  ;;  %v16483_v47 = vld [vmem:[#allocation39_spill] sm:$0xff] }
 0x2b8   : > { %8426 = vrot.lane.b32.xlu1 %v8425_v40, %s9643_s12  ;;  %8421 = vrot.lane.b32.xlu0 %v8420_v56, %s9642_s11  ;;  %v4071_v40 = vsel %vm809_vm5, %v11363_v14, %v4070_v60  ;;  %v8223_v60 = vunpack.i.l.bf16 %v11055_v32 }
 0x2b9   : > { %8451 = vrot.lane.b32.xlu2 %v8450_v35, %s9641_s22  ;;  %v8445_v17 = vpack.i.bf16 %v4071_v40, %v11371_v37  ;;  %v8303_v35 = vunpack.i.l.bf16 %v11159_v50  ;;  %v2562_v40 = vrot.slane %v2332_v12, 2  ;;  %v8387_v50 = vpop.permute.xlu1 %8386 }
 0x2bb   : > { %v11376_v41 = vpop.f32.mrf.mxu0 }
 0x2be   : > { %2068 = vmatmul.f32.gmra.mxu1 %v1775_v3  ;;  %7786 = vmatmul.msk.f32.gmra.mxu0 %vm363_vm0, %v16480_v16  ;;  %v16482_v3 = vld [vmem:[#allocation28_spill] sm:$0xff] }
 0x2bf   : > { %v1712_v49 = vsel %vm363_vm0, %v16482_v3, %v8219_v15  ;;  %v2564_v15 = vsel %vm932_vm4, %v2562_v40, %v2563_v61  ;;  %v16484_v3 = vld [vmem:[#allocation48_spill] sm:$0xff] }
 0x2c0   : > { %v1744_v16 = vsel %vm1631_vm6, %v1712_v49, %v8299_v44  ;;  %8446 = vrot.lane.b32.xlu1 %v8445_v17, %s9643_s12  ;;  %v2566_v44 = vsel %vm932_vm4, %v2563_v61, %v2565_v55  ;;  %v1713_v49 = vsel %vm363_vm0, %v16484_v3, %v8223_v60  ;;  %v8384_v55 = vunpack.i.h.bf16 %v8382_v27 }
 0x2c1   : > { %v1776_v51 = vsel %vm1664_vm7, %v1744_v16, %v8379_v46  ;;  %6096 = vrot.lane.b32.xlu2 %v2384_v24, %s9642_s11  ;;  %v8435_v16 = vpack.i.bf16 %v2566_v44, %v2564_v15  ;;  %v16485_v24 = vld [vmem:[#allocation9_spill] sm:$0xff]  ;;  %v8228_v27 = vunpack.i.l.bf16 %v11041_v18 }
 0x2c3   : > { %v11402_v13 = vpop.f32.mrf.mxu0  ;;  %8436 = vrot.lane.b32.xlu0 %v8435_v16, %s9642_s11  ;;  %v4192_v16 = vrot.slane %v11387_v43, 2 }
 0x2c6   : > { %2071 = vmatmul.f32.gmra.mxu1 %v1776_v51  ;;  %7787 = vmatmul.msk.f32.gmra.mxu0 %vm363_vm0, %v16483_v47  ;;  %v1745_v51 = vsel %vm1631_vm6, %v1713_v49, %v8303_v35  ;;  %v5588_v47 = vld [vmem:[#allocation2 + $0x10] sm:$0x3]  ;;  %v8308_v49 = vunpack.i.l.bf16 %v11183_v4 }
 0x2c7   : > { %v1777_v12 = vsel %vm1664_vm7, %v1745_v51, %v8383_v22  ;;  %v16486_v35 = vld [vmem:[#allocation49_spill] sm:$0xff]  ;;  %v8388_v51 = vunpack.i.l.bf16 %v8387_v50 }
 0x2c8   : > { %6094 = vrot.lane.b32.xlu1 %v11348_v33, %s9642_s11  ;;  %v1714_v40 = vsel %vm363_vm0, %v16486_v35, %v8224_v21  ;;  %v5697_v33 = vrot.slane %v5588_v47, 1  ;;  %v16488_v21 = vld [vmem:[#allocation52_spill] sm:$0xff]  ;;  %v11454_v35 = vld [vmem:[%s16171_s3] ss:$0 sm:$0xff] }
 0x2c9   : > { %6286 = vrot.lane.b32.xlu2 %v11359_v38, %s9641_s22  ;;  %v1746_v44 = vsel %vm1631_vm6, %v1714_v40, %v8304_v62  ;;  %v16487_v38 = vld [vmem:[#allocation70_spill] sm:$0xff]  ;;  %v1715_v62 = vsel %vm363_vm0, %v16488_v21, %v8228_v27 }
 0x2ca   : > { %v1778_v3 = vsel %vm1664_vm7, %v1746_v44, %v8384_v55  ;;  %v5698_v32 = vsel %vm809_vm5, %v11363_v14, %v5697_v33  ;;  %v1747_v40 = vsel %vm1631_vm6, %v1715_v62, %v8308_v49  ;;  %v16489_v33 = vld [vmem:[#allocation71_spill] sm:$0xff]  ;;  %v8229_v44 = vunpack.i.h.bf16 %v11041_v18  ;;  %v8392_v18 = vpop.permute.xlu2 %8391 }
 0x2cb   : > { %v11416_v46 = vpop.f32.mrf.mxu0  ;;  %v2027_v17 = vpop.f32.mrf.mxu1  ;;  %8441 = vrot.lane.b32.xlu0 %v8420_v56, %s9642_s11  ;;  %v4193_v56 = vsel %vm932_vm4, %v2563_v61, %v4192_v16  ;;  %v16490_v16 = vld [vmem:[#allocation53_spill] sm:$0xff] }
 0x2cc   : > { %v8455_v55 = vpack.i.bf16 %v4193_v56, %v2564_v15 }
 0x2ce   : > { %2074 = vmatmul.f32.gmra.mxu1 %v1777_v12  ;;  %7788 = vmatmul.msk.f32.gmra.mxu0 %vm363_vm0, %v16485_v24  ;;  %v5819_v12 = vrot.slane %v5588_v47, 2  ;;  %v1779_v47 = vsel %vm1664_vm7, %v1747_v40, %v8388_v51  ;;  %v1716_v51 = vsel %vm363_vm0, %v16490_v16, %v8229_v44  ;;  %v5639_v40 = vld [vmem:[#allocation2 + $0x1a8] sm:$0x3] }
 0x2d0   : > { %6132 = vrot.lane.b32.xlu1 %v5698_v32, %s9643_s12  ;;  %v5820_v43 = vsel %vm932_vm4, %v2563_v61, %v5819_v12  ;;  %v1915_v32 = vadd.f32 %v11454_v35, %v11186_v20  ;;  %v8389_v61 = vunpack.i.h.bf16 %v8387_v50  ;;  %v8233_v20 = vunpack.i.l.bf16 %v11087_v11 }
 0x2d1   : > { %6324 = vrot.lane.b32.xlu2 %v5820_v43, %s9642_s11  ;;  %v1918_v50 = vadd.f32 %v11454_v35, %v11204_v39 }
 0x2d3   : > { %v11431_v60 = vpop.f32.mrf.mxu0  ;;  %v2030_v22 = vpop.f32.mrf.mxu1  ;;  %8456 = vrot.lane.b32.xlu0 %v8455_v55, %s9642_s11  ;;  %v8393_v55 = vunpack.i.l.bf16 %v8392_v18 }
 0x2d4   : > { %v2031_v43 = vadd.f32 %v2030_v22, %v1918_v50 }
 0x2d6   : > { %2077 = vmatmul.f32.gmra.mxu1 %v1778_v3  ;;  %7789 = vmatmul.msk.f32.gmra.mxu0 %vm363_vm0, %v16487_v38  ;;  %v8309_v3 = vunpack.i.h.bf16 %v11183_v4  ;;  %v2028_v38 = vadd.f32 %v2027_v17, %v1915_v32  ;;  %v8313_v17 = vunpack.i.l.bf16 %v11162_v5  ;;  %v16492_v32 = vld [vmem:[#allocation37_spill] sm:$0xff] }
 0x2d7   : > { %v1717_v39 = vsel %vm363_vm0, %v16492_v32, %v8233_v20  ;;  %v3453_v20 = vld [vmem:[%s16172_s4 + $0x108] sm:$0xff] }
 0x2d8   : > { %6322 = vrot.lane.b32.xlu1 %v2564_v15, %s9642_s11  ;;  %v1748_v56 = vsel %vm1631_vm6, %v1716_v51, %v8309_v3  ;;  %v16491_v15 = vld [vmem:[#allocation12_spill] sm:$0xff]  ;;  %v1749_v22 = vsel %vm1631_vm6, %v1717_v39, %v8313_v17  ;;  %v16493_v51 = vld [vmem:[#allocation10_spill] sm:$0xff] }
 0x2d9   : > { %v1780_v21 = vsel %vm1664_vm7, %v1748_v56, %v8389_v61  ;;  %v8314_v56 = vunpack.i.h.bf16 %v11162_v5  ;;  %v3452_v17 = vld [vmem:[%s16172_s4 + $0x100] sm:$0xff] }
 0x2da   : > { %v16494_v5 = vld [vmem:[#allocation38_spill] sm:$0xff] }
 0x2db   : > { %v11447_v24 = vpop.f32.mrf.mxu0  ;;  %v2033_v14 = vpop.f32.mrf.mxu1  ;;  %6130 = vrot.lane.b32.xlu0 %v11371_v37, %s9643_s12  ;;  %v5782_v37 = vrot.slane %v5639_v40, 1 }
 0x2de   : > { %2080 = vmatmul.f32.gmra.mxu1 %v1779_v47  ;;  %7790 = vmatmul.msk.f32.gmra.mxu0 %vm363_vm0, %v16489_v33  ;;  %v3455_v47 = vld [vmem:[%s16172_s4 + $0x118] sm:$0xff]  ;;  %v3454_v33 = vld [vmem:[%s16172_s4 + $0x110] sm:$0xff] }
 0x2df   : > { %3762 = vmatpush.msra.mxu0 %v3455_v47  ;;  %v1924_v47 = vadd.f32 %v11454_v35, %v11231_v34 }
 0x2e1   : > { %3763 = vmatpush.msra.mxu0 %v3454_v33 }
 0x2e3   : > { %v2036_v27 = vpop.f32.mrf.mxu1  ;;  %v2140_v49 = vpop.f32.mrf.mxu0  ;;  %3764 = vmatpush.msra.mxu0 %v3453_v20 }
 0x2e4   : > { %v2141_v12 = vadd.f32 %v2140_v49, %v2028_v38  ;;  %v5783_v38 = vsel %vm809_vm5, %v11352_v48, %v5782_v37  ;;  %v1781_v49 = vsel %vm1664_vm7, %v1749_v22, %v8393_v55  ;;  %v8397_v55 = vpop.permute.xlu0 %8396  ;;  %v8238_v37 = vunpack.i.l.bf16 %v11079_v45 }
 0x2e5   : > { %6288 = vrot.lane.b32.xlu0 %v5783_v38, %s9641_s22  ;;  %3765 = vmatpush.msra.mxu0 %v3452_v17  ;;  %v8398_v39 = vunpack.i.l.bf16 %v8397_v55 }
 0x2e6   : > { %v2236_v4 = vmul.f32 0.2, %v2141_v12  ;;  %2083 = vmatmul.f32.gmra.mxu1 %v1780_v21  ;;  %7791 = vmatmul.msk.f32.gmra.mxu0 %vm363_vm0, %v16491_v15  ;;  %v1921_v21 = vadd.f32 %v11454_v35, %v11218_v59  ;;  %v8394_v15 = vunpack.i.h.bf16 %v8392_v18 }
 0x2e8   : > { %v2268_v62 = vmax.f32 %v2141_v12, %v2236_v4  ;;  %v8234_v12 = vunpack.i.h.bf16 %v11087_v11  ;;  %v2034_v48 = vadd.f32 %v2033_v14, %v1921_v21 }
 0x2ea   : > { %2300 = vst.msk [vmem:[#allocation2 + $0x19] sm:$0xff] %vm363_vm0, %v2268_v62  ;;  %v1718_v62 = vsel %vm363_vm0, %v16494_v5, %v8234_v12 }
 0x2eb   : > { %v11487_v44 = vpop.f32.mrf.mxu1  ;;  %v2143_v3 = vpop.f32.mrf.mxu0  ;;  %v1750_v14 = vsel %vm1631_vm6, %v1718_v62, %v8314_v56 }
 0x2ec   : > { %v2144_v61 = vadd.f32 %v2143_v3, %v2031_v43  ;;  %v1782_v18 = vsel %vm1664_vm7, %v1750_v14, %v8394_v15  ;;  %v16495_v43 = vld [vmem:[#allocation11_spill] sm:$0xff]  ;;  %v8318_v3 = vunpack.i.l.bf16 %v11172_v6 }
 0x2ee   : > { %v2237_v16 = vmul.f32 0.2, %v2144_v61  ;;  %2086 = vmatmul.f32.gmra.mxu1 %v1781_v49  ;;  %7792 = vmatmul.msk.f32.gmra.mxu0 %vm363_vm0, %v16493_v51 }
 0x2f0   : > { %v2269_v4 = vmax.f32 %v2144_v61, %v2237_v16  ;;  %v2037_v61 = vadd.f32 %v2036_v27, %v1924_v47  ;;  %v8319_v47 = vunpack.i.h.bf16 %v11172_v6 }
 0x2f1   : > { %v2335_v33 = vld [vmem:[#allocation2 + $0x18] sm:$0xff] }
 0x2f2   : > { %2301 = vst.msk [vmem:[#allocation2 + $0x21] sm:$0xff] %vm363_vm0, %v2269_v4  ;;  %v2567_v16 = vrot.slane %v2335_v33, 2  ;;  %v16496_v4 = vld [vmem:[#allocation54_spill] sm:$0xff] }
 0x2f3   : > { %v11509_v50 = vpop.f32.mrf.mxu1  ;;  %v2146_v11 = vpop.f32.mrf.mxu0  ;;  %v1719_v34 = vsel %vm363_vm0, %v16496_v4, %v8238_v37  ;;  %v1930_v4 = vadd.f32 %v11454_v35, %v11251_v31 }
 0x2f4   : > { %v2147_v59 = vadd.f32 %v2146_v11, %v2034_v48  ;;  %v1751_v27 = vsel %vm1631_vm6, %v1719_v34, %v8318_v3  ;;  %v8323_v34 = vunpack.i.l.bf16 %v11202_v36 }
 0x2f5   : > { %v1783_v5 = vsel %vm1664_vm7, %v1751_v27, %v8398_v39 }
 0x2f6   : > { %v2238_v40 = vmul.f32 0.2, %v2147_v59  ;;  %2089 = vmatmul.f32.gmra.mxu1 %v1782_v18  ;;  %7793 = vmatmul.msk.f32.gmra.mxu0 %vm363_vm0, %v16495_v43  ;;  %v16497_v18 = vld [vmem:[#allocation26_spill] sm:$0xff] }
 0x2f8   : > { %v2270_v32 = vmax.f32 %v2147_v59, %v2238_v40  ;;  %v2445_v59 = vrot.slane %v2335_v33, 1  ;;  %v8239_v40 = vunpack.i.h.bf16 %v11079_v45 }
 0x2f9   : > { %v2336_v22 = vld [vmem:[#allocation2 + $0x20] sm:$0xff]  ;;  %v2337_v38 = vld [vmem:[#allocation2 + $0x28] sm:$0x3] }
 0x2fa   : > { %2302 = vst.msk [vmem:[#allocation2 + $0x31] sm:$0xff] %vm363_vm0, %v2270_v32  ;;  %v8460_v49 = vpack.i.bf16 %v2336_v22, %v2335_v33  ;;  %v2568_v51 = vrot.slane %v2336_v22, 2  ;;  %v2570_v12 = vrot.slane %v2337_v38, 2  ;;  %v2446_v15 = vrot.slane %v2336_v22, 1 }
 0x2fb   : > { %v11522_v56 = vpop.f32.mrf.mxu1  ;;  %v2149_v21 = vpop.f32.mrf.mxu0  ;;  %v2448_v48 = vrot.slane %v2337_v38, 1  ;;  %v1927_v33 = vadd.f32 %v11454_v35, %v11241_v63  ;;  %v8399_v32 = vunpack.i.h.bf16 %v8397_v55  ;;  %v16498_v38 = vld [vmem:[#allocation55_spill] sm:$0xff] }
 0x2fc   : > { %v2150_v20 = vadd.f32 %v2149_v21, %v2037_v61  ;;  %8461 = vrot.lane.b32.xlu2 %v8460_v49, %s9641_s22  ;;  %v2569_v17 = vsel %vm932_vm4, %v2567_v16, %v2568_v51  ;;  %v2571_v11 = vsel %vm932_vm4, %v2568_v51, %v2570_v12  ;;  %v11536_v43 = vsel %vm809_vm5, %v2445_v59, %v2446_v15  ;;  %v8402_v55 = vpop.permute.xlu1 %8401  ;;  %v16499_v51 = vld [vmem:[#allocation8_spill] sm:$0xff] }
 0x2fd   : > { %v8470_v62 = vpack.i.bf16 %v2571_v11, %v2569_v17  ;;  %v11539_v37 = vsel %vm809_vm5, %v2446_v15, %v2448_v48  ;;  %v2040_v39 = vadd.f32 %v11487_v44, %v1927_v33  ;;  %v1720_v49 = vsel %vm363_vm0, %v16498_v38, %v8239_v40 }
 0x2fe   : > { %v2239_v14 = vmul.f32 0.2, %v2150_v20  ;;  %2092 = vmatmul.f32.gmra.mxu1 %v1783_v5  ;;  %7794 = vmatmul.msk.f32.gmra.mxu0 %vm363_vm0, %v16497_v18  ;;  %v8465_v45 = vpack.i.bf16 %v11539_v37, %v11536_v43  ;;  %v1752_v6 = vsel %vm1631_vm6, %v1720_v49, %v8319_v47  ;;  %v8243_v21 = vunpack.i.l.bf16 %v11075_v0 }
 0x2ff   : > { %8471 = vrot.lane.b32.xlu1 %v8470_v62, %s9642_s11  ;;  %v1784_v63 = vsel %vm1664_vm7, %v1752_v6, %v8399_v32  ;;  %v8403_v48 = vunpack.i.l.bf16 %v8402_v55 }
 0x300   : > { %v2271_v3 = vmax.f32 %v2150_v20, %v2239_v14  ;;  %v2043_v20 = vadd.f32 %v11509_v50, %v1930_v4 }
 0x301   : > { %v2338_v12 = vld [vmem:[#allocation2 + $0x30] sm:$0xff] }
 0x302   : > { %2303 = vst.msk [vmem:[#allocation2 + $0x39] sm:$0xff] %vm363_vm0, %v2271_v3  ;;  %v2572_v17 = vrot.slane %v2338_v12, 2  ;;  %v2450_v5 = vrot.slane %v2338_v12, 1 }
 0x303   : > { %v11548_v61 = vpop.f32.mrf.mxu1  ;;  %v2152_v22 = vpop.f32.mrf.mxu0 }
 0x304   : > { %v2153_v16 = vadd.f32 %v2152_v22, %v2040_v39  ;;  %8466 = vrot.lane.b32.xlu2 %v8465_v45, %s9643_s12 }
 0x306   : > { %v2240_v44 = vmul.f32 0.2, %v2153_v16  ;;  %2095 = vmatmul.f32.gmra.mxu1 %v1784_v63  ;;  %7795 = vmatmul.msk.f32.gmra.mxu0 %vm363_vm0, %v16499_v51  ;;  %v8324_v63 = vunpack.i.h.bf16 %v11202_v36 }
 0x307   : > { %8476 = vrot.lane.b32.xlu1 %v8470_v62, %s9643_s12  ;;  %v16500_v62 = vld [vmem:[#allocation56_spill] sm:$0xff] }
 0x308   : > { %v2272_v15 = vmax.f32 %v2153_v16, %v2240_v44  ;;  %v1721_v33 = vsel %vm363_vm0, %v16500_v62, %v8243_v21  ;;  %v8244_v16 = vunpack.i.h.bf16 %v11075_v0  ;;  %v1933_v44 = vadd.f32 %v11454_v35, %v11261_v29  ;;  %v16502_v62 = vld [vmem:[#allocation44_spill] sm:$0xff] }
 0x309   : > { %v2339_v27 = vld [vmem:[#allocation2 + $0x38] sm:$0xff]  ;;  %v2340_v11 = vld [vmem:[#allocation2 + $0x40] sm:$0x3]  ;;  %v1753_v50 = vsel %vm1631_vm6, %v1721_v33, %v8323_v34 }
 0x30a   : > { %2304 = vst.msk [vmem:[#allocation2 + $0x49] sm:$0xff] %vm363_vm0, %v2272_v15  ;;  %v8480_v59 = vpack.i.bf16 %v2339_v27, %v2338_v12  ;;  %v2573_v14 = vrot.slane %v2339_v27, 2  ;;  %v2451_v18 = vrot.slane %v2339_v27, 1  ;;  %v2453_v40 = vrot.slane %v2340_v11, 1  ;;  %v16501_v15 = vld [vmem:[#allocation57_spill] sm:$0xff] }
 0x30b   : > { %v11564_v47 = vpop.f32.mrf.mxu1  ;;  %v2155_v31 = vpop.f32.mrf.mxu0  ;;  %v1785_v45 = vsel %vm1664_vm7, %v1753_v50, %v8403_v48  ;;  %v2575_v6 = vrot.slane %v2340_v11, 2  ;;  %v8404_v12 = vunpack.i.h.bf16 %v8402_v55  ;;  %v2046_v21 = vadd.f32 %v11522_v56, %v1933_v44 }
 0x30c   : > { %v2156_v3 = vadd.f32 %v2155_v31, %v2043_v20  ;;  %8481 = vrot.lane.b32.xlu0 %v8480_v59, %s9641_s22  ;;  %v2574_v32 = vsel %vm932_vm4, %v2572_v17, %v2573_v14  ;;  %v11572_v39 = vsel %vm809_vm5, %v2450_v5, %v2451_v18  ;;  %v11576_v22 = vsel %vm809_vm5, %v2451_v18, %v2453_v40  ;;  %v8407_v56 = vpop.permute.xlu2 %8406 }
 0x30d   : > { %v8495_v49 = vpack.i.bf16 %v11576_v22, %v11572_v39  ;;  %v1722_v0 = vsel %vm363_vm0, %v16501_v15, %v8244_v16  ;;  %v2576_v48 = vsel %vm932_vm4, %v2573_v14, %v2575_v6  ;;  %v8248_v20 = vunpack.i.l.bf16 %v11119_v42 }
 0x30e   : > { %v2241_v38 = vmul.f32 0.2, %v2156_v3  ;;  %2098 = vmatmul.f32.gmra.mxu1 %v1785_v45  ;;  %7807 = vmatmul.msk.f32.vlgmr.msra.gmra.mxu0 %vm363_vm0, %v2574_v32  ;;  %v1754_v29 = vsel %vm1631_vm6, %v1722_v0, %v8324_v63  ;;  %v8500_v17 = vpack.i.bf16 %v2576_v48, %v2574_v32  ;;  %v1936_v11 = vadd.f32 %v11454_v35, %v11273_v28  ;;  %v9541_v63 = vld [vmem:[#allocation2 + $0x198] sm:$0xff] }
 0x30f   : > { %8496 = vrot.lane.b32.xlu2 %v8495_v49, %s9641_s22  ;;  %v1786_v55 = vsel %vm1664_vm7, %v1754_v29, %v8404_v12  ;;  %v8328_v14 = vunpack.i.l.bf16 %v11174_v19  ;;  %v1723_v33 = vsel %vm363_vm0, %v16502_v62, %v8248_v20  ;;  %v1018_v44 = vrot.slane %v9541_v63, 2 }
 0x310   : > { %v2273_v51 = vmax.f32 %v2156_v3, %v2241_v38  ;;  %v2049_v40 = vadd.f32 %v11548_v61, %v1936_v11  ;;  %v8333_v63 = vunpack.i.l.bf16 %v11191_v25 }
 0x311   : > { %v2341_v5 = vld [vmem:[#allocation2 + $0x48] sm:$0xff] }
 0x312   : > { %2305 = vst.msk [vmem:[#allocation2 + $0x51] sm:$0xff] %vm363_vm0, %v2273_v51  ;;  %v2577_v32 = vrot.slane %v2341_v5, 2  ;;  %v9542_v51 = vld [vmem:[#allocation2 + $0x1a0] sm:$0xff]  ;;  %v2455_v0 = vrot.slane %v2341_v5, 1 }
 0x313   : > { %v11588_v4 = vpop.f32.mrf.mxu1  ;;  %v2158_v34 = vpop.f32.mrf.mxu0  ;;  %v1019_v12 = vrot.slane %v9542_v51, 2 }
 0x314   : > { %v2159_v36 = vadd.f32 %v2158_v34, %v2046_v21  ;;  %8486 = vrot.lane.b32.xlu0 %v8480_v59, %s9642_s11  ;;  %v8408_v59 = vunpack.i.l.bf16 %v8407_v56  ;;  %v1755_v21 = vsel %vm1631_vm6, %v1723_v33, %v8328_v14 }
 0x316   : > { %v2242_v27 = vmul.f32 0.2, %v2159_v36  ;;  %2101 = vmatmul.f32.gmra.mxu1 %v1786_v55  ;;  %7808 = vmatmul.msk.f32.gmra.mxu0 %vm363_vm0, %v2576_v48  ;;  %v1787_v15 = vsel %vm1664_vm7, %v1755_v21, %v8408_v59  ;;  %v8329_v55 = vunpack.i.h.bf16 %v11174_v19  ;;  %v9543_v59 = vld [vmem:[#allocation2 + $0x1a8] sm:$0x3] }
 0x317   : > { %8501 = vrot.lane.b32.xlu2 %v8500_v17, %s9642_s11 }
 0x318   : > { %v2274_v18 = vmax.f32 %v2159_v36, %v2242_v27  ;;  %v8249_v36 = vunpack.i.h.bf16 %v11119_v42  ;;  %v1939_v27 = vadd.f32 %v11454_v35, %v11285_v58  ;;  %v16503_v58 = vld [vmem:[#allocation45_spill] sm:$0xff] }
 0x319   : > { %v2342_v31 = vld [vmem:[#allocation2 + $0x50] sm:$0xff]  ;;  %v2343_v3 = vld [vmem:[#allocation2 + $0x58] sm:$0x3] }
 0x31a   : > { %2306 = vst.msk [vmem:[#allocation2 + $0x61] sm:$0xff] %vm363_vm0, %v2274_v18  ;;  %v8510_v50 = vpack.i.bf16 %v2342_v31, %v2341_v5  ;;  %v2578_v45 = vrot.slane %v2342_v31, 2  ;;  %v2456_v16 = vrot.slane %v2342_v31, 1  ;;  %v2458_v6 = vrot.slane %v2343_v3, 1 }
 0x31b   : > { %v11606_v28 = vpop.f32.mrf.mxu1  ;;  %v2161_v38 = vpop.f32.mrf.mxu0  ;;  %v8409_v5 = vunpack.i.h.bf16 %v8407_v56  ;;  %v2580_v42 = vrot.slane %v2343_v3, 2  ;;  %v2052_v14 = vadd.f32 %v11564_v47, %v1939_v27  ;;  %v1724_v62 = vsel %vm363_vm0, %v16503_v58, %v8249_v36 }
 0x31c   : > { %v2162_v61 = vadd.f32 %v2161_v38, %v2049_v40  ;;  %8511 = vrot.lane.b32.xlu1 %v8510_v50, %s9641_s22  ;;  %8491 = vrot.lane.b32.xlu0 %v8495_v49, %s9643_s12  ;;  %v2579_v34 = vsel %vm932_vm4, %v2577_v32, %v2578_v45  ;;  %v11616_v29 = vsel %vm809_vm5, %v2455_v0, %v2456_v16  ;;  %v1021_v40 = vrot.slane %v9543_v59, 2  ;;  %v8412_v32 = vpop.permute.xlu0 %8411 }
 0x31d   : > { %v11619_v20 = vsel %vm809_vm5, %v2456_v16, %v2458_v6  ;;  %v1020_v49 = vsel %vm932_vm4, %v1018_v44, %v1019_v12  ;;  %v1756_v47 = vsel %vm1631_vm6, %v1724_v62, %v8329_v55  ;;  %v2581_v33 = vsel %vm932_vm4, %v2578_v45, %v2580_v42  ;;  %v16505_v55 = vld [vmem:[#allocation58_spill] sm:$0xff] }
 0x31e   : > { %v2243_v48 = vmul.f32 0.2, %v2162_v61  ;;  %2104 = vmatmul.f32.gmra.mxu1 %v1787_v15  ;;  %7809 = vmatmul.msk.f32.gmra.mxu0 %vm363_vm0, %v2579_v34  ;;  %v8525_v18 = vpack.i.bf16 %v11619_v20, %v11616_v29  ;;  %v1788_v56 = vsel %vm1664_vm7, %v1756_v47, %v8409_v5  ;;  %v1022_v3 = vsel %vm932_vm4, %v1019_v12, %v1021_v40  ;;  %v11649_v15 = vpop.permute.xlu2 %8431 }
 0x31f   : > { %8506 = vrot.lane.b32.xlu2 %v8500_v17, %s9643_s12  ;;  %7805 = vmatmul.msk.f32.gmra.mxu2 %vm363_vm0, %v1020_v49  ;;  %v8253_v16 = vunpack.i.l.bf16 %v11103_v57  ;;  %v8413_v51 = vunpack.i.l.bf16 %v8412_v32  ;;  %16504 = vst [vmem:[#allocation18_spill] sm:$0xff] %v11649_v15  ;;  %v8530_v36 = vpack.i.bf16 %v2581_v33, %v2579_v34  ;;  %v8334_v62 = vunpack.i.h.bf16 %v11191_v25 }
 0x320   : > { %v2275_v11 = vmax.f32 %v2162_v61, %v2243_v48 }
 0x321   : > { %v2344_v6 = vld [vmem:[#allocation2 + $0x60] sm:$0xff]  ;;  %v1725_v27 = vsel %vm363_vm0, %v16505_v55, %v8253_v16 }
 0x322   : > { %2307 = vst.msk [vmem:[#allocation2 + $0x69] sm:$0xff] %vm363_vm0, %v2275_v11  ;;  %v2582_v0 = vrot.slane %v2344_v6, 2  ;;  %v2460_v59 = vrot.slane %v2344_v6, 1 }
 0x323   : > { %v11631_v19 = vpop.f32.mrf.mxu1  ;;  %v2164_v31 = vpop.f32.mrf.mxu0 }
 0x324   : > { %v2165_v17 = vadd.f32 %v2164_v31, %v2052_v14  ;;  %8516 = vrot.lane.b32.xlu1 %v8510_v50, %s9642_s11  ;;  %8526 = vrot.lane.b32.xlu0 %v8525_v18, %s9641_s22  ;;  %v1942_v50 = vadd.f32 %v11454_v35, %v11297_v9  ;;  %v8254_v31 = vunpack.i.h.bf16 %v11103_v57 }
 0x326   : > { %v2244_v38 = vmul.f32 0.2, %v2165_v17  ;;  %2107 = vmatmul.f32.gmra.mxu1 %v1788_v56  ;;  %7810 = vmatmul.msk.f32.gmra.mxu0 %vm363_vm0, %v2581_v33  ;;  %v2055_v45 = vadd.f32 %v11588_v4, %v1942_v50  ;;  %v1757_v4 = vsel %vm1631_vm6, %v1725_v27, %v8333_v63  ;;  %v8414_v56 = vunpack.i.h.bf16 %v8412_v32  ;;  %v16506_v50 = vld [vmem:[#allocation59_spill] sm:$0xff] }
 0x327   : > { %7806 = vmatmul.msk.f32.gmra.mxu2 %vm363_vm0, %v1022_v3  ;;  %v1789_v34 = vsel %vm1664_vm7, %v1757_v4, %v8413_v51 }
 0x328   : > { %v2276_v44 = vmax.f32 %v2165_v17, %v2244_v38  ;;  %v1945_v17 = vadd.f32 %v11454_v35, %v11309_v10  ;;  %v11682_v10 = vpop.permute.xlu2 %8451 }
 0x329   : > { %v2345_v12 = vld [vmem:[#allocation2 + $0x68] sm:$0xff]  ;;  %v2346_v61 = vld [vmem:[#allocation2 + $0x70] sm:$0x3]  ;;  %16507 = vst [vmem:[#allocation15_spill] sm:$0xff] %v11682_v10 }
 0x32a   : > { %2308 = vst.msk [vmem:[#allocation2 + $0x79] sm:$0xff] %vm363_vm0, %v2276_v44  ;;  %v8540_v21 = vpack.i.bf16 %v2345_v12, %v2344_v6  ;;  %v2583_v48 = vrot.slane %v2345_v12, 2  ;;  %v2461_v11 = vrot.slane %v2345_v12, 1  ;;  %v2463_v5 = vrot.slane %v2346_v61, 1  ;;  %v8417_v44 = vpop.permute.xlu1 %8416 }
 0x32b   : > { %v11651_v9 = vpop.f32.mrf.mxu1  ;;  %v2167_v49 = vpop.f32.mrf.mxu0  ;;  %v2585_v33 = vrot.slane %v2346_v61, 2  ;;  %v2058_v3 = vadd.f32 %v11606_v28, %v1945_v17  ;;  %v1726_v6 = vsel %vm363_vm0, %v16506_v50, %v8254_v31  ;;  %v1948_v12 = vadd.f32 %v11454_v35, %v11319_v2 }
 0x32c   : > { %v2168_v42 = vadd.f32 %v2167_v49, %v2055_v45  ;;  %8521 = vrot.lane.b32.xlu1 %v8525_v18, %s9643_s12  ;;  %8541 = vrot.lane.b32.xlu2 %v8540_v21, %s9641_s22  ;;  %v2584_v14 = vsel %vm932_vm4, %v2582_v0, %v2583_v48  ;;  %v11664_v58 = vsel %vm809_vm5, %v2460_v59, %v2461_v11  ;;  %v8258_v45 = vunpack.i.l.bf16 %v11101_v53  ;;  %v16508_v59 = vld [vmem:[#allocation64_spill] sm:$0xff] }
 0x32d   : > { %8531 = vrot.lane.b32.xlu0 %v8530_v36, %s9642_s11  ;;  %v11667_v18 = vsel %vm809_vm5, %v2461_v11, %v2463_v5  ;;  %v1758_v28 = vsel %vm1631_vm6, %v1726_v6, %v8334_v62  ;;  %v2586_v63 = vsel %vm932_vm4, %v2583_v48, %v2585_v33  ;;  %v8418_v49 = vunpack.i.l.bf16 %v8417_v44 }
 0x32e   : > { %v2245_v40 = vmul.f32 0.2, %v2168_v42  ;;  %2110 = vmatmul.f32.gmra.mxu1 %v1789_v34  ;;  %7811 = vmatmul.msk.f32.gmra.mxu0 %vm363_vm0, %v2584_v14  ;;  %v8555_v57 = vpack.i.bf16 %v11667_v18, %v11664_v58  ;;  %v1790_v32 = vsel %vm1664_vm7, %v1758_v28, %v8414_v56  ;;  %v8560_v55 = vpack.i.bf16 %v2586_v63, %v2584_v14 }
 0x32f   : > { %v1727_v2 = vsel %vm363_vm0, %v16508_v59, %v8258_v45  ;;  %v8339_v6 = vunpack.i.h.bf16 %v11223_v30  ;;  %v11724_v45 = vpop.permute.xlu0 %8421 }
 0x330   : > { %v2277_v47 = vmax.f32 %v2168_v42, %v2245_v40  ;;  %v11705_v33 = vpop.permute.xlu2 %6096  ;;  %16510 = vst [vmem:[#allocation17_spill] sm:$0xff] %v11724_v45 }
 0x331   : > { %v2347_v61 = vld [vmem:[#allocation2 + $0x78] sm:$0xff]  ;;  %16509 = vst [vmem:[#allocation43_spill] sm:$0xff] %v11705_v33 }
 0x332   : > { %2309 = vst.msk [vmem:[#allocation2 + $0x81] sm:$0xff] %vm363_vm0, %v2277_v47  ;;  %v2587_v5 = vrot.slane %v2347_v61, 2  ;;  %v2465_v47 = vrot.slane %v2347_v61, 1 }
 0x333   : > { %v11676_v38 = vpop.f32.mrf.mxu1  ;;  %v2170_v16 = vpop.f32.mrf.mxu0 }
 0x334   : > { %v2171_v25 = vadd.f32 %v2170_v16, %v2058_v3  ;;  %8556 = vrot.lane.b32.xlu1 %v8555_v57, %s9641_s22  ;;  %8546 = vrot.lane.b32.xlu2 %v8540_v21, %s9642_s11  ;;  %v8338_v21 = vunpack.i.l.bf16 %v11223_v30  ;;  %v11708_v3 = vpop.permute.xlu1 %8426  ;;  %v8259_v16 = vunpack.i.h.bf16 %v11101_v53  ;;  %v3450_v30 = vld [vmem:[%s16172_s4 + $0xf0] sm:$0xff] }
 0x335   : > { %8536 = vrot.lane.b32.xlu0 %v8530_v36, %s9643_s12  ;;  %v2061_v36 = vadd.f32 %v11631_v19, %v1948_v12  ;;  %v3451_v12 = vld [vmem:[%s16172_s4 + $0xf8] sm:$0xff] }
 0x336   : > { %v2246_v51 = vmul.f32 0.2, %v2171_v25  ;;  %2113 = vmatmul.f32.gmra.mxu1 %v1790_v32  ;;  %7812 = vmatmul.msk.f32.gmra.mxu0 %vm363_vm0, %v2586_v63  ;;  %v1759_v19 = vsel %vm1631_vm6, %v1727_v2, %v8338_v21  ;;  %v8419_v32 = vunpack.i.h.bf16 %v8417_v44 }
 0x337   : > { %v1791_v17 = vsel %vm1664_vm7, %v1759_v19, %v8418_v49  ;;  %3637 = vmatpush.msrb.mxu2 %v3451_v12  ;;  %v3449_v49 = vld [vmem:[%s16172_s4 + $0xe8] sm:$0xff] }
 0x338   : > { %v2278_v0 = vmax.f32 %v2171_v25, %v2246_v51  ;;  %v1951_v25 = vadd.f32 %v11454_v35, %v11331_v52  ;;  %v11748_v59 = vpop.permute.xlu2 %6286  ;;  %v3445_v12 = vld [vmem:[%s16172_s4 + $0xc8] sm:$0xff] }
 0x339   : > { %v2348_v27 = vld [vmem:[#allocation2 + $0x80] sm:$0xff]  ;;  %v2349_v48 = vld [vmem:[#allocation2 + $0x88] sm:$0x3]  ;;  %3638 = vmatpush.msrb.mxu2 %v3450_v30  ;;  %16512 = vst [vmem:[#allocation16_spill] sm:$0xff] %v11748_v59  ;;  %v1957_v30 = vadd.f32 %v11454_v35, %v11376_v41  ;;  %v3435_v41 = vld [vmem:[%s16172_s4 + $0x78] sm:$0xff] }
 0x33a   : > { %2310 = vst.msk [vmem:[#allocation2 + $0x91] sm:$0xff] %vm363_vm0, %v2278_v0  ;;  %v8570_v11 = vpack.i.bf16 %v2348_v27, %v2347_v61  ;;  %v2588_v42 = vrot.slane %v2348_v27, 2  ;;  %v2466_v40 = vrot.slane %v2348_v27, 1  ;;  %v2468_v31 = vrot.slane %v2349_v48, 1  ;;  %v16511_v61 = vld [vmem:[#allocation65_spill] sm:$0xff]  ;;  %3524 = vmatpush.msrb.mxu3 %v3435_v41 }
 0x33b   : > { %v11695_v4 = vpop.f32.mrf.mxu1  ;;  %v2173_v34 = vpop.f32.mrf.mxu0  ;;  %v2590_v63 = vrot.slane %v2349_v48, 2  ;;  %v2064_v51 = vadd.f32 %v11651_v9, %v1951_v25  ;;  %v1728_v9 = vsel %vm363_vm0, %v16511_v61, %v8259_v16  ;;  %3639 = vmatpush.msrb.mxu2 %v3449_v49  ;;  %v3431_v41 = vld [vmem:[%s16172_s4 + $0x58] sm:$0xff] }
 0x33c   : > { %v2174_v62 = vadd.f32 %v2173_v34, %v2061_v36  ;;  %8561 = vrot.lane.b32.xlu1 %v8560_v55, %s9642_s11  ;;  %8551 = vrot.lane.b32.xlu2 %v8555_v57, %s9643_s12  ;;  %v2589_v14 = vsel %vm932_vm4, %v2587_v5, %v2588_v42  ;;  %v11712_v57 = vsel %vm809_vm5, %v2465_v47, %v2466_v40  ;;  %v11750_v2 = vpop.permute.xlu1 %8446  ;;  %v3447_v47 = vld [vmem:[%s16172_s4 + $0xd8] sm:$0xff] }
 0x33d   : > { %8571 = vrot.lane.b32.xlu0 %v8570_v11, %s9641_s22  ;;  %v11715_v50 = vsel %vm809_vm5, %v2466_v40, %v2468_v31  ;;  %v1760_v0 = vsel %vm1631_vm6, %v1728_v9, %v8339_v6  ;;  %v2591_v27 = vsel %vm932_vm4, %v2588_v42, %v2590_v63  ;;  %16513 = vst [vmem:[#allocation42_spill] sm:$0xff] %v11750_v2 }
 0x33e   : > { %v2247_v56 = vmul.f32 0.2, %v2174_v62  ;;  %2116 = vmatmul.f32.gmra.mxu1 %v1791_v17  ;;  %7813 = vmatmul.msk.f32.gmra.mxu0 %vm363_vm0, %v2589_v14  ;;  %v8585_v53 = vpack.i.bf16 %v11715_v50, %v11712_v57  ;;  %v1792_v36 = vsel %vm1664_vm7, %v1760_v0, %v8419_v32  ;;  %v8590_v42 = vpack.i.bf16 %v2591_v27, %v2589_v14  ;;  %v3446_v32 = vld [vmem:[%s16172_s4 + $0xd0] sm:$0xff] }
 0x340   : > { %v2279_v28 = vmax.f32 %v2174_v62, %v2247_v56  ;;  %v11785_v0 = vpop.permute.xlu2 %6324 }
 0x341   : > { %v2350_v5 = vld [vmem:[#allocation2 + $0x90] sm:$0xff]  ;;  %16516 = vst [vmem:[#allocation51_spill] sm:$0xff] %v11785_v0 }
 0x342   : > { %2311 = vst.msk [vmem:[#allocation2 + $0x99] sm:$0xff] %vm363_vm0, %v2279_v28  ;;  %v2592_v19 = vrot.slane %v2350_v5, 2  ;;  %v11765_v28 = vpop.permute.xlu0 %8436 }
 0x343   : > { %v11732_v52 = vpop.f32.mrf.mxu1  ;;  %v2176_v44 = vpop.f32.mrf.mxu0 }
 0x344   : > { %v2177_v21 = vadd.f32 %v2176_v44, %v2064_v51  ;;  %8566 = vrot.lane.b32.xlu1 %v8560_v55, %s9643_s12  ;;  %8586 = vrot.lane.b32.xlu2 %v8585_v53, %s9641_s22  ;;  %v1954_v55 = vadd.f32 %v11454_v35, %v11343_v1  ;;  %v3448_v1 = vld [vmem:[%s16172_s4 + $0xe0] sm:$0xff]  ;;  %v2470_v51 = vrot.slane %v2350_v5, 1  ;;  %v11787_v49 = vpop.permute.xlu1 %6094 }
 0x345   : > { %8576 = vrot.lane.b32.xlu0 %v8570_v11, %s9642_s11  ;;  %3640 = vmatpush.msrb.mxu2 %v3448_v1  ;;  %16517 = vst [vmem:[#allocation50_spill] sm:$0xff] %v11787_v49 }
 0x346   : > { %v2248_v48 = vmul.f32 0.2, %v2177_v21  ;;  %2119 = vmatmul.f32.gmra.mxu1 %v1792_v36  ;;  %7814 = vmatmul.msk.f32.gmra.mxu0 %vm363_vm0, %v2591_v27  ;;  %v2067_v11 = vadd.f32 %v11676_v38, %v1954_v55  ;;  %v3444_v36 = vld [vmem:[%s16172_s4 + $0xc0] sm:$0xff]  ;;  %v3434_v27 = vld [vmem:[%s16172_s4 + $0x70] sm:$0xff] }
 0x347   : > { %3641 = vmatpush.msrb.mxu2 %v3447_v47  ;;  %3525 = vmatpush.msrb.mxu3 %v3434_v27 }
 0x348   : > { %v2280_v34 = vmax.f32 %v2177_v21, %v2248_v48  ;;  %v2070_v21 = vadd.f32 %v11695_v4, %v1957_v30 }
 0x349   : > { %v2351_v40 = vld [vmem:[#allocation2 + $0x98] sm:$0xff]  ;;  %v2352_v31 = vld [vmem:[#allocation2 + $0xa0] sm:$0x3]  ;;  %3642 = vmatpush.msrb.mxu2 %v3446_v32 }
 0x34a   : > { %2312 = vst.msk [vmem:[#allocation2 + $0xa9] sm:$0xff] %vm363_vm0, %v2280_v34  ;;  %v8600_v62 = vpack.i.bf16 %v2351_v40, %v2350_v5  ;;  %v2593_v17 = vrot.slane %v2351_v40, 2  ;;  %v2471_v6 = vrot.slane %v2351_v40, 1  ;;  %v2473_v25 = vrot.slane %v2352_v31, 1  ;;  %v3443_v5 = vld [vmem:[%s16172_s4 + $0xb8] sm:$0xff]  ;;  %v11816_v1 = vpop.permute.xlu0 %8441 }
 0x34b   : > { %v11760_v56 = vpop.f32.mrf.mxu1  ;;  %v2179_v16 = vpop.f32.mrf.mxu0  ;;  %3643 = vmatpush.msrb.mxu2 %v3445_v12  ;;  %16518 = vst [vmem:[#allocation60_spill] sm:$0xff] %v11816_v1 }
 0x34c   : > { %v2180_v38 = vadd.f32 %v2179_v16, %v2067_v11  ;;  %8601 = vrot.lane.b32.xlu1 %v8600_v62, %s9641_s22  ;;  %8591 = vrot.lane.b32.xlu2 %v8590_v42, %s9642_s11  ;;  %v2594_v14 = vsel %vm932_vm4, %v2592_v19, %v2593_v17  ;;  %v11778_v61 = vsel %vm809_vm5, %v2470_v51, %v2471_v6  ;;  %v3433_v11 = vld [vmem:[%s16172_s4 + $0x68] sm:$0xff] }
 0x34d   : > { %8581 = vrot.lane.b32.xlu0 %v8585_v53, %s9643_s12  ;;  %16514 = vst [vmem:[#allocation20_spill] sm:$0xff] %v11778_v61  ;;  %v11781_v9 = vsel %vm809_vm5, %v2471_v6, %v2473_v25  ;;  %v2595_v53 = vrot.slane %v2352_v31, 2  ;;  %3644 = vmatpush.msrb.mxu2 %v3444_v36  ;;  %v3442_v31 = vld [vmem:[%s16172_s4 + $0xb0] sm:$0xff]  ;;  %v11853_v36 = vpop.permute.xlu1 %6132 }
 0x34e   : > { %v2249_v63 = vmul.f32 0.2, %v2180_v38  ;;  %7815 = vmatmul.msk.f32.gmra.mxu0 %vm363_vm0, %v2594_v14  ;;  %16515 = vst [vmem:[#allocation19_spill] sm:$0xff] %v11781_v9  ;;  %v8615_v55 = vpack.i.bf16 %v11781_v9, %v11778_v61  ;;  %3526 = vmatpush.msrb.mxu3 %v3433_v11  ;;  %v3429_v11 = vld [vmem:[%s16172_s4 + $0x48] sm:$0xff] }
 0x34f   : > { %v2596_v40 = vsel %vm932_vm4, %v2593_v17, %v2595_v53  ;;  %3645 = vmatpush.msrb.mxu2 %v3443_v5  ;;  %v3441_v17 = vld [vmem:[%s16172_s4 + $0xa8] sm:$0xff]  ;;  %16519 = vst [vmem:[#allocation61_spill] sm:$0xff] %v11853_v36 }
 0x350   : > { %v2281_v44 = vmax.f32 %v2180_v38, %v2249_v63  ;;  %v8620_v12 = vpack.i.bf16 %v2596_v40, %v2594_v14  ;;  %v3440_v14 = vld [vmem:[%s16172_s4 + $0xa0] sm:$0xff] }
 0x351   : > { %v11823_v47 = vld [vmem:[#allocation2 + $0xa8] sm:$0xff]  ;;  %3646 = vmatpush.msrb.mxu2 %v3442_v31  ;;  %v1963_v31 = vadd.f32 %v11454_v35, %v11416_v46 }
 0x352   : > { %2313 = vst.msk [vmem:[#allocation2 + $0xb1] sm:$0xff] %vm363_vm0, %v2281_v44  ;;  %v2597_v32 = vrot.slane %v11823_v47, 2 }
 0x353   : > { %v11798_v48 = vpop.f32.mrf.mxu1  ;;  %v2182_v4 = vpop.f32.mrf.mxu0  ;;  %3647 = vmatpush.msrb.mxu2 %v3441_v17  ;;  %v3437_v17 = vld [vmem:[%s16172_s4 + $0x88] sm:$0xff] }
 0x354   : > { %v2183_v34 = vadd.f32 %v2182_v4, %v2070_v21  ;;  %8606 = vrot.lane.b32.xlu1 %v8600_v62, %s9642_s11  ;;  %8596 = vrot.lane.b32.xlu2 %v8590_v42, %s9643_s12  ;;  %v3432_v42 = vld [vmem:[%s16172_s4 + $0x60] sm:$0xff]  ;;  %v1960_v62 = vadd.f32 %v11454_v35, %v11402_v13  ;;  %v3430_v4 = vld [vmem:[%s16172_s4 + $0x50] sm:$0xff] }
 0x355   : > { %8616 = vrot.lane.b32.xlu0 %v8615_v55, %s9641_s22  ;;  %3527 = vmatpush.msrb.mxu3 %v3432_v42  ;;  %v11873_v42 = vpop.permute.xlu0 %8456 }
 0x356   : > { %v2250_v19 = vmul.f32 0.2, %v2183_v34  ;;  %7816 = vmatmul.msk.f32.gmra.mxu0 %vm363_vm0, %v2596_v40  ;;  %v2073_v38 = vadd.f32 %v11732_v52, %v1960_v62  ;;  %v11841_v44 = vpop.permute.xlu2 %8461  ;;  %3648 = vmatpush.msrb.mxu2 %v3440_v14  ;;  %v3438_v40 = vld [vmem:[%s16172_s4 + $0x90] sm:$0xff]  ;;  %16520 = vst [vmem:[#allocation13_spill] sm:$0xff] %v11873_v42  ;;  %v3428_v62 = vld [vmem:[%s16172_s4 + $0x40] sm:$0xff]  ;;  %v1966_v14 = vadd.f32 %v11454_v35, %v11431_v60  ;;  %v1995_v42 = vpop.f32.mrf.mxu3 }
 0x357   : > { %3528 = vmatpush.msrb.mxu3 %v3431_v41  ;;  %v3425_v41 = vld [vmem:[%s16172_s4 + $0x28] sm:$0xff] }
 0x358   : > { %v2282_v16 = vmax.f32 %v2183_v34, %v2250_v19 }
 0x359   : > { %v11829_v6 = vld [vmem:[#allocation2 + $0xb0] sm:$0xff]  ;;  %v11831_v25 = vld [vmem:[#allocation2 + $0xb8] sm:$0x3]  ;;  %3529 = vmatpush.msrb.mxu3 %v3430_v4  ;;  %v11909_v4 = vpop.permute.xlu1 %6322 }
 0x35a   : > { %2314 = vst.msk [vmem:[#allocation2 + $0xc1] sm:$0xff] %vm363_vm0, %v2282_v16  ;;  %v8640_v13 = vpack.i.bf16 %v11829_v6, %v11823_v47  ;;  %v2598_v63 = vrot.slane %v11829_v6, 2  ;;  %v2600_v51 = vrot.slane %v11831_v25, 2  ;;  %v11881_v16 = vpop.f32.mrf.mxu2 }
 0x35b   : > { %v11839_v30 = vpop.f32.mrf.mxu1  ;;  %v2185_v52 = vpop.f32.mrf.mxu0  ;;  %3530 = vmatpush.msrb.mxu3 %v3429_v11  ;;  %16521 = vst [vmem:[#allocation29_spill] sm:$0xff] %v11909_v4  ;;  %v2079_v11 = vadd.f32 %v11798_v48, %v1966_v14  ;;  %v11962_v14 = vld [vmem:[%s16171_s3] ss:$0 sm:$0xff] }
 0x35c   : > { %v2186_v53 = vadd.f32 %v2185_v52, %v2073_v38  ;;  %8611 = vrot.lane.b32.xlu1 %v8615_v55, %s9643_s12  ;;  %8641 = vrot.lane.b32.xlu2 %v8640_v13, %s9641_s22  ;;  %v2599_v21 = vsel %vm932_vm4, %v2597_v32, %v2598_v63  ;;  %v2601_v27 = vsel %vm932_vm4, %v2598_v63, %v2600_v51  ;;  %v3439_v55 = vld [vmem:[%s16172_s4 + $0x98] sm:$0xff]  ;;  %v2476_v63 = vrot.slane %v11829_v6, 1 }
 0x35d   : > { %8621 = vrot.lane.b32.xlu0 %v8620_v12, %s9642_s11  ;;  %v11863_v34 = vpack.i.bf16 %v2601_v27, %v2599_v21  ;;  %3649 = vmatpush.msrb.mxu2 %v3439_v55  ;;  %v2076_v38 = vadd.f32 %v11760_v56, %v1963_v31  ;;  %v2478_v51 = vrot.slane %v11831_v25, 1  ;;  %v3436_v56 = vld [vmem:[%s16172_s4 + $0x80] sm:$0xff]  ;;  %v2475_v6 = vrot.slane %v11823_v47, 1 }
 0x35e   : > { %v2251_v5 = vmul.f32 0.2, %v2186_v53  ;;  %7817 = vmatmul.msk.f32.gmra.mxu0 %vm363_vm0, %v2599_v21  ;;  %3531 = vmatpush.msrb.mxu3 %v3428_v62  ;;  %v3426_v21 = vld [vmem:[%s16172_s4 + $0x30] sm:$0xff]  ;;  %v11901_v25 = vpop.permute.xlu2 %8466 }
 0x35f   : > { %3650 = vmatpush.msrb.mxu2 %v3438_v40  ;;  %v11915_v47 = vsel %vm809_vm5, %v2476_v63, %v2478_v51 }
 0x360   : > { %v2283_v19 = vmax.f32 %v2186_v53, %v2251_v5  ;;  %v3427_v53 = vld [vmem:[%s16172_s4 + $0x38] sm:$0xff]  ;;  %16523 = vst [vmem:[#allocation21_spill] sm:$0xff] %v11915_v47  ;;  %v3424_v5 = vld [vmem:[%s16172_s4 + $0x20] sm:$0xff] }
 0x361   : > { %3651 = vmatpush.msrb.mxu2 %v3437_v17  ;;  %3532 = vmatpush.msrb.mxu3 %v3427_v53  ;;  %v11917_v55 = vld [vmem:[#allocation2 + $0xc0] sm:$0xff]  ;;  %v3423_v53 = vld [vmem:[%s16172_s4 + $0x18] sm:$0xff] }
 0x362   : > { %2315 = vst.msk [vmem:[#allocation2 + $0xc9] sm:$0xff] %vm363_vm0, %v2283_v19  ;;  %v11927_v35 = vpop.f32.mrf.mxu2  ;;  %v11934_v19 = vpop.permute.xlu0 %6130  ;;  %v2602_v62 = vrot.slane %v11917_v55, 2 }
 0x363   : > { %v11885_v46 = vpop.f32.mrf.mxu1  ;;  %v2188_v32 = vpop.f32.mrf.mxu0  ;;  %3652 = vmatpush.msrb.mxu2 %v3436_v56  ;;  %3533 = vmatpush.msrb.mxu3 %v3426_v21  ;;  %16524 = vst [vmem:[#allocation22_spill] sm:$0xff] %v11934_v19  ;;  %v3422_v56 = vld [vmem:[%s16172_s4 + $0x10] sm:$0xff] }
 0x364   : > { %v2189_v52 = vadd.f32 %v2188_v32, %v2076_v38  ;;  %8646 = vrot.lane.b32.xlu2 %v8640_v13, %s9642_s11 }
 0x365   : > { %8626 = vrot.lane.b32.xlu0 %v8620_v12, %s9643_s12  ;;  %v11912_v12 = vsel %vm809_vm5, %v2475_v6, %v2476_v63  ;;  %3534 = vmatpush.msrb.mxu3 %v3425_v41  ;;  %v3421_v41 = vld [vmem:[%s16172_s4 + $0x8] sm:$0xff] }
 0x366   : > { %v2252_v13 = vmul.f32 0.2, %v2189_v52  ;;  %7818 = vmatmul.msk.f32.gmra.mxu0 %vm363_vm0, %v2601_v27  ;;  %16522 = vst [vmem:[#allocation30_spill] sm:$0xff] %v11912_v12  ;;  %v11932_v31 = vpack.i.bf16 %v11915_v47, %v11912_v12  ;;  %v9547_v12 = vld [vmem:[#allocation2 + $0x18] sm:$0xff] }
 0x367   : > { %3535 = vmatpush.msrb.mxu3 %v3424_v5 }
 0x368   : > { %v2284_v27 = vmax.f32 %v2189_v52, %v2252_v13 }
 0x369   : > { %v11923_v40 = vld [vmem:[#allocation2 + $0xc8] sm:$0xff]  ;;  %v11925_v60 = vld [vmem:[#allocation2 + $0xd0] sm:$0x3]  ;;  %3536 = vmatpush.msrb.mxu3 %v3423_v53  ;;  %v11953_v6 = vpop.permute.xlu2 %8496 }
 0x36a   : > { %2316 = vst.msk [vmem:[#allocation2 + $0xd9] sm:$0xff] %vm363_vm0, %v2284_v27  ;;  %v2603_v17 = vrot.slane %v11923_v40, 2  ;;  %v2605_v48 = vrot.slane %v11925_v60, 2  ;;  %v1969_v27 = vadd.f32 %v11962_v14, %v11447_v24  ;;  %v8498_v24 = vunpack.i.l.bf16 %v11953_v6 }
 0x36b   : > { %v11939_v38 = vpop.f32.mrf.mxu1  ;;  %v2191_v32 = vpop.f32.mrf.mxu0  ;;  %3537 = vmatpush.msrb.mxu3 %v3422_v56 }
 0x36c   : > { %v2192_v63 = vadd.f32 %v2191_v32, %v2079_v11  ;;  %8671 = vrot.lane.b32.xlu2 %v11932_v31, %s9643_s12  ;;  %v2604_v51 = vsel %vm932_vm4, %v2602_v62, %v2603_v17  ;;  %v2606_v52 = vsel %vm932_vm4, %v2603_v17, %v2605_v48  ;;  %v3420_v11 = vld [vmem:[%s16172_s4] sm:$0xff]  ;;  %v1978_v17 = vadd.f32 %v11962_v14, %v11295_v23  ;;  %v11976_v56 = vpop.permute.xlu0 %6288 }
 0x36d   : > { %v11951_v21 = vpack.i.bf16 %v2606_v52, %v2604_v51  ;;  %3538 = vmatpush.msrb.mxu3 %v3421_v41  ;;  %v2082_v48 = vadd.f32 %v11839_v30, %v1969_v27  ;;  %16525 = vst [vmem:[#allocation68_spill] sm:$0xff] %v11976_v56  ;;  %v1972_v23 = vadd.f32 %v11962_v14, %v11266_v54  ;;  %v8438_v30 = vunpack.i.l.bf16 %v11765_v28 }
 0x36e   : > { %v2253_v13 = vmul.f32 0.2, %v2192_v63  ;;  %7819 = vmatmul.msk.f32.gmra.mxu0 %vm363_vm0, %v2604_v51 }
 0x36f   : > { %3539 = vmatpush.msrb.mxu3 %v3420_v11 }
 0x370   : > { %v2285_v5 = vmax.f32 %v2192_v63, %v2253_v13  ;;  %v2209_v13 = vpop.f32.mrf.mxu2 }
 0x371   : > { %v11969_v62 = vpop.permute.xlu1 %8471  ;;  %v11983_v27 = vld [vmem:[#allocation2 + $0xd8] sm:$0xff] }
 0x372   : > { %2317 = vst.msk [vmem:[#allocation2 + $0xe1] sm:$0xff] %vm363_vm0, %v2285_v5  ;;  %v11985_v5 = vpop.permute.xlu2 %8501  ;;  %v2607_v56 = vrot.slane %v11983_v27, 2 }
 0x373   : > { %v2090_v32 = vpop.f32.mrf.mxu1  ;;  %v2194_v51 = vpop.f32.mrf.mxu0 }
 0x374   : > { %v2091_v63 = vadd.f32 %v2090_v32, %v1978_v17  ;;  %v2195_v53 = vadd.f32 %v2194_v51, %v2082_v48  ;;  %v3324_v48 = vsel %vm363_vm0, %v11536_v43, %v8498_v24  ;;  %v2085_v32 = vadd.f32 %v11885_v46, %v1972_v23 }
 0x375   : > { %v8499_v43 = vunpack.i.h.bf16 %v11953_v6 }
 0x376   : > { %v2204_v59 = vadd.f32 %v11881_v16, %v2091_v63  ;;  %v2254_v41 = vmul.f32 0.2, %v2195_v53  ;;  %7820 = vmatmul.msk.f32.gmra.mxu0 %vm363_vm0, %v2606_v52  ;;  %v1981_v16 = vadd.f32 %v11962_v14, %v11307_v8  ;;  %v3356_v8 = vsel %vm1631_vm6, %v3324_v48, %v8438_v30 }
 0x378   : > { %v2257_v11 = vmul.f32 0.2, %v2204_v59  ;;  %v2286_v17 = vmax.f32 %v2195_v53, %v2254_v41  ;;  %v2212_v48 = vpop.f32.mrf.mxu2 }
 0x379   : > { %v8477_v52 = vpop.permute.xlu1 %8476  ;;  %v11992_v51 = vld [vmem:[#allocation2 + $0xe0] sm:$0xff]  ;;  %v11994_v54 = vld [vmem:[#allocation2 + $0xe8] sm:$0x3] }
 0x37a   : > { %v2289_v63 = vmax.f32 %v2204_v59, %v2257_v11  ;;  %2318 = vst.msk [vmem:[#allocation2 + $0xf1] sm:$0xff] %vm363_vm0, %v2286_v17  ;;  %v8478_v49 = vunpack.i.l.bf16 %v8477_v52  ;;  %v2608_v53 = vrot.slane %v11992_v51, 2  ;;  %v2610_v46 = vrot.slane %v11994_v54, 2 }
 0x37b   : > { %v2093_v24 = vpop.f32.mrf.mxu1  ;;  %v2197_v41 = vpop.f32.mrf.mxu0 }
 0x37c   : > { %2321 = vst.msk [vmem:[#allocation2 + $0x111] sm:$0xff] %vm363_vm0, %v2289_v63  ;;  %v2094_v23 = vadd.f32 %v2093_v24, %v1981_v16  ;;  %v2198_v33 = vadd.f32 %v2197_v41, %v2085_v32  ;;  %v3388_v59 = vsel %vm1664_vm7, %v3356_v8, %v8478_v49  ;;  %v2609_v11 = vsel %vm932_vm4, %v2607_v56, %v2608_v53  ;;  %v12020_v41 = vpop.permute.xlu2 %8506 }
 0x37d   : > { %3653 = vmatmul.f32.vlgmr.msrb.gmra.mxu2 %v3388_v59  ;;  %v2611_v17 = vsel %vm932_vm4, %v2608_v53, %v2610_v46  ;;  %v1975_v16 = vadd.f32 %v11962_v14, %v11282_v26  ;;  %v8439_v49 = vunpack.i.h.bf16 %v11765_v28  ;;  %v8479_v32 = vunpack.i.h.bf16 %v8477_v52 }
 0x37e   : > { %v2207_v36 = vadd.f32 %v11927_v35, %v2094_v23  ;;  %v2255_v6 = vmul.f32 0.2, %v2198_v33  ;;  %v12007_v0 = vpop.permute.xlu0 %8481  ;;  %7821 = vmatmul.msk.f32.gmra.mxu0 %vm363_vm0, %v2609_v11  ;;  %v12010_v30 = vpack.i.bf16 %v2611_v17, %v2609_v11  ;;  %v3325_v53 = vsel %vm363_vm0, %v11539_v37, %v8499_v43 }
 0x37f   : > { %v1984_v35 = vadd.f32 %v11962_v14, %v11324_v7  ;;  %v2088_v24 = vadd.f32 %v11939_v38, %v1975_v16  ;;  %v3357_v28 = vsel %vm1631_vm6, %v3325_v53, %v8439_v49  ;;  %v8463_v52 = vunpack.i.l.bf16 %v11841_v44  ;;  %v9545_v49 = vld [vmem:[#allocation2] sm:$0xff] }
 0x380   : > { %v2258_v56 = vmul.f32 0.2, %v2207_v36  ;;  %v2287_v63 = vmax.f32 %v2198_v33, %v2255_v6  ;;  %v3389_v43 = vsel %vm1664_vm7, %v3357_v28, %v8479_v32  ;;  %v8428_v7 = vunpack.i.l.bf16 %v11708_v3  ;;  %v16526_v53 = vld [vmem:[#allocation14_spill] sm:$0xff] }
 0x381   : > { %v12029_v11 = vld [vmem:[#allocation2 + $0xf0] sm:$0xff]  ;;  %v1987_v32 = vadd.f32 %v11962_v14, %v16526_v53  ;;  %v8508_v15 = vunpack.i.l.bf16 %v12020_v41  ;;  %v8484_v45 = vunpack.i.h.bf16 %v12007_v0 }
 0x382   : > { %v2290_v8 = vmax.f32 %v2207_v36, %v2258_v56  ;;  %2319 = vst.msk [vmem:[#allocation2 + $0xf9] sm:$0xff] %vm363_vm0, %v2287_v63  ;;  %v3228_v56 = vsel %vm363_vm0, %v9545_v49, %v8463_v52  ;;  %v2215_v63 = vpop.f32.mrf.mxu2 }
 0x383   : > { %v2096_v46 = vpop.f32.mrf.mxu1  ;;  %v2200_v26 = vpop.f32.mrf.mxu0  ;;  %v12080_v1 = vld [vmem:[#allocation2 + $0x118] sm:$0x3] }
 0x384   : > { %2322 = vst.msk [vmem:[#allocation2 + $0x121] sm:$0xff] %vm363_vm0, %v2290_v8  ;;  %v2097_v33 = vadd.f32 %v2096_v46, %v1984_v35  ;;  %v2201_v37 = vadd.f32 %v2200_v26, %v2088_v24  ;;  %v8464_v35 = vunpack.i.h.bf16 %v11841_v44  ;;  %v2612_v26 = vrot.slane %v12029_v11, 2 }
 0x385   : > { %3656 = vmatmul.f32.gmra.mxu2 %v3389_v43 }
 0x386   : > { %v2210_v38 = vadd.f32 %v2209_v13, %v2097_v33  ;;  %v2256_v23 = vmul.f32 0.2, %v2201_v37  ;;  %v8487_v36 = vpop.permute.xlu0 %8486  ;;  %7822 = vmatmul.msk.f32.gmra.mxu0 %vm363_vm0, %v2611_v17  ;;  %v12044_v33 = vpop.permute.xlu2 %8541 }
 0x387   : > { %v8488_v59 = vunpack.i.l.bf16 %v8487_v36  ;;  %v8489_v52 = vunpack.i.h.bf16 %v8487_v36  ;;  %v9546_v36 = vld [vmem:[#allocation2 + $0x8] sm:$0xff] }
 0x388   : > { %v2259_v6 = vmul.f32 0.2, %v2210_v38  ;;  %v2288_v16 = vmax.f32 %v2201_v37, %v2256_v23  ;;  %v8429_v23 = vunpack.i.h.bf16 %v11708_v3  ;;  %v16529_v3 = vld [vmem:[#allocation33_spill] sm:$0xff] }
 0x389   : > { %v3260_v13 = vsel %vm1631_vm6, %v3228_v56, %v8488_v59  ;;  %v12036_v24 = vld [vmem:[#allocation2 + $0xf8] sm:$0xff]  ;;  %v12038_v8 = vld [vmem:[#allocation2 + $0x100] sm:$0x3] }
 0x38a   : > { %16527 = vst [vmem:[#allocation31_spill] sm:$0xff] %v12038_v8  ;;  %v2291_v17 = vmax.f32 %v2210_v38, %v2259_v6  ;;  %v3292_v46 = vsel %vm1664_vm7, %v3260_v13, %v8428_v7  ;;  %v2613_v28 = vrot.slane %v12036_v24, 2  ;;  %v2615_v44 = vrot.slane %v12038_v8, 2 }
 0x38b   : > { %2320 = vst.msk [vmem:[#allocation2 + $0x109] sm:$0xff] %vm363_vm0, %v2288_v16  ;;  %v2099_v37 = vpop.f32.mrf.mxu1  ;;  %3540 = vmatmul.f32.vlgmr.msrb.gmra.mxu3 %v3292_v46  ;;  %v3229_v16 = vsel %vm363_vm0, %v9546_v36, %v8464_v35  ;;  %v12060_v13 = vld [vmem:[#allocation2 + $0x120] sm:$0xff]  ;;  %v2218_v35 = vpop.f32.mrf.mxu2 }
 0x38c   : > { %2323 = vst.msk [vmem:[#allocation2 + $0x129] sm:$0xff] %vm363_vm0, %v2291_v17  ;;  %v2100_v43 = vadd.f32 %v2099_v37, %v1987_v32  ;;  %v2614_v38 = vsel %vm932_vm4, %v2612_v26, %v2613_v28  ;;  %v2616_v7 = vsel %vm932_vm4, %v2613_v28, %v2615_v44  ;;  %v3261_v53 = vsel %vm1631_vm6, %v3229_v16, %v8489_v52 }
 0x38d   : > { %v12055_v49 = vpack.i.bf16 %v2616_v7, %v2614_v38  ;;  %v1990_v17 = vadd.f32 %v11962_v14, %v16529_v3  ;;  %v3293_v46 = vsel %vm1664_vm7, %v3261_v53, %v8429_v23  ;;  %v8483_v37 = vunpack.i.l.bf16 %v12007_v0  ;;  %v16532_v53 = vld [vmem:[#allocation34_spill] sm:$0xff] }
 0x38e   : > { %v2213_v59 = vadd.f32 %v2212_v48, %v2100_v43  ;;  %v12051_v6 = vpop.permute.xlu1 %8511  ;;  %7823 = vmatmul.msk.f32.gmra.mxu0 %vm363_vm0, %v2614_v38  ;;  %v12057_v56 = vpop.permute.xlu0 %8491  ;;  %v2500_v38 = vrot.slane %v12060_v13, 1  ;;  %v8468_v3 = vunpack.i.l.bf16 %v11901_v25 }
 0x38f   : > { %16528 = vst [vmem:[#allocation69_spill] sm:$0xff] %v12055_v49  ;;  %v12076_v4 = vpop.permute.xlu2 %8546 }
 0x390   : > { %v2260_v32 = vmul.f32 0.2, %v2213_v59 }
 0x392   : > { %v2292_v48 = vmax.f32 %v2213_v59, %v2260_v32  ;;  %v12065_v26 = vld [vmem:[#allocation2 + $0x108] sm:$0xff]  ;;  %v12067_v28 = vld [vmem:[#allocation2 + $0x110] sm:$0xff]  ;;  %v1993_v32 = vadd.f32 %v11962_v14, %v16532_v53 }
 0x393   : > { %16530 = vst [vmem:[#allocation32_spill] sm:$0xff] %v12065_v26  ;;  %v2102_v44 = vpop.f32.mrf.mxu1  ;;  %3543 = vmatmul.f32.gmra.mxu3 %v3293_v46  ;;  %v2369_v43 = vld [vmem:[#allocation2 + $0x128] sm:$0xff]  ;;  %v2370_v52 = vld [vmem:[#allocation2 + $0x130] sm:$0x3]  ;;  %v2617_v46 = vrot.slane %v12065_v26, 2  ;;  %v2618_v19 = vrot.slane %v12067_v28, 2 }
 0x394   : > { %16531 = vst [vmem:[#allocation62_spill] sm:$0xff] %v12067_v28  ;;  %v2103_v36 = vadd.f32 %v2102_v44, %v1990_v17  ;;  %v8630_v59 = vpack.i.bf16 %v2369_v43, %v12060_v13  ;;  %v2501_v16 = vrot.slane %v2369_v43, 1  ;;  %v2503_v23 = vrot.slane %v2370_v52, 1 }
 0x395   : > { %2324 = vst.msk [vmem:[#allocation2 + $0x139] sm:$0xff] %vm363_vm0, %v2292_v48  ;;  %v8473_v48 = vunpack.i.l.bf16 %v11969_v62  ;;  %v2623_v61 = vrot.slane %v2369_v43, 2  ;;  %v2625_v49 = vrot.slane %v2370_v52, 2 }
 0x396   : > { %v2216_v17 = vadd.f32 %v2215_v63, %v2103_v36  ;;  %v8517_v44 = vpop.permute.xlu1 %8516  ;;  %8631 = vrot.lane.b32.xlu1 %v8630_v59, %s9641_s22  ;;  %7824 = vmatmul.msk.f32.gmra.mxu0 %vm363_vm0, %v2616_v7  ;;  %v12086_v53 = vsel %vm809_vm5, %v2500_v38, %v2501_v16  ;;  %v12089_v10 = vsel %vm809_vm5, %v2501_v16, %v2503_v23  ;;  %v8527_v47 = vpop.permute.xlu0 %8526  ;;  %v2620_v38 = vrot.slane %v12080_v1, 2 }
 0x397   : > { %16533 = vst [vmem:[#allocation35_spill] sm:$0xff] %v12089_v10  ;;  %v8518_v2 = vunpack.i.l.bf16 %v8517_v44  ;;  %v3230_v63 = vsel %vm363_vm0, %v9547_v12, %v8483_v37  ;;  %v8528_v9 = vunpack.i.l.bf16 %v8527_v47  ;;  %v8655_v7 = vpack.i.bf16 %v12089_v10, %v12086_v53 }
 0x398   : > { %v2261_v36 = vmul.f32 0.2, %v2216_v17  ;;  %v2619_v23 = vsel %vm932_vm4, %v2617_v46, %v2618_v19  ;;  %v8529_v0 = vunpack.i.h.bf16 %v8527_v47  ;;  %v8519_v37 = vunpack.i.h.bf16 %v8517_v44  ;;  %v2221_v46 = vpop.f32.mrf.mxu2 }
 0x399   : > { %v3262_v16 = vsel %vm1631_vm6, %v3230_v63, %v8518_v2  ;;  %8656 = vrot.lane.b32.xlu0 %v8655_v7, %s9641_s22  ;;  %v3326_v12 = vsel %vm363_vm0, %v11572_v39, %v8528_v9  ;;  %v2622_v2 = vrot.slane %v12060_v13, 2  ;;  %v2621_v47 = vsel %vm932_vm4, %v2618_v19, %v2620_v38 }
 0x39a   : > { %v2293_v28 = vmax.f32 %v2216_v17, %v2261_v36  ;;  %v3294_v26 = vsel %vm1664_vm7, %v3262_v16, %v8468_v3  ;;  %v3358_v10 = vsel %vm1631_vm6, %v3326_v12, %v8473_v48  ;;  %v12112_v39 = vsel %vm932_vm4, %v2623_v61, %v2625_v49  ;;  %v12125_v49 = vpop.permute.xlu2 %8551 }
 0x39b   : > { %v2105_v8 = vpop.f32.mrf.mxu1  ;;  %3546 = vmatmul.f32.gmra.mxu3 %v3294_v26  ;;  %v3390_v52 = vsel %vm1664_vm7, %v3358_v10, %v8508_v15  ;;  %v12109_v3 = vsel %vm932_vm4, %v2622_v2, %v2623_v61  ;;  %v12114_v9 = vpack.i.bf16 %v2621_v47, %v2619_v23  ;;  %v9548_v15 = vld [vmem:[#allocation2 + $0x20] sm:$0xff]  ;;  %v3327_v19 = vsel %vm363_vm0, %v11576_v22, %v8529_v0 }
 0x39c   : > { %2325 = vst.msk [vmem:[#allocation2 + $0x141] sm:$0xff] %vm363_vm0, %v2293_v28  ;;  %v2106_v43 = vadd.f32 %v2105_v8, %v1993_v32  ;;  %3659 = vmatmul.f32.gmra.mxu2 %v3390_v52  ;;  %v3231_v10 = vsel %vm363_vm0, %v9548_v15, %v8484_v45  ;;  %v8474_v8 = vunpack.i.h.bf16 %v11969_v62  ;;  %v8513_v61 = vunpack.i.l.bf16 %v12051_v6  ;;  %v1998_v45 = vpop.f32.mrf.mxu3 }
 0x39d   : > { %v8660_v48 = vpack.i.bf16 %v12112_v39, %v12109_v3  ;;  %v1996_v22 = vadd.f32 %v11962_v14, %v1995_v42  ;;  %v8509_v62 = vunpack.i.h.bf16 %v12020_v41  ;;  %v8548_v36 = vunpack.i.l.bf16 %v12076_v4 }
 0x39e   : > { %v2219_v26 = vadd.f32 %v2218_v35, %v2106_v43  ;;  %8636 = vrot.lane.b32.xlu1 %v8630_v59, %s9642_s11  ;;  %v12117_v13 = vpop.permute.xlu1 %8521  ;;  %7825 = vmatmul.msk.f32.gmra.mxu0 %vm363_vm0, %v2619_v23  ;;  %v3263_v35 = vsel %vm1631_vm6, %v3231_v10, %v8519_v37  ;;  %v8469_v59 = vunpack.i.h.bf16 %v11901_v25  ;;  %v3359_v17 = vsel %vm1631_vm6, %v3327_v19, %v8474_v8  ;;  %v12139_v25 = vld [vmem:[#allocation2 + $0x138] sm:$0xff]  ;;  %v9549_v23 = vld [vmem:[#allocation2 + $0x30] sm:$0xff] }
 0x39f   : > { %v12127_v28 = vpop.permute.xlu0 %8531  ;;  %v3232_v0 = vsel %vm363_vm0, %v9549_v23, %v8513_v61  ;;  %v3391_v41 = vsel %vm1664_vm7, %v3359_v17, %v8509_v62  ;;  %v8514_v37 = vunpack.i.h.bf16 %v12051_v6  ;;  %v8503_v8 = vunpack.i.l.bf16 %v11985_v5 }
 0x3a0   : > { %v2262_v32 = vmul.f32 0.2, %v2219_v26  ;;  %v3295_v63 = vsel %vm1664_vm7, %v3263_v35, %v8469_v59  ;;  %v2224_v52 = vpop.f32.mrf.mxu2  ;;  %v3264_v19 = vsel %vm1631_vm6, %v3232_v0, %v8548_v36  ;;  %v8493_v6 = vunpack.i.l.bf16 %v12057_v56  ;;  %v9550_v59 = vld [vmem:[#allocation2 + $0x38] sm:$0xff] }
 0x3a1   : > { %8661 = vrot.lane.b32.xlu0 %v8660_v48, %s9642_s11 }
 0x3a2   : > { %v2294_v44 = vmax.f32 %v2219_v26, %v2262_v32  ;;  %v1999_v26 = vadd.f32 %v11962_v14, %v1998_v45  ;;  %v3233_v32 = vsel %vm363_vm0, %v9550_v59, %v8514_v37  ;;  %v8504_v37 = vunpack.i.h.bf16 %v11985_v5 }
 0x3a3   : > { %v2108_v38 = vpop.f32.mrf.mxu1  ;;  %3549 = vmatmul.f32.gmra.mxu3 %v3295_v63  ;;  %v12141_v16 = vld [vmem:[#allocation2 + $0x140] sm:$0xff]  ;;  %v12166_v36 = vld [vmem:[#allocation2 + $0x148] sm:$0x3]  ;;  %v8543_v59 = vunpack.i.l.bf16 %v12044_v33 }
 0x3a4   : > { %2326 = vst.msk [vmem:[#allocation2 + $0x151] sm:$0xff] %vm363_vm0, %v2294_v44  ;;  %v2109_v42 = vadd.f32 %v2108_v38, %v1996_v22  ;;  %v8690_v12 = vpack.i.bf16 %v12141_v16, %v12139_v25  ;;  %3662 = vmatmul.f32.gmra.mxu2 %v3391_v41  ;;  %v3296_v22 = vsel %vm1664_vm7, %v3264_v19, %v8493_v6  ;;  %v2001_v44 = vpop.f32.mrf.mxu3  ;;  %v2508_v41 = vrot.slane %v12166_v36, 1 }
 0x3a6   : > { %v2222_v2 = vadd.f32 %v2221_v46, %v2109_v42  ;;  %8651 = vrot.lane.b32.xlu1 %v8655_v7, %s9643_s12  ;;  %v8557_v43 = vpop.permute.xlu1 %8556  ;;  %7826 = vmatmul.msk.f32.gmra.mxu0 %vm363_vm0, %v2621_v47  ;;  %v8549_v46 = vunpack.i.h.bf16 %v12076_v4  ;;  %v12157_v7 = vpop.permute.xlu2 %8586  ;;  %v2506_v42 = vrot.slane %v12141_v16, 1 }
 0x3a7   : > { %v8558_v15 = vunpack.i.l.bf16 %v8557_v43  ;;  %8691 = vrot.lane.b32.xlu2 %v8690_v12, %s9641_s22  ;;  %v8537_v10 = vpop.permute.xlu0 %8536  ;;  %v8559_v17 = vunpack.i.h.bf16 %v8557_v43 }
 0x3a8   : > { %v2263_v61 = vmul.f32 0.2, %v2222_v2  ;;  %v8538_v35 = vunpack.i.l.bf16 %v8537_v10  ;;  %v3265_v38 = vsel %vm1631_vm6, %v3233_v32, %v8549_v46  ;;  %v8539_v5 = vunpack.i.h.bf16 %v8537_v10 }
 0x3a9   : > { %v3328_v47 = vsel %vm363_vm0, %v11616_v29, %v8558_v15  ;;  %8666 = vrot.lane.b32.xlu0 %v8660_v48, %s9643_s12  ;;  %v3329_v0 = vsel %vm363_vm0, %v11619_v20, %v8559_v17  ;;  %v2002_v20 = vadd.f32 %v11962_v14, %v2001_v44  ;;  %v8588_v46 = vunpack.i.l.bf16 %v12157_v7 }
 0x3aa   : > { %v2295_v45 = vmax.f32 %v2222_v2, %v2263_v61  ;;  %v3360_v62 = vsel %vm1631_vm6, %v3328_v47, %v8503_v8  ;;  %v8494_v2 = vunpack.i.h.bf16 %v12057_v56  ;;  %v3361_v19 = vsel %vm1631_vm6, %v3329_v0, %v8504_v37 }
 0x3ab   : > { %v2111_v63 = vpop.f32.mrf.mxu1  ;;  %3552 = vmatmul.f32.gmra.mxu3 %v3296_v22  ;;  %v3392_v4 = vsel %vm1664_vm7, %v3360_v62, %v8538_v35  ;;  %v3393_v10 = vsel %vm1664_vm7, %v3361_v19, %v8539_v5  ;;  %v2481_v22 = vrot.slane %v11923_v40, 1  ;;  %v2483_v62 = vrot.slane %v11925_v60, 1  ;;  %v9551_v60 = vld [vmem:[#allocation2 + $0x48] sm:$0xff] }
 0x3ac   : > { %2327 = vst.msk [vmem:[#allocation2 + $0x159] sm:$0xff] %vm363_vm0, %v2295_v45  ;;  %v2112_v29 = vadd.f32 %v2111_v63, %v1999_v26  ;;  %3665 = vmatmul.f32.gmra.mxu2 %v3392_v4  ;;  %v2227_v26 = vpop.f32.mrf.mxu2  ;;  %v3297_v15 = vsel %vm1664_vm7, %v3265_v38, %v8494_v2  ;;  %v2004_v47 = vpop.f32.mrf.mxu3  ;;  %v8533_v44 = vunpack.i.l.bf16 %v12127_v28  ;;  %v2480_v4 = vrot.slane %v11917_v55, 1 }
 0x3ad   : > { %v3330_v0 = vsel %vm363_vm0, %v11664_v58, %v8588_v46  ;;  %v2628_v37 = vrot.slane %v12141_v16, 2  ;;  %v12233_v58 = vsel %vm809_vm5, %v2481_v22, %v2483_v62  ;;  %v2627_v16 = vrot.slane %v12139_v25, 2 }
 0x3ae   : > { %v2225_v23 = vadd.f32 %v2224_v52, %v2112_v29  ;;  %8676 = vrot.lane.b32.xlu1 %v11932_v31, %s9641_s22  ;;  %v12172_v48 = vpop.permute.xlu1 %8561  ;;  %7827 = vmatmul.msk.f32.gmra.mxu0 %vm363_vm0, %v12109_v3  ;;  %v8700_v52 = vpack.i.bf16 %v11923_v40, %v11917_v55  ;;  %v2505_v3 = vrot.slane %v12139_v25, 1  ;;  %v12198_v6 = vpop.permute.xlu2 %8591  ;;  %v8523_v40 = vunpack.i.l.bf16 %v12117_v13 }
 0x3af   : > { %8696 = vrot.lane.b32.xlu2 %v8690_v12, %s9642_s11  ;;  %v12183_v43 = vpop.permute.xlu0 %8571  ;;  %v12196_v12 = vsel %vm809_vm5, %v2506_v42, %v2508_v41  ;;  %v8589_v19 = vunpack.i.h.bf16 %v12157_v7 }
 0x3b0   : > { %v2264_v31 = vmul.f32 0.2, %v2225_v23  ;;  %v12193_v56 = vsel %vm809_vm5, %v2505_v3, %v2506_v42  ;;  %v3234_v42 = vsel %vm363_vm0, %v9551_v60, %v8543_v59  ;;  %v8544_v3 = vunpack.i.h.bf16 %v12044_v33  ;;  %v9552_v59 = vld [vmem:[#allocation2 + $0x50] sm:$0xff] }
 0x3b1   : > { %8701 = vrot.lane.b32.xlu0 %v8700_v52, %s9641_s22  ;;  %v12206_v32 = vpack.i.bf16 %v12196_v12, %v12193_v56  ;;  %v12245_v33 = vsel %vm932_vm4, %v2627_v16, %v2628_v37  ;;  %v9553_v16 = vld [vmem:[#allocation2 + $0x60] sm:$0xff] }
 0x3b2   : > { %v2296_v8 = vmax.f32 %v2225_v23, %v2264_v31  ;;  %v12230_v31 = vsel %vm809_vm5, %v2480_v4, %v2481_v22  ;;  %v2630_v4 = vrot.slane %v12166_v36, 2 }
 0x3b3   : > { %v2114_v61 = vpop.f32.mrf.mxu1  ;;  %3555 = vmatmul.f32.gmra.mxu3 %v3297_v15  ;;  %v3362_v15 = vsel %vm1631_vm6, %v3330_v0, %v8533_v44  ;;  %v8735_v46 = vpack.i.bf16 %v12233_v58, %v12230_v31  ;;  %v3331_v44 = vsel %vm363_vm0, %v11667_v18, %v8589_v19  ;;  %v12276_v36 = vld [vmem:[#allocation2 + $0x158] sm:$0xff]  ;;  %v8563_v19 = vunpack.i.l.bf16 %v12172_v48 }
 0x3b4   : > { %2328 = vst.msk [vmem:[#allocation2 + $0x169] sm:$0xff] %vm363_vm0, %v2296_v8  ;;  %v2115_v35 = vadd.f32 %v2114_v61, %v2002_v20  ;;  %3668 = vmatmul.f32.gmra.mxu2 %v3393_v10  ;;  %v2230_v41 = vpop.f32.mrf.mxu2  ;;  %v2007_v7 = vpop.f32.mrf.mxu3  ;;  %v8534_v10 = vunpack.i.h.bf16 %v12127_v28 }
 0x3b5   : > { %v2008_v28 = vadd.f32 %v11962_v14, %v2007_v7 }
 0x3b6   : > { %v2228_v45 = vadd.f32 %v2227_v26, %v2115_v35  ;;  %8681 = vrot.lane.b32.xlu1 %v11863_v34, %s9642_s11  ;;  %v12210_v17 = vpop.permute.xlu1 %8566  ;;  %7828 = vmatmul.msk.f32.gmra.mxu0 %vm363_vm0, %v12112_v39  ;;  %v2005_v39 = vadd.f32 %v11962_v14, %v2004_v47  ;;  %v12242_v61 = vpop.permute.xlu2 %8596  ;;  %v2631_v14 = vsel %vm932_vm4, %v2628_v37, %v2630_v4 }
 0x3b7   : > { %8711 = vrot.lane.b32.xlu2 %v12206_v32, %s9643_s12  ;;  %v8577_v63 = vpop.permute.xlu0 %8576  ;;  %v8568_v38 = vunpack.i.l.bf16 %v12210_v17  ;;  %v8569_v22 = vunpack.i.h.bf16 %v12210_v17  ;;  %v3363_v17 = vsel %vm1631_vm6, %v3331_v44, %v8534_v10  ;;  %v8720_v44 = vpack.i.bf16 %v2631_v14, %v12245_v33 }
 0x3b8   : > { %v2265_v29 = vmul.f32 0.2, %v2228_v45  ;;  %v8578_v23 = vunpack.i.l.bf16 %v8577_v63 }
 0x3b9   : > { %8706 = vrot.lane.b32.xlu0 %v8700_v52, %s9642_s11  ;;  %v8579_v52 = vunpack.i.h.bf16 %v8577_v63  ;;  %v3394_v8 = vsel %vm1664_vm7, %v3362_v15, %v8568_v38  ;;  %v8524_v63 = vunpack.i.h.bf16 %v12117_v13  ;;  %v3395_v13 = vsel %vm1664_vm7, %v3363_v17, %v8569_v22 }
 0x3ba   : > { %v2297_v2 = vmax.f32 %v2228_v45, %v2265_v29  ;;  %v3266_v55 = vsel %vm1631_vm6, %v3234_v42, %v8578_v23  ;;  %v3235_v45 = vsel %vm363_vm0, %v9552_v59, %v8544_v3  ;;  %v8574_v59 = vunpack.i.h.bf16 %v12183_v43 }
 0x3bb   : > { %v2117_v26 = vpop.f32.mrf.mxu1  ;;  %v3298_v20 = vsel %vm1664_vm7, %v3266_v55, %v8523_v40  ;;  %v8573_v40 = vunpack.i.l.bf16 %v12183_v43  ;;  %v2511_v43 = vrot.slane %v12276_v36, 1 }
 0x3bc   : > { %2329 = vst.msk [vmem:[#allocation2 + $0x171] sm:$0xff] %vm363_vm0, %v2297_v2  ;;  %v2118_v5 = vadd.f32 %v2117_v26, %v2005_v39  ;;  %3558 = vmatmul.f32.gmra.mxu3 %v3298_v20  ;;  %3671 = vmatmul.f32.gmra.mxu2 %v3394_v8  ;;  %v2233_v0 = vpop.f32.mrf.mxu2  ;;  %v12270_v39 = vpop.f32.mrf.mxu0  ;;  %v2374_v26 = vld [vmem:[#allocation2 + $0x150] sm:$0xff]  ;;  %v2633_v8 = vrot.slane %v12276_v36, 2 }
 0x3bd   : > { %v8750_v15 = vpack.i.bf16 %v12276_v36, %v2374_v26  ;;  %v2632_v22 = vrot.slane %v2374_v26, 2  ;;  %v8599_v36 = vunpack.i.h.bf16 %v12242_v61 }
 0x3be   : > { %v2231_v35 = vadd.f32 %v2230_v41, %v2118_v5  ;;  %8686 = vrot.lane.b32.xlu1 %v11863_v34, %s9643_s12  ;;  %v12251_v25 = vpop.permute.xlu1 %8601  ;;  %7829 = vmatmul.msk.f32.gmra.mxu0 %vm363_vm0, %v12245_v33  ;;  %v3267_v34 = vsel %vm1631_vm6, %v3235_v45, %v8579_v52  ;;  %v8553_v41 = vunpack.i.l.bf16 %v12125_v49  ;;  %v12282_v2 = vpop.permute.xlu2 %8641  ;;  %v8598_v52 = vunpack.i.l.bf16 %v12242_v61 }
 0x3bf   : > { %8736 = vrot.lane.b32.xlu2 %v8735_v46, %s9641_s22  ;;  %v12257_v47 = vpop.permute.xlu0 %8581  ;;  %v3299_v23 = vsel %vm1664_vm7, %v3267_v34, %v8524_v63  ;;  %v2634_v4 = vsel %vm932_vm4, %v2632_v22, %v2633_v8  ;;  %v8564_v33 = vunpack.i.h.bf16 %v12172_v48  ;;  %v9556_v22 = vld [vmem:[#allocation2 + $0x80] sm:$0xff] }
 0x3c0   : > { %v2266_v62 = vmul.f32 0.2, %v2231_v35 }
 0x3c1   : > { %8731 = vrot.lane.b32.xlu0 %v8735_v46, %s9643_s12 }
 0x3c2   : > { %v2298_v29 = vmax.f32 %v2231_v35, %v2266_v62  ;;  %v2376_v62 = vld [vmem:[#allocation2 + $0x160] sm:$0x3] }
 0x3c3   : > { %v2120_v38 = vpop.f32.mrf.mxu1 }
 0x3c4   : > { %2330 = vst.msk [vmem:[#allocation2 + $0x181] sm:$0xff] %vm363_vm0, %v2298_v29  ;;  %v2121_v18 = vadd.f32 %v2120_v38, %v2008_v28  ;;  %3561 = vmatmul.f32.gmra.mxu3 %v3299_v23  ;;  %3674 = vmatmul.f32.gmra.mxu2 %v3395_v13  ;;  %v12302_v28 = vpop.f32.mrf.mxu0  ;;  %v2513_v29 = vrot.slane %v2376_v62, 1  ;;  %v9554_v38 = vld [vmem:[#allocation2 + $0x68] sm:$0xff] }
 0x3c5   : > { %v3237_v23 = vsel %vm363_vm0, %v9554_v38, %v8574_v59 }
 0x3c6   : > { %v2234_v60 = vadd.f32 %v2233_v0, %v2121_v18  ;;  %8716 = vrot.lane.b32.xlu1 %v12206_v32, %s9641_s22  ;;  %v8607_v42 = vpop.permute.xlu1 %8606  ;;  %7830 = vmatmul.msk.f32.gmra.mxu0 %vm363_vm0, %v2631_v14  ;;  %v3236_v32 = vsel %vm363_vm0, %v9553_v16, %v8573_v40  ;;  %v2510_v0 = vrot.slane %v2374_v26, 1  ;;  %v8554_v40 = vunpack.i.h.bf16 %v12125_v49  ;;  %v8647_v13 = vpop.permute.xlu2 %8646  ;;  %v12333_v26 = vld [vmem:[#allocation2 + $0x170] sm:$0xff] }
 0x3c7   : > { %v8608_v55 = vunpack.i.l.bf16 %v8607_v42  ;;  %8741 = vrot.lane.b32.xlu2 %v11951_v21, %s9642_s11  ;;  %v8617_v3 = vpop.permute.xlu0 %8616  ;;  %v8609_v34 = vunpack.i.h.bf16 %v8607_v42  ;;  %v8603_v18 = vunpack.i.l.bf16 %v12251_v25  ;;  %v2635_v14 = vrot.slane %v2376_v62, 2 }
 0x3c8   : > { %v2267_v37 = vmul.f32 0.2, %v2234_v60  ;;  %v8618_v20 = vunpack.i.l.bf16 %v8617_v3  ;;  %v8619_v35 = vunpack.i.h.bf16 %v8617_v3  ;;  %v12323_v48 = vsel %vm809_vm5, %v2511_v43, %v2513_v29 }
 0x3c9   : > { %v3268_v5 = vsel %vm1631_vm6, %v3236_v32, %v8608_v55  ;;  %8751 = vrot.lane.b32.xlu0 %v8750_v15, %s9641_s22  ;;  %v3269_v17 = vsel %vm1631_vm6, %v3237_v23, %v8609_v34  ;;  %v8648_v42 = vunpack.i.l.bf16 %v8647_v13  ;;  %v9555_v55 = vld [vmem:[#allocation2 + $0x78] sm:$0xff]  ;;  %v2486_v16 = vrot.slane %v11992_v51, 1 }
 0x3ca   : > { %v2299_v46 = vmax.f32 %v2234_v60, %v2267_v37  ;;  %v3300_v7 = vsel %vm1664_vm7, %v3268_v5, %v8553_v41  ;;  %v3332_v10 = vsel %vm363_vm0, %v11712_v57, %v8618_v20  ;;  %v3333_v57 = vsel %vm363_vm0, %v11715_v50, %v8619_v35  ;;  %v2379_v34 = vld [vmem:[#allocation2 + $0x178] sm:$0x3] }
 0x3cb   : > { %v3364_v45 = vsel %vm1631_vm6, %v3332_v10, %v8563_v19  ;;  %v3365_v50 = vsel %vm1631_vm6, %v3333_v57, %v8564_v33  ;;  %v3301_v60 = vsel %vm1664_vm7, %v3269_v17, %v8554_v40  ;;  %v2636_v41 = vsel %vm932_vm4, %v2633_v8, %v2635_v14  ;;  %v12380_v33 = vld [vmem:[#allocation2 + $0x180] sm:$0xff]  ;;  %v5082_v23 = vld [vmem:[%s16174_s6 + $0x118] sm:$0xff] }
 0x3cc   : > { %2331 = vst.msk [vmem:[#allocation2 + $0x189] sm:$0xff] %vm363_vm0, %v2299_v46  ;;  %3564 = vmatmul.f32.gmra.mxu3 %v3300_v7  ;;  %v3396_v63 = vsel %vm1664_vm7, %v3364_v45, %v8598_v52  ;;  %v3397_v49 = vsel %vm1664_vm7, %v3365_v50, %v8599_v36  ;;  %v3238_v3 = vsel %vm363_vm0, %v9555_v55, %v8603_v18  ;;  %v12336_v37 = vpop.f32.mrf.mxu0  ;;  %v8604_v32 = vunpack.i.h.bf16 %v12251_v25 }
 0x3cd   : > { %3677 = vmatmul.f32.gmra.mxu2 %v3396_v63  ;;  %v3270_v20 = vsel %vm1631_vm6, %v3238_v3, %v8648_v42  ;;  %v8583_v19 = vunpack.i.l.bf16 %v12257_v47  ;;  %v2638_v52 = vrot.slane %v12333_v26, 2  ;;  %v2488_v5 = vrot.slane %v11994_v54, 1 }
 0x3ce   : > { %8721 = vrot.lane.b32.xlu1 %v8720_v44, %s9642_s11  ;;  %7831 = vmatmul.msk.f32.gmra.mxu0 %vm363_vm0, %v2634_v4  ;;  %v2485_v8 = vrot.slane %v11983_v27, 1  ;;  %v8649_v7 = vunpack.i.h.bf16 %v8647_v13  ;;  %v8760_v10 = vpack.i.bf16 %v11992_v51, %v11983_v27  ;;  %v8780_v59 = vpack.i.bf16 %v2636_v41, %v2634_v4  ;;  %v5062_v13 = vld [vmem:[%s16174_s6 + $0x78] sm:$0xff] }
 0x3cf   : > { %8746 = vrot.lane.b32.xlu2 %v11951_v21, %s9643_s12  ;;  %v12320_v21 = vsel %vm809_vm5, %v2510_v0, %v2511_v43  ;;  %v3302_v46 = vsel %vm1664_vm7, %v3270_v20, %v8583_v19  ;;  %v12356_v54 = vsel %vm809_vm5, %v2486_v16, %v2488_v5  ;;  %v3239_v62 = vsel %vm363_vm0, %v9556_v22, %v8604_v32  ;;  %v16536_v20 = vld [vmem:[#allocation31_spill] sm:$0xff]  ;;  %v12430_v32 = vpop.permute.xlu2 %8671  ;;  %v12432_v19 = vpop.permute.xlu0 %8621 }
 0x3d0   : > { %v8775_v61 = vpack.i.bf16 %v12323_v48, %v12320_v21  ;;  %v12350_v25 = vsel %vm809_vm5, %v2485_v8, %v2486_v16  ;;  %v3271_v51 = vsel %vm1631_vm6, %v3239_v62, %v8649_v7  ;;  %v2640_v63 = vrot.slane %v2379_v34, 2  ;;  %5389 = vmatpush.msra.mxu2 %v5082_v23  ;;  %5151 = vmatpush.msra.mxu1 %v5062_v13  ;;  %v16537_v8 = vld [vmem:[#allocation32_spill] sm:$0xff]  ;;  %v12447_v7 = vpop.permute.xlu1 %8611 }
 0x3d1   : > { %8756 = vrot.lane.b32.xlu0 %v8750_v15, %s9642_s11  ;;  %v2377_v15 = vld [vmem:[#allocation2 + $0x168] sm:$0xff]  ;;  %v8795_v27 = vpack.i.bf16 %v12356_v54, %v12350_v25  ;;  %v2642_v17 = vrot.slane %v12380_v33, 2  ;;  %v8820_v18 = vpack.i.bf16 %v12036_v24, %v12029_v11  ;;  %v2516_v36 = vrot.slane %v12333_v26, 1  ;;  %v5077_v62 = vld [vmem:[%s16174_s6 + $0xf0] sm:$0xff] }
 0x3d2   : > { %v2637_v35 = vrot.slane %v2377_v15, 2  ;;  %v2641_v43 = vsel %vm932_vm4, %v2638_v52, %v2640_v63  ;;  %v2515_v42 = vrot.slane %v2377_v15, 1  ;;  %v2490_v16 = vrot.slane %v12029_v11, 1  ;;  %v16538_v11 = vld [vmem:[#allocation62_spill] sm:$0xff] }
 0x3d3   : > { %v12374_v29 = vld [vmem:[#allocation2 + $0x188] sm:$0xff]  ;;  %v12402_v50 = vld [vmem:[#allocation2 + $0x190] sm:$0x3] }
 0x3d4   : > { %3567 = vmatmul.f32.gmra.mxu3 %v3301_v60  ;;  %v12353_v45 = vsel %vm932_vm4, %v2637_v35, %v2638_v52  ;;  %v12367_v4 = vpop.f32.mrf.mxu0  ;;  %v2643_v38 = vrot.slane %v12374_v29, 2  ;;  %v2645_v14 = vrot.slane %v12402_v50, 2  ;;  %v2518_v60 = vrot.slane %v2379_v34, 1  ;;  %v5061_v34 = vld [vmem:[%s16174_s6 + $0x70] sm:$0xff] }
 0x3d5   : > { %3680 = vmatmul.f32.gmra.mxu2 %v3397_v49  ;;  %v8810_v49 = vpack.i.bf16 %v12333_v26, %v2377_v15  ;;  %v2493_v26 = vrot.slane %v16536_v20, 1  ;;  %v2496_v35 = vrot.slane %v16538_v11, 1  ;;  %5152 = vmatpush.msra.mxu1 %v5061_v34  ;;  %v16539_v20 = vld [vmem:[#allocation69_spill] sm:$0xff] }
 0x3d6   : > { %8726 = vrot.lane.b32.xlu1 %v8720_v44, %s9643_s12  ;;  %7832 = vmatmul.msk.f32.gmra.mxu0 %vm363_vm0, %v2636_v41  ;;  %v8584_v44 = vunpack.i.h.bf16 %v12257_v47  ;;  %v5078_v47 = vld [vmem:[%s16174_s6 + $0xf8] sm:$0xff]  ;;  %v12392_v40 = vsel %vm932_vm4, %v2642_v17, %v2643_v38  ;;  %v12411_v41 = vsel %vm932_vm4, %v2643_v38, %v2645_v14  ;;  %v12417_v55 = vsel %vm809_vm5, %v2516_v36, %v2518_v60  ;;  %v5060_v60 = vld [vmem:[%s16174_s6 + $0x68] sm:$0xff] }
 0x3d7   : > { %8776 = vrot.lane.b32.xlu2 %v8775_v61, %s9641_s22  ;;  %5264 = vmatpush.msra.mxu3 %v5078_v47  ;;  %16535 = vst [vmem:[#allocation36_spill] sm:$0xff] %v12417_v55 }
 0x3d8   : > { %v3303_v57 = vsel %vm1664_vm7, %v3271_v51, %v8584_v44  ;;  %5153 = vmatpush.msra.mxu1 %v5060_v60 }
 0x3d9   : > { %8771 = vrot.lane.b32.xlu0 %v8775_v61, %s9643_s12  ;;  %v12414_v61 = vsel %vm809_vm5, %v2515_v42, %v2516_v36  ;;  %5265 = vmatpush.msra.mxu3 %v5077_v62  ;;  %v5076_v36 = vld [vmem:[%s16174_s6 + $0xe8] sm:$0xff]  ;;  %v2523_v62 = vrot.slane %v12402_v50, 1 }
 0x3da   : > { %16534 = vst [vmem:[#allocation63_spill] sm:$0xff] %v12414_v61  ;;  %v8835_v15 = vpack.i.bf16 %v12417_v55, %v12414_v61 }
 0x3db   : > { %5266 = vmatpush.msra.mxu3 %v5076_v36 }
 0x3dc   : > { %3570 = vmatmul.f32.gmra.mxu3 %v3302_v46  ;;  %v12389_v0 = vpop.f32.mrf.mxu0  ;;  %v2495_v46 = vrot.slane %v16537_v8, 1 }
 0x3de   : > { %8761 = vrot.lane.b32.xlu1 %v8760_v10, %s9641_s22  ;;  %7833 = vmatmul.msk.f32.gmra.mxu0 %vm363_vm0, %v12353_v45 }
 0x3df   : > { %8781 = vrot.lane.b32.xlu2 %v8780_v59, %s9642_s11 }
 0x3e1   : > { %8796 = vrot.lane.b32.xlu0 %v8795_v27, %s9641_s22 }
 0x3e4   : > { %3573 = vmatmul.f32.gmra.mxu3 %v3303_v57  ;;  %v12419_v3 = vpop.f32.mrf.mxu0  ;;  %v12480_v57 = vld [vmem:[%s16173_s5] ss:$0 sm:$0xff] }
 0x3e6   : > { %8766 = vrot.lane.b32.xlu1 %v8760_v10, %s9642_s11  ;;  %7834 = vmatmul.msk.f32.gmra.mxu0 %vm363_vm0, %v2641_v43  ;;  %v8840_v10 = vpack.i.bf16 %v2641_v43, %v12353_v45 }
 0x3e7   : > { %8786 = vrot.lane.b32.xlu2 %v8780_v59, %s9643_s12  ;;  %v2498_v59 = vrot.slane %v12080_v1, 1  ;;  %v12466_v1 = vpop.permute.xlu0 %8626 }
 0x3e9   : > { %8801 = vrot.lane.b32.xlu0 %v12010_v30, %s9642_s11  ;;  %v12464_v51 = vsel %vm809_vm5, %v2496_v35, %v2498_v59  ;;  %v8900_v59 = vpack.i.bf16 %v12374_v29, %v12380_v33 }
 0x3ee   : > { %8791 = vrot.lane.b32.xlu1 %v8795_v27, %s9643_s12  ;;  %7835 = vmatmul.msk.f32.gmra.mxu0 %vm363_vm0, %v12392_v40  ;;  %v12461_v27 = vsel %vm809_vm5, %v2495_v46, %v2496_v35 }
 0x3ef   : > { %8821 = vrot.lane.b32.xlu2 %v8820_v18, %s9641_s22  ;;  %v8885_v45 = vpack.i.bf16 %v12464_v51, %v12461_v27 }
 0x3f1   : > { %8806 = vrot.lane.b32.xlu0 %v12010_v30, %s9643_s12  ;;  %v2491_v30 = vrot.slane %v12036_v24, 1 }
 0x3f3   : > { %v12436_v52 = vsel %vm809_vm5, %v2490_v16, %v2491_v30  ;;  %v12439_v24 = vsel %vm809_vm5, %v2491_v30, %v2493_v26 }
 0x3f4   : > { %v8850_v5 = vpack.i.bf16 %v12439_v24, %v12436_v52 }
 0x3f6   : > { %8811 = vrot.lane.b32.xlu1 %v8810_v49, %s9641_s22  ;;  %7836 = vmatmul.msk.f32.gmra.mxu0 %vm363_vm0, %v12411_v41 }
 0x3f7   : > { %8826 = vrot.lane.b32.xlu2 %v8820_v18, %s9642_s11  ;;  %v8870_v18 = vpack.i.bf16 %v16538_v11, %v16537_v8 }
 0x3f9   : > { %8836 = vrot.lane.b32.xlu0 %v8835_v15, %s9641_s22 }
 0x3fe   : > { %8816 = vrot.lane.b32.xlu1 %v8810_v49, %s9642_s11 }
 0x3ff   : > { %8851 = vrot.lane.b32.xlu2 %v8850_v5, %s9643_s12 }
 0x400   : > { %v3654_v47 = vpop.f32.mrf.mxu2 }
 0x401   : > { %v12451_v22 = vpop.permute.xlu2 %8691  ;;  %8841 = vrot.lane.b32.xlu0 %v8840_v10, %s9642_s11 }
 0x406   : > { %8831 = vrot.lane.b32.xlu1 %v8835_v15, %s9643_s12 }
 0x407   : > { %8886 = vrot.lane.b32.xlu2 %v8885_v45, %s9641_s22 }
 0x408   : > { %v12472_v44 = vpop.permute.xlu1 %8631 }
 0x409   : > { %v12474_v63 = vpop.permute.xlu2 %8696  ;;  %8846 = vrot.lane.b32.xlu0 %v8840_v10, %s9643_s12 }
 0x40b   : > { %v12482_v43 = vpop.permute.xlu0 %8656 }
 0x40e   : > { %8856 = vrot.lane.b32.xlu1 %v8850_v5, %s9641_s22  ;;  %v3541_v38 = vpop.f32.mrf.mxu3  ;;  %v3657_v5 = vpop.f32.mrf.mxu2 }
 0x40f   : > { %v3542_v23 = vadd.f32 %v12480_v57, %v3541_v38  ;;  %8891 = vrot.lane.b32.xlu2 %v12114_v9, %s9642_s11 }
 0x410   : > { %v12488_v17 = vpop.permute.xlu1 %8636 }
 0x411   : > { %v3655_v13 = vadd.f32 %v3654_v47, %v3542_v23  ;;  %v12492_v14 = vpop.permute.xlu2 %8711  ;;  %8871 = vrot.lane.b32.xlu0 %v8870_v18, %s9641_s22 }
 0x413   : > { %v3768_v42 = vadd.f32 %v12270_v39, %v3655_v13  ;;  %v12502_v49 = vpop.permute.xlu0 %8661 }
 0x415   : > { %v3863_v30 = vmul.f32 0.2, %v3768_v42 }
 0x416   : > { %8861 = vrot.lane.b32.xlu1 %v16539_v20, %s9642_s11  ;;  %v3544_v26 = vpop.f32.mrf.mxu3 }
 0x417   : > { %v3895_v15 = vmax.f32 %v3768_v42, %v3863_v30  ;;  %v3545_v16 = vadd.f32 %v12480_v57, %v3544_v26  ;;  %8896 = vrot.lane.b32.xlu2 %v12114_v9, %s9643_s12  ;;  %v2521_v9 = vrot.slane %v12374_v29, 1  ;;  %v5075_v42 = vld [vmem:[%s16174_s6 + $0xe0] sm:$0xff]  ;;  %v8593_v30 = vunpack.i.l.bf16 %v12198_v6 }
 0x418   : > { %v12509_v8 = vpop.permute.xlu1 %8651  ;;  %5267 = vmatpush.msra.mxu3 %v5075_v42  ;;  %v8628_v26 = vunpack.i.l.bf16 %v12466_v1 }
 0x419   : > { %3927 = vst.msk [vmem:[#allocation2 + $0x19] sm:$0xff] %vm363_vm0, %v3895_v15  ;;  %v3658_v39 = vadd.f32 %v3657_v5, %v3545_v16  ;;  %v12512_v46 = vpop.permute.xlu2 %8736  ;;  %8876 = vrot.lane.b32.xlu0 %v8870_v18, %s9642_s11  ;;  %v12534_v60 = vsel %vm809_vm5, %v2521_v9, %v2523_v62  ;;  %v16542_v16 = vld [vmem:[#allocation20_spill] sm:$0xff] }
 0x41a   : > { %16541 = vst [vmem:[#allocation24_spill] sm:$0xff] %v12534_v60 }
 0x41b   : > { %v3771_v11 = vadd.f32 %v12302_v28, %v3658_v39  ;;  %v12516_v35 = vpop.permute.xlu0 %8666  ;;  %v2520_v28 = vrot.slane %v12380_v33, 1  ;;  %v5059_v33 = vld [vmem:[%s16174_s6 + $0x60] sm:$0xff] }
 0x41c   : > { %5154 = vmatpush.msra.mxu1 %v5059_v33 }
 0x41d   : > { %v3864_v10 = vmul.f32 0.2, %v3771_v11  ;;  %v12531_v50 = vsel %vm809_vm5, %v2520_v28, %v2521_v9 }
 0x41e   : > { %8866 = vrot.lane.b32.xlu1 %v16539_v20, %s9643_s12  ;;  %v3547_v34 = vpop.f32.mrf.mxu3  ;;  %16540 = vst [vmem:[#allocation72_spill] sm:$0xff] %v12531_v50 }
 0x41f   : > { %v3896_v47 = vmax.f32 %v3771_v11, %v3864_v10  ;;  %v3548_v38 = vadd.f32 %v12480_v57, %v3547_v34  ;;  %8901 = vrot.lane.b32.xlu2 %v8900_v59, %s9641_s22  ;;  %v3660_v23 = vpop.f32.mrf.mxu2  ;;  %v8910_v11 = vpack.i.bf16 %v12534_v60, %v12531_v50  ;;  %v16543_v34 = vld [vmem:[#allocation19_spill] sm:$0xff]  ;;  %v16544_v60 = vld [vmem:[#allocation30_spill] sm:$0xff] }
 0x420   : > { %v8677_v18 = vpop.permute.xlu1 %8676 }
 0x421   : > { %3928 = vst.msk [vmem:[#allocation2 + $0x21] sm:$0xff] %vm363_vm0, %v3896_v47  ;;  %v3661_v13 = vadd.f32 %v3660_v23, %v3548_v38  ;;  %v8678_v36 = vunpack.i.l.bf16 %v8677_v18  ;;  %v12528_v29 = vpop.permute.xlu2 %8741  ;;  %v8679_v20 = vunpack.i.h.bf16 %v8677_v18  ;;  %8881 = vrot.lane.b32.xlu0 %v8885_v45, %s9643_s12  ;;  %v8594_v47 = vunpack.i.h.bf16 %v12198_v6 }
 0x422   : > { %v8643_v38 = vunpack.i.l.bf16 %v12282_v2  ;;  %v8629_v6 = vunpack.i.h.bf16 %v12466_v1 }
 0x423   : > { %v3774_v15 = vadd.f32 %v12336_v37, %v3661_v13  ;;  %v3334_v5 = vsel %vm363_vm0, %v16542_v16, %v8678_v36  ;;  %v12548_v39 = vpop.permute.xlu0 %8701  ;;  %v3335_v37 = vsel %vm363_vm0, %v16543_v34, %v8679_v20  ;;  %v9557_v16 = vld [vmem:[#allocation2 + $0x90] sm:$0xff] }
 0x424   : > { %v3366_v10 = vsel %vm1631_vm6, %v3334_v5, %v8593_v30  ;;  %v3367_v30 = vsel %vm1631_vm6, %v3335_v37, %v8594_v47  ;;  %v8915_v5 = vpack.i.bf16 %v12411_v41, %v12392_v40  ;;  %v8613_v47 = vunpack.i.l.bf16 %v12447_v7 }
 0x425   : > { %v3865_v9 = vmul.f32 0.2, %v3774_v15  ;;  %v3398_v62 = vsel %vm1664_vm7, %v3366_v10, %v8628_v26  ;;  %v8644_v40 = vunpack.i.h.bf16 %v12282_v2 }
 0x426   : > { %8911 = vrot.lane.b32.xlu1 %v8910_v11, %s9641_s22  ;;  %v3550_v45 = vpop.f32.mrf.mxu3  ;;  %3683 = vmatmul.f32.gmra.mxu2 %v3398_v62  ;;  %v8738_v11 = vunpack.i.l.bf16 %v12512_v46 }
 0x427   : > { %v3897_v28 = vmax.f32 %v3774_v15, %v3865_v9  ;;  %v3551_v23 = vadd.f32 %v12480_v57, %v3550_v45  ;;  %8906 = vrot.lane.b32.xlu2 %v8900_v59, %s9642_s11  ;;  %v3663_v18 = vpop.f32.mrf.mxu2  ;;  %v3962_v15 = vld [vmem:[#allocation2 + $0x18] sm:$0xff]  ;;  %v3240_v59 = vsel %vm363_vm0, %v9557_v16, %v8643_v38  ;;  %v3399_v9 = vsel %vm1664_vm7, %v3367_v30, %v8629_v6 }
 0x428   : > { %v12561_v13 = vpop.permute.xlu1 %8681  ;;  %v3963_v33 = vld [vmem:[#allocation2 + $0x20] sm:$0xff]  ;;  %v3964_v20 = vld [vmem:[#allocation2 + $0x28] sm:$0x3]  ;;  %v4194_v38 = vrot.slane %v3962_v15, 2 }
 0x429   : > { %3929 = vst.msk [vmem:[#allocation2 + $0x31] sm:$0xff] %vm363_vm0, %v3897_v28  ;;  %v3664_v36 = vadd.f32 %v3663_v18, %v3551_v23  ;;  %v12564_v42 = vpop.permute.xlu2 %8746  ;;  %v4195_v62 = vrot.slane %v3963_v33, 2  ;;  %v8920_v37 = vpack.i.bf16 %v3963_v33, %v3962_v15  ;;  %v4197_v1 = vrot.slane %v3964_v20, 2 }
 0x42a   : > { %v4073_v28 = vrot.slane %v3963_v33, 1  ;;  %v4075_v23 = vrot.slane %v3964_v20, 1  ;;  %v3336_v33 = vsel %vm363_vm0, %v16544_v60, %v8738_v11  ;;  %v5074_v60 = vld [vmem:[%s16174_s6 + $0xd8] sm:$0xff]  ;;  %v5081_v11 = vld [vmem:[%s16174_s6 + $0x110] sm:$0xff] }
 0x42b   : > { %v3777_v26 = vadd.f32 %v12367_v4, %v3664_v36  ;;  %v8707_v10 = vpop.permute.xlu0 %8706  ;;  %5268 = vmatpush.msra.mxu3 %v5074_v60  ;;  %5390 = vmatpush.msra.mxu2 %v5081_v11  ;;  %v16548_v11 = vld [vmem:[#allocation21_spill] sm:$0xff] }
 0x42c   : > { %v8708_v34 = vunpack.i.l.bf16 %v8707_v10  ;;  %v8709_v2 = vunpack.i.h.bf16 %v8707_v10  ;;  %v5058_v10 = vld [vmem:[%s16174_s6 + $0x58] sm:$0xff] }
 0x42d   : > { %v3866_v45 = vmul.f32 0.2, %v3777_v26  ;;  %5155 = vmatpush.msra.mxu1 %v5058_v10 }
 0x42e   : > { %8916 = vrot.lane.b32.xlu1 %v8915_v5, %s9643_s12  ;;  %v3553_v4 = vpop.f32.mrf.mxu3  ;;  %3686 = vmatmul.f32.gmra.mxu2 %v3399_v9  ;;  %v3272_v36 = vsel %vm1631_vm6, %v3240_v59, %v8708_v34  ;;  %v4196_v5 = vsel %vm932_vm4, %v4194_v38, %v4195_v62  ;;  %v4072_v9 = vrot.slane %v3962_v15, 1  ;;  %v4198_v59 = vsel %vm932_vm4, %v4195_v62, %v4197_v1 }
 0x42f   : > { %v3898_v41 = vmax.f32 %v3777_v26, %v3866_v45  ;;  %8921 = vrot.lane.b32.xlu2 %v8920_v37, %s9641_s22  ;;  %v3554_v18 = vadd.f32 %v12480_v57, %v3553_v4  ;;  %v3666_v30 = vpop.f32.mrf.mxu2  ;;  %v3304_v16 = vsel %vm1664_vm7, %v3272_v36, %v8613_v47  ;;  %v8623_v34 = vunpack.i.l.bf16 %v12432_v19 }
 0x430   : > { %v12580_v6 = vpop.permute.xlu1 %8686  ;;  %3576 = vmatmul.f32.gmra.mxu3 %v3304_v16  ;;  %v12593_v37 = vsel %vm809_vm5, %v4072_v9, %v4073_v28  ;;  %v12596_v15 = vsel %vm809_vm5, %v4073_v28, %v4075_v23  ;;  %v8739_v1 = vunpack.i.h.bf16 %v12512_v46  ;;  %v8930_v4 = vpack.i.bf16 %v4198_v59, %v4196_v5  ;;  %v9558_v28 = vld [vmem:[#allocation2 + $0x98] sm:$0xff]  ;;  %v3965_v5 = vld [vmem:[#allocation2 + $0x30] sm:$0xff] }
 0x431   : > { %3930 = vst.msk [vmem:[#allocation2 + $0x39] sm:$0xff] %vm363_vm0, %v3898_v41  ;;  %v3667_v20 = vadd.f32 %v3666_v30, %v3554_v18  ;;  %v8688_v26 = vunpack.i.l.bf16 %v12580_v6  ;;  %v12588_v45 = vpop.permute.xlu2 %8776  ;;  %v3368_v38 = vsel %vm1631_vm6, %v3336_v33, %v8623_v34  ;;  %v3241_v23 = vsel %vm363_vm0, %v9558_v28, %v8644_v40 }
 0x432   : > { %16545 = vst [vmem:[#allocation73_spill] sm:$0xff] %v12593_v37  ;;  %v8925_v18 = vpack.i.bf16 %v12596_v15, %v12593_v37  ;;  %v8614_v30 = vunpack.i.h.bf16 %v12447_v7  ;;  %v8689_v7 = vunpack.i.h.bf16 %v12580_v6  ;;  %v3337_v10 = vsel %vm363_vm0, %v16548_v11, %v8739_v1  ;;  %v3785_v1 = vpop.f32.mrf.mxu0  ;;  %v5071_v37 = vld [vmem:[%s16174_s6 + $0xc0] sm:$0xff] }
 0x433   : > { %16546 = vst [vmem:[#allocation25_spill] sm:$0xff] %v12596_v15  ;;  %v3780_v62 = vadd.f32 %v12389_v0, %v3667_v20  ;;  %v12609_v47 = vpop.permute.xlu0 %8731  ;;  %v3400_v36 = vsel %vm1664_vm7, %v3368_v38, %v8688_v26  ;;  %v3273_v0 = vsel %vm1631_vm6, %v3241_v23, %v8709_v2  ;;  %v4077_v38 = vrot.slane %v3965_v5, 1 }
 0x434   : > { %v3305_v20 = vsel %vm1664_vm7, %v3273_v0, %v8614_v30 }
 0x435   : > { %v3867_v41 = vmul.f32 0.2, %v3780_v62 }
 0x436   : > { %8931 = vrot.lane.b32.xlu1 %v8930_v4, %s9642_s11  ;;  %v3556_v46 = vpop.f32.mrf.mxu3  ;;  %3689 = vmatmul.f32.gmra.mxu2 %v3400_v36 }
 0x437   : > { %v3899_v16 = vmax.f32 %v3780_v62, %v3867_v41  ;;  %8926 = vrot.lane.b32.xlu2 %v8925_v18, %s9643_s12  ;;  %v3557_v40 = vadd.f32 %v12480_v57, %v3556_v46  ;;  %v3669_v9 = vpop.f32.mrf.mxu2  ;;  %v8624_v62 = vunpack.i.h.bf16 %v12432_v19 }
 0x438   : > { %v12621_v33 = vpop.permute.xlu1 %8716  ;;  %v3966_v26 = vld [vmem:[#allocation2 + $0x38] sm:$0xff]  ;;  %v3967_v59 = vld [vmem:[#allocation2 + $0x40] sm:$0x3]  ;;  %3579 = vmatmul.f32.gmra.mxu3 %v3305_v20 }
 0x439   : > { %3931 = vst.msk [vmem:[#allocation2 + $0x49] sm:$0xff] %vm363_vm0, %v3899_v16  ;;  %v3670_v2 = vadd.f32 %v3669_v9, %v3557_v40  ;;  %v12626_v34 = vpop.permute.xlu2 %8781  ;;  %v8940_v60 = vpack.i.bf16 %v3966_v26, %v3965_v5  ;;  %v4078_v28 = vrot.slane %v3966_v26, 1  ;;  %v4080_v23 = vrot.slane %v3967_v59, 1 }
 0x43a   : > { %16547 = vst [vmem:[#allocation7_spill] sm:$0xff] %v12626_v34  ;;  %v3369_v6 = vsel %vm1631_vm6, %v3337_v10, %v8624_v62  ;;  %v4202_v16 = vrot.slane %v3967_v59, 2  ;;  %v4199_v10 = vrot.slane %v3965_v5, 2  ;;  %v5073_v59 = vld [vmem:[%s16174_s6 + $0xd0] sm:$0xff] }
 0x43b   : > { %v3783_v41 = vadd.f32 %v12419_v3, %v3670_v2  ;;  %8941 = vrot.lane.b32.xlu0 %v8940_v60, %s9641_s22  ;;  %v12633_v18 = vpop.permute.xlu0 %8751  ;;  %v12637_v36 = vsel %vm809_vm5, %v4077_v38, %v4078_v28  ;;  %v12640_v0 = vsel %vm809_vm5, %v4078_v28, %v4080_v23  ;;  %v3401_v19 = vsel %vm1664_vm7, %v3369_v6, %v8689_v7  ;;  %v5057_v38 = vld [vmem:[%s16174_s6 + $0x50] sm:$0xff]  ;;  %v3788_v6 = vpop.f32.mrf.mxu0 }
 0x43c   : > { %16549 = vst [vmem:[#allocation40_spill] sm:$0xff] %v12637_v36  ;;  %v8955_v46 = vpack.i.bf16 %v12640_v0, %v12637_v36  ;;  %v4200_v3 = vrot.slane %v3966_v26, 2  ;;  %5269 = vmatpush.msra.mxu3 %v5073_v59  ;;  %5156 = vmatpush.msra.mxu1 %v5057_v38 }
 0x43d   : > { %16550 = vst [vmem:[#allocation23_spill] sm:$0xff] %v12640_v0  ;;  %v3868_v30 = vmul.f32 0.2, %v3783_v41  ;;  %v5056_v0 = vld [vmem:[%s16174_s6 + $0x48] sm:$0xff] }
 0x43e   : > { %8936 = vrot.lane.b32.xlu1 %v8930_v4, %s9643_s12  ;;  %3692 = vmatmul.f32.gmra.mxu2 %v3401_v19  ;;  %v12654_v4 = vsel %vm932_vm4, %v4199_v10, %v4200_v3  ;;  %v12657_v26 = vsel %vm932_vm4, %v4200_v3, %v4202_v16 }
 0x43f   : > { %v3900_v40 = vmax.f32 %v3783_v41, %v3868_v30  ;;  %8956 = vrot.lane.b32.xlu2 %v8955_v46, %s9641_s22  ;;  %v3559_v9 = vpop.f32.mrf.mxu3  ;;  %v3672_v2 = vpop.f32.mrf.mxu2  ;;  %16551 = vst [vmem:[#allocation41_spill] sm:$0xff] %v12654_v4  ;;  %v8960_v23 = vpack.i.bf16 %v12657_v26, %v12654_v4  ;;  %5157 = vmatpush.msra.mxu1 %v5056_v0 }
 0x440   : > { %v3560_v20 = vadd.f32 %v12480_v57, %v3559_v9  ;;  %v12648_v11 = vpop.permute.xlu1 %8721  ;;  %16552 = vst [vmem:[#allocation66_spill] sm:$0xff] %v12657_v26  ;;  %v3968_v19 = vld [vmem:[#allocation2 + $0x48] sm:$0xff] }
 0x441   : > { %3932 = vst.msk [vmem:[#allocation2 + $0x51] sm:$0xff] %vm363_vm0, %v3900_v40  ;;  %v12651_v7 = vpop.permute.xlu2 %8786 }
 0x442   : > { %v3673_v62 = vadd.f32 %v3672_v2, %v3560_v20  ;;  %v5072_v20 = vld [vmem:[%s16174_s6 + $0xc8] sm:$0xff] }
 0x443   : > { %8946 = vrot.lane.b32.xlu0 %v8940_v60, %s9642_s11  ;;  %v12666_v28 = vpop.permute.xlu0 %8756  ;;  %5270 = vmatpush.msra.mxu3 %v5072_v20  ;;  %v3791_v36 = vpop.f32.mrf.mxu0 }
 0x444   : > { %v3786_v5 = vadd.f32 %v3785_v1, %v3673_v62 }
 0x445   : > { %5271 = vmatpush.msra.mxu3 %v5071_v37 }
 0x446   : > { %v3869_v41 = vmul.f32 0.2, %v3786_v5 }
 0x447   : > { %8961 = vrot.lane.b32.xlu2 %v8960_v23, %s9642_s11  ;;  %v3562_v30 = vpop.f32.mrf.mxu3  ;;  %v3675_v40 = vpop.f32.mrf.mxu2 }
 0x448   : > { %v3901_v3 = vmax.f32 %v3786_v5, %v3869_v41  ;;  %v3563_v16 = vadd.f32 %v12480_v57, %v3562_v30  ;;  %v12672_v9 = vpop.permute.xlu1 %8726  ;;  %v3969_v60 = vld [vmem:[#allocation2 + $0x50] sm:$0xff]  ;;  %v3970_v1 = vld [vmem:[#allocation2 + $0x58] sm:$0x3]  ;;  %v4082_v30 = vrot.slane %v3968_v19, 1 }
 0x449   : > { %v12677_v2 = vpop.permute.xlu2 %8821  ;;  %v8970_v10 = vpack.i.bf16 %v3969_v60, %v3968_v19  ;;  %v4083_v59 = vrot.slane %v3969_v60, 1  ;;  %v4085_v38 = vrot.slane %v3970_v1, 1  ;;  %v4207_v0 = vrot.slane %v3970_v1, 2 }
 0x44a   : > { %3933 = vst.msk [vmem:[#allocation2 + $0x61] sm:$0xff] %vm363_vm0, %v3901_v3  ;;  %v3676_v62 = vadd.f32 %v3675_v40, %v3563_v16 }
 0x44b   : > { %8951 = vrot.lane.b32.xlu0 %v8955_v46, %s9643_s12  ;;  %8971 = vrot.lane.b32.xlu1 %v8970_v10, %s9641_s22  ;;  %v12682_v41 = vpop.permute.xlu0 %8771  ;;  %v12688_v20 = vsel %vm809_vm5, %v4082_v30, %v4083_v59  ;;  %v12691_v3 = vsel %vm809_vm5, %v4083_v59, %v4085_v38  ;;  %v4205_v38 = vrot.slane %v3969_v60, 2 }
 0x44c   : > { %v3789_v5 = vadd.f32 %v3788_v6, %v3676_v62  ;;  %16553 = vst [vmem:[#allocation46_spill] sm:$0xff] %v12688_v20  ;;  %v8985_v30 = vpack.i.bf16 %v12691_v3, %v12688_v20 }
 0x44d   : > { %16554 = vst [vmem:[#allocation67_spill] sm:$0xff] %v12691_v3  ;;  %v8683_v3 = vunpack.i.l.bf16 %v12561_v13  ;;  %v12713_v1 = vsel %vm932_vm4, %v4205_v38, %v4207_v0 }
 0x44e   : > { %v3870_v26 = vmul.f32 0.2, %v3789_v5  ;;  %16555 = vst [vmem:[#allocation47_spill] sm:$0xff] %v12713_v1 }
 0x44f   : > { %8966 = vrot.lane.b32.xlu2 %v8960_v23, %s9643_s12  ;;  %v3565_v46 = vpop.f32.mrf.mxu3 }
 0x450   : > { %v3902_v16 = vmax.f32 %v3789_v5, %v3870_v26  ;;  %v3566_v6 = vadd.f32 %v12480_v57, %v3565_v46  ;;  %v3678_v40 = vpop.f32.mrf.mxu2  ;;  %v12695_v62 = vpop.permute.xlu1 %8761  ;;  %v4204_v5 = vrot.slane %v3968_v19, 2  ;;  %v8703_v46 = vunpack.i.l.bf16 %v12548_v39 }
 0x451   : > { %v12697_v4 = vpop.permute.xlu2 %8826  ;;  %v3971_v0 = vld [vmem:[#allocation2 + $0x60] sm:$0xff] }
 0x452   : > { %3934 = vst.msk [vmem:[#allocation2 + $0x69] sm:$0xff] %vm363_vm0, %v3902_v16  ;;  %v3679_v59 = vadd.f32 %v3678_v40, %v3566_v6  ;;  %v12710_v60 = vsel %vm932_vm4, %v4204_v5, %v4205_v38  ;;  %v8673_v40 = vunpack.i.l.bf16 %v12430_v32 }
 0x453   : > { %8976 = vrot.lane.b32.xlu1 %v8970_v10, %s9642_s11  ;;  %8986 = vrot.lane.b32.xlu0 %v8985_v30, %s9641_s22  ;;  %v8797_v23 = vpop.permute.xlu0 %8796  ;;  %v8990_v61 = vpack.i.bf16 %v12713_v1, %v12710_v60 }
 0x454   : > { %v3792_v26 = vadd.f32 %v3791_v36, %v3679_v59  ;;  %v8798_v15 = vunpack.i.l.bf16 %v8797_v23  ;;  %v8748_v36 = vunpack.i.l.bf16 %v12564_v42  ;;  %v8799_v19 = vunpack.i.h.bf16 %v8797_v23 }
 0x456   : > { %v3871_v16 = vmul.f32 0.2, %v3792_v26  ;;  %v3338_v6 = vsel %vm363_vm0, %v12230_v31, %v8798_v15  ;;  %v8704_v15 = vunpack.i.h.bf16 %v12548_v39 }
 0x457   : > { %v3568_v10 = vpop.f32.mrf.mxu3  ;;  %v3370_v5 = vsel %vm1631_vm6, %v3338_v6, %v8683_v3  ;;  %v3794_v6 = vpop.f32.mrf.mxu0 }
 0x458   : > { %v3903_v59 = vmax.f32 %v3792_v26, %v3871_v16  ;;  %v3569_v20 = vadd.f32 %v12480_v57, %v3568_v10  ;;  %v3681_v50 = vpop.f32.mrf.mxu2  ;;  %v8767_v55 = vpop.permute.xlu1 %8766  ;;  %v3402_v37 = vsel %vm1664_vm7, %v3370_v5, %v8748_v36  ;;  %v9559_v10 = vld [vmem:[#allocation2 + $0xa8] sm:$0xff]  ;;  %v3339_v5 = vsel %vm363_vm0, %v12233_v58, %v8799_v19 }
 0x459   : > { %v8768_v34 = vunpack.i.l.bf16 %v8767_v55  ;;  %v12721_v38 = vpop.permute.xlu2 %8851  ;;  %v3972_v23 = vld [vmem:[#allocation2 + $0x68] sm:$0xff]  ;;  %v3973_v31 = vld [vmem:[#allocation2 + $0x70] sm:$0x3]  ;;  %3695 = vmatmul.f32.gmra.mxu2 %v3402_v37  ;;  %v3242_v3 = vsel %vm363_vm0, %v9559_v10, %v8703_v46  ;;  %v4087_v37 = vrot.slane %v3971_v0, 1  ;;  %v8769_v10 = vunpack.i.h.bf16 %v8767_v55 }
 0x45a   : > { %3935 = vst.msk [vmem:[#allocation2 + $0x79] sm:$0xff] %vm363_vm0, %v3903_v59  ;;  %v3682_v26 = vadd.f32 %v3681_v50, %v3569_v20  ;;  %v9000_v16 = vpack.i.bf16 %v3972_v23, %v3971_v0  ;;  %v4088_v1 = vrot.slane %v3972_v23, 1  ;;  %v4090_v39 = vrot.slane %v3973_v31, 1 }
 0x45b   : > { %8991 = vrot.lane.b32.xlu0 %v8990_v61, %s9642_s11  ;;  %8981 = vrot.lane.b32.xlu1 %v8985_v30, %s9643_s12  ;;  %v3274_v36 = vsel %vm1631_vm6, %v3242_v3, %v8768_v34  ;;  %v8684_v59 = vunpack.i.h.bf16 %v12561_v13  ;;  %v12735_v20 = vpop.permute.xlu0 %8801  ;;  %v5055_v34 = vld [vmem:[%s16174_s6 + $0x40] sm:$0xff] }
 0x45c   : > { %v3795_v50 = vadd.f32 %v3794_v6, %v3682_v26  ;;  %9001 = vrot.lane.b32.xlu2 %v9000_v16, %s9641_s22  ;;  %v3306_v46 = vsel %vm1664_vm7, %v3274_v36, %v8673_v40  ;;  %v12744_v19 = vsel %vm809_vm5, %v4087_v37, %v4088_v1  ;;  %v12747_v13 = vsel %vm809_vm5, %v4088_v1, %v4090_v39  ;;  %v9560_v6 = vld [vmem:[#allocation2 + $0xb0] sm:$0xff] }
 0x45d   : > { %3582 = vmatmul.f32.gmra.mxu3 %v3306_v46  ;;  %v3371_v58 = vsel %vm1631_vm6, %v3339_v5, %v8684_v59  ;;  %16556 = vst [vmem:[#allocation5_spill] sm:$0xff] %v12747_v13  ;;  %5158 = vmatpush.msra.mxu1 %v5055_v34  ;;  %v8749_v26 = vunpack.i.h.bf16 %v12564_v42  ;;  %v8674_v40 = vunpack.i.h.bf16 %v12430_v32  ;;  %v3243_v36 = vsel %vm363_vm0, %v9560_v6, %v8704_v15 }
 0x45e   : > { %v3872_v30 = vmul.f32 0.2, %v3795_v50  ;;  %v9015_v5 = vpack.i.bf16 %v12747_v13, %v12744_v19  ;;  %v3275_v59 = vsel %vm1631_vm6, %v3243_v36, %v8769_v10  ;;  %v8763_v1 = vunpack.i.l.bf16 %v12695_v62 }
 0x45f   : > { %v3403_v46 = vsel %vm1664_vm7, %v3371_v58, %v8749_v26  ;;  %v4210_v32 = vrot.slane %v3972_v23, 2  ;;  %v4212_v39 = vrot.slane %v3973_v31, 2  ;;  %v4209_v37 = vrot.slane %v3971_v0, 2  ;;  %v9561_v31 = vld [vmem:[#allocation2 + $0xc0] sm:$0xff] }
 0x460   : > { %v3904_v55 = vmax.f32 %v3795_v50, %v3872_v30  ;;  %v12751_v3 = vpop.permute.xlu1 %8791  ;;  %v3307_v50 = vsel %vm1664_vm7, %v3275_v59, %v8674_v40  ;;  %v8828_v10 = vunpack.i.l.bf16 %v12697_v4  ;;  %v5070_v30 = vld [vmem:[%s16174_s6 + $0xb8] sm:$0xff]  ;;  %v8733_v6 = vunpack.i.l.bf16 %v12609_v47 }
 0x461   : > { %v12760_v42 = vpop.permute.xlu2 %8886  ;;  %3698 = vmatmul.f32.gmra.mxu2 %v3403_v46  ;;  %v12770_v34 = vsel %vm932_vm4, %v4209_v37, %v4210_v32  ;;  %v12773_v23 = vsel %vm932_vm4, %v4210_v32, %v4212_v39  ;;  %5272 = vmatpush.msra.mxu3 %v5070_v30  ;;  %v3974_v0 = vld [vmem:[#allocation2 + $0x78] sm:$0xff]  ;;  %v8764_v36 = vunpack.i.h.bf16 %v12695_v62  ;;  %v5080_v37 = vld [vmem:[%s16174_s6 + $0x108] sm:$0xff]  ;;  %v8829_v62 = vunpack.i.h.bf16 %v12697_v4 }
 0x462   : > { %3936 = vst.msk [vmem:[#allocation2 + $0x81] sm:$0xff] %vm363_vm0, %v3904_v55  ;;  %v9020_v26 = vpack.i.bf16 %v12773_v23, %v12770_v34  ;;  %5391 = vmatpush.msra.mxu2 %v5080_v37 }
 0x463   : > { %8996 = vrot.lane.b32.xlu0 %v8990_v61, %s9643_s12  ;;  %9016 = vrot.lane.b32.xlu1 %v9015_v5, %s9641_s22  ;;  %v12764_v15 = vpop.permute.xlu0 %8806  ;;  %16557 = vst [vmem:[#allocation27_spill] sm:$0xff] %v12773_v23  ;;  %v3244_v61 = vsel %vm363_vm0, %v9561_v31, %v8763_v1  ;;  %v5054_v31 = vld [vmem:[%s16174_s6 + $0x38] sm:$0xff] }
 0x464   : > { %9006 = vrot.lane.b32.xlu2 %v9000_v16, %s9642_s11  ;;  %v3276_v40 = vsel %vm1631_vm6, %v3244_v61, %v8828_v10  ;;  %v4092_v10 = vrot.slane %v3974_v0, 1  ;;  %v9562_v61 = vld [vmem:[#allocation2 + $0xc8] sm:$0xff]  ;;  %5159 = vmatpush.msra.mxu1 %v5054_v31 }
 0x465   : > { %3585 = vmatmul.f32.gmra.mxu3 %v3307_v50  ;;  %v3308_v50 = vsel %vm1664_vm7, %v3276_v40, %v8733_v6 }
 0x468   : > { %v12779_v16 = vpop.permute.xlu1 %8811 }
 0x469   : > { %v3975_v58 = vld [vmem:[#allocation2 + $0x80] sm:$0xff]  ;;  %v3976_v55 = vld [vmem:[#allocation2 + $0x88] sm:$0x3]  ;;  %v12787_v32 = vpop.permute.xlu2 %8891 }
 0x46a   : > { %v9030_v46 = vpack.i.bf16 %v3975_v58, %v3974_v0  ;;  %v4093_v59 = vrot.slane %v3975_v58, 1  ;;  %v4095_v1 = vrot.slane %v3976_v55, 1  ;;  %v4215_v13 = vrot.slane %v3975_v58, 2 }
 0x46b   : > { %9021 = vrot.lane.b32.xlu1 %v9020_v26, %s9642_s11  ;;  %v12789_v39 = vpop.permute.xlu0 %8836 }
 0x46c   : > { %9011 = vrot.lane.b32.xlu2 %v9015_v5, %s9643_s12  ;;  %9031 = vrot.lane.b32.xlu0 %v9030_v46, %s9641_s22  ;;  %v3245_v5 = vsel %vm363_vm0, %v9562_v61, %v8764_v36  ;;  %v12803_v30 = vsel %vm809_vm5, %v4092_v10, %v4093_v59  ;;  %v12806_v40 = vsel %vm809_vm5, %v4093_v59, %v4095_v1  ;;  %v4217_v36 = vrot.slane %v3976_v55, 2 }
 0x46d   : > { %3588 = vmatmul.f32.gmra.mxu3 %v3308_v50  ;;  %16558 = vst [vmem:[#allocation6_spill] sm:$0xff] %v12803_v30  ;;  %v3277_v4 = vsel %vm1631_vm6, %v3245_v5, %v8829_v62  ;;  %v8734_v50 = vunpack.i.h.bf16 %v12609_v47  ;;  %v9045_v37 = vpack.i.bf16 %v12806_v40, %v12803_v30  ;;  %v4214_v1 = vrot.slane %v3974_v0, 2  ;;  %v5069_v47 = vld [vmem:[%s16174_s6 + $0xb0] sm:$0xff] }
 0x46e   : > { %16559 = vst [vmem:[#allocation28_spill] sm:$0xff] %v12806_v40  ;;  %v12829_v58 = vsel %vm932_vm4, %v4215_v13, %v4217_v36  ;;  %5273 = vmatpush.msra.mxu3 %v5069_v47  ;;  %v5053_v0 = vld [vmem:[%s16174_s6 + $0x30] sm:$0xff]  ;;  %v8824_v30 = vunpack.i.h.bf16 %v12677_v2 }
 0x46f   : > { %v3309_v59 = vsel %vm1664_vm7, %v3277_v4, %v8734_v50  ;;  %16561 = vst [vmem:[#allocation48_spill] sm:$0xff] %v12829_v58  ;;  %5160 = vmatpush.msra.mxu1 %v5053_v0  ;;  %v8743_v4 = vunpack.i.l.bf16 %v12528_v29  ;;  %v8808_v50 = vunpack.i.l.bf16 %v12764_v15  ;;  %v5068_v0 = vld [vmem:[%s16174_s6 + $0xa8] sm:$0xff] }
 0x470   : > { %v12808_v6 = vpop.permute.xlu1 %8816  ;;  %5274 = vmatpush.msra.mxu3 %v5068_v0 }
 0x471   : > { %v12820_v62 = vpop.permute.xlu2 %8896 }
 0x473   : > { %9026 = vrot.lane.b32.xlu1 %v9020_v26, %s9643_s12  ;;  %v12815_v31 = vpop.permute.xlu0 %8841  ;;  %v12826_v26 = vsel %vm932_vm4, %v4214_v1, %v4215_v13 }
 0x474   : > { %9046 = vrot.lane.b32.xlu2 %v9045_v37, %s9641_s22  ;;  %9036 = vrot.lane.b32.xlu0 %v9030_v46, %s9642_s11  ;;  %16560 = vst [vmem:[#allocation39_spill] sm:$0xff] %v12826_v26  ;;  %v9050_v46 = vpack.i.bf16 %v12829_v58, %v12826_v26 }
 0x475   : > { %3591 = vmatmul.f32.gmra.mxu3 %v3309_v59 }
 0x478   : > { %v12831_v55 = vpop.permute.xlu1 %8831 }
 0x479   : > { %v12842_v61 = vpop.permute.xlu2 %8901 }
 0x47b   : > { %v12835_v10 = vpop.permute.xlu0 %8846 }
 0x47c   : > { %9051 = vrot.lane.b32.xlu2 %v9050_v46, %s9642_s11  ;;  %9041 = vrot.lane.b32.xlu0 %v9045_v37, %s9643_s12 }
 0x480   : > { %v8857_v13 = vpop.permute.xlu1 %8856 }
 0x481   : > { %v8858_v5 = vunpack.i.l.bf16 %v8857_v13  ;;  %v8859_v36 = vunpack.i.h.bf16 %v8857_v13  ;;  %v8744_v13 = vunpack.i.h.bf16 %v12528_v29  ;;  %v9563_v29 = vld [vmem:[#allocation2 + $0xd8] sm:$0xff] }
 0x483   : > { %v3340_v59 = vsel %vm363_vm0, %v12350_v25, %v8858_v5  ;;  %v12848_v1 = vpop.permute.xlu0 %8871  ;;  %v3341_v40 = vsel %vm363_vm0, %v12356_v54, %v8859_v36  ;;  %v8823_v5 = vunpack.i.l.bf16 %v12677_v2  ;;  %v8793_v54 = vunpack.i.l.bf16 %v12751_v3 }
 0x484   : > { %9056 = vrot.lane.b32.xlu2 %v9050_v46, %s9643_s12  ;;  %v3372_v37 = vsel %vm1631_vm6, %v3340_v59, %v8743_v4  ;;  %v12862_v46 = vpop.permute.xlu2 %8906  ;;  %v3373_v4 = vsel %vm1631_vm6, %v3341_v40, %v8744_v13 }
 0x485   : > { %v3404_v47 = vsel %vm1664_vm7, %v3372_v37, %v8808_v50  ;;  %v8809_v50 = vunpack.i.h.bf16 %v12764_v15  ;;  %v8888_v37 = vunpack.i.l.bf16 %v12760_v42  ;;  %v3246_v36 = vsel %vm363_vm0, %v9563_v29, %v8823_v5 }
 0x486   : > { %3701 = vmatmul.f32.gmra.mxu2 %v3404_v47  ;;  %v8873_v29 = vunpack.i.l.bf16 %v12848_v1 }
 0x487   : > { %v3405_v58 = vsel %vm1664_vm7, %v3373_v4, %v8809_v50  ;;  %v3342_v23 = vsel %vm363_vm0, %v12436_v52, %v8888_v37  ;;  %v8803_v4 = vunpack.i.l.bf16 %v12735_v20  ;;  %v9564_v50 = vld [vmem:[#allocation2 + $0xe0] sm:$0xff]  ;;  %v8794_v37 = vunpack.i.h.bf16 %v12751_v3 }
 0x488   : > { %v12859_v25 = vpop.permute.xlu1 %8861  ;;  %v5051_v3 = vld [vmem:[%s16174_s6 + $0x20] sm:$0xff] }
 0x489   : > { %v3374_v2 = vsel %vm1631_vm6, %v3342_v23, %v8803_v4  ;;  %v8638_v4 = vunpack.i.l.bf16 %v12488_v17 }
 0x48b   : > { %v8877_v59 = vpop.permute.xlu0 %8876 }
 0x48c   : > { %v8878_v47 = vunpack.i.l.bf16 %v8877_v59  ;;  %v8879_v15 = vunpack.i.h.bf16 %v8877_v59  ;;  %v12879_v5 = vpop.permute.xlu2 %8921  ;;  %v8889_v59 = vunpack.i.h.bf16 %v12760_v42  ;;  %v8804_v42 = vunpack.i.h.bf16 %v12735_v20 }
 0x48e   : > { %3704 = vmatmul.f32.gmra.mxu2 %v3405_v58  ;;  %v3278_v0 = vsel %vm1631_vm6, %v3246_v36, %v8878_v47  ;;  %v5052_v58 = vld [vmem:[%s16174_s6 + $0x28] sm:$0xff]  ;;  %v3247_v47 = vsel %vm363_vm0, %v9564_v50, %v8824_v30  ;;  %v3343_v23 = vsel %vm363_vm0, %v12439_v24, %v8889_v59  ;;  %v9565_v30 = vld [vmem:[#allocation2 + $0xf0] sm:$0xff]  ;;  %v5067_v24 = vld [vmem:[%s16174_s6 + $0xa0] sm:$0xff]  ;;  %v8874_v59 = vunpack.i.h.bf16 %v12848_v1  ;;  %v3571_v1 = vpop.f32.mrf.mxu3 }
 0x48f   : > { %v3310_v40 = vsel %vm1664_vm7, %v3278_v0, %v8793_v54  ;;  %5161 = vmatpush.msra.mxu1 %v5052_v58  ;;  %v3279_v52 = vsel %vm1631_vm6, %v3247_v47, %v8879_v15  ;;  %v5050_v15 = vld [vmem:[%s16174_s6 + $0x18] sm:$0xff]  ;;  %v3375_v20 = vsel %vm1631_vm6, %v3343_v23, %v8804_v42  ;;  %5275 = vmatpush.msra.mxu3 %v5067_v24  ;;  %v8658_v58 = vunpack.i.l.bf16 %v12482_v43 }
 0x490   : > { %v8867_v26 = vpop.permute.xlu1 %8866  ;;  %3594 = vmatmul.f32.gmra.mxu3 %v3310_v40  ;;  %v3311_v0 = vsel %vm1664_vm7, %v3279_v52, %v8794_v37  ;;  %v8853_v47 = vunpack.i.l.bf16 %v12721_v38  ;;  %v5048_v37 = vld [vmem:[%s16174_s6 + $0x8] sm:$0xff]  ;;  %v9566_v42 = vld [vmem:[#allocation2 + $0xf8] sm:$0xff]  ;;  %v8659_v24 = vunpack.i.h.bf16 %v12482_v43 }
 0x491   : > { %v8868_v13 = vunpack.i.l.bf16 %v8867_v26  ;;  %v8869_v40 = vunpack.i.h.bf16 %v8867_v26  ;;  %5162 = vmatpush.msra.mxu1 %v5051_v3  ;;  %v5049_v26 = vld [vmem:[%s16174_s6 + $0x10] sm:$0xff]  ;;  %v8639_v3 = vunpack.i.h.bf16 %v12488_v17  ;;  %v3572_v17 = vadd.f32 %v12480_v57, %v3571_v1  ;;  %v5079_v57 = vld [vmem:[%s16174_s6 + $0x100] sm:$0xff] }
 0x492   : > { %5392 = vmatpush.msra.mxu2 %v5079_v57  ;;  %v8668_v57 = vunpack.i.l.bf16 %v12516_v35 }
 0x493   : > { %v3406_v54 = vsel %vm1664_vm7, %v3374_v2, %v8868_v13  ;;  %v3248_v13 = vsel %vm363_vm0, %v9565_v30, %v8873_v29  ;;  %v3407_v2 = vsel %vm1664_vm7, %v3375_v20, %v8869_v40  ;;  %5163 = vmatpush.msra.mxu1 %v5050_v15  ;;  %v3344_v40 = vsel %vm363_vm0, %v12461_v27, %v8658_v58  ;;  %v12933_v27 = vpop.permute.xlu0 %8881 }
 0x494   : > { %v3280_v50 = vsel %vm1631_vm6, %v3248_v13, %v8638_v4  ;;  %v12915_v52 = vpop.permute.xlu2 %8926  ;;  %v3249_v30 = vsel %vm363_vm0, %v9566_v42, %v8874_v59  ;;  %v5047_v13 = vld [vmem:[%s16174_s6] sm:$0xff]  ;;  %v8898_v15 = vunpack.i.l.bf16 %v12820_v62  ;;  %v3797_v4 = vpop.f32.mrf.mxu0  ;;  %v8854_v58 = vunpack.i.h.bf16 %v12721_v38  ;;  %v5066_v38 = vld [vmem:[%s16174_s6 + $0x98] sm:$0xff] }
 0x495   : > { %5164 = vmatpush.msra.mxu1 %v5049_v26  ;;  %v3312_v29 = vsel %vm1664_vm7, %v3280_v50, %v8853_v47  ;;  %v3281_v26 = vsel %vm1631_vm6, %v3249_v30, %v8639_v3  ;;  %v8633_v50 = vunpack.i.l.bf16 %v12472_v44  ;;  %5276 = vmatpush.msra.mxu3 %v5066_v38  ;;  %v9567_v30 = vld [vmem:[#allocation2 + $0x108] sm:$0xff]  ;;  %v8718_v3 = vunpack.i.l.bf16 %v12621_v33 }
 0x496   : > { %3707 = vmatmul.f32.gmra.mxu2 %v3406_v54  ;;  %v8863_v54 = vunpack.i.l.bf16 %v12859_v25  ;;  %v3313_v59 = vsel %vm1664_vm7, %v3281_v26, %v8854_v58  ;;  %v8699_v38 = vunpack.i.h.bf16 %v12474_v63 }
 0x497   : > { %5165 = vmatpush.msra.mxu1 %v5048_v37 }
 0x498   : > { %v12888_v36 = vpop.permute.xlu1 %8911  ;;  %3597 = vmatmul.f32.gmra.mxu3 %v3311_v0  ;;  %v3376_v23 = vsel %vm1631_vm6, %v3344_v40, %v8863_v54  ;;  %v3345_v54 = vsel %vm363_vm0, %v12464_v51, %v8659_v24  ;;  %v8899_v40 = vunpack.i.h.bf16 %v12820_v62  ;;  %v3574_v51 = vpop.f32.mrf.mxu3 }
 0x499   : > { %5166 = vmatpush.msra.mxu1 %v5047_v13  ;;  %v3408_v20 = vsel %vm1664_vm7, %v3376_v23, %v8898_v15  ;;  %v8883_v23 = vunpack.i.l.bf16 %v12933_v27  ;;  %v3250_v13 = vsel %vm363_vm0, %v9567_v30, %v8633_v50  ;;  %v8719_v30 = vunpack.i.h.bf16 %v12621_v33 }
 0x49c   : > { %v12941_v47 = vpop.permute.xlu2 %8956  ;;  %v3800_v26 = vpop.f32.mrf.mxu0 }
 0x49e   : > { %3710 = vmatmul.f32.gmra.mxu2 %v3407_v2  ;;  %v8864_v2 = vunpack.i.h.bf16 %v12859_v25  ;;  %v8698_v25 = vunpack.i.l.bf16 %v12474_v63  ;;  %v8894_v63 = vunpack.i.h.bf16 %v12787_v32 }
 0x4a0   : > { %v12921_v0 = vpop.permute.xlu1 %8916  ;;  %3600 = vmatmul.f32.gmra.mxu3 %v3312_v29  ;;  %v3377_v29 = vsel %vm1631_vm6, %v3345_v54, %v8864_v2  ;;  %v3282_v58 = vsel %vm1631_vm6, %v3250_v13, %v8698_v25  ;;  %v8634_v2 = vunpack.i.h.bf16 %v12472_v44  ;;  %v3346_v54 = vsel %vm363_vm0, %v12086_v53, %v8718_v3 }
 0x4a1   : > { %v3409_v24 = vsel %vm1664_vm7, %v3377_v29, %v8899_v40  ;;  %v8923_v25 = vunpack.i.l.bf16 %v12879_v5  ;;  %v8884_v40 = vunpack.i.h.bf16 %v12933_v27  ;;  %v8693_v27 = vunpack.i.l.bf16 %v12451_v22 }
 0x4a6   : > { %3713 = vmatmul.f32.gmra.mxu2 %v3408_v20  ;;  %v8893_v20 = vunpack.i.l.bf16 %v12787_v32  ;;  %v3803_v32 = vpop.f32.mrf.mxu0 }
 0x4a8   : > { %3603 = vmatmul.f32.gmra.mxu3 %v3313_v59  ;;  %v12955_v1 = vpop.permute.xlu1 %8931  ;;  %v3314_v59 = vsel %vm1664_vm7, %v3282_v58, %v8883_v23  ;;  %v3378_v29 = vsel %vm1631_vm6, %v3346_v54, %v8893_v20  ;;  %v16562_v58 = vld [vmem:[#allocation42_spill] sm:$0xff] }
 0x4a9   : > { %v3684_v43 = vpop.f32.mrf.mxu2 }
 0x4aa   : > { %v3685_v37 = vadd.f32 %v3684_v43, %v3572_v17 }
 0x4ac   : > { %v3798_v42 = vadd.f32 %v3797_v4, %v3685_v37  ;;  %v12969_v4 = vld [vmem:[%s16173_s5] ss:$0 sm:$0xff]  ;;  %v12975_v37 = vpop.permute.xlu2 %8961 }
 0x4ad   : > { %v12960_v15 = vpop.permute.xlu0 %8941  ;;  %v3575_v50 = vadd.f32 %v12969_v4, %v3574_v51 }
 0x4ae   : > { %v3873_v62 = vmul.f32 0.2, %v3798_v42  ;;  %3716 = vmatmul.f32.gmra.mxu2 %v3409_v24  ;;  %v3410_v24 = vsel %vm1664_vm7, %v3378_v29, %v8668_v57  ;;  %v8924_v29 = vunpack.i.h.bf16 %v12879_v5  ;;  %v8669_v5 = vunpack.i.h.bf16 %v12516_v35 }
 0x4b0   : > { %v3905_v17 = vmax.f32 %v3798_v42, %v3873_v62  ;;  %3606 = vmatmul.f32.gmra.mxu3 %v3314_v59  ;;  %v9569_v42 = vld [vmem:[#allocation2 + $0x110] sm:$0xff]  ;;  %v12985_v13 = vpop.permute.xlu1 %8936 }
 0x4b1   : > { %v3687_v43 = vpop.f32.mrf.mxu2  ;;  %v3251_v53 = vsel %vm363_vm0, %v9569_v42, %v8634_v2 }
 0x4b2   : > { %3937 = vst.msk [vmem:[#allocation2 + $0x91] sm:$0xff] %vm363_vm0, %v3905_v17  ;;  %v3688_v44 = vadd.f32 %v3687_v43, %v3575_v50  ;;  %v8448_v50 = vunpack.i.l.bf16 %v16562_v58  ;;  %v3283_v2 = vsel %vm1631_vm6, %v3251_v53, %v8699_v38  ;;  %v5065_v38 = vld [vmem:[%s16174_s6 + $0x90] sm:$0xff]  ;;  %v8778_v53 = vunpack.i.l.bf16 %v12588_v45 }
 0x4b3   : > { %v3577_v23 = vpop.f32.mrf.mxu3  ;;  %v3315_v43 = vsel %vm1664_vm7, %v3283_v2, %v8884_v40  ;;  %5277 = vmatpush.msra.mxu3 %v5065_v38  ;;  %v8759_v38 = vunpack.i.h.bf16 %v12666_v28 }
 0x4b4   : > { %v3801_v51 = vadd.f32 %v3800_v26, %v3688_v44  ;;  %v9570_v26 = vld [vmem:[#allocation2] sm:$0xff]  ;;  %v3578_v59 = vadd.f32 %v12969_v4, %v3577_v23  ;;  %v8758_v44 = vunpack.i.l.bf16 %v12666_v28  ;;  %v8664_v28 = vunpack.i.h.bf16 %v12502_v49 }
 0x4b5   : > { %v8947_v3 = vpop.permute.xlu0 %8946  ;;  %v4855_v17 = vsel %vm363_vm0, %v9570_v26, %v8923_v25 }
 0x4b6   : > { %v3874_v20 = vmul.f32 0.2, %v3801_v51  ;;  %v8948_v62 = vunpack.i.l.bf16 %v8947_v3  ;;  %3719 = vmatmul.f32.gmra.mxu2 %v3410_v24  ;;  %v16563_v24 = vld [vmem:[#allocation35_spill] sm:$0xff]  ;;  %v8949_v40 = vunpack.i.h.bf16 %v8947_v3 }
 0x4b7   : > { %v3347_v25 = vsel %vm363_vm0, %v16563_v24, %v8719_v30 }
 0x4b8   : > { %v3906_v33 = vmax.f32 %v3801_v51, %v3874_v20  ;;  %v4887_v54 = vsel %vm1631_vm6, %v4855_v17, %v8948_v62  ;;  %3609 = vmatmul.f32.gmra.mxu3 %v3315_v43  ;;  %v3379_v23 = vsel %vm1631_vm6, %v3347_v25, %v8894_v63  ;;  %v13008_v20 = vpop.permute.xlu2 %8966 }
 0x4b9   : > { %v3690_v57 = vpop.f32.mrf.mxu2  ;;  %v4919_v42 = vsel %vm1664_vm7, %v4887_v54, %v8448_v50  ;;  %v9571_v50 = vld [vmem:[#allocation2 + $0x120] sm:$0xff]  ;;  %v3411_v3 = vsel %vm1664_vm7, %v3379_v23, %v8669_v5 }
 0x4ba   : > { %3938 = vst.msk [vmem:[#allocation2 + $0x99] sm:$0xff] %vm363_vm0, %v3906_v33  ;;  %v3691_v51 = vadd.f32 %v3690_v57, %v3578_v59  ;;  %5167 = vmatmul.f32.vlgmr.msra.gmra.mxu1 %v4919_v42  ;;  %v3252_v26 = vsel %vm363_vm0, %v9571_v50, %v8693_v27  ;;  %v9572_v33 = vld [vmem:[#allocation2 + $0x8] sm:$0xff]  ;;  %v8653_v59 = vunpack.i.l.bf16 %v12509_v8  ;;  %v8449_v27 = vunpack.i.h.bf16 %v16562_v58 }
 0x4bb   : > { %v3580_v30 = vpop.f32.mrf.mxu3  ;;  %v3284_v63 = vsel %vm1631_vm6, %v3252_v26, %v8758_v44  ;;  %v4856_v35 = vsel %vm363_vm0, %v9572_v33, %v8924_v29  ;;  %v8694_v57 = vunpack.i.h.bf16 %v12451_v22  ;;  %v8663_v42 = vunpack.i.l.bf16 %v12502_v49 }
 0x4bc   : > { %v3804_v62 = vadd.f32 %v3803_v32, %v3691_v51  ;;  %v4888_v54 = vsel %vm1631_vm6, %v4856_v35, %v8949_v40  ;;  %v13020_v32 = vld [vmem:[#allocation2 + $0x90] sm:$0xff]  ;;  %v3581_v44 = vadd.f32 %v12969_v4, %v3580_v30  ;;  %v3316_v25 = vsel %vm1664_vm7, %v3284_v63, %v8653_v59  ;;  %v9573_v63 = vld [vmem:[#allocation2 + $0x128] sm:$0xff] }
 0x4bd   : > { %v13011_v17 = vpop.permute.xlu0 %8951  ;;  %v13013_v2 = vpop.permute.xlu1 %8971  ;;  %v3348_v29 = vsel %vm363_vm0, %v12193_v56, %v8778_v53  ;;  %v8728_v40 = vunpack.i.l.bf16 %v12672_v9  ;;  %v4920_v58 = vsel %vm1664_vm7, %v4888_v54, %v8449_v27  ;;  %v4097_v5 = vrot.slane %v13020_v32, 1 }
 0x4be   : > { %v3875_v43 = vmul.f32 0.2, %v3804_v62  ;;  %3722 = vmatmul.f32.gmra.mxu2 %v3411_v3  ;;  %v3806_v53 = vpop.f32.mrf.mxu0  ;;  %v8779_v26 = vunpack.i.h.bf16 %v12588_v45  ;;  %v8943_v3 = vunpack.i.l.bf16 %v12960_v15  ;;  %v3253_v33 = vsel %vm363_vm0, %v9573_v63, %v8694_v57 }
 0x4bf   : > { %v8654_v49 = vunpack.i.h.bf16 %v12509_v8  ;;  %v8928_v8 = vunpack.i.l.bf16 %v12915_v52  ;;  %v8818_v63 = vunpack.i.l.bf16 %v12808_v6 }
 0x4c0   : > { %v3907_v24 = vmax.f32 %v3804_v62, %v3875_v43  ;;  %3612 = vmatmul.f32.gmra.mxu3 %v3316_v25  ;;  %v13039_v35 = vpop.permute.xlu2 %9001  ;;  %v3380_v43 = vsel %vm1631_vm6, %v3348_v29, %v8663_v42  ;;  %v3285_v25 = vsel %vm1631_vm6, %v3253_v33, %v8759_v38  ;;  %v8944_v33 = vunpack.i.h.bf16 %v12960_v15  ;;  %v9575_v15 = vld [vmem:[#allocation2 + $0x138] sm:$0xff] }
 0x4c1   : > { %v3693_v51 = vpop.f32.mrf.mxu2  ;;  %v3978_v23 = vld [vmem:[#allocation2 + $0x98] sm:$0xff]  ;;  %v3979_v22 = vld [vmem:[#allocation2 + $0xa0] sm:$0x3]  ;;  %v3412_v57 = vsel %vm1664_vm7, %v3380_v43, %v8728_v40  ;;  %v3317_v38 = vsel %vm1664_vm7, %v3285_v25, %v8654_v49 }
 0x4c2   : > { %3939 = vst.msk [vmem:[#allocation2 + $0xa9] sm:$0xff] %vm363_vm0, %v3907_v24  ;;  %v3694_v62 = vadd.f32 %v3693_v51, %v3581_v44  ;;  %5170 = vmatmul.f32.gmra.mxu1 %v4920_v58  ;;  %v9060_v30 = vpack.i.bf16 %v3978_v23, %v13020_v32  ;;  %v4098_v50 = vrot.slane %v3978_v23, 1  ;;  %v4100_v56 = vrot.slane %v3979_v22, 1 }
 0x4c3   : > { %v4220_v51 = vrot.slane %v3978_v23, 2  ;;  %v4222_v58 = vrot.slane %v3979_v22, 2  ;;  %v4219_v23 = vrot.slane %v13020_v32, 2  ;;  %v8729_v22 = vunpack.i.h.bf16 %v12672_v9 }
 0x4c4   : > { %v3807_v59 = vadd.f32 %v3806_v53, %v3694_v62  ;;  %9061 = vrot.lane.b32.xlu1 %v9060_v30, %s9641_s22  ;;  %v13044_v54 = vsel %vm809_vm5, %v4097_v5, %v4098_v50  ;;  %v13047_v27 = vsel %vm809_vm5, %v4098_v50, %v4100_v56  ;;  %v8753_v5 = vunpack.i.l.bf16 %v12633_v18  ;;  %v9574_v62 = vld [vmem:[#allocation2 + $0x18] sm:$0xff] }
 0x4c5   : > { %v8977_v45 = vpop.permute.xlu1 %8976  ;;  %v13050_v24 = vpop.permute.xlu0 %8986  ;;  %v13055_v44 = vpack.i.bf16 %v13047_v27, %v13044_v54  ;;  %v4857_v40 = vsel %vm363_vm0, %v9574_v62, %v8943_v3  ;;  %v3349_v50 = vsel %vm363_vm0, %v12196_v12, %v8779_v26  ;;  %v13074_v12 = vsel %vm932_vm4, %v4219_v23, %v4220_v51 }
 0x4c6   : > { %v3876_v42 = vmul.f32 0.2, %v3807_v59  ;;  %v8978_v29 = vunpack.i.l.bf16 %v8977_v45  ;;  %3725 = vmatmul.f32.gmra.mxu2 %v3412_v57  ;;  %v8979_v3 = vunpack.i.h.bf16 %v8977_v45  ;;  %v13077_v26 = vsel %vm932_vm4, %v4220_v51, %v4222_v58 }
 0x4c7   : > { %9076 = vrot.lane.b32.xlu0 %v13055_v44, %s9641_s22  ;;  %v8838_v32 = vunpack.i.l.bf16 %v12789_v39  ;;  %v3381_v9 = vsel %vm1631_vm6, %v3349_v50, %v8664_v28  ;;  %v9080_v57 = vpack.i.bf16 %v13077_v26, %v13074_v12  ;;  %v8713_v51 = vunpack.i.l.bf16 %v12492_v14 }
 0x4c8   : > { %v3908_v56 = vmax.f32 %v3807_v59, %v3876_v42  ;;  %v4889_v53 = vsel %vm1631_vm6, %v4857_v40, %v8978_v29  ;;  %3615 = vmatmul.f32.gmra.mxu3 %v3317_v38  ;;  %v3254_v59 = vsel %vm363_vm0, %v9575_v15, %v8753_v5  ;;  %v3413_v45 = vsel %vm1664_vm7, %v3381_v9, %v8729_v22  ;;  %v9576_v42 = vld [vmem:[#allocation2 + $0x20] sm:$0xff]  ;;  %v13093_v58 = vpop.permute.xlu2 %9006 }
 0x4c9   : > { %v4921_v43 = vsel %vm1664_vm7, %v4889_v53, %v8928_v8  ;;  %v3286_v25 = vsel %vm1631_vm6, %v3254_v59, %v8818_v63  ;;  %v4858_v29 = vsel %vm363_vm0, %v9576_v42, %v8944_v33  ;;  %v8929_v28 = vunpack.i.h.bf16 %v12915_v52  ;;  %v13105_v53 = vld [vmem:[#allocation2 + $0xa8] sm:$0xff]  ;;  %v9578_v9 = vld [vmem:[#allocation2 + $0x140] sm:$0xff] }
 0x4ca   : > { %3940 = vst.msk [vmem:[#allocation2 + $0xb1] sm:$0xff] %vm363_vm0, %v3908_v56  ;;  %5173 = vmatmul.f32.gmra.mxu1 %v4921_v43  ;;  %v8973_v5 = vunpack.i.l.bf16 %v13013_v2  ;;  %v3350_v8 = vsel %vm363_vm0, %v12320_v21, %v8838_v32  ;;  %v8754_v62 = vunpack.i.h.bf16 %v12633_v18  ;;  %v8723_v40 = vunpack.i.l.bf16 %v12648_v11  ;;  %v5064_v32 = vld [vmem:[%s16174_s6 + $0x88] sm:$0xff] }
 0x4cb   : > { %v3318_v50 = vsel %vm1664_vm7, %v3286_v25, %v8713_v51  ;;  %v8839_v56 = vunpack.i.h.bf16 %v12789_v39  ;;  %v8819_v38 = vunpack.i.h.bf16 %v12808_v6  ;;  %v9008_v21 = vunpack.i.l.bf16 %v13093_v58  ;;  %v9577_v6 = vld [vmem:[#allocation2 + $0x30] sm:$0xff]  ;;  %5278 = vmatpush.msra.mxu3 %v5064_v32 }
 0x4cc   : > { %9066 = vrot.lane.b32.xlu1 %v9060_v30, %s9642_s11  ;;  %v4890_v30 = vsel %vm1631_vm6, %v4858_v29, %v8979_v3  ;;  %v3382_v63 = vsel %vm1631_vm6, %v3350_v8, %v8723_v40  ;;  %v8788_v39 = vunpack.i.l.bf16 %v12651_v7  ;;  %v4859_v33 = vsel %vm363_vm0, %v9577_v6, %v8973_v5 }
 0x4cd   : > { %v13083_v49 = vpop.permute.xlu0 %8991  ;;  %v4922_v52 = vsel %vm1664_vm7, %v4890_v30, %v8929_v28  ;;  %v3255_v15 = vsel %vm363_vm0, %v9578_v9, %v8754_v62  ;;  %v4102_v42 = vrot.slane %v13105_v53, 1  ;;  %v8714_v29 = vunpack.i.h.bf16 %v12492_v14  ;;  %v13144_v62 = vpop.f32.mrf.mxu0 }
 0x4ce   : > { %3728 = vmatmul.f32.gmra.mxu2 %v3413_v45  ;;  %v3414_v45 = vsel %vm1664_vm7, %v3382_v63, %v8788_v39  ;;  %v3287_v25 = vsel %vm1631_vm6, %v3255_v15, %v8819_v38  ;;  %v4891_v51 = vsel %vm1631_vm6, %v4859_v33, %v9008_v21  ;;  %v8953_v30 = vunpack.i.l.bf16 %v13011_v17  ;;  %v9579_v21 = vld [vmem:[#allocation2 + $0x38] sm:$0xff] }
 0x4cf   : > { %9081 = vrot.lane.b32.xlu0 %v9080_v57, %s9642_s11  ;;  %v8974_v28 = vunpack.i.h.bf16 %v13013_v2  ;;  %v8724_v14 = vunpack.i.h.bf16 %v12648_v11  ;;  %v8813_v40 = vunpack.i.l.bf16 %v12779_v16  ;;  %v8908_v2 = vunpack.i.l.bf16 %v12862_v46 }
 0x4d0   : > { %3618 = vmatmul.f32.gmra.mxu3 %v3318_v50  ;;  %v8789_v50 = vunpack.i.h.bf16 %v12651_v7  ;;  %v9009_v38 = vunpack.i.h.bf16 %v13093_v58  ;;  %v8913_v7 = vunpack.i.l.bf16 %v12888_v36  ;;  %v9580_v58 = vld [vmem:[#allocation2 + $0x150] sm:$0xff]  ;;  %v4224_v32 = vrot.slane %v13105_v53, 2 }
 0x4d1   : > { %v13107_v23 = vld [vmem:[#allocation2 + $0xb0] sm:$0xff]  ;;  %v13109_v22 = vld [vmem:[#allocation2 + $0xb8] sm:$0x3]  ;;  %v4860_v63 = vsel %vm363_vm0, %v9579_v21, %v8974_v28  ;;  %v3256_v33 = vsel %vm363_vm0, %v9580_v58, %v8813_v40  ;;  %v8773_v9 = vunpack.i.l.bf16 %v12682_v41  ;;  %v8914_v21 = vunpack.i.h.bf16 %v12888_v36  ;;  %v9584_v36 = vld [vmem:[#allocation2 + $0x1a8] sm:$0x3] }
 0x4d2   : > { %5176 = vmatmul.f32.gmra.mxu1 %v4922_v52  ;;  %v9090_v18 = vpack.i.bf16 %v13107_v23, %v13105_v53  ;;  %v4103_v43 = vrot.slane %v13107_v23, 1  ;;  %v4105_v3 = vrot.slane %v13109_v22, 1  ;;  %v4225_v39 = vrot.slane %v13107_v23, 2  ;;  %v16564_v53 = vld [vmem:[#allocation63_spill] sm:$0xff] }
 0x4d3   : > { %v4227_v6 = vrot.slane %v13109_v22, 2  ;;  %v4892_v23 = vsel %vm1631_vm6, %v4860_v63, %v9009_v38  ;;  %v9581_v22 = vld [vmem:[#allocation2 + $0x198] sm:$0xff] }
 0x4d4   : > { %9091 = vrot.lane.b32.xlu2 %v9090_v18, %s9641_s22  ;;  %9071 = vrot.lane.b32.xlu1 %v13055_v44, %s9643_s12  ;;  %v3351_v44 = vsel %vm363_vm0, %v12323_v48, %v8839_v56  ;;  %v13139_v5 = vsel %vm809_vm5, %v4102_v42, %v4103_v43  ;;  %v13142_v8 = vsel %vm809_vm5, %v4103_v43, %v4105_v3  ;;  %v5063_v56 = vld [vmem:[%s16174_s6 + $0x80] sm:$0xff]  ;;  %v8954_v42 = vunpack.i.h.bf16 %v13011_v17 }
 0x4d5   : > { %v13126_v59 = vpop.permute.xlu0 %8996  ;;  %v3319_v48 = vsel %vm1664_vm7, %v3287_v25, %v8714_v29  ;;  %v9105_v11 = vpack.i.bf16 %v13142_v8, %v13139_v5  ;;  %v3383_v52 = vsel %vm1631_vm6, %v3351_v44, %v8724_v14  ;;  %5279 = vmatpush.msra.mxu3 %v5063_v56  ;;  %v3288_v3 = vsel %vm1631_vm6, %v3256_v33, %v8908_v2  ;;  %v3812_v38 = vpop.f32.mrf.mxu0 }
 0x4d6   : > { %3731 = vmatmul.f32.gmra.mxu2 %v3414_v45  ;;  %v3415_v43 = vsel %vm1664_vm7, %v3383_v52, %v8789_v50  ;;  %v9582_v45 = vld [vmem:[#allocation2 + $0x1a0] sm:$0xff]  ;;  %v13175_v29 = vsel %vm932_vm4, %v4224_v32, %v4225_v39  ;;  %v3352_v44 = vsel %vm363_vm0, %v16564_v53, %v8913_v7  ;;  %v8814_v14 = vunpack.i.h.bf16 %v12779_v16  ;;  %v8982_v33 = vpop.permute.xlu1 %8981 }
 0x4d7   : > { %9086 = vrot.lane.b32.xlu0 %v9080_v57, %s9643_s12  ;;  %v4923_v57 = vsel %vm1664_vm7, %v4891_v51, %v8953_v30  ;;  %v2648_v25 = vrot.slane %v9582_v45, 2  ;;  %v13178_v51 = vsel %vm932_vm4, %v4225_v39, %v4227_v6  ;;  %v16565_v30 = vld [vmem:[#allocation7_spill] sm:$0xff]  ;;  %v3320_v50 = vsel %vm1664_vm7, %v3288_v3, %v8773_v9  ;;  %v9583_v6 = vld [vmem:[#allocation2 + $0x158] sm:$0xff]  ;;  %v16566_v45 = vld [vmem:[#allocation36_spill] sm:$0xff] }
 0x4d8   : > { %3621 = vmatmul.f32.gmra.mxu3 %v3319_v48  ;;  %v8783_v28 = vunpack.i.l.bf16 %v16565_v30  ;;  %v8909_v17 = vunpack.i.h.bf16 %v12862_v46  ;;  %v4924_v56 = vsel %vm1664_vm7, %v4892_v23, %v8954_v42  ;;  %v9110_v16 = vpack.i.bf16 %v13178_v51, %v13175_v29 }
 0x4d9   : > { %v8848_v7 = vunpack.i.l.bf16 %v12835_v10  ;;  %v8903_v46 = vunpack.i.l.bf16 %v12842_v61  ;;  %v9003_v39 = vunpack.i.l.bf16 %v13039_v35  ;;  %v3257_v58 = vsel %vm363_vm0, %v9583_v6, %v8814_v14 }
 0x4da   : > { %5179 = vmatmul.f32.gmra.mxu1 %v4923_v57  ;;  %v3384_v52 = vsel %vm1631_vm6, %v3352_v44, %v8783_v28  ;;  %v3289_v32 = vsel %vm1631_vm6, %v3257_v58, %v8909_v17  ;;  %v2650_v9 = vrot.slane %v9584_v36, 2  ;;  %v8774_v23 = vunpack.i.h.bf16 %v12682_v41  ;;  %v9586_v17 = vld [vmem:[#allocation2 + $0x168] sm:$0xff] }
 0x4db   : > { %v3416_v3 = vsel %vm1664_vm7, %v3384_v52, %v8848_v7  ;;  %v3353_v42 = vsel %vm363_vm0, %v16566_v45, %v8914_v21  ;;  %v8784_v44 = vunpack.i.h.bf16 %v16565_v30  ;;  %v16567_v7 = vld [vmem:[#allocation17_spill] sm:$0xff]  ;;  %v8918_v45 = vunpack.i.l.bf16 %v12921_v0 }
 0x4dc   : > { %9096 = vrot.lane.b32.xlu2 %v9090_v18, %s9642_s11  ;;  %9106 = vrot.lane.b32.xlu1 %v9105_v11, %s9641_s22  ;;  %v2647_v18 = vrot.slane %v9581_v22, 2  ;;  %v3696_v40 = vpop.f32.mrf.mxu2  ;;  %v2651_v53 = vsel %vm932_vm4, %v2648_v25, %v2650_v9  ;;  %v3321_v14 = vsel %vm1664_vm7, %v3289_v32, %v8774_v23  ;;  %v8423_v21 = vunpack.i.l.bf16 %v16567_v7 }
 0x4dd   : > { %v3385_v52 = vsel %vm1631_vm6, %v3353_v42, %v8784_v44  ;;  %v13220_v58 = vpop.f32.mrf.mxu0  ;;  %v8904_v32 = vunpack.i.h.bf16 %v12842_v61 }
 0x4de   : > { %v13170_v15 = vpop.permute.xlu0 %9031  ;;  %3734 = vmatmul.f32.gmra.mxu2 %v3415_v43  ;;  %v2649_v2 = vsel %vm932_vm4, %v2647_v18, %v2648_v25  ;;  %v9004_v25 = vunpack.i.h.bf16 %v13039_v35 }
 0x4df   : > { %7837 = vmatmul.msk.f32.gmra.mxu0 %vm363_vm0, %v2649_v2 }
 0x4e0   : > { %v3583_v48 = vpop.f32.mrf.mxu3  ;;  %3624 = vmatmul.f32.gmra.mxu3 %v3320_v50 }
 0x4e1   : > { %v3584_v57 = vadd.f32 %v12969_v4, %v3583_v48 }
 0x4e2   : > { %5182 = vmatmul.f32.gmra.mxu1 %v4924_v56 }
 0x4e3   : > { %v3697_v63 = vadd.f32 %v3696_v40, %v3584_v57  ;;  %v9585_v40 = vld [vmem:[#allocation2 + $0x48] sm:$0xff]  ;;  %v3258_v57 = vsel %vm363_vm0, %v9586_v17, %v8903_v46  ;;  %v8844_v17 = vunpack.i.h.bf16 %v12815_v31 }
 0x4e4   : > { %9101 = vrot.lane.b32.xlu2 %v9105_v11, %s9643_s12  ;;  %9111 = vrot.lane.b32.xlu1 %v9110_v16, %s9642_s11  ;;  %v4861_v48 = vsel %vm363_vm0, %v9585_v40, %v9003_v39  ;;  %v3699_v56 = vpop.f32.mrf.mxu2 }
 0x4e5   : > { %v3810_v43 = vadd.f32 %v13144_v62, %v3697_v63  ;;  %v8983_v62 = vunpack.i.l.bf16 %v8982_v33  ;;  %v8849_v63 = vunpack.i.h.bf16 %v12835_v10  ;;  %v9587_v10 = vld [vmem:[#allocation2 + $0x50] sm:$0xff] }
 0x4e6   : > { %v9037_v22 = vpop.permute.xlu0 %9036  ;;  %3737 = vmatmul.f32.gmra.mxu2 %v3416_v3  ;;  %v8833_v3 = vunpack.i.l.bf16 %v12831_v55  ;;  %v4862_v36 = vsel %vm363_vm0, %v9587_v10, %v9004_v25 }
 0x4e7   : > { %v3877_v18 = vmul.f32 0.2, %v3810_v43  ;;  %v9038_v11 = vunpack.i.l.bf16 %v9037_v22  ;;  %7838 = vmatmul.msk.f32.gmra.mxu0 %vm363_vm0, %v2651_v53  ;;  %v9039_v39 = vunpack.i.h.bf16 %v9037_v22  ;;  %v3417_v46 = vsel %vm1664_vm7, %v3385_v52, %v8849_v63  ;;  %v9588_v53 = vld [vmem:[#allocation2 + $0x170] sm:$0xff] }
 0x4e8   : > { %v3586_v28 = vpop.f32.mrf.mxu3  ;;  %3627 = vmatmul.f32.gmra.mxu3 %v3321_v14  ;;  %v8843_v22 = vunpack.i.l.bf16 %v12815_v31  ;;  %v3259_v44 = vsel %vm363_vm0, %v9588_v53, %v8904_v32  ;;  %v16572_v32 = vld [vmem:[#allocation13_spill] sm:$0xff] }
 0x4e9   : > { %v3909_v50 = vmax.f32 %v3810_v43, %v3877_v18  ;;  %v3587_v41 = vadd.f32 %v12969_v4, %v3586_v28  ;;  %v4893_v2 = vsel %vm1631_vm6, %v4861_v48, %v9038_v11  ;;  %v3290_v43 = vsel %vm1631_vm6, %v3258_v57, %v8423_v21  ;;  %v16569_v28 = vld [vmem:[#allocation72_spill] sm:$0xff] }
 0x4ea   : > { %v4925_v30 = vsel %vm1664_vm7, %v4893_v2, %v8983_v62  ;;  %v4894_v23 = vsel %vm1631_vm6, %v4862_v36, %v9039_v39  ;;  %v8984_v18 = vunpack.i.h.bf16 %v8982_v33  ;;  %v8424_v62 = vunpack.i.h.bf16 %v16567_v7  ;;  %v16570_v7 = vld [vmem:[#allocation24_spill] sm:$0xff] }
 0x4eb   : > { %3941 = vst.msk [vmem:[#allocation2 + $0xc1] sm:$0xff] %vm363_vm0, %v3909_v50  ;;  %v3700_v6 = vadd.f32 %v3699_v56, %v3587_v41  ;;  %5185 = vmatmul.f32.gmra.mxu1 %v4925_v30  ;;  %v13242_v50 = vpop.f32.mrf.mxu0  ;;  %v8834_v41 = vunpack.i.h.bf16 %v12831_v55  ;;  %v8958_v57 = vunpack.i.l.bf16 %v12941_v47  ;;  %v8919_v30 = vunpack.i.h.bf16 %v12921_v0 }
 0x4ec   : > { %9116 = vrot.lane.b32.xlu1 %v9110_v16, %s9643_s12  ;;  %v16568_v16 = vld [vmem:[#allocation18_spill] sm:$0xff]  ;;  %v4926_v61 = vsel %vm1664_vm7, %v4894_v23, %v8984_v18  ;;  %v3291_v48 = vsel %vm1631_vm6, %v3259_v44, %v8424_v62  ;;  %v8458_v10 = vunpack.i.l.bf16 %v16572_v32  ;;  %v8939_v62 = vunpack.i.h.bf16 %v12985_v13 }
 0x4ed   : > { %v3813_v35 = vadd.f32 %v3812_v38, %v3700_v6  ;;  %v3322_v38 = vsel %vm1664_vm7, %v3290_v43, %v8833_v3  ;;  %v8433_v11 = vunpack.i.l.bf16 %v16568_v16  ;;  %v8434_v2 = vunpack.i.h.bf16 %v16568_v16 }
 0x4ee   : > { %3740 = vmatmul.f32.gmra.mxu2 %v3417_v46  ;;  %v3323_v25 = vsel %vm1664_vm7, %v3291_v48, %v8834_v41  ;;  %v16571_v46 = vld [vmem:[#allocation73_spill] sm:$0xff]  ;;  %v8938_v43 = vunpack.i.l.bf16 %v12985_v13 }
 0x4ef   : > { %v3878_v9 = vmul.f32 0.2, %v3813_v35  ;;  %v3354_v33 = vsel %vm363_vm0, %v16569_v28, %v8433_v11  ;;  %v3355_v21 = vsel %vm363_vm0, %v16570_v7, %v8434_v2  ;;  %v4951_v31 = vsel %vm363_vm0, %v16571_v46, %v8958_v57  ;;  %v16573_v28 = vld [vmem:[#allocation25_spill] sm:$0xff] }
 0x4f0   : > { %3630 = vmatmul.f32.gmra.mxu3 %v3322_v38  ;;  %v3386_v14 = vsel %vm1631_vm6, %v3354_v33, %v8843_v22  ;;  %v3387_v3 = vsel %vm1631_vm6, %v3355_v21, %v8844_v17  ;;  %v4983_v22 = vsel %vm1631_vm6, %v4951_v31, %v8458_v10  ;;  %v8959_v11 = vunpack.i.h.bf16 %v12941_v47 }
 0x4f1   : > { %v3910_v42 = vmax.f32 %v3813_v35, %v3878_v9  ;;  %v3418_v40 = vsel %vm1664_vm7, %v3386_v14, %v8918_v45  ;;  %v3419_v0 = vsel %vm1664_vm7, %v3387_v3, %v8919_v30  ;;  %v5015_v45 = vsel %vm1664_vm7, %v4983_v22, %v8938_v43 }
 0x4f2   : > { %v3983_v56 = vld [vmem:[#allocation2 + $0xc0] sm:$0xff]  ;;  %v4952_v33 = vsel %vm363_vm0, %v16573_v28, %v8959_v11  ;;  %v8459_v47 = vunpack.i.h.bf16 %v16572_v32  ;;  %v8988_v14 = vunpack.i.l.bf16 %v13050_v24  ;;  %v8969_v11 = vunpack.i.h.bf16 %v13008_v20 }
 0x4f3   : > { %3942 = vst.msk [vmem:[#allocation2 + $0xc9] sm:$0xff] %vm363_vm0, %v3910_v42  ;;  %5188 = vmatmul.f32.gmra.mxu1 %v4926_v61  ;;  %v4107_v55 = vrot.slane %v3983_v56, 1  ;;  %v13268_v16 = vpop.f32.mrf.mxu0  ;;  %v4229_v42 = vrot.slane %v3983_v56, 2  ;;  %v3589_v61 = vpop.f32.mrf.mxu3  ;;  %v16577_v32 = vld [vmem:[#allocation23_spill] sm:$0xff] }
 0x4f4   : > { %v4984_v41 = vsel %vm1631_vm6, %v4952_v33, %v8459_v47  ;;  %v3590_v2 = vadd.f32 %v12969_v4, %v3589_v61  ;;  %v16578_v47 = vld [vmem:[#allocation46_spill] sm:$0xff] }
 0x4f5   : > { %v5016_v13 = vsel %vm1664_vm7, %v4984_v41, %v8939_v62 }
 0x4f6   : > { %3743 = vmatmul.f32.gmra.mxu2 %v3418_v40  ;;  %v16574_v40 = vld [vmem:[#allocation41_spill] sm:$0xff] }
 0x4f8   : > { %3633 = vmatmul.f32.gmra.mxu3 %v3323_v25 }
 0x4fa   : > { %v3984_v52 = vld [vmem:[#allocation2 + $0xc8] sm:$0xff]  ;;  %v3985_v63 = vld [vmem:[#allocation2 + $0xd0] sm:$0x3] }
 0x4fb   : > { %v9120_v39 = vpack.i.bf16 %v3984_v52, %v3983_v56  ;;  %v4108_v6 = vrot.slane %v3984_v52, 1  ;;  %v4110_v35 = vrot.slane %v3985_v63, 1  ;;  %v4230_v18 = vrot.slane %v3984_v52, 2  ;;  %v13293_v57 = vpop.f32.mrf.mxu0  ;;  %v16575_v56 = vld [vmem:[#allocation40_spill] sm:$0xff]  ;;  %v3592_v7 = vpop.f32.mrf.mxu3 }
 0x4fc   : > { %v4232_v38 = vrot.slane %v3985_v63, 2  ;;  %v4953_v30 = vsel %vm363_vm0, %v16575_v56, %v8988_v14  ;;  %v8933_v52 = vunpack.i.l.bf16 %v12955_v1  ;;  %v3593_v46 = vadd.f32 %v12969_v4, %v3592_v7 }
 0x4fd   : > { %9121 = vrot.lane.b32.xlu0 %v9120_v39, %s9641_s22  ;;  %v13260_v36 = vsel %vm809_vm5, %v4107_v55, %v4108_v6  ;;  %v13263_v9 = vsel %vm809_vm5, %v4108_v6, %v4110_v35  ;;  %v13274_v53 = vsel %vm932_vm4, %v4229_v42, %v4230_v18  ;;  %v8989_v55 = vunpack.i.h.bf16 %v13050_v24  ;;  %v16576_v35 = vld [vmem:[#allocation66_spill] sm:$0xff] }
 0x4fe   : > { %3746 = vmatmul.f32.gmra.mxu2 %v3419_v0  ;;  %v9135_v23 = vpack.i.bf16 %v13263_v9, %v13260_v36  ;;  %v13277_v44 = vsel %vm932_vm4, %v4230_v18, %v4232_v38  ;;  %v4985_v63 = vsel %vm1631_vm6, %v4953_v30, %v8933_v52  ;;  %v8934_v24 = vunpack.i.h.bf16 %v12955_v1  ;;  %v9017_v0 = vpop.permute.xlu1 %9016 }
 0x4ff   : > { %v9140_v48 = vpack.i.bf16 %v13277_v44, %v13274_v53  ;;  %v4954_v10 = vsel %vm363_vm0, %v16577_v32, %v8989_v55  ;;  %v9018_v42 = vunpack.i.l.bf16 %v9017_v0  ;;  %v8963_v14 = vunpack.i.l.bf16 %v12975_v37 }
 0x500   : > { %9136 = vrot.lane.b32.xlu2 %v9135_v23, %s9641_s22  ;;  %5280 = vmatmul.f32.vlgmr.msra.gmra.mxu3 %v5015_v45  ;;  %v4986_v38 = vsel %vm1631_vm6, %v4954_v10, %v8934_v24  ;;  %v13317_v45 = vpop.permute.xlu2 %9011  ;;  %v9019_v41 = vunpack.i.h.bf16 %v9017_v0  ;;  %v8964_v32 = vunpack.i.h.bf16 %v12975_v37 }
 0x501   : > { %v5018_v28 = vsel %vm1664_vm7, %v4986_v38, %v8969_v11  ;;  %v8999_v11 = vunpack.i.h.bf16 %v13126_v59 }
 0x505   : > { %9126 = vrot.lane.b32.xlu0 %v9120_v39, %s9642_s11  ;;  %v8968_v39 = vunpack.i.l.bf16 %v13008_v20  ;;  %v4955_v20 = vsel %vm363_vm0, %v16578_v47, %v9018_v42 }
 0x506   : > { %7839 = vmatmul.msk.f32.vlgmr.msra.gmra.mxu2 %vm363_vm0, %v16574_v40  ;;  %v13334_v30 = vpop.permute.xlu1 %9021 }
 0x507   : > { %v5017_v43 = vsel %vm1664_vm7, %v4985_v63, %v8968_v39 }
 0x508   : > { %9141 = vrot.lane.b32.xlu2 %v9140_v48, %s9642_s11  ;;  %5283 = vmatmul.f32.gmra.mxu3 %v5016_v13  ;;  %v8998_v13 = vunpack.i.l.bf16 %v13126_v59  ;;  %v13336_v52 = vpop.permute.xlu2 %9046 }
 0x509   : > { %v3702_v17 = vpop.f32.mrf.mxu2 }
 0x50a   : > { %v3703_v25 = vadd.f32 %v3702_v17, %v3590_v2 }
 0x50c   : > { %v3816_v21 = vadd.f32 %v13220_v58, %v3703_v25  ;;  %v16579_v25 = vld [vmem:[#allocation47_spill] sm:$0xff] }
 0x50d   : > { %9131 = vrot.lane.b32.xlu0 %v9135_v23, %s9643_s12  ;;  %v13312_v23 = vpop.f32.mrf.mxu0 }
 0x50e   : > { %v3879_v6 = vmul.f32 0.2, %v3816_v21  ;;  %7840 = vmatmul.msk.f32.gmra.mxu2 %vm363_vm0, %v16576_v35  ;;  %v16580_v35 = vld [vmem:[#allocation67_spill] sm:$0xff]  ;;  %v9027_v47 = vpop.permute.xlu1 %9026 }
 0x510   : > { %v3911_v31 = vmax.f32 %v3816_v21, %v3879_v6  ;;  %9146 = vrot.lane.b32.xlu2 %v9140_v48, %s9643_s12  ;;  %5286 = vmatmul.f32.gmra.mxu3 %v5017_v43 }
 0x511   : > { %v3705_v58 = vpop.f32.mrf.mxu2 }
 0x512   : > { %3943 = vst.msk [vmem:[#allocation2 + $0xd9] sm:$0xff] %vm363_vm0, %v3911_v31  ;;  %v3706_v3 = vadd.f32 %v3705_v58, %v3593_v46  ;;  %v4956_v46 = vsel %vm363_vm0, %v16580_v35, %v9019_v41  ;;  %v9028_v41 = vunpack.i.l.bf16 %v9027_v47 }
 0x513   : > { %v3595_v18 = vpop.f32.mrf.mxu3  ;;  %v4988_v38 = vsel %vm1631_vm6, %v4956_v46, %v8964_v32 }
 0x514   : > { %v3819_v22 = vadd.f32 %v13242_v50, %v3706_v3  ;;  %v3596_v1 = vadd.f32 %v12969_v4, %v3595_v18 }
 0x515   : > { %v13329_v2 = vpop.f32.mrf.mxu0 }
 0x516   : > { %v3880_v61 = vmul.f32 0.2, %v3819_v22  ;;  %7841 = vmatmul.msk.f32.gmra.mxu2 %vm363_vm0, %v12710_v60  ;;  %v4987_v60 = vsel %vm1631_vm6, %v4955_v20, %v8963_v14  ;;  %v13364_v20 = vpop.permute.xlu2 %9051 }
 0x517   : > { %v5019_v21 = vsel %vm1664_vm7, %v4987_v60, %v8998_v13 }
 0x518   : > { %v3912_v62 = vmax.f32 %v3819_v22, %v3880_v61  ;;  %5289 = vmatmul.f32.gmra.mxu3 %v5018_v28  ;;  %v9048_v61 = vunpack.i.l.bf16 %v13336_v52 }
 0x519   : > { %v3708_v33 = vpop.f32.mrf.mxu2  ;;  %v3986_v56 = vld [vmem:[#allocation2 + $0xd8] sm:$0xff] }
 0x51a   : > { %3944 = vst.msk [vmem:[#allocation2 + $0xe1] sm:$0xff] %vm363_vm0, %v3912_v62  ;;  %v3709_v50 = vadd.f32 %v3708_v33, %v3596_v1  ;;  %v4112_v6 = vrot.slane %v3986_v56, 1  ;;  %v5020_v33 = vsel %vm1664_vm7, %v4988_v38, %v8999_v11 }
 0x51b   : > { %v3598_v48 = vpop.f32.mrf.mxu3 }
 0x51c   : > { %v3822_v40 = vadd.f32 %v13268_v16, %v3709_v50  ;;  %v3599_v16 = vadd.f32 %v12969_v4, %v3598_v48  ;;  %v4234_v50 = vrot.slane %v3986_v56, 2  ;;  %v8993_v48 = vunpack.i.l.bf16 %v13083_v49 }
 0x51d   : > { %v13360_v62 = vpop.f32.mrf.mxu0 }
 0x51e   : > { %v3881_v17 = vmul.f32 0.2, %v3822_v40  ;;  %7842 = vmatmul.msk.f32.gmra.mxu2 %vm363_vm0, %v16579_v25 }
 0x520   : > { %v3913_v7 = vmax.f32 %v3822_v40, %v3881_v17  ;;  %5292 = vmatmul.f32.gmra.mxu3 %v5019_v21  ;;  %v4957_v17 = vsel %vm363_vm0, %v12744_v19, %v9048_v61  ;;  %v9049_v21 = vunpack.i.h.bf16 %v13336_v52  ;;  %v8994_v52 = vunpack.i.h.bf16 %v13083_v49 }
 0x521   : > { %v3711_v63 = vpop.f32.mrf.mxu2  ;;  %v3987_v39 = vld [vmem:[#allocation2 + $0xe0] sm:$0xff]  ;;  %v3988_v55 = vld [vmem:[#allocation2 + $0xe8] sm:$0x3] }
 0x522   : > { %3945 = vst.msk [vmem:[#allocation2 + $0xf1] sm:$0xff] %vm363_vm0, %v3913_v7  ;;  %v3712_v31 = vadd.f32 %v3711_v63, %v3599_v16  ;;  %v9150_v43 = vpack.i.bf16 %v3987_v39, %v3986_v56  ;;  %v4113_v58 = vrot.slane %v3987_v39, 1  ;;  %v4115_v3 = vrot.slane %v3988_v55, 1  ;;  %v16581_v7 = vld [vmem:[#allocation27_spill] sm:$0xff] }
 0x523   : > { %v3601_v24 = vpop.f32.mrf.mxu3  ;;  %v4235_v37 = vrot.slane %v3987_v39, 2  ;;  %v4989_v16 = vsel %vm1631_vm6, %v4957_v17, %v8993_v48 }
 0x524   : > { %v3825_v10 = vadd.f32 %v13293_v57, %v3712_v31  ;;  %9151 = vrot.lane.b32.xlu1 %v9150_v43, %s9641_s22  ;;  %v13347_v0 = vsel %vm809_vm5, %v4112_v6, %v4113_v58  ;;  %v13350_v22 = vsel %vm809_vm5, %v4113_v58, %v4115_v3  ;;  %v4237_v57 = vrot.slane %v3988_v55, 2  ;;  %v13387_v55 = vpop.permute.xlu0 %9041 }
 0x525   : > { %v9165_v18 = vpack.i.bf16 %v13350_v22, %v13347_v0  ;;  %v3602_v28 = vadd.f32 %v12969_v4, %v3601_v24  ;;  %v13368_v14 = vsel %vm932_vm4, %v4234_v50, %v4235_v37  ;;  %v5021_v39 = vsel %vm1664_vm7, %v4989_v16, %v9028_v41  ;;  %v13390_v58 = vpop.f32.mrf.mxu0 }
 0x526   : > { %v3882_v42 = vmul.f32 0.2, %v3825_v10  ;;  %7843 = vmatmul.msk.f32.gmra.mxu2 %vm363_vm0, %v12770_v34  ;;  %v13371_v40 = vsel %vm932_vm4, %v4235_v37, %v4237_v57  ;;  %v9029_v24 = vunpack.i.h.bf16 %v9027_v47 }
 0x527   : > { %9166 = vrot.lane.b32.xlu0 %v9165_v18, %s9641_s22  ;;  %v9170_v25 = vpack.i.bf16 %v13371_v40, %v13368_v14 }
 0x528   : > { %v3914_v1 = vmax.f32 %v3825_v10, %v3882_v42  ;;  %5295 = vmatmul.f32.gmra.mxu3 %v5020_v33  ;;  %v13393_v10 = vpop.permute.xlu2 %9056  ;;  %v16582_v42 = vld [vmem:[#allocation5_spill] sm:$0xff] }
 0x529   : > { %v3714_v59 = vpop.f32.mrf.mxu2  ;;  %v3989_v6 = vld [vmem:[#allocation2 + $0xf0] sm:$0xff]  ;;  %v4958_v37 = vsel %vm363_vm0, %v16582_v42, %v9049_v21 }
 0x52a   : > { %3946 = vst.msk [vmem:[#allocation2 + $0xf9] sm:$0xff] %vm363_vm0, %v3914_v1  ;;  %v3715_v34 = vadd.f32 %v3714_v59, %v3602_v28  ;;  %v4117_v57 = vrot.slane %v3989_v6, 1  ;;  %v16583_v1 = vld [vmem:[#allocation39_spill] sm:$0xff]  ;;  %v4990_v28 = vsel %vm1631_vm6, %v4958_v37, %v8994_v52  ;;  %v16585_v52 = vld [vmem:[#allocation48_spill] sm:$0xff] }
 0x52b   : > { %v3604_v13 = vpop.f32.mrf.mxu3  ;;  %v5022_v47 = vsel %vm1664_vm7, %v4990_v28, %v9029_v24  ;;  %v9013_v24 = vunpack.i.l.bf16 %v13317_v45  ;;  %v9590_v37 = vld [vmem:[#allocation2 + $0x60] sm:$0xff] }
 0x52c   : > { %v3828_v60 = vadd.f32 %v13312_v23, %v3715_v34  ;;  %9156 = vrot.lane.b32.xlu1 %v9150_v43, %s9642_s11  ;;  %v3605_v63 = vadd.f32 %v12969_v4, %v3604_v13 }
 0x52e   : > { %v3883_v56 = vmul.f32 0.2, %v3828_v60  ;;  %7844 = vmatmul.msk.f32.gmra.mxu2 %vm363_vm0, %v16581_v7  ;;  %v9058_v7 = vunpack.i.l.bf16 %v13393_v10 }
 0x52f   : > { %9171 = vrot.lane.b32.xlu0 %v9170_v25, %s9642_s11 }
 0x530   : > { %v3915_v23 = vmax.f32 %v3828_v60, %v3883_v56  ;;  %5298 = vmatmul.f32.gmra.mxu3 %v5021_v39  ;;  %v4239_v56 = vrot.slane %v3989_v6, 2  ;;  %v13420_v16 = vpop.permute.xlu2 %9091 }
 0x531   : > { %v3717_v19 = vpop.f32.mrf.mxu2  ;;  %v3990_v35 = vld [vmem:[#allocation2 + $0xf8] sm:$0xff]  ;;  %v3991_v46 = vld [vmem:[#allocation2 + $0x100] sm:$0x3] }
 0x532   : > { %3947 = vst.msk [vmem:[#allocation2 + $0x109] sm:$0xff] %vm363_vm0, %v3915_v23  ;;  %v3718_v31 = vadd.f32 %v3717_v19, %v3605_v63  ;;  %v9180_v43 = vpack.i.bf16 %v3990_v35, %v3989_v6  ;;  %v4118_v3 = vrot.slane %v3990_v35, 1  ;;  %v4120_v32 = vrot.slane %v3991_v46, 1  ;;  %v16584_v63 = vld [vmem:[#allocation6_spill] sm:$0xff]  ;;  %v13427_v19 = vpop.f32.mrf.mxu0 }
 0x533   : > { %v3607_v11 = vpop.f32.mrf.mxu3  ;;  %v4240_v48 = vrot.slane %v3990_v35, 2  ;;  %v4242_v17 = vrot.slane %v3991_v46, 2 }
 0x534   : > { %v3831_v38 = vadd.f32 %v13329_v2, %v3718_v31  ;;  %9181 = vrot.lane.b32.xlu2 %v9180_v43, %s9641_s22  ;;  %9161 = vrot.lane.b32.xlu1 %v9165_v18, %s9643_s12  ;;  %v13407_v2 = vsel %vm809_vm5, %v4117_v57, %v4118_v3  ;;  %v13410_v33 = vsel %vm809_vm5, %v4118_v3, %v4120_v32 }
 0x535   : > { %v3608_v50 = vadd.f32 %v12969_v4, %v3607_v11  ;;  %v9195_v13 = vpack.i.bf16 %v13410_v33, %v13407_v2  ;;  %v9033_v4 = vunpack.i.l.bf16 %v13170_v15  ;;  %v13431_v35 = vsel %vm932_vm4, %v4239_v56, %v4240_v48  ;;  %v13443_v11 = vld [vmem:[%s16173_s5] ss:$0 sm:$0xff] }
 0x536   : > { %v3884_v61 = vmul.f32 0.2, %v3831_v38  ;;  %7845 = vmatmul.msk.f32.gmra.mxu2 %vm363_vm0, %v16583_v1  ;;  %v13402_v49 = vpop.permute.xlu1 %9061  ;;  %v13437_v3 = vsel %vm932_vm4, %v4240_v48, %v4242_v17  ;;  %v9024_v17 = vunpack.i.h.bf16 %v13334_v30 }
 0x537   : > { %9176 = vrot.lane.b32.xlu0 %v9170_v25, %s9643_s12  ;;  %v9023_v25 = vunpack.i.l.bf16 %v13334_v30  ;;  %v4863_v57 = vsel %vm363_vm0, %v9590_v37, %v9033_v4  ;;  %v9591_v30 = vld [vmem:[#allocation2 + $0x68] sm:$0xff] }
 0x538   : > { %v3916_v18 = vmax.f32 %v3831_v38, %v3884_v61  ;;  %5301 = vmatmul.f32.gmra.mxu3 %v5022_v47  ;;  %v9034_v61 = vunpack.i.h.bf16 %v13170_v15 }
 0x539   : > { %v3720_v59 = vpop.f32.mrf.mxu2  ;;  %v9077_v34 = vpop.permute.xlu0 %9076 }
 0x53a   : > { %3948 = vst.msk [vmem:[#allocation2 + $0x111] sm:$0xff] %vm363_vm0, %v3916_v18  ;;  %v3721_v41 = vadd.f32 %v3720_v59, %v3608_v50  ;;  %v9078_v60 = vunpack.i.l.bf16 %v9077_v34  ;;  %v9079_v31 = vunpack.i.h.bf16 %v9077_v34  ;;  %v9200_v50 = vpack.i.bf16 %v13437_v3, %v13431_v35 }
 0x53b   : > { %v3610_v23 = vpop.f32.mrf.mxu3 }
 0x53c   : > { %v3834_v21 = vadd.f32 %v13360_v62, %v3721_v41  ;;  %9186 = vrot.lane.b32.xlu2 %v9180_v43, %s9642_s11  ;;  %9196 = vrot.lane.b32.xlu1 %v9195_v13, %s9641_s22  ;;  %v4959_v39 = vsel %vm363_vm0, %v16584_v63, %v9078_v60  ;;  %v3611_v42 = vadd.f32 %v13443_v11, %v3610_v23  ;;  %v3992_v41 = vld [vmem:[#allocation2 + $0x108] sm:$0xff] }
 0x53d   : > { %v4991_v6 = vsel %vm1631_vm6, %v4959_v39, %v9023_v25  ;;  %v16586_v60 = vld [vmem:[#allocation28_spill] sm:$0xff]  ;;  %v4864_v39 = vsel %vm363_vm0, %v9591_v30, %v9034_v61 }
 0x53e   : > { %v3885_v46 = vmul.f32 0.2, %v3834_v21  ;;  %7846 = vmatmul.msk.f32.gmra.mxu2 %vm363_vm0, %v16585_v52  ;;  %v9067_v62 = vpop.permute.xlu1 %9066  ;;  %v5023_v43 = vsel %vm1664_vm7, %v4991_v6, %v9058_v7  ;;  %v4960_v15 = vsel %vm363_vm0, %v16586_v60, %v9079_v31  ;;  %v4122_v6 = vrot.slane %v3992_v41, 1  ;;  %v13469_v31 = vpop.permute.xlu2 %9096 }
 0x53f   : > { %v9068_v32 = vunpack.i.l.bf16 %v9067_v62  ;;  %v9069_v59 = vunpack.i.h.bf16 %v9067_v62  ;;  %v4992_v63 = vsel %vm1631_vm6, %v4960_v15, %v9024_v17  ;;  %v3842_v62 = vpop.f32.mrf.mxu0  ;;  %v9098_v37 = vunpack.i.l.bf16 %v13469_v31 }
 0x540   : > { %v3917_v38 = vmax.f32 %v3834_v21, %v3885_v46  ;;  %5304 = vmatmul.f32.gmra.mxu3 %v5023_v43  ;;  %v9059_v46 = vunpack.i.h.bf16 %v13393_v10  ;;  %v9014_v43 = vunpack.i.h.bf16 %v13317_v45  ;;  %v4244_v17 = vrot.slane %v3992_v41, 2 }
 0x541   : > { %v3723_v1 = vpop.f32.mrf.mxu2  ;;  %v4895_v28 = vsel %vm1631_vm6, %v4863_v57, %v9068_v32  ;;  %v13449_v18 = vld [vmem:[#allocation2 + $0x110] sm:$0xff]  ;;  %v3994_v47 = vld [vmem:[#allocation2 + $0x118] sm:$0x3]  ;;  %v13461_v21 = vpop.permute.xlu0 %9081  ;;  %v9063_v32 = vunpack.i.l.bf16 %v13402_v49 }
 0x542   : > { %3949 = vst.msk [vmem:[#allocation2 + $0x121] sm:$0xff] %vm363_vm0, %v3917_v38  ;;  %v3724_v34 = vadd.f32 %v3723_v1, %v3611_v42  ;;  %v4927_v48 = vsel %vm1664_vm7, %v4895_v28, %v9013_v24  ;;  %v9210_v25 = vpack.i.bf16 %v13449_v18, %v3992_v41  ;;  %v4123_v56 = vrot.slane %v13449_v18, 1 }
 0x543   : > { %5191 = vmatmul.f32.gmra.mxu1 %v4927_v48  ;;  %v4125_v7 = vrot.slane %v3994_v47, 1  ;;  %v3613_v23 = vpop.f32.mrf.mxu3  ;;  %v4245_v28 = vrot.slane %v13449_v18, 2  ;;  %v9064_v41 = vunpack.i.h.bf16 %v13402_v49 }
 0x544   : > { %v3837_v4 = vadd.f32 %v13390_v58, %v3724_v34  ;;  %9191 = vrot.lane.b32.xlu2 %v9195_v13, %s9643_s12  ;;  %9201 = vrot.lane.b32.xlu1 %v9200_v50, %s9642_s11  ;;  %v4896_v13 = vsel %vm1631_vm6, %v4864_v39, %v9069_v59  ;;  %v13479_v24 = vsel %vm809_vm5, %v4122_v6, %v4123_v56  ;;  %v4247_v59 = vrot.slane %v3994_v47, 2  ;;  %v9592_v34 = vld [vmem:[#allocation2 + $0x78] sm:$0xff] }
 0x545   : > { %9211 = vrot.lane.b32.xlu0 %v9210_v25, %s9641_s22  ;;  %v13482_v10 = vsel %vm809_vm5, %v4123_v56, %v4125_v7  ;;  %v3614_v42 = vadd.f32 %v13443_v11, %v3613_v23  ;;  %v4928_v61 = vsel %vm1664_vm7, %v4896_v13, %v9014_v43  ;;  %v4865_v48 = vsel %vm363_vm0, %v9592_v34, %v9063_v32 }
 0x546   : > { %v3886_v58 = vmul.f32 0.2, %v3837_v4  ;;  %7847 = vmatmul.msk.f32.gmra.mxu2 %vm363_vm0, %v13074_v12  ;;  %v13473_v52 = vpop.permute.xlu1 %9071  ;;  %v5024_v12 = vsel %vm1664_vm7, %v4992_v63, %v9059_v46  ;;  %v9225_v1 = vpack.i.bf16 %v13482_v10, %v13479_v24  ;;  %v4897_v47 = vsel %vm1631_vm6, %v4865_v48, %v9098_v37 }
 0x547   : > { %v9053_v23 = vunpack.i.l.bf16 %v13364_v20  ;;  %v9099_v63 = vunpack.i.h.bf16 %v13469_v31  ;;  %v3845_v39 = vpop.f32.mrf.mxu0 }
 0x548   : > { %v3918_v38 = vmax.f32 %v3837_v4, %v3886_v58  ;;  %5307 = vmatmul.f32.gmra.mxu3 %v5024_v12  ;;  %v13503_v4 = vsel %vm932_vm4, %v4244_v17, %v4245_v28 }
 0x549   : > { %v3726_v57 = vpop.f32.mrf.mxu2  ;;  %v13497_v7 = vpop.permute.xlu0 %9086  ;;  %v3995_v43 = vld [vmem:[#allocation2 + $0x120] sm:$0xff] }
 0x54a   : > { %3950 = vst.msk [vmem:[#allocation2 + $0x129] sm:$0xff] %vm363_vm0, %v3918_v38  ;;  %v3727_v45 = vadd.f32 %v3726_v57, %v3614_v42  ;;  %v9088_v6 = vunpack.i.l.bf16 %v13497_v7  ;;  %v13519_v42 = vpop.permute.xlu2 %9101 }
 0x54b   : > { %5194 = vmatmul.f32.gmra.mxu1 %v4928_v61  ;;  %v3616_v15 = vpop.f32.mrf.mxu3 }
 0x54c   : > { %v3840_v60 = vadd.f32 %v13427_v19, %v3727_v45  ;;  %9226 = vrot.lane.b32.xlu2 %v9225_v1, %s9641_s22  ;;  %9206 = vrot.lane.b32.xlu1 %v9200_v50, %s9643_s12  ;;  %v13506_v19 = vsel %vm932_vm4, %v4245_v28, %v4247_v59  ;;  %v9043_v50 = vunpack.i.l.bf16 %v13387_v55  ;;  %v9593_v45 = vld [vmem:[#allocation2 + $0x80] sm:$0xff] }
 0x54d   : > { %9216 = vrot.lane.b32.xlu0 %v9210_v25, %s9642_s11  ;;  %v9230_v13 = vpack.i.bf16 %v13506_v19, %v13503_v4  ;;  %v4866_v28 = vsel %vm363_vm0, %v9593_v45, %v9064_v41 }
 0x54e   : > { %v3887_v56 = vmul.f32 0.2, %v3840_v60  ;;  %7848 = vmatmul.msk.f32.gmra.mxu2 %vm363_vm0, %v13077_v26  ;;  %v9107_v18 = vpop.permute.xlu1 %9106  ;;  %v3617_v26 = vadd.f32 %v13443_v11, %v3616_v15  ;;  %v4929_v58 = vsel %vm1664_vm7, %v4897_v47, %v9043_v50  ;;  %v4898_v17 = vsel %vm1631_vm6, %v4866_v28, %v9099_v63 }
 0x54f   : > { %v9108_v25 = vunpack.i.l.bf16 %v9107_v18  ;;  %v9109_v31 = vunpack.i.h.bf16 %v9107_v18  ;;  %v9054_v18 = vunpack.i.h.bf16 %v13364_v20  ;;  %v9044_v47 = vunpack.i.h.bf16 %v13387_v55 }
 0x550   : > { %v3919_v30 = vmax.f32 %v3840_v60, %v3887_v56  ;;  %v4127_v56 = vrot.slane %v3995_v43, 1 }
 0x551   : > { %v3729_v46 = vpop.f32.mrf.mxu2  ;;  %v3996_v32 = vld [vmem:[#allocation2 + $0x128] sm:$0xff]  ;;  %v4961_v49 = vsel %vm363_vm0, %v13044_v54, %v9108_v25  ;;  %v3997_v38 = vld [vmem:[#allocation2 + $0x130] sm:$0x3] }
 0x552   : > { %3951 = vst.msk [vmem:[#allocation2 + $0x139] sm:$0xff] %vm363_vm0, %v3919_v30  ;;  %v3730_v12 = vadd.f32 %v3729_v46, %v3617_v26  ;;  %v9240_v37 = vpack.i.bf16 %v3996_v32, %v3995_v43  ;;  %v4993_v57 = vsel %vm1631_vm6, %v4961_v49, %v9053_v23  ;;  %v4128_v54 = vrot.slane %v3996_v32, 1  ;;  %v3848_v30 = vpop.f32.mrf.mxu0 }
 0x553   : > { %5197 = vmatmul.f32.gmra.mxu1 %v4929_v58  ;;  %v5025_v61 = vsel %vm1664_vm7, %v4993_v57, %v9088_v6  ;;  %v3619_v34 = vpop.f32.mrf.mxu3  ;;  %v4130_v48 = vrot.slane %v3997_v38, 1  ;;  %v4930_v23 = vsel %vm1664_vm7, %v4898_v17, %v9044_v47  ;;  %v4250_v6 = vrot.slane %v3996_v32, 2 }
 0x554   : > { %v3843_v59 = vadd.f32 %v3842_v62, %v3730_v12  ;;  %9231 = vrot.lane.b32.xlu2 %v9230_v13, %s9642_s11  ;;  %9241 = vrot.lane.b32.xlu1 %v9240_v37, %s9641_s22  ;;  %v4962_v62 = vsel %vm363_vm0, %v13047_v27, %v9109_v31  ;;  %v13539_v41 = vsel %vm809_vm5, %v4127_v56, %v4128_v54  ;;  %v9089_v27 = vunpack.i.h.bf16 %v13497_v7 }
 0x555   : > { %9221 = vrot.lane.b32.xlu0 %v9225_v1, %s9643_s12  ;;  %5310 = vmatmul.f32.gmra.mxu3 %v5025_v61  ;;  %v3620_v1 = vadd.f32 %v13443_v11, %v3619_v34  ;;  %v4994_v63 = vsel %vm1631_vm6, %v4962_v62, %v9054_v18  ;;  %v4252_v46 = vrot.slane %v3997_v38, 2  ;;  %v4249_v12 = vrot.slane %v3995_v43, 2 }
 0x556   : > { %v3888_v60 = vmul.f32 0.2, %v3843_v59  ;;  %7849 = vmatmul.msk.f32.gmra.mxu2 %vm363_vm0, %v13175_v29  ;;  %v13530_v15 = vpop.permute.xlu1 %9111  ;;  %v13542_v29 = vsel %vm809_vm5, %v4128_v54, %v4130_v48  ;;  %v5026_v7 = vsel %vm1664_vm7, %v4994_v63, %v9089_v27  ;;  %v9083_v43 = vunpack.i.l.bf16 %v13461_v21 }
 0x557   : > { %v9255_v26 = vpack.i.bf16 %v13542_v29, %v13539_v41  ;;  %v13557_v32 = vsel %vm932_vm4, %v4249_v12, %v4250_v6 }
 0x558   : > { %v3920_v50 = vmax.f32 %v3843_v59, %v3888_v60 }
 0x559   : > { %v3732_v25 = vpop.f32.mrf.mxu2  ;;  %v3998_v59 = vld [vmem:[#allocation2 + $0x138] sm:$0xff] }
 0x55a   : > { %3952 = vst.msk [vmem:[#allocation2 + $0x141] sm:$0xff] %vm363_vm0, %v3920_v50  ;;  %v3733_v20 = vadd.f32 %v3732_v25, %v3620_v1  ;;  %v9137_v55 = vpop.permute.xlu2 %9136  ;;  %v3851_v1 = vpop.f32.mrf.mxu0  ;;  %v4132_v25 = vrot.slane %v3998_v59, 1 }
 0x55b   : > { %5200 = vmatmul.f32.gmra.mxu1 %v4930_v23  ;;  %v9138_v49 = vunpack.i.l.bf16 %v9137_v55  ;;  %v3622_v31 = vpop.f32.mrf.mxu3  ;;  %v9139_v18 = vunpack.i.h.bf16 %v9137_v55 }
 0x55c   : > { %v3846_v58 = vadd.f32 %v3845_v39, %v3733_v20  ;;  %9236 = vrot.lane.b32.xlu2 %v9230_v13, %s9643_s12  ;;  %9246 = vrot.lane.b32.xlu1 %v9240_v37, %s9642_s11  ;;  %v13560_v39 = vsel %vm932_vm4, %v4250_v6, %v4252_v46  ;;  %v3623_v38 = vadd.f32 %v13443_v11, %v3622_v31  ;;  %v9084_v6 = vunpack.i.h.bf16 %v13461_v21 }
 0x55d   : > { %9256 = vrot.lane.b32.xlu0 %v9255_v26, %s9641_s22  ;;  %5313 = vmatmul.f32.gmra.mxu3 %v5026_v7  ;;  %v4963_v45 = vsel %vm363_vm0, %v13139_v5, %v9138_v49  ;;  %v9260_v60 = vpack.i.bf16 %v13560_v39, %v13557_v32  ;;  %v4254_v21 = vrot.slane %v3998_v59, 2 }
 0x55e   : > { %v3889_v57 = vmul.f32 0.2, %v3846_v58  ;;  %7850 = vmatmul.msk.f32.gmra.mxu2 %vm363_vm0, %v13178_v51  ;;  %v9117_v61 = vpop.permute.xlu1 %9116  ;;  %v4995_v17 = vsel %vm1631_vm6, %v4963_v45, %v9083_v43  ;;  %v13604_v43 = vpop.f32.mrf.mxu1 }
 0x55f   : > { %v9118_v37 = vunpack.i.l.bf16 %v9117_v61  ;;  %v9119_v20 = vunpack.i.h.bf16 %v9117_v61 }
 0x560   : > { %v3921_v13 = vmax.f32 %v3846_v58, %v3889_v57 }
 0x561   : > { %v3735_v28 = vpop.f32.mrf.mxu2  ;;  %v3999_v34 = vld [vmem:[#allocation2 + $0x140] sm:$0xff]  ;;  %v4000_v51 = vld [vmem:[#allocation2 + $0x148] sm:$0x3]  ;;  %v5027_v50 = vsel %vm1664_vm7, %v4995_v17, %v9118_v37 }
 0x562   : > { %3953 = vst.msk [vmem:[#allocation2 + $0x151] sm:$0xff] %vm363_vm0, %v3921_v13  ;;  %v3736_v54 = vadd.f32 %v3735_v28, %v3623_v38  ;;  %v9270_v48 = vpack.i.bf16 %v3999_v34, %v3998_v59  ;;  %v4133_v56 = vrot.slane %v3999_v34, 1  ;;  %v4135_v62 = vrot.slane %v4000_v51, 1  ;;  %v3854_v13 = vpop.f32.mrf.mxu0 }
 0x563   : > { %v3625_v5 = vpop.f32.mrf.mxu3  ;;  %v4255_v31 = vrot.slane %v3999_v34, 2  ;;  %v4257_v7 = vrot.slane %v4000_v51, 2 }
 0x564   : > { %v3849_v47 = vadd.f32 %v3848_v30, %v3736_v54  ;;  %9271 = vrot.lane.b32.xlu2 %v9270_v48, %s9641_s22  ;;  %9251 = vrot.lane.b32.xlu1 %v9255_v26, %s9643_s12  ;;  %v13577_v63 = vsel %vm809_vm5, %v4132_v25, %v4133_v56  ;;  %v13580_v27 = vsel %vm809_vm5, %v4133_v56, %v4135_v62 }
 0x565   : > { %9261 = vrot.lane.b32.xlu0 %v9260_v60, %s9642_s11  ;;  %5316 = vmatmul.f32.gmra.mxu3 %v5027_v50  ;;  %v3626_v30 = vadd.f32 %v13443_v11, %v3625_v5  ;;  %v4964_v26 = vsel %vm363_vm0, %v13142_v8, %v9139_v18  ;;  %v13599_v37 = vsel %vm932_vm4, %v4254_v21, %v4255_v31  ;;  %v9093_v5 = vunpack.i.l.bf16 %v13420_v16 }
 0x566   : > { %v3890_v23 = vmul.f32 0.2, %v3849_v47  ;;  %7851 = vmatmul.msk.f32.gmra.mxu2 %vm363_vm0, %v13274_v53  ;;  %v9285_v53 = vpack.i.bf16 %v13580_v27, %v13577_v63  ;;  %v4996_v49 = vsel %vm1631_vm6, %v4964_v26, %v9084_v6  ;;  %v13602_v45 = vsel %vm932_vm4, %v4255_v31, %v4257_v7  ;;  %v13625_v31 = vpop.f32.mrf.mxu1 }
 0x567   : > { %v5028_v8 = vsel %vm1664_vm7, %v4996_v49, %v9119_v20  ;;  %v9290_v17 = vpack.i.bf16 %v13602_v45, %v13599_v37 }
 0x568   : > { %v3922_v55 = vmax.f32 %v3849_v47, %v3890_v23 }
 0x569   : > { %v3738_v46 = vpop.f32.mrf.mxu2  ;;  %v4001_v59 = vld [vmem:[#allocation2 + $0x150] sm:$0xff] }
 0x56a   : > { %3954 = vst.msk [vmem:[#allocation2 + $0x159] sm:$0xff] %vm363_vm0, %v3922_v55  ;;  %v3739_v58 = vadd.f32 %v3738_v46, %v3626_v30  ;;  %v4137_v50 = vrot.slane %v4001_v59, 1  ;;  %v3857_v23 = vpop.f32.mrf.mxu0  ;;  %v9073_v46 = vunpack.i.l.bf16 %v13473_v52 }
 0x56b   : > { %v3628_v57 = vpop.f32.mrf.mxu3 }
 0x56c   : > { %v3852_v12 = vadd.f32 %v3851_v1, %v3739_v58  ;;  %9276 = vrot.lane.b32.xlu2 %v9270_v48, %s9642_s11  ;;  %9286 = vrot.lane.b32.xlu1 %v9285_v53, %s9641_s22  ;;  %v3629_v34 = vadd.f32 %v13443_v11, %v3628_v57 }
 0x56d   : > { %9266 = vrot.lane.b32.xlu0 %v9260_v60, %s9643_s12  ;;  %5319 = vmatmul.f32.gmra.mxu3 %v5028_v8 }
 0x56e   : > { %v3891_v61 = vmul.f32 0.2, %v3852_v12  ;;  %7852 = vmatmul.msk.f32.gmra.mxu2 %vm363_vm0, %v13277_v44 }
 0x56f   : > { %v13596_v38 = vpop.permute.xlu0 %9121 }
 0x570   : > { %v3923_v28 = vmax.f32 %v3852_v12, %v3891_v61  ;;  %v9094_v61 = vunpack.i.h.bf16 %v13420_v16 }
 0x571   : > { %v3741_v51 = vpop.f32.mrf.mxu2  ;;  %v4002_v54 = vld [vmem:[#allocation2 + $0x158] sm:$0xff]  ;;  %v4003_v48 = vld [vmem:[#allocation2 + $0x160] sm:$0x3] }
 0x572   : > { %3955 = vst.msk [vmem:[#allocation2 + $0x169] sm:$0xff] %vm363_vm0, %v3923_v28  ;;  %v3742_v44 = vadd.f32 %v3741_v51, %v3629_v34  ;;  %v9300_v60 = vpack.i.bf16 %v4002_v54, %v4001_v59  ;;  %v4138_v56 = vrot.slane %v4002_v54, 1  ;;  %v4140_v62 = vrot.slane %v4003_v48, 1 }
 0x573   : > { %v3631_v47 = vpop.f32.mrf.mxu3  ;;  %v4260_v8 = vrot.slane %v4002_v54, 2  ;;  %v4262_v21 = vrot.slane %v4003_v48, 2 }
 0x574   : > { %v3855_v18 = vadd.f32 %v3854_v13, %v3742_v44  ;;  %9281 = vrot.lane.b32.xlu2 %v9285_v53, %s9643_s12  ;;  %9291 = vrot.lane.b32.xlu1 %v9290_v17, %s9642_s11  ;;  %v13617_v20 = vsel %vm809_vm5, %v4137_v50, %v4138_v56  ;;  %v13620_v55 = vsel %vm809_vm5, %v4138_v56, %v4140_v62  ;;  %v9594_v53 = vld [vmem:[#allocation2 + $0x90] sm:$0xff]  ;;  %v13633_v13 = vpop.permute.xlu2 %9141  ;;  %v4259_v44 = vrot.slane %v4001_v59, 2 }
 0x575   : > { %9301 = vrot.lane.b32.xlu0 %v9300_v60, %s9641_s22  ;;  %v3632_v26 = vadd.f32 %v13443_v11, %v3631_v47  ;;  %v4867_v49 = vsel %vm363_vm0, %v9594_v53, %v9093_v5  ;;  %v9315_v7 = vpack.i.bf16 %v13620_v55, %v13617_v20  ;;  %v13644_v16 = vsel %vm932_vm4, %v4260_v8, %v4262_v21 }
 0x576   : > { %v3892_v1 = vmul.f32 0.2, %v3855_v18  ;;  %7853 = vmatmul.msk.f32.gmra.mxu2 %vm363_vm0, %v13368_v14  ;;  %v13641_v54 = vsel %vm932_vm4, %v4259_v44, %v4260_v8 }
 0x577   : > { %v9127_v25 = vpop.permute.xlu0 %9126 }
 0x578   : > { %v3924_v30 = vmax.f32 %v3855_v18, %v3892_v1  ;;  %v9128_v6 = vunpack.i.l.bf16 %v9127_v25  ;;  %v9129_v51 = vunpack.i.h.bf16 %v9127_v25  ;;  %v9595_v18 = vld [vmem:[#allocation2 + $0x98] sm:$0xff]  ;;  %v9074_v25 = vunpack.i.h.bf16 %v13473_v52 }
 0x579   : > { %v3744_v58 = vpop.f32.mrf.mxu2  ;;  %v4004_v5 = vld [vmem:[#allocation2 + $0x168] sm:$0xff] }
 0x57a   : > { %3956 = vst.msk [vmem:[#allocation2 + $0x171] sm:$0xff] %vm363_vm0, %v3924_v30  ;;  %v3745_v14 = vadd.f32 %v3744_v58, %v3632_v26  ;;  %v4899_v12 = vsel %vm1631_vm6, %v4867_v49, %v9128_v6  ;;  %v5174_v26 = vpop.f32.mrf.mxu1 }
 0x57b   : > { %v4931_v57 = vsel %vm1664_vm7, %v4899_v12, %v9073_v46  ;;  %v3634_v28 = vpop.f32.mrf.mxu3 }
 0x57c   : > { %v3858_v34 = vadd.f32 %v3857_v23, %v3745_v14  ;;  %9316 = vrot.lane.b32.xlu2 %v9315_v7, %s9641_s22  ;;  %9296 = vrot.lane.b32.xlu1 %v9290_v17, %s9643_s12  ;;  %v3635_v48 = vadd.f32 %v13443_v11, %v3634_v28  ;;  %v4868_v17 = vsel %vm363_vm0, %v9595_v18, %v9094_v61  ;;  %v13664_v14 = vpop.permute.xlu2 %9146 }
 0x57d   : > { %9306 = vrot.lane.b32.xlu0 %v9300_v60, %s9642_s11  ;;  %5203 = vmatmul.f32.gmra.mxu1 %v4931_v57  ;;  %v3860_v60 = vpop.f32.mrf.mxu0  ;;  %v4900_v50 = vsel %vm1631_vm6, %v4868_v17, %v9129_v51  ;;  %v9320_v23 = vpack.i.bf16 %v13644_v16, %v13641_v54  ;;  %v4142_v57 = vrot.slane %v4004_v5, 1 }
 0x57e   : > { %v3893_v56 = vmul.f32 0.2, %v3858_v34  ;;  %7854 = vmatmul.msk.f32.gmra.mxu2 %vm363_vm0, %v13371_v40  ;;  %v13652_v40 = vld [vmem:[%s16175_s7] ss:$0 sm:$0xff]  ;;  %v4932_v58 = vsel %vm1664_vm7, %v4900_v50, %v9074_v25 }
 0x57f   : > { %v5169_v52 = vadd.f32 %v13652_v40, %v13604_v43 }
 0x580   : > { %v3925_v62 = vmax.f32 %v3858_v34, %v3893_v56 }
 0x581   : > { %v3747_v47 = vpop.f32.mrf.mxu2  ;;  %v4005_v59 = vld [vmem:[#allocation2 + $0x170] sm:$0xff]  ;;  %v4006_v1 = vld [vmem:[#allocation2 + $0x178] sm:$0x3] }
 0x582   : > { %3957 = vst.msk [vmem:[#allocation2 + $0x181] sm:$0xff] %vm363_vm0, %v3925_v62  ;;  %v3748_v11 = vadd.f32 %v3747_v47, %v3635_v48  ;;  %v9330_v30 = vpack.i.bf16 %v4005_v59, %v4004_v5  ;;  %v4143_v53 = vrot.slane %v4005_v59, 1  ;;  %v4145_v49 = vrot.slane %v4006_v1, 1  ;;  %v5177_v62 = vpop.f32.mrf.mxu1 }
 0x583   : > { %v5281_v46 = vpop.f32.mrf.mxu3  ;;  %v4267_v56 = vrot.slane %v4006_v1, 2  ;;  %v5172_v48 = vadd.f32 %v13652_v40, %v13625_v31  ;;  %v4264_v47 = vrot.slane %v4004_v5, 2  ;;  %v13693_v1 = vpop.permute.xlu0 %9131 }
 0x584   : > { %v3861_v6 = vadd.f32 %v3860_v60, %v3748_v11  ;;  %9321 = vrot.lane.b32.xlu2 %v9320_v23, %s9642_s11  ;;  %9331 = vrot.lane.b32.xlu1 %v9330_v30, %s9641_s22  ;;  %v5282_v21 = vadd.f32 %v5281_v46, %v5169_v52  ;;  %v13669_v61 = vsel %vm809_vm5, %v4142_v57, %v4143_v53 }
 0x585   : > { %9311 = vrot.lane.b32.xlu0 %v9315_v7, %s9643_s12  ;;  %5206 = vmatmul.f32.gmra.mxu1 %v4932_v58  ;;  %v13672_v28 = vsel %vm809_vm5, %v4143_v53, %v4145_v49  ;;  %v5175_v52 = vadd.f32 %v13652_v40, %v5174_v26  ;;  %v9113_v26 = vunpack.i.l.bf16 %v13530_v15 }
 0x586   : > { %v3894_v12 = vmul.f32 0.2, %v3861_v6  ;;  %7855 = vmatmul.msk.f32.gmra.mxu2 %vm363_vm0, %v13431_v35  ;;  %v9345_v43 = vpack.i.bf16 %v13672_v28, %v13669_v61  ;;  %v4265_v35 = vrot.slane %v4005_v59, 2 }
 0x588   : > { %v3926_v8 = vmax.f32 %v3861_v6, %v3894_v12  ;;  %v13688_v50 = vsel %vm932_vm4, %v4264_v47, %v4265_v35  ;;  %v13691_v59 = vsel %vm932_vm4, %v4265_v35, %v4267_v56 }
 0x589   : > { %v5394_v7 = vpop.f32.mrf.mxu2  ;;  %v4007_v25 = vld [vmem:[#allocation2 + $0x180] sm:$0xff] }
 0x58a   : > { %3958 = vst.msk [vmem:[#allocation2 + $0x189] sm:$0xff] %vm363_vm0, %v3926_v8  ;;  %v5395_v34 = vadd.f32 %v5394_v7, %v5282_v21  ;;  %v4147_v49 = vrot.slane %v4007_v25, 1 }
 0x58b   : > { %v5284_v44 = vpop.f32.mrf.mxu3 }
 0x58c   : > { %v5490_v51 = vmul.f32 0.2, %v5395_v34  ;;  %9326 = vrot.lane.b32.xlu2 %v9320_v23, %s9643_s12  ;;  %9336 = vrot.lane.b32.xlu1 %v9330_v30, %s9642_s11  ;;  %v5285_v60 = vadd.f32 %v5284_v44, %v5172_v48  ;;  %v9148_v48 = vunpack.i.l.bf16 %v13664_v14 }
 0x58d   : > { %9346 = vrot.lane.b32.xlu0 %v9345_v43, %s9641_s22 }
 0x58e   : > { %v5522_v18 = vmax.f32 %v5395_v34, %v5490_v51  ;;  %v13682_v17 = vpop.permute.xlu2 %9181  ;;  %7856 = vmatmul.msk.f32.gmra.mxu2 %vm363_vm0, %v13437_v3  ;;  %v9350_v3 = vpack.i.bf16 %v13691_v59, %v13688_v50  ;;  %v5180_v34 = vpop.f32.mrf.mxu1 }
 0x590   : > { %5554 = vst.msk [vmem:[#allocation2 + $0x19] sm:$0xff] %vm363_vm0, %v5522_v18 }
 0x591   : > { %v5397_v31 = vpop.f32.mrf.mxu2  ;;  %v4008_v11 = vld [vmem:[#allocation2 + $0x188] sm:$0xff]  ;;  %v4009_v23 = vld [vmem:[#allocation2 + $0x190] sm:$0x3] }
 0x592   : > { %v5398_v30 = vadd.f32 %v5397_v31, %v5285_v60  ;;  %v9360_v6 = vpack.i.bf16 %v4008_v11, %v4007_v25  ;;  %v4148_v5 = vrot.slane %v4008_v11, 1  ;;  %v4150_v46 = vrot.slane %v4009_v23, 1 }
 0x593   : > { %v5287_v53 = vpop.f32.mrf.mxu3  ;;  %v4270_v18 = vrot.slane %v4008_v11, 2  ;;  %v4272_v47 = vrot.slane %v4009_v23, 2  ;;  %v9123_v60 = vunpack.i.l.bf16 %v13596_v38  ;;  %v5178_v11 = vadd.f32 %v13652_v40, %v5177_v62 }
 0x594   : > { %v5491_v58 = vmul.f32 0.2, %v5398_v30  ;;  %9361 = vrot.lane.b32.xlu2 %v9360_v6, %s9641_s22  ;;  %9341 = vrot.lane.b32.xlu1 %v9345_v43, %s9643_s12  ;;  %v13708_v21 = vsel %vm809_vm5, %v4147_v49, %v4148_v5  ;;  %v13711_v7 = vsel %vm809_vm5, %v4148_v5, %v4150_v46  ;;  %v5288_v43 = vadd.f32 %v5287_v53, %v5175_v52 }
 0x595   : > { %9351 = vrot.lane.b32.xlu0 %v9350_v3, %s9642_s11  ;;  %v4269_v53 = vrot.slane %v4007_v25, 2  ;;  %v9103_v25 = vunpack.i.l.bf16 %v13519_v42 }
 0x596   : > { %v5523_v12 = vmax.f32 %v5398_v30, %v5491_v58  ;;  %v13701_v57 = vpop.permute.xlu2 %9186  ;;  %7857 = vmatmul.msk.f32.gmra.mxu2 %vm363_vm0, %v13503_v4  ;;  %v13705_v8 = vpop.permute.xlu1 %9151  ;;  %v9370_v4 = vpack.i.bf16 %v13711_v7, %v13708_v21 }
 0x598   : > { %5555 = vst.msk [vmem:[#allocation2 + $0x21] sm:$0xff] %vm363_vm0, %v5523_v12 }
 0x599   : > { %v5400_v51 = vpop.f32.mrf.mxu2  ;;  %v9167_v44 = vpop.permute.xlu0 %9166 }
 0x59a   : > { %v5401_v35 = vadd.f32 %v5400_v51, %v5288_v43  ;;  %v9168_v56 = vunpack.i.l.bf16 %v9167_v44  ;;  %v9169_v30 = vunpack.i.h.bf16 %v9167_v44  ;;  %v9596_v43 = vld [vmem:[#allocation2 + $0xa8] sm:$0xff]  ;;  %v9114_v51 = vunpack.i.h.bf16 %v13530_v15 }
 0x59b   : > { %v5290_v5 = vpop.f32.mrf.mxu3  ;;  %v9149_v15 = vunpack.i.h.bf16 %v13664_v14 }
 0x59c   : > { %v5492_v31 = vmul.f32 0.2, %v5401_v35  ;;  %9366 = vrot.lane.b32.xlu2 %v9360_v6, %s9642_s11  ;;  %9371 = vrot.lane.b32.xlu1 %v9370_v4, %s9641_s22  ;;  %v4965_v46 = vsel %vm363_vm0, %v13260_v36, %v9168_v56  ;;  %v13732_v36 = vsel %vm932_vm4, %v4269_v53, %v4270_v18  ;;  %v5291_v62 = vadd.f32 %v5290_v5, %v5178_v11 }
 0x59d   : > { %9356 = vrot.lane.b32.xlu0 %v9350_v3, %s9643_s12  ;;  %v4997_v58 = vsel %vm1631_vm6, %v4965_v46, %v9113_v26  ;;  %v13735_v3 = vsel %vm932_vm4, %v4270_v18, %v4272_v47  ;;  %v4869_v26 = vsel %vm363_vm0, %v9596_v43, %v9123_v60  ;;  %v9124_v56 = vunpack.i.h.bf16 %v13596_v38  ;;  %v5183_v47 = vpop.f32.mrf.mxu1  ;;  %v13750_v60 = vld [vmem:[#allocation2 + $0x18] sm:$0xff] }
 0x59e   : > { %v5524_v23 = vmax.f32 %v5401_v35, %v5492_v31  ;;  %v13726_v49 = vpop.permute.xlu2 %9191  ;;  %7858 = vmatmul.msk.f32.gmra.mxu2 %vm363_vm0, %v13506_v19  ;;  %v9157_v52 = vpop.permute.xlu1 %9156  ;;  %v5029_v6 = vsel %vm1664_vm7, %v4997_v58, %v9148_v48  ;;  %v4966_v19 = vsel %vm363_vm0, %v13263_v9, %v9169_v30  ;;  %v9375_v18 = vpack.i.bf16 %v13735_v3, %v13732_v36 }
 0x59f   : > { %v9158_v12 = vunpack.i.l.bf16 %v9157_v52  ;;  %5322 = vmatmul.f32.gmra.mxu3 %v5029_v6  ;;  %v9159_v31 = vunpack.i.h.bf16 %v9157_v52  ;;  %v4998_v9 = vsel %vm1631_vm6, %v4966_v19, %v9114_v51  ;;  %v13756_v38 = vld [vmem:[#allocation2 + $0x20] sm:$0xff]  ;;  %v5591_v58 = vld [vmem:[#allocation2 + $0x28] sm:$0x3]  ;;  %v5181_v53 = vadd.f32 %v13652_v40, %v5180_v34  ;;  %v9597_v6 = vld [vmem:[#allocation2 + $0xb0] sm:$0xff] }
 0x5a0   : > { %5556 = vst.msk [vmem:[#allocation2 + $0x31] sm:$0xff] %vm363_vm0, %v5524_v23  ;;  %v5030_v52 = vsel %vm1664_vm7, %v4998_v9, %v9149_v15  ;;  %v5824_v43 = vrot.slane %v5591_v58, 2  ;;  %v9153_v19 = vunpack.i.l.bf16 %v13705_v8  ;;  %v5702_v51 = vrot.slane %v5591_v58, 1 }
 0x5a1   : > { %v5403_v44 = vpop.f32.mrf.mxu2  ;;  %v4901_v35 = vsel %vm1631_vm6, %v4869_v26, %v9158_v12  ;;  %v13748_v5 = vpop.permute.xlu0 %9171  ;;  %v4870_v12 = vsel %vm363_vm0, %v9597_v6, %v9124_v56  ;;  %v9104_v26 = vunpack.i.h.bf16 %v13519_v42 }
 0x5a2   : > { %v5404_v4 = vadd.f32 %v5403_v44, %v5291_v62  ;;  %v4933_v48 = vsel %vm1664_vm7, %v4901_v35, %v9103_v25  ;;  %v5700_v25 = vrot.slane %v13756_v38, 1  ;;  %v5822_v62 = vrot.slane %v13756_v38, 2 }
 0x5a3   : > { %5209 = vmatmul.f32.gmra.mxu1 %v4933_v48  ;;  %v5293_v46 = vpop.f32.mrf.mxu3  ;;  %v4902_v34 = vsel %vm1631_vm6, %v4870_v12, %v9159_v31  ;;  %v5699_v44 = vrot.slane %v13750_v60, 1  ;;  %v9188_v48 = vunpack.i.l.bf16 %v13701_v57 }
 0x5a4   : > { %v5493_v30 = vmul.f32 0.2, %v5404_v4  ;;  %5938 = vrot.lane.b32.xlu2 %v13750_v60, %s9641_s22  ;;  %9376 = vrot.lane.b32.xlu1 %v9375_v18, %s9643_s12  ;;  %v5825_v42 = vsel %vm932_vm4, %v5822_v62, %v5824_v43  ;;  %v13786_v15 = vsel %vm809_vm5, %v5700_v25, %v5702_v51  ;;  %v9133_v43 = vunpack.i.l.bf16 %v13693_v1 }
 0x5a5   : > { %5940 = vrot.lane.b32.xlu0 %v13756_v38, %s9641_s22  ;;  %v13780_v18 = vsel %vm809_vm5, %v5699_v44, %v5700_v25  ;;  %v5186_v38 = vpop.f32.mrf.mxu1 }
 0x5a6   : > { %v5525_v11 = vmax.f32 %v5404_v4, %v5493_v30  ;;  %v13762_v23 = vpop.permute.xlu2 %9226  ;;  %7859 = vmatmul.msk.f32.gmra.mxu2 %vm363_vm0, %v13557_v32  ;;  %v13766_v14 = vpop.permute.xlu1 %9161  ;;  %v5294_v32 = vadd.f32 %v5293_v46, %v5181_v53  ;;  %v4934_v4 = vsel %vm1664_vm7, %v4902_v34, %v9104_v26  ;;  %v9598_v30 = vld [vmem:[#allocation2 + $0xc0] sm:$0xff]  ;;  %v5184_v53 = vadd.f32 %v13652_v40, %v5183_v47 }
 0x5a7   : > { %5325 = vmatmul.f32.gmra.mxu3 %v5030_v52  ;;  %v4871_v46 = vsel %vm363_vm0, %v9598_v30, %v9153_v19  ;;  %v9143_v34 = vunpack.i.l.bf16 %v13633_v13  ;;  %v9154_v26 = vunpack.i.h.bf16 %v13705_v8  ;;  %v5821_v47 = vrot.slane %v13750_v60, 2 }
 0x5a8   : > { %5557 = vst.msk [vmem:[#allocation2 + $0x39] sm:$0xff] %vm363_vm0, %v5525_v11  ;;  %v4903_v25 = vsel %vm1631_vm6, %v4871_v46, %v9188_v48  ;;  %v9189_v48 = vunpack.i.h.bf16 %v13701_v57  ;;  %v5187_v57 = vadd.f32 %v13652_v40, %v5186_v38  ;;  %v9134_v38 = vunpack.i.h.bf16 %v13693_v1 }
 0x5a9   : > { %v5406_v35 = vpop.f32.mrf.mxu2  ;;  %v9177_v58 = vpop.permute.xlu0 %9176  ;;  %v5823_v30 = vsel %vm932_vm4, %v5821_v47, %v5822_v62 }
 0x5aa   : > { %v5407_v56 = vadd.f32 %v5406_v35, %v5294_v32  ;;  %v9178_v32 = vunpack.i.l.bf16 %v9177_v58 }
 0x5ab   : > { %5212 = vmatmul.f32.gmra.mxu1 %v4934_v4  ;;  %v5296_v9 = vpop.f32.mrf.mxu3 }
 0x5ac   : > { %v5494_v31 = vmul.f32 0.2, %v5407_v56  ;;  %6134 = vrot.lane.b32.xlu2 %v13780_v18, %s9643_s12  ;;  %6328 = vrot.lane.b32.xlu1 %v5825_v42, %s9642_s11  ;;  %v5297_v19 = vadd.f32 %v5296_v9, %v5184_v53 }
 0x5ad   : > { %6136 = vrot.lane.b32.xlu0 %v13786_v15, %s9643_s12 }
 0x5ae   : > { %v5526_v11 = vmax.f32 %v5407_v56, %v5494_v31  ;;  %v13793_v52 = vpop.permute.xlu2 %9231  ;;  %7860 = vmatmul.msk.f32.gmra.mxu2 %vm363_vm0, %v13560_v39  ;;  %v9197_v6 = vpop.permute.xlu1 %9196  ;;  %v4935_v56 = vsel %vm1664_vm7, %v4903_v25, %v9133_v43 }
 0x5af   : > { %v9198_v12 = vunpack.i.l.bf16 %v9197_v6  ;;  %v9199_v44 = vunpack.i.h.bf16 %v9197_v6  ;;  %v13808_v8 = vld [vmem:[#allocation2 + $0x38] sm:$0xff] }
 0x5b0   : > { %5558 = vst.msk [vmem:[#allocation2 + $0x49] sm:$0xff] %vm363_vm0, %v5526_v11 }
 0x5b1   : > { %v5409_v51 = vpop.f32.mrf.mxu2  ;;  %v4967_v39 = vsel %vm363_vm0, %v13347_v0, %v9198_v12  ;;  %v9599_v0 = vld [vmem:[#allocation2 + $0xc8] sm:$0xff]  ;;  %v4968_v6 = vsel %vm363_vm0, %v13350_v22, %v9199_v44  ;;  %v13834_v22 = vld [vmem:[#allocation2 + $0x30] sm:$0xff]  ;;  %v9228_v44 = vunpack.i.l.bf16 %v13762_v23 }
 0x5b2   : > { %v5410_v35 = vadd.f32 %v5409_v51, %v5297_v19  ;;  %v4999_v4 = vsel %vm1631_vm6, %v4967_v39, %v9143_v34  ;;  %v4872_v46 = vsel %vm363_vm0, %v9599_v0, %v9154_v26  ;;  %v5189_v34 = vpop.f32.mrf.mxu1  ;;  %v9179_v19 = vunpack.i.h.bf16 %v9177_v58  ;;  %v13841_v39 = vld [vmem:[#allocation2 + $0x40] sm:$0x3] }
 0x5b3   : > { %5215 = vmatmul.f32.gmra.mxu1 %v4935_v56  ;;  %v5031_v31 = vsel %vm1664_vm7, %v4999_v4, %v9178_v32  ;;  %v5299_v60 = vpop.f32.mrf.mxu3  ;;  %v4904_v25 = vsel %vm1631_vm6, %v4872_v46, %v9189_v48  ;;  %v9183_v58 = vunpack.i.l.bf16 %v13682_v17 }
 0x5b4   : > { %v5495_v9 = vmul.f32 0.2, %v5410_v35  ;;  %5944 = vrot.lane.b32.xlu2 %v13808_v8, %s9641_s22  ;;  %6420 = vrot.lane.b32.xlu1 %v5825_v42, %s9643_s12  ;;  %v9144_v42 = vunpack.i.h.bf16 %v13633_v13  ;;  %v5300_v43 = vadd.f32 %v5299_v60, %v5187_v57  ;;  %v4936_v32 = vsel %vm1664_vm7, %v4904_v25, %v9134_v38 }
 0x5b5   : > { %6326 = vrot.lane.b32.xlu0 %v5823_v30, %s9642_s11  ;;  %5328 = vmatmul.f32.gmra.mxu3 %v5031_v31  ;;  %v5707_v60 = vrot.slane %v13841_v39, 1  ;;  %v9163_v57 = vunpack.i.l.bf16 %v13766_v14  ;;  %v4969_v25 = vsel %vm363_vm0, %v13407_v2, %v9228_v44 }
 0x5b6   : > { %v5527_v53 = vmax.f32 %v5410_v35, %v5495_v9  ;;  %v13818_v11 = vpop.permute.xlu2 %9236  ;;  %7861 = vmatmul.msk.f32.gmra.mxu2 %vm363_vm0, %v13599_v37  ;;  %v13822_v62 = vpop.permute.xlu1 %9201  ;;  %v5000_v37 = vsel %vm1631_vm6, %v4968_v6, %v9144_v42  ;;  %v5190_v35 = vadd.f32 %v13652_v40, %v5189_v34  ;;  %v5705_v9 = vrot.slane %v13808_v8, 1  ;;  %v9600_v42 = vld [vmem:[#allocation2 + $0xd8] sm:$0xff] }
 0x5b7   : > { %v13827_v12 = vpop.permute.xlu0 %9211  ;;  %v5032_v1 = vsel %vm1664_vm7, %v5000_v37, %v9179_v19  ;;  %v9173_v34 = vunpack.i.l.bf16 %v13748_v5  ;;  %v9229_v37 = vunpack.i.h.bf16 %v13762_v23 }
 0x5b8   : > { %5559 = vst.msk [vmem:[#allocation2 + $0x51] sm:$0xff] %vm363_vm0, %v5527_v53 }
 0x5b9   : > { %v5412_v26 = vpop.f32.mrf.mxu2 }
 0x5ba   : > { %v5413_v47 = vadd.f32 %v5412_v26, %v5300_v43  ;;  %v9184_v26 = vunpack.i.h.bf16 %v13682_v17 }
 0x5bb   : > { %5218 = vmatmul.f32.gmra.mxu1 %v4936_v32  ;;  %v5302_v51 = vpop.f32.mrf.mxu3 }
 0x5bc   : > { %v5496_v13 = vmul.f32 0.2, %v5413_v47  ;;  %6036 = vrot.lane.b32.xlu2 %v13808_v8, %s9642_s11  ;;  %5942 = vrot.lane.b32.xlu1 %v13834_v22, %s9641_s22  ;;  %v5303_v0 = vadd.f32 %v5302_v51, %v5190_v35 }
 0x5bd   : > { %6418 = vrot.lane.b32.xlu0 %v5823_v30, %s9643_s12  ;;  %5331 = vmatmul.f32.gmra.mxu3 %v5032_v1  ;;  %v5001_v1 = vsel %vm1631_vm6, %v4969_v25, %v9173_v34  ;;  %v5704_v25 = vrot.slane %v13834_v22, 1 }
 0x5be   : > { %v5528_v56 = vmax.f32 %v5413_v47, %v5496_v13  ;;  %v13847_v4 = vpop.permute.xlu2 %9271  ;;  %7862 = vmatmul.msk.f32.gmra.mxu2 %vm363_vm0, %v13602_v45  ;;  %v13851_v48 = vpop.permute.xlu1 %9206  ;;  %v4873_v45 = vsel %vm363_vm0, %v9600_v42, %v9183_v58  ;;  %v13867_v47 = vsel %vm809_vm5, %v5705_v9, %v5707_v60  ;;  %v4970_v60 = vsel %vm363_vm0, %v13410_v33, %v9229_v37 }
 0x5bf   : > { %v9217_v31 = vpop.permute.xlu0 %9216  ;;  %v9208_v53 = vunpack.i.l.bf16 %v13851_v48  ;;  %16587 = vst [vmem:[#allocation9_spill] sm:$0xff] %v13867_v47  ;;  %v9209_v42 = vunpack.i.h.bf16 %v13851_v48 }
 0x5c0   : > { %5560 = vst.msk [vmem:[#allocation2 + $0x61] sm:$0xff] %vm363_vm0, %v5528_v56  ;;  %v9218_v30 = vunpack.i.l.bf16 %v9217_v31  ;;  %v5192_v46 = vpop.f32.mrf.mxu1  ;;  %v9219_v32 = vunpack.i.h.bf16 %v9217_v31  ;;  %v9601_v56 = vld [vmem:[#allocation2 + $0xe0] sm:$0xff] }
 0x5c1   : > { %v5415_v6 = vpop.f32.mrf.mxu2  ;;  %v5193_v13 = vadd.f32 %v13652_v40, %v5192_v46  ;;  %v5033_v17 = vsel %vm1664_vm7, %v5001_v1, %v9208_v53  ;;  %v4874_v31 = vsel %vm363_vm0, %v9601_v56, %v9184_v26  ;;  %v9174_v53 = vunpack.i.h.bf16 %v13748_v5 }
 0x5c2   : > { %v5416_v38 = vadd.f32 %v5415_v6, %v5303_v0  ;;  %v4905_v43 = vsel %vm1631_vm6, %v4873_v45, %v9218_v30  ;;  %v4906_v46 = vsel %vm1631_vm6, %v4874_v31, %v9219_v32  ;;  %v9164_v6 = vunpack.i.h.bf16 %v13766_v14 }
 0x5c3   : > { %v4937_v19 = vsel %vm1664_vm7, %v4905_v43, %v9163_v57  ;;  %v5305_v2 = vpop.f32.mrf.mxu3  ;;  %v5827_v57 = vrot.slane %v13808_v8, 2  ;;  %v5002_v43 = vsel %vm1631_vm6, %v4970_v60, %v9174_v53  ;;  %v9213_v8 = vunpack.i.l.bf16 %v13827_v12 }
 0x5c4   : > { %v5497_v51 = vmul.f32 0.2, %v5416_v38  ;;  %5221 = vmatmul.f32.gmra.mxu1 %v4937_v19  ;;  %6140 = vrot.lane.b32.xlu2 %v13867_v47, %s9643_s12  ;;  %v5306_v0 = vadd.f32 %v5305_v2, %v5193_v13  ;;  %v4938_v34 = vsel %vm1664_vm7, %v4906_v46, %v9164_v6  ;;  %v9203_v56 = vunpack.i.l.bf16 %v13822_v62 }
 0x5c5   : > { %6228 = vrot.lane.b32.xlu0 %v13867_v47, %s9641_s22  ;;  %6034 = vrot.lane.b32.xlu1 %v13834_v22, %s9642_s11  ;;  %v9214_v6 = vunpack.i.h.bf16 %v13827_v12 }
 0x5c6   : > { %v5529_v23 = vmax.f32 %v5416_v38, %v5497_v51  ;;  %5334 = vmatmul.f32.gmra.mxu3 %v5033_v17  ;;  %v13878_v58 = vpop.permute.xlu2 %9276  ;;  %7863 = vmatmul.msk.f32.gmra.mxu2 %vm363_vm0, %v13641_v54  ;;  %v13882_v44 = vpop.permute.xlu1 %9241  ;;  %v5829_v54 = vrot.slane %v13841_v39, 2  ;;  %v13899_v38 = vsel %vm809_vm5, %v5704_v25, %v5705_v9  ;;  %v5034_v9 = vsel %vm1664_vm7, %v5002_v43, %v9209_v42  ;;  %v9602_v17 = vld [vmem:[#allocation2 + $0xf0] sm:$0xff] }
 0x5c7   : > { %v13884_v35 = vpop.permute.xlu0 %9221  ;;  %16588 = vst [vmem:[#allocation49_spill] sm:$0xff] %v13899_v38  ;;  %v9193_v51 = vunpack.i.l.bf16 %v13726_v49  ;;  %v13936_v43 = vld [vmem:[#allocation2 + $0x50] sm:$0xff] }
 0x5c8   : > { %5561 = vst.msk [vmem:[#allocation2 + $0x69] sm:$0xff] %vm363_vm0, %v5529_v23  ;;  %v5195_v30 = vpop.f32.mrf.mxu1  ;;  %v13905_v14 = vsel %vm932_vm4, %v5827_v57, %v5829_v54  ;;  %v4875_v23 = vsel %vm363_vm0, %v9602_v17, %v9213_v8  ;;  %v9239_v17 = vunpack.i.h.bf16 %v13818_v11 }
 0x5c9   : > { %v5418_v45 = vpop.f32.mrf.mxu2  ;;  %v5196_v39 = vadd.f32 %v13652_v40, %v5195_v30 }
 0x5ca   : > { %v5419_v33 = vadd.f32 %v5418_v45, %v5306_v0  ;;  %v5826_v0 = vrot.slane %v13834_v22, 2 }
 0x5cb   : > { %v5308_v48 = vpop.f32.mrf.mxu3 }
 0x5cc   : > { %v5498_v5 = vmul.f32 0.2, %v5419_v33  ;;  %5224 = vmatmul.f32.gmra.mxu1 %v4938_v34  ;;  %6226 = vrot.lane.b32.xlu2 %v13899_v38, %s9641_s22  ;;  %v5309_v2 = vadd.f32 %v5308_v48, %v5196_v39  ;;  %v13930_v45 = vsel %vm932_vm4, %v5826_v0, %v5827_v57 }
 0x5cd   : > { %6332 = vrot.lane.b32.xlu0 %v13905_v14, %s9642_s11  ;;  %6138 = vrot.lane.b32.xlu1 %v13899_v38, %s9643_s12 }
 0x5ce   : > { %v5530_v26 = vmax.f32 %v5419_v33, %v5498_v5  ;;  %5337 = vmatmul.f32.gmra.mxu3 %v5034_v9  ;;  %v13914_v37 = vpop.permute.xlu2 %9281  ;;  %7864 = vmatmul.msk.f32.gmra.mxu2 %vm363_vm0, %v13644_v16  ;;  %v9247_v19 = vpop.permute.xlu1 %9246  ;;  %v9238_v16 = vunpack.i.l.bf16 %v13818_v11  ;;  %v9603_v5 = vld [vmem:[#allocation2 + $0xf8] sm:$0xff]  ;;  %v9604_v11 = vld [vmem:[#allocation2 + $0x108] sm:$0xff] }
 0x5cf   : > { %v9257_v32 = vpop.permute.xlu0 %9256  ;;  %v9248_v13 = vunpack.i.l.bf16 %v9247_v19  ;;  %v9249_v33 = vunpack.i.h.bf16 %v9247_v19  ;;  %v4876_v48 = vsel %vm363_vm0, %v9603_v5, %v9214_v6  ;;  %v9244_v5 = vunpack.i.h.bf16 %v13882_v44 }
 0x5d0   : > { %5562 = vst.msk [vmem:[#allocation2 + $0x79] sm:$0xff] %vm363_vm0, %v5530_v26  ;;  %v9258_v1 = vunpack.i.l.bf16 %v9257_v32  ;;  %v5198_v30 = vpop.f32.mrf.mxu1  ;;  %v9259_v42 = vunpack.i.h.bf16 %v9257_v32  ;;  %v9204_v26 = vunpack.i.h.bf16 %v13822_v62  ;;  %v9278_v62 = vunpack.i.l.bf16 %v13878_v58 }
 0x5d1   : > { %v5421_v31 = vpop.f32.mrf.mxu2  ;;  %v4907_v60 = vsel %vm1631_vm6, %v4875_v23, %v9248_v13  ;;  %v5199_v8 = vadd.f32 %v13652_v40, %v5198_v30  ;;  %v4908_v32 = vsel %vm1631_vm6, %v4876_v48, %v9249_v33  ;;  %v9243_v13 = vunpack.i.l.bf16 %v13882_v44 }
 0x5d2   : > { %v5422_v46 = vadd.f32 %v5421_v31, %v5309_v2  ;;  %v4939_v54 = vsel %vm1664_vm7, %v4907_v60, %v9193_v51  ;;  %v4971_v53 = vsel %vm363_vm0, %v13479_v24, %v9258_v1  ;;  %v4972_v9 = vsel %vm363_vm0, %v13482_v10, %v9259_v42 }
 0x5d3   : > { %v5003_v25 = vsel %vm1631_vm6, %v4971_v53, %v9203_v56  ;;  %v5004_v1 = vsel %vm1631_vm6, %v4972_v9, %v9204_v26  ;;  %v13962_v56 = vld [vmem:[#allocation2 + $0x58] sm:$0x3] }
 0x5d4   : > { %v5499_v34 = vmul.f32 0.2, %v5422_v46  ;;  %5227 = vmatmul.f32.gmra.mxu1 %v4939_v54  ;;  %6330 = vrot.lane.b32.xlu2 %v13930_v45, %s9642_s11  ;;  %v5035_v22 = vsel %vm1664_vm7, %v5003_v25, %v9238_v16  ;;  %v5036_v0 = vsel %vm1664_vm7, %v5004_v1, %v9239_v17  ;;  %v4877_v16 = vsel %vm363_vm0, %v9604_v11, %v9243_v13 }
 0x5d5   : > { %6424 = vrot.lane.b32.xlu0 %v13905_v14, %s9643_s12  ;;  %5948 = vrot.lane.b32.xlu1 %v13936_v43, %s9641_s22  ;;  %v5710_v54 = vrot.slane %v13936_v43, 1  ;;  %v5712_v53 = vrot.slane %v13962_v56, 1  ;;  %v9234_v11 = vunpack.i.h.bf16 %v13793_v52 }
 0x5d6   : > { %v5531_v24 = vmax.f32 %v5422_v46, %v5499_v34  ;;  %5340 = vmatmul.f32.gmra.mxu3 %v5035_v22  ;;  %v13942_v12 = vpop.permute.xlu2 %9316  ;;  %7865 = vmatmul.msk.f32.gmra.mxu2 %vm363_vm0, %v13688_v50  ;;  %v13946_v57 = vpop.permute.xlu1 %9251  ;;  %v9194_v50 = vunpack.i.h.bf16 %v13726_v49  ;;  %v13967_v49 = vld [vmem:[#allocation2 + $0x48] sm:$0xff]  ;;  %v4909_v22 = vsel %vm1631_vm6, %v4877_v16, %v9278_v62 }
 0x5d7   : > { %v13949_v39 = vpop.permute.xlu0 %9261 }
 0x5d8   : > { %5563 = vst.msk [vmem:[#allocation2 + $0x81] sm:$0xff] %vm363_vm0, %v5531_v24  ;;  %v5311_v19 = vpop.f32.mrf.mxu3  ;;  %v4940_v10 = vsel %vm1664_vm7, %v4908_v32, %v9194_v50  ;;  %v5201_v31 = vpop.f32.mrf.mxu1  ;;  %v9233_v24 = vunpack.i.l.bf16 %v13793_v52 }
 0x5d9   : > { %v5312_v51 = vadd.f32 %v5311_v19, %v5199_v8  ;;  %v5424_v2 = vpop.f32.mrf.mxu2  ;;  %v5202_v6 = vadd.f32 %v13652_v40, %v5201_v31  ;;  %v9223_v8 = vunpack.i.l.bf16 %v13884_v35  ;;  %v13990_v19 = vsel %vm809_vm5, %v5710_v54, %v5712_v53 }
 0x5da   : > { %16589 = vst [vmem:[#allocation70_spill] sm:$0xff] %v13990_v19  ;;  %v5709_v53 = vrot.slane %v13967_v49, 1 }
 0x5db   : > { %v5425_v23 = vadd.f32 %v5424_v2, %v5312_v51  ;;  %v4941_v13 = vsel %vm1664_vm7, %v4909_v22, %v9223_v8  ;;  %v9279_v2 = vunpack.i.h.bf16 %v13878_v58 }
 0x5dc   : > { %5230 = vmatmul.f32.gmra.mxu1 %v4940_v10  ;;  %6422 = vrot.lane.b32.xlu2 %v13930_v45, %s9643_s12  ;;  %v14028_v52 = vsel %vm809_vm5, %v5709_v53, %v5710_v54 }
 0x5dd   : > { %v5500_v60 = vmul.f32 0.2, %v5425_v23  ;;  %6040 = vrot.lane.b32.xlu1 %v13936_v43, %s9642_s11  ;;  %5946 = vrot.lane.b32.xlu0 %v13967_v49, %s9641_s22  ;;  %16590 = vst [vmem:[#allocation52_spill] sm:$0xff] %v14028_v52 }
 0x5de   : > { %5343 = vmatmul.f32.gmra.mxu3 %v5036_v0  ;;  %v13975_v30 = vpop.permute.xlu2 %9321  ;;  %7866 = vmatmul.msk.f32.gmra.mxu2 %vm363_vm0, %v13691_v59  ;;  %v9287_v46 = vpop.permute.xlu1 %9286  ;;  %v5834_v0 = vrot.slane %v13962_v56, 2 }
 0x5df   : > { %v5532_v42 = vmax.f32 %v5425_v23, %v5500_v60  ;;  %v9267_v25 = vpop.permute.xlu0 %9266  ;;  %v9288_v33 = vunpack.i.l.bf16 %v9287_v46  ;;  %v9289_v32 = vunpack.i.h.bf16 %v9287_v46  ;;  %v5832_v60 = vrot.slane %v13936_v43, 2 }
 0x5e0   : > { %v5314_v34 = vpop.f32.mrf.mxu3  ;;  %v9268_v9 = vunpack.i.l.bf16 %v9267_v25  ;;  %v9224_v46 = vunpack.i.h.bf16 %v13884_v35  ;;  %v9273_v35 = vunpack.i.l.bf16 %v13847_v4  ;;  %v9318_v43 = vunpack.i.l.bf16 %v13942_v12 }
 0x5e1   : > { %5564 = vst.msk [vmem:[#allocation2 + $0x91] sm:$0xff] %vm363_vm0, %v5532_v42  ;;  %v5315_v59 = vadd.f32 %v5314_v34, %v5202_v6  ;;  %v5427_v48 = vpop.f32.mrf.mxu2  ;;  %v4973_v26 = vsel %vm363_vm0, %v13539_v41, %v9288_v33  ;;  %v9605_v41 = vld [vmem:[#allocation2 + $0x110] sm:$0xff]  ;;  %v4974_v31 = vsel %vm363_vm0, %v13542_v29, %v9289_v32  ;;  %v9269_v6 = vunpack.i.h.bf16 %v9267_v25 }
 0x5e2   : > { %v5005_v51 = vsel %vm1631_vm6, %v4973_v26, %v9233_v24  ;;  %v4878_v17 = vsel %vm363_vm0, %v9605_v41, %v9244_v5  ;;  %v14023_v29 = vsel %vm932_vm4, %v5832_v60, %v5834_v0  ;;  %v9263_v34 = vunpack.i.l.bf16 %v13949_v39  ;;  %v9606_v5 = vld [vmem:[#allocation2 + $0x120] sm:$0xff] }
 0x5e3   : > { %v5428_v50 = vadd.f32 %v5427_v48, %v5315_v59  ;;  %v5037_v44 = vsel %vm1664_vm7, %v5005_v51, %v9268_v9  ;;  %v4910_v16 = vsel %vm1631_vm6, %v4878_v17, %v9279_v2  ;;  %v9253_v24 = vunpack.i.l.bf16 %v13946_v57  ;;  %v9607_v17 = vld [vmem:[#allocation2 + $0x128] sm:$0xff] }
 0x5e4   : > { %5233 = vmatmul.f32.gmra.mxu1 %v4941_v13  ;;  %6232 = vrot.lane.b32.xlu2 %v13990_v19, %s9641_s22  ;;  %v4942_v42 = vsel %vm1664_vm7, %v4910_v16, %v9224_v46  ;;  %v4879_v59 = vsel %vm363_vm0, %v9606_v5, %v9273_v35  ;;  %v4975_v48 = vsel %vm363_vm0, %v13577_v63, %v9318_v43  ;;  %v5831_v26 = vrot.slane %v13967_v49, 2  ;;  %v14056_v63 = vld [vmem:[#allocation2 + $0x68] sm:$0xff]  ;;  %v14089_v43 = vld [vmem:[#allocation2 + $0x70] sm:$0x3]  ;;  %v9608_v5 = vld [vmem:[#allocation2 + $0x138] sm:$0xff] }
 0x5e5   : > { %v5501_v1 = vmul.f32 0.2, %v5428_v50  ;;  %6144 = vrot.lane.b32.xlu1 %v13990_v19, %s9643_s12  ;;  %6038 = vrot.lane.b32.xlu0 %v13967_v49, %s9642_s11  ;;  %v5007_v51 = vsel %vm1631_vm6, %v4975_v48, %v9263_v34  ;;  %v5715_v48 = vrot.slane %v14056_v63, 1 }
 0x5e6   : > { %5346 = vmatmul.f32.gmra.mxu3 %v5037_v44  ;;  %v14003_v23 = vpop.permute.xlu2 %9326  ;;  %7867 = vmatmul.msk.f32.gmra.mxu2 %vm363_vm0, %v13732_v36  ;;  %v14007_v58 = vpop.permute.xlu1 %9291  ;;  %v5006_v36 = vsel %vm1631_vm6, %v4974_v31, %v9234_v11  ;;  %v14054_v2 = vsel %vm932_vm4, %v5831_v26, %v5832_v60  ;;  %v9319_v44 = vunpack.i.h.bf16 %v13942_v12  ;;  %v9264_v12 = vunpack.i.h.bf16 %v13949_v39 }
 0x5e7   : > { %v5533_v10 = vmax.f32 %v5428_v50, %v5501_v1  ;;  %v14009_v62 = vpop.permute.xlu0 %9301  ;;  %v5038_v56 = vsel %vm1664_vm7, %v5006_v36, %v9269_v6  ;;  %16591 = vst [vmem:[#allocation71_spill] sm:$0xff] %v14054_v2  ;;  %v9254_v60 = vunpack.i.h.bf16 %v13946_v57  ;;  %v14078_v6 = vld [vmem:[#allocation2 + $0x60] sm:$0xff]  ;;  %v9293_v26 = vunpack.i.l.bf16 %v14007_v58 }
 0x5e8   : > { %v4976_v11 = vsel %vm363_vm0, %v13580_v27, %v9319_v44  ;;  %v5317_v16 = vpop.f32.mrf.mxu3 }
 0x5e9   : > { %5565 = vst.msk [vmem:[#allocation2 + $0x99] sm:$0xff] %vm363_vm0, %v5533_v10  ;;  %v5430_v32 = vpop.f32.mrf.mxu2  ;;  %v5008_v39 = vsel %vm1631_vm6, %v4976_v11, %v9264_v12 }
 0x5ec   : > { %5236 = vmatmul.f32.gmra.mxu1 %v4942_v42  ;;  %6336 = vrot.lane.b32.xlu2 %v14023_v29, %s9642_s11  ;;  %v9303_v42 = vunpack.i.l.bf16 %v14009_v62 }
 0x5ed   : > { %6230 = vrot.lane.b32.xlu1 %v14028_v52, %s9641_s22  ;;  %6142 = vrot.lane.b32.xlu0 %v14028_v52, %s9643_s12 }
 0x5ee   : > { %5349 = vmatmul.f32.gmra.mxu3 %v5038_v56  ;;  %v14037_v25 = vpop.permute.xlu2 %9361  ;;  %7868 = vmatmul.msk.f32.gmra.mxu2 %vm363_vm0, %v13735_v3  ;;  %v9297_v54 = vpop.permute.xlu1 %9296  ;;  %v9274_v3 = vunpack.i.h.bf16 %v13847_v4 }
 0x5ef   : > { %v9307_v33 = vpop.permute.xlu0 %9306  ;;  %v9298_v8 = vunpack.i.l.bf16 %v9297_v54  ;;  %v9299_v0 = vunpack.i.h.bf16 %v9297_v54 }
 0x5f0   : > { %v9308_v22 = vunpack.i.l.bf16 %v9307_v33  ;;  %v9309_v13 = vunpack.i.h.bf16 %v9307_v33  ;;  %v4880_v10 = vsel %vm363_vm0, %v9607_v17, %v9274_v3  ;;  %v9283_v33 = vunpack.i.l.bf16 %v13914_v37 }
 0x5f1   : > { %v5039_v49 = vsel %vm1664_vm7, %v5007_v51, %v9298_v8  ;;  %v5433_v57 = vpop.f32.mrf.mxu2  ;;  %v5040_v27 = vsel %vm1664_vm7, %v5008_v39, %v9299_v0  ;;  %v9304_v51 = vunpack.i.h.bf16 %v14009_v62 }
 0x5f2   : > { %v4911_v9 = vsel %vm1631_vm6, %v4879_v59, %v9308_v22  ;;  %v4912_v31 = vsel %vm1631_vm6, %v4880_v10, %v9309_v13  ;;  %v4881_v59 = vsel %vm363_vm0, %v9608_v5, %v9303_v42  ;;  %v9328_v13 = vunpack.i.l.bf16 %v14003_v23  ;;  %v9609_v42 = vld [vmem:[#allocation2 + $0x140] sm:$0xff] }
 0x5f3   : > { %v4943_v50 = vsel %vm1664_vm7, %v4911_v9, %v9253_v24  ;;  %v4944_v53 = vsel %vm1664_vm7, %v4912_v31, %v9254_v60  ;;  %v5717_v9 = vrot.slane %v14089_v43, 1  ;;  %v5320_v60 = vpop.f32.mrf.mxu3  ;;  %v4882_v39 = vsel %vm363_vm0, %v9609_v42, %v9304_v51 }
 0x5f4   : > { %5239 = vmatmul.f32.gmra.mxu1 %v4943_v50  ;;  %6428 = vrot.lane.b32.xlu2 %v14023_v29, %s9643_s12  ;;  %v9329_v5 = vunpack.i.h.bf16 %v14003_v23  ;;  %v5836_v42 = vrot.slane %v14078_v6, 2 }
 0x5f5   : > { %6334 = vrot.lane.b32.xlu1 %v14054_v2, %s9642_s11  ;;  %5952 = vrot.lane.b32.xlu0 %v14056_v63, %s9641_s22 }
 0x5f6   : > { %5352 = vmatmul.f32.gmra.mxu3 %v5039_v49  ;;  %v14064_v4 = vpop.permute.xlu2 %9366  ;;  %v14066_v1 = vpop.permute.xlu1 %9331 }
 0x5f7   : > { %v14068_v41 = vpop.permute.xlu0 %9311 }
 0x5fa   : > { %v5204_v46 = vpop.f32.mrf.mxu1 }
 0x5fb   : > { %v5205_v36 = vadd.f32 %v13652_v40, %v5204_v46  ;;  %v14121_v46 = vpop.f32.mrf.mxu2 }
 0x5fc   : > { %5242 = vmatmul.f32.gmra.mxu1 %v4944_v53  ;;  %5950 = vrot.lane.b32.xlu2 %v14078_v6, %s9641_s22 }
 0x5fd   : > { %v5318_v35 = vadd.f32 %v5317_v16, %v5205_v36  ;;  %6426 = vrot.lane.b32.xlu1 %v14054_v2, %s9643_s12  ;;  %6044 = vrot.lane.b32.xlu0 %v14056_v63, %s9642_s11  ;;  %v14108_v16 = vsel %vm809_vm5, %v5715_v48, %v5717_v9 }
 0x5fe   : > { %5355 = vmatmul.f32.gmra.mxu3 %v5040_v27  ;;  %v14091_v56 = vpop.permute.xlu2 %5938  ;;  %v9337_v54 = vpop.permute.xlu1 %9336  ;;  %16592 = vst [vmem:[#allocation53_spill] sm:$0xff] %v14108_v16  ;;  %v5714_v27 = vrot.slane %v14078_v6, 1 }
 0x5ff   : > { %v5431_v34 = vadd.f32 %v5430_v32, %v5318_v35  ;;  %v9347_v22 = vpop.permute.xlu0 %9346  ;;  %v9338_v24 = vunpack.i.l.bf16 %v9337_v54  ;;  %v9339_v0 = vunpack.i.h.bf16 %v9337_v54  ;;  %v9294_v54 = vunpack.i.h.bf16 %v14007_v58 }
 0x600   : > { %v9348_v8 = vunpack.i.l.bf16 %v9347_v22  ;;  %v9349_v10 = vunpack.i.h.bf16 %v9347_v22  ;;  %v5839_v22 = vrot.slane %v14089_v43, 2  ;;  %v9368_v43 = vunpack.i.l.bf16 %v14064_v4 }
 0x601   : > { %v5502_v3 = vmul.f32 0.2, %v5431_v34  ;;  %v4913_v50 = vsel %vm1631_vm6, %v4881_v59, %v9338_v24  ;;  %v9333_v24 = vunpack.i.l.bf16 %v14066_v1 }
 0x602   : > { %v5207_v32 = vpop.f32.mrf.mxu1  ;;  %v4945_v44 = vsel %vm1664_vm7, %v4913_v50, %v9283_v33  ;;  %v4977_v49 = vsel %vm363_vm0, %v13617_v20, %v9348_v8  ;;  %v4978_v35 = vsel %vm363_vm0, %v13620_v55, %v9349_v10  ;;  %v4914_v33 = vsel %vm1631_vm6, %v4882_v39, %v9339_v0 }
 0x603   : > { %v5534_v17 = vmax.f32 %v5431_v34, %v5502_v3  ;;  %v5208_v12 = vadd.f32 %v13652_v40, %v5207_v32  ;;  %v5009_v31 = vsel %vm1631_vm6, %v4977_v49, %v9293_v26  ;;  %v5837_v34 = vrot.slane %v14056_v63, 2  ;;  %v9610_v26 = vld [vmem:[#allocation2 + $0x198] sm:$0xff]  ;;  %v9611_v63 = vld [vmem:[#allocation2 + $0x1a0] sm:$0xff]  ;;  %v14162_v0 = vpop.f32.mrf.mxu2 }
 0x604   : > { %5245 = vmatmul.f32.gmra.mxu1 %v4945_v44  ;;  %v5041_v11 = vsel %vm1664_vm7, %v5009_v31, %v9328_v13  ;;  %6042 = vrot.lane.b32.xlu2 %v14078_v6, %s9642_s11  ;;  %v5010_v59 = vsel %vm1631_vm6, %v4978_v35, %v9294_v54  ;;  %v14138_v55 = vsel %vm809_vm5, %v5714_v27, %v5715_v48  ;;  %v4274_v3 = vrot.slane %v9610_v26, 2  ;;  %v9612_v48 = vld [vmem:[#allocation2 + $0x150] sm:$0xff]  ;;  %v14170_v54 = vld [vmem:[#allocation2 + $0x80] sm:$0xff] }
 0x605   : > { %5566 = vst.msk [vmem:[#allocation2 + $0xa9] sm:$0xff] %vm363_vm0, %v5534_v17  ;;  %v5321_v20 = vadd.f32 %v5320_v60, %v5208_v12  ;;  %6236 = vrot.lane.b32.xlu1 %v14108_v16, %s9641_s22  ;;  %6148 = vrot.lane.b32.xlu0 %v14108_v16, %s9643_s12  ;;  %v4275_v50 = vrot.slane %v9611_v63, 2  ;;  %v5042_v23 = vsel %vm1664_vm7, %v5010_v59, %v9329_v5  ;;  %v9323_v10 = vunpack.i.l.bf16 %v13975_v30 }
 0x606   : > { %5358 = vmatmul.f32.gmra.mxu3 %v5041_v11  ;;  %v14117_v40 = vpop.permute.xlu2 %6134  ;;  %v14119_v62 = vpop.permute.xlu1 %9341  ;;  %16594 = vst [vmem:[#allocation37_spill] sm:$0xff] %v14138_v55  ;;  %v4883_v13 = vsel %vm363_vm0, %v9612_v48, %v9333_v24  ;;  %v9313_v31 = vunpack.i.l.bf16 %v14068_v41  ;;  %v9334_v60 = vunpack.i.h.bf16 %v14066_v1  ;;  %v9369_v1 = vunpack.i.h.bf16 %v14064_v4 }
 0x607   : > { %16593 = vst [vmem:[#allocation12_spill] sm:$0xff] %v14117_v40  ;;  %v5434_v36 = vadd.f32 %v5433_v57, %v5321_v20  ;;  %v14123_v53 = vpop.permute.xlu0 %9351  ;;  %v9284_v57 = vunpack.i.h.bf16 %v13914_v37  ;;  %v14143_v37 = vsel %vm932_vm4, %v5837_v34, %v5839_v22  ;;  %v4276_v51 = vsel %vm932_vm4, %v4274_v3, %v4275_v50 }
 0x608   : > { %16595 = vst [vmem:[#allocation10_spill] sm:$0xff] %v14143_v37  ;;  %7869 = vmatmul.msk.f32.gmra.mxu2 %vm363_vm0, %v4276_v51  ;;  %v4915_v12 = vsel %vm1631_vm6, %v4883_v13, %v9368_v43  ;;  %v9324_v59 = vunpack.i.h.bf16 %v13975_v30  ;;  %v9363_v3 = vunpack.i.l.bf16 %v14037_v25  ;;  %v9343_v13 = vunpack.i.l.bf16 %v14119_v62 }
 0x609   : > { %v5503_v8 = vmul.f32 0.2, %v5434_v36  ;;  %v4946_v58 = vsel %vm1664_vm7, %v4914_v33, %v9284_v57  ;;  %v4947_v35 = vsel %vm1664_vm7, %v4915_v12, %v9313_v31  ;;  %v9613_v33 = vld [vmem:[#allocation2 + $0x1a8] sm:$0x3]  ;;  %v14174_v57 = vsel %vm932_vm4, %v5836_v42, %v5837_v34 }
 0x60a   : > { %v4277_v22 = vrot.slane %v9613_v33, 2  ;;  %16596 = vst [vmem:[#allocation38_spill] sm:$0xff] %v14174_v57  ;;  %v16600_v12 = vld [vmem:[#allocation15_spill] sm:$0xff] }
 0x60b   : > { %v5535_v9 = vmax.f32 %v5434_v36, %v5503_v8  ;;  %v14198_v63 = vpop.f32.mrf.mxu2  ;;  %v8453_v31 = vunpack.i.l.bf16 %v16600_v12 }
 0x60c   : > { %5248 = vmatmul.f32.gmra.mxu1 %v4946_v58  ;;  %6146 = vrot.lane.b32.xlu2 %v14138_v55, %s9643_s12  ;;  %v4278_v24 = vsel %vm932_vm4, %v4275_v50, %v4277_v22  ;;  %v9314_v58 = vunpack.i.h.bf16 %v14068_v41 }
 0x60d   : > { %5567 = vst.msk [vmem:[#allocation2 + $0xb1] sm:$0xff] %vm363_vm0, %v5535_v9  ;;  %6340 = vrot.lane.b32.xlu1 %v14143_v37, %s9642_s11  ;;  %6234 = vrot.lane.b32.xlu0 %v14138_v55, %s9641_s22  ;;  %v4981_v22 = vsel %vm363_vm0, %v13708_v21, %v8453_v31 }
 0x60e   : > { %5361 = vmatmul.f32.gmra.mxu3 %v5042_v23  ;;  %v14155_v32 = vpop.permute.xlu2 %5944  ;;  %v9372_v44 = vpop.permute.xlu1 %9371  ;;  %v14201_v23 = vld [vmem:[#allocation2 + $0x78] sm:$0xff] }
 0x60f   : > { %v9357_v49 = vpop.permute.xlu0 %9356  ;;  %v9373_v17 = vunpack.i.l.bf16 %v9372_v44  ;;  %v9374_v39 = vunpack.i.h.bf16 %v9372_v44  ;;  %v9615_v44 = vld [vmem:[#allocation2 + $0x168] sm:$0xff] }
 0x610   : > { %v9358_v11 = vunpack.i.l.bf16 %v9357_v49  ;;  %7870 = vmatmul.msk.f32.gmra.mxu2 %vm363_vm0, %v4278_v24  ;;  %v9359_v50 = vunpack.i.h.bf16 %v9357_v49  ;;  %v4885_v49 = vsel %vm363_vm0, %v9615_v44, %v9363_v3  ;;  %v9344_v3 = vunpack.i.h.bf16 %v14119_v62 }
 0x611   : > { %v4979_v20 = vsel %vm363_vm0, %v13669_v61, %v9373_v17  ;;  %v9614_v61 = vld [vmem:[#allocation2 + $0x158] sm:$0xff]  ;;  %v4980_v5 = vsel %vm363_vm0, %v13672_v28, %v9374_v39  ;;  %v14205_v28 = vld [vmem:[#allocation2 + $0x88] sm:$0x3]  ;;  %v5720_v17 = vrot.slane %v14170_v54, 1  ;;  %v14229_v39 = vld [vmem:[%s16175_s7] ss:$0 sm:$0xff]  ;;  %v9354_v44 = vunpack.i.h.bf16 %v14123_v53 }
 0x612   : > { %v5011_v36 = vsel %vm1631_vm6, %v4979_v20, %v9323_v10  ;;  %v4884_v6 = vsel %vm363_vm0, %v9614_v61, %v9334_v60  ;;  %v5012_v26 = vsel %vm1631_vm6, %v4980_v5, %v9324_v59  ;;  %v5722_v10 = vrot.slane %v14205_v28, 1  ;;  %v16601_v60 = vld [vmem:[#allocation60_spill] sm:$0xff] }
 0x613   : > { %v5043_v27 = vsel %vm1664_vm7, %v5011_v36, %v9358_v11  ;;  %v4916_v9 = vsel %vm1631_vm6, %v4884_v6, %v9369_v1  ;;  %v5044_v30 = vsel %vm1664_vm7, %v5012_v26, %v9359_v50  ;;  %v8443_v11 = vunpack.i.l.bf16 %v16601_v60  ;;  %v14243_v59 = vpop.f32.mrf.mxu2 }
 0x614   : > { %5251 = vmatmul.f32.gmra.mxu1 %v4947_v35  ;;  %5956 = vrot.lane.b32.xlu2 %v14170_v54, %s9641_s22  ;;  %v4948_v43 = vsel %vm1664_vm7, %v4916_v9, %v9314_v58  ;;  %v9353_v20 = vunpack.i.l.bf16 %v14123_v53  ;;  %v9364_v1 = vunpack.i.h.bf16 %v14037_v25  ;;  %v14238_v24 = vsel %vm809_vm5, %v5720_v17, %v5722_v10 }
 0x615   : > { %6432 = vrot.lane.b32.xlu1 %v14143_v37, %s9643_s12  ;;  %6338 = vrot.lane.b32.xlu0 %v14174_v57, %s9642_s11  ;;  %v4917_v33 = vsel %vm1631_vm6, %v4885_v49, %v8443_v11  ;;  %16602 = vst [vmem:[#allocation55_spill] sm:$0xff] %v14238_v24  ;;  %v8454_v26 = vunpack.i.h.bf16 %v16600_v12  ;;  %v5842_v10 = vrot.slane %v14170_v54, 2  ;;  %v5844_v31 = vrot.slane %v14205_v28, 2 }
 0x616   : > { %5364 = vmatmul.f32.gmra.mxu3 %v5043_v27  ;;  %v14184_v4 = vpop.permute.xlu2 %6036  ;;  %v14186_v8 = vpop.permute.xlu1 %9376  ;;  %v4949_v6 = vsel %vm1664_vm7, %v4917_v33, %v9343_v13  ;;  %v5013_v5 = vsel %vm1631_vm6, %v4981_v22, %v9353_v20  ;;  %v8444_v13 = vunpack.i.h.bf16 %v16601_v60  ;;  %v5719_v20 = vrot.slane %v14201_v23, 1 }
 0x617   : > { %v14189_v34 = vpop.permute.xlu0 %5940  ;;  %v9378_v42 = vunpack.i.l.bf16 %v14186_v8  ;;  %v9379_v11 = vunpack.i.h.bf16 %v14186_v8 }
 0x618   : > { %v14273_v28 = vsel %vm809_vm5, %v5719_v20, %v5720_v17 }
 0x619   : > { %v5045_v21 = vsel %vm1664_vm7, %v5013_v5, %v9378_v42  ;;  %16605 = vst [vmem:[#allocation57_spill] sm:$0xff] %v14273_v28 }
 0x61c   : > { %5254 = vmatmul.f32.gmra.mxu1 %v4948_v43  ;;  %6048 = vrot.lane.b32.xlu2 %v14170_v54, %s9642_s11 }
 0x61d   : > { %5954 = vrot.lane.b32.xlu1 %v14201_v23, %s9641_s22  ;;  %6430 = vrot.lane.b32.xlu0 %v14174_v57, %s9643_s12 }
 0x61e   : > { %5367 = vmatmul.f32.gmra.mxu3 %v5044_v30  ;;  %v14212_v41 = vpop.permute.xlu2 %6140  ;;  %v14214_v48 = vpop.permute.xlu1 %6328 }
 0x61f   : > { %16597 = vst [vmem:[#allocation11_spill] sm:$0xff] %v14212_v41  ;;  %v14217_v51 = vpop.permute.xlu0 %6136 }
 0x620   : > { %16598 = vst [vmem:[#allocation54_spill] sm:$0xff] %v14214_v48  ;;  %v5210_v36 = vpop.f32.mrf.mxu1 }
 0x621   : > { %16599 = vst [vmem:[#allocation26_spill] sm:$0xff] %v14217_v51  ;;  %v5211_v35 = vadd.f32 %v14229_v39, %v5210_v36 }
 0x622   : > { %v5323_v27 = vpop.f32.mrf.mxu3 }
 0x623   : > { %v5324_v61 = vadd.f32 %v5323_v27, %v5211_v35  ;;  %v4982_v35 = vsel %vm363_vm0, %v13711_v7, %v8454_v26  ;;  %v14277_v27 = vsel %vm932_vm4, %v5842_v10, %v5844_v31  ;;  %v14298_v26 = vld [vmem:[#allocation2 + $0x98] sm:$0xff] }
 0x624   : > { %5257 = vmatmul.f32.gmra.mxu1 %v4949_v6  ;;  %6152 = vrot.lane.b32.xlu2 %v14238_v24, %s9643_s12  ;;  %v5014_v8 = vsel %vm1631_vm6, %v4982_v35, %v9354_v44  ;;  %16606 = vst [vmem:[#allocation44_spill] sm:$0xff] %v14277_v27  ;;  %v5448_v6 = vpop.f32.mrf.mxu2 }
 0x625   : > { %v5437_v9 = vadd.f32 %v14121_v46, %v5324_v61  ;;  %6046 = vrot.lane.b32.xlu1 %v14201_v23, %s9642_s11  ;;  %6240 = vrot.lane.b32.xlu0 %v14238_v24, %s9641_s22  ;;  %v9617_v46 = vld [vmem:[#allocation2 + $0x170] sm:$0xff]  ;;  %v5046_v22 = vsel %vm1664_vm7, %v5014_v8, %v9379_v11 }
 0x626   : > { %5370 = vmatmul.f32.gmra.mxu3 %v5045_v21  ;;  %v14251_v25 = vpop.permute.xlu2 %6226  ;;  %v14253_v58 = vpop.permute.xlu1 %6420  ;;  %v4886_v30 = vsel %vm363_vm0, %v9617_v46, %v9364_v1  ;;  %v14314_v11 = vld [vmem:[#allocation2 + $0x90] sm:$0xff] }
 0x627   : > { %16603 = vst [vmem:[#allocation8_spill] sm:$0xff] %v14253_v58  ;;  %v5504_v50 = vmul.f32 0.2, %v5437_v9  ;;  %v14257_v43 = vpop.permute.xlu0 %6326  ;;  %v4918_v42 = vsel %vm1631_vm6, %v4886_v30, %v8444_v13 }
 0x628   : > { %16604 = vst [vmem:[#allocation56_spill] sm:$0xff] %v14257_v43  ;;  %v5213_v49 = vpop.f32.mrf.mxu1  ;;  %v4950_v53 = vsel %vm1664_vm7, %v4918_v42, %v9344_v3 }
 0x629   : > { %v5536_v12 = vmax.f32 %v5437_v9, %v5504_v50  ;;  %v5214_v62 = vadd.f32 %v14229_v39, %v5213_v49 }
 0x62a   : > { %v5326_v36 = vpop.f32.mrf.mxu3 }
 0x62b   : > { %5568 = vst.msk [vmem:[#allocation2 + $0xc1] sm:$0xff] %vm363_vm0, %v5536_v12  ;;  %v5327_v60 = vadd.f32 %v5326_v36, %v5214_v62  ;;  %v5606_v12 = vld [vmem:[#allocation2 + $0xa0] sm:$0x3] }
 0x62c   : > { %5260 = vmatmul.f32.gmra.mxu1 %v4950_v53  ;;  %6238 = vrot.lane.b32.xlu2 %v14273_v28, %s9641_s22  ;;  %v5725_v53 = vrot.slane %v14298_v26, 1  ;;  %v5727_v35 = vrot.slane %v5606_v12, 1 }
 0x62d   : > { %v5440_v33 = vadd.f32 %v14162_v0, %v5327_v60  ;;  %6150 = vrot.lane.b32.xlu1 %v14273_v28, %s9643_s12  ;;  %6344 = vrot.lane.b32.xlu0 %v14277_v27, %s9642_s11  ;;  %v5841_v0 = vrot.slane %v14201_v23, 2 }
 0x62e   : > { %5373 = vmatmul.f32.gmra.mxu3 %v5046_v22  ;;  %v14287_v7 = vpop.permute.xlu2 %6330  ;;  %v14289_v17 = vpop.permute.xlu1 %5942 }
 0x62f   : > { %16607 = vst [vmem:[#allocation45_spill] sm:$0xff] %v14287_v7  ;;  %v5505_v1 = vmul.f32 0.2, %v5440_v33  ;;  %v14291_v61 = vpop.permute.xlu0 %6418  ;;  %v14296_v21 = vsel %vm932_vm4, %v5841_v0, %v5842_v10  ;;  %v5451_v10 = vpop.f32.mrf.mxu2 }
 0x630   : > { %16608 = vst [vmem:[#allocation58_spill] sm:$0xff] %v14289_v17  ;;  %v5216_v5 = vpop.f32.mrf.mxu1 }
 0x631   : > { %16609 = vst [vmem:[#allocation59_spill] sm:$0xff] %v14291_v61  ;;  %v5537_v9 = vmax.f32 %v5440_v33, %v5505_v1  ;;  %v5217_v50 = vadd.f32 %v14229_v39, %v5216_v5  ;;  %v14333_v5 = vsel %vm809_vm5, %v5725_v53, %v5727_v35 }
 0x632   : > { %16610 = vst [vmem:[#allocation64_spill] sm:$0xff] %v14296_v21 }
 0x633   : > { %5569 = vst.msk [vmem:[#allocation2 + $0xc9] sm:$0xff] %vm363_vm0, %v5537_v9 }
 0x634   : > { %6342 = vrot.lane.b32.xlu2 %v14296_v21, %s9642_s11 }
 0x635   : > { %5960 = vrot.lane.b32.xlu1 %v14298_v26, %s9641_s22  ;;  %6436 = vrot.lane.b32.xlu0 %v14277_v27, %s9643_s12  ;;  %v5846_v27 = vrot.slane %v14314_v11, 2 }
 0x636   : > { %v14306_v3 = vpop.permute.xlu2 %6422 }
 0x637   : > { %16611 = vst [vmem:[#allocation65_spill] sm:$0xff] %v14306_v3  ;;  %v14309_v46 = vpop.permute.xlu0 %6228  ;;  %v14311_v30 = vpop.permute.xlu1 %6034 }
 0x638   : > { %v5329_v13 = vpop.f32.mrf.mxu3  ;;  %v5219_v44 = vpop.f32.mrf.mxu1 }
 0x639   : > { %v5330_v49 = vadd.f32 %v5329_v13, %v5217_v50  ;;  %v5220_v42 = vadd.f32 %v14229_v39, %v5219_v44  ;;  %v5454_v9 = vpop.f32.mrf.mxu2 }
 0x63b   : > { %v5443_v31 = vadd.f32 %v14198_v63, %v5330_v49  ;;  %v5847_v49 = vrot.slane %v14298_v26, 2 }
 0x63c   : > { %6434 = vrot.lane.b32.xlu2 %v14296_v21, %s9643_s12 }
 0x63d   : > { %v5506_v62 = vmul.f32 0.2, %v5443_v31  ;;  %6052 = vrot.lane.b32.xlu1 %v14298_v26, %s9642_s11  ;;  %5958 = vrot.lane.b32.xlu0 %v14314_v11, %s9641_s22  ;;  %v14373_v28 = vsel %vm932_vm4, %v5846_v27, %v5847_v49 }
 0x63e   : > { %v14322_v20 = vpop.permute.xlu2 %6232  ;;  %16622 = vst [vmem:[#allocation21_spill] sm:$0xff] %v14373_v28 }
 0x63f   : > { %16612 = vst [vmem:[#allocation14_spill] sm:$0xff] %v14322_v20  ;;  %v5538_v36 = vmax.f32 %v5443_v31, %v5506_v62  ;;  %v14325_v60 = vpop.permute.xlu0 %6332  ;;  %v14327_v63 = vpop.permute.xlu1 %6138  ;;  %v5849_v31 = vrot.slane %v5606_v12, 2 }
 0x640   : > { %16613 = vst [vmem:[#allocation33_spill] sm:$0xff] %v14325_v60  ;;  %v5332_v8 = vpop.f32.mrf.mxu3 }
 0x641   : > { %16614 = vst [vmem:[#allocation34_spill] sm:$0xff] %v14327_v63  ;;  %v5333_v33 = vadd.f32 %v5332_v8, %v5220_v42  ;;  %v5222_v22 = vpop.f32.mrf.mxu1  ;;  %v5724_v8 = vrot.slane %v14314_v11, 1  ;;  %v5457_v12 = vpop.f32.mrf.mxu2 }
 0x642   : > { %5570 = vst.msk [vmem:[#allocation2 + $0xd9] sm:$0xff] %vm363_vm0, %v5538_v36  ;;  %v5223_v62 = vadd.f32 %v14229_v39, %v5222_v22 }
 0x643   : > { %v5446_v1 = vadd.f32 %v14243_v59, %v5333_v33  ;;  %v14352_v33 = vsel %vm932_vm4, %v5847_v49, %v5849_v31 }
 0x644   : > { %6244 = vrot.lane.b32.xlu2 %v14333_v5, %s9641_s22  ;;  %16618 = vst [vmem:[#allocation69_spill] sm:$0xff] %v14352_v33 }
 0x645   : > { %v5507_v0 = vmul.f32 0.2, %v5446_v1  ;;  %6156 = vrot.lane.b32.xlu1 %v14333_v5, %s9643_s12  ;;  %6050 = vrot.lane.b32.xlu0 %v14314_v11, %s9642_s11 }
 0x646   : > { %v14341_v50 = vpop.permute.xlu2 %6336 }
 0x647   : > { %16615 = vst [vmem:[#allocation31_spill] sm:$0xff] %v14341_v50  ;;  %v5539_v13 = vmax.f32 %v5446_v1, %v5507_v0  ;;  %v14343_v44 = vpop.permute.xlu0 %6424  ;;  %v14345_v59 = vpop.permute.xlu1 %5948  ;;  %v14355_v0 = vsel %vm809_vm5, %v5724_v8, %v5725_v53  ;;  %v14375_v50 = vld [vmem:[#allocation2 + $0xb0] sm:$0xff] }
 0x648   : > { %16616 = vst [vmem:[#allocation32_spill] sm:$0xff] %v14343_v44 }
 0x649   : > { %16617 = vst [vmem:[#allocation62_spill] sm:$0xff] %v14345_v59  ;;  %v5335_v36 = vpop.f32.mrf.mxu3  ;;  %v5225_v42 = vpop.f32.mrf.mxu1 }
 0x64a   : > { %5571 = vst.msk [vmem:[#allocation2 + $0xe1] sm:$0xff] %vm363_vm0, %v5539_v13  ;;  %v5336_v35 = vadd.f32 %v5335_v36, %v5223_v62  ;;  %v5226_v53 = vadd.f32 %v14229_v39, %v5225_v42  ;;  %v5460_v27 = vpop.f32.mrf.mxu2 }
 0x64c   : > { %v5449_v1 = vadd.f32 %v5448_v6, %v5336_v35  ;;  %6348 = vrot.lane.b32.xlu2 %v14352_v33, %s9642_s11 }
 0x64d   : > { %6242 = vrot.lane.b32.xlu1 %v14355_v0, %s9641_s22  ;;  %6154 = vrot.lane.b32.xlu0 %v14355_v0, %s9643_s12 }
 0x64e   : > { %v5508_v22 = vmul.f32 0.2, %v5449_v1  ;;  %v14363_v13 = vpop.permute.xlu2 %6428 }
 0x64f   : > { %16619 = vst [vmem:[#allocation20_spill] sm:$0xff] %v14363_v13  ;;  %v14365_v62 = vpop.permute.xlu1 %6040  ;;  %v14367_v31 = vpop.permute.xlu0 %5946 }
 0x650   : > { %16620 = vst [vmem:[#allocation19_spill] sm:$0xff] %v14365_v62  ;;  %v5540_v6 = vmax.f32 %v5449_v1, %v5508_v22 }
 0x651   : > { %16621 = vst [vmem:[#allocation30_spill] sm:$0xff] %v14367_v31  ;;  %v5338_v36 = vpop.f32.mrf.mxu3  ;;  %v5228_v35 = vpop.f32.mrf.mxu1 }
 0x652   : > { %5572 = vst.msk [vmem:[#allocation2 + $0xf1] sm:$0xff] %vm363_vm0, %v5540_v6  ;;  %v5339_v8 = vadd.f32 %v5338_v36, %v5226_v53  ;;  %v5229_v6 = vadd.f32 %v14229_v39, %v5228_v35 }
 0x654   : > { %v5452_v24 = vadd.f32 %v5451_v10, %v5339_v8  ;;  %6440 = vrot.lane.b32.xlu2 %v14352_v33, %s9643_s12  ;;  %v14391_v33 = vld [vmem:[#allocation2 + $0xa8] sm:$0xff] }
 0x655   : > { %6346 = vrot.lane.b32.xlu1 %v14373_v28, %s9642_s11  ;;  %5964 = vrot.lane.b32.xlu0 %v14375_v50, %s9641_s22  ;;  %v5729_v63 = vrot.slane %v14391_v33, 1 }
 0x656   : > { %v5509_v42 = vmul.f32 0.2, %v5452_v24  ;;  %v14383_v1 = vpop.permute.xlu2 %5950 }
 0x657   : > { %16623 = vst [vmem:[#allocation42_spill] sm:$0xff] %v14383_v1  ;;  %v14385_v22 = vpop.permute.xlu1 %6144  ;;  %v14387_v10 = vpop.permute.xlu0 %6038 }
 0x658   : > { %16624 = vst [vmem:[#allocation35_spill] sm:$0xff] %v14385_v22  ;;  %v5541_v49 = vmax.f32 %v5452_v24, %v5509_v42  ;;  %v5609_v24 = vld [vmem:[#allocation2 + $0xb8] sm:$0x3] }
 0x659   : > { %16625 = vst [vmem:[#allocation63_spill] sm:$0xff] %v14387_v10  ;;  %v5341_v53 = vpop.f32.mrf.mxu3  ;;  %v5231_v36 = vpop.f32.mrf.mxu1  ;;  %v14527_v10 = vld [vmem:[#allocation2 + $0xe0] sm:$0xff] }
 0x65a   : > { %5573 = vst.msk [vmem:[#allocation2 + $0xf9] sm:$0xff] %vm363_vm0, %v5541_v49  ;;  %v5342_v8 = vadd.f32 %v5341_v53, %v5229_v6  ;;  %v5730_v53 = vrot.slane %v14375_v50, 1 }
 0x65c   : > { %v5455_v21 = vadd.f32 %v5454_v9, %v5342_v8  ;;  %5962 = vrot.lane.b32.xlu2 %v14391_v33, %s9641_s22  ;;  %v5232_v9 = vadd.f32 %v14229_v39, %v5231_v36  ;;  %v5732_v8 = vrot.slane %v5609_v24, 1  ;;  %v14428_v60 = vsel %vm809_vm5, %v5729_v63, %v5730_v53 }
 0x65d   : > { %6438 = vrot.lane.b32.xlu1 %v14373_v28, %s9643_s12  ;;  %6056 = vrot.lane.b32.xlu0 %v14375_v50, %s9642_s11  ;;  %v5463_v28 = vpop.f32.mrf.mxu2 }
 0x65e   : > { %v5510_v42 = vmul.f32 0.2, %v5455_v21  ;;  %v14399_v35 = vpop.permute.xlu2 %6042  ;;  %v14409_v1 = vsel %vm809_vm5, %v5730_v53, %v5732_v8 }
 0x65f   : > { %16626 = vst [vmem:[#allocation7_spill] sm:$0xff] %v14399_v35  ;;  %v14401_v22 = vpop.permute.xlu1 %6230  ;;  %v14403_v49 = vpop.permute.xlu0 %6142 }
 0x660   : > { %16627 = vst [vmem:[#allocation36_spill] sm:$0xff] %v14401_v22  ;;  %v5542_v6 = vmax.f32 %v5455_v21, %v5510_v42 }
 0x661   : > { %16628 = vst [vmem:[#allocation17_spill] sm:$0xff] %v14403_v49  ;;  %v5344_v16 = vpop.f32.mrf.mxu3  ;;  %v5234_v41 = vpop.f32.mrf.mxu1  ;;  %v14603_v17 = vld [vmem:[#allocation2 + $0xf8] sm:$0xff] }
 0x662   : > { %5574 = vst.msk [vmem:[#allocation2 + $0x109] sm:$0xff] %vm363_vm0, %v5542_v6  ;;  %v5345_v55 = vadd.f32 %v5344_v16, %v5232_v9  ;;  %v5854_v9 = vrot.slane %v5609_v24, 2 }
 0x664   : > { %v5458_v13 = vadd.f32 %v5457_v12, %v5345_v55  ;;  %6054 = vrot.lane.b32.xlu2 %v14391_v33, %s9642_s11  ;;  %v5235_v55 = vadd.f32 %v14229_v39, %v5234_v41  ;;  %v5852_v12 = vrot.slane %v14375_v50, 2 }
 0x665   : > { %6248 = vrot.lane.b32.xlu1 %v14409_v1, %s9641_s22  ;;  %6160 = vrot.lane.b32.xlu0 %v14409_v1, %s9643_s12 }
 0x666   : > { %v5511_v21 = vmul.f32 0.2, %v5458_v13  ;;  %v14417_v36 = vpop.permute.xlu2 %6146 }
 0x667   : > { %16629 = vst [vmem:[#allocation18_spill] sm:$0xff] %v14417_v36  ;;  %v14419_v42 = vpop.permute.xlu1 %6334  ;;  %v14421_v6 = vpop.permute.xlu0 %5952 }
 0x668   : > { %16630 = vst [vmem:[#allocation72_spill] sm:$0xff] %v14419_v42  ;;  %v5543_v16 = vmax.f32 %v5458_v13, %v5511_v21  ;;  %v5466_v36 = vpop.f32.mrf.mxu2 }
 0x669   : > { %16631 = vst [vmem:[#allocation24_spill] sm:$0xff] %v14421_v6  ;;  %v5347_v8 = vpop.f32.mrf.mxu3  ;;  %v5237_v49 = vpop.f32.mrf.mxu1  ;;  %v14431_v6 = vsel %vm932_vm4, %v5852_v12, %v5854_v9  ;;  %v14448_v9 = vld [vmem:[#allocation2 + $0xc8] sm:$0xff] }
 0x66a   : > { %5575 = vst.msk [vmem:[#allocation2 + $0x111] sm:$0xff] %vm363_vm0, %v5543_v16  ;;  %v5348_v59 = vadd.f32 %v5347_v8, %v5235_v55  ;;  %v5851_v55 = vrot.slane %v14391_v33, 2 }
 0x66b   : > { %16632 = vst [vmem:[#allocation73_spill] sm:$0xff] %v14431_v6 }
 0x66c   : > { %v5461_v42 = vadd.f32 %v5460_v27, %v5348_v59  ;;  %6158 = vrot.lane.b32.xlu2 %v14428_v60, %s9643_s12  ;;  %v5238_v27 = vadd.f32 %v14229_v39, %v5237_v49  ;;  %v14451_v40 = vsel %vm932_vm4, %v5851_v55, %v5852_v12 }
 0x66d   : > { %6352 = vrot.lane.b32.xlu1 %v14431_v6, %s9642_s11  ;;  %6246 = vrot.lane.b32.xlu0 %v14428_v60, %s9641_s22  ;;  %16636 = vst [vmem:[#allocation40_spill] sm:$0xff] %v14451_v40 }
 0x66e   : > { %v5512_v41 = vmul.f32 0.2, %v5461_v42  ;;  %v14439_v13 = vpop.permute.xlu2 %5956 }
 0x66f   : > { %16633 = vst [vmem:[#allocation13_spill] sm:$0xff] %v14439_v13  ;;  %v14441_v24 = vpop.permute.xlu1 %6426  ;;  %v14443_v63 = vpop.permute.xlu0 %6044  ;;  %v14467_v13 = vld [vmem:[#allocation2 + $0xc0] sm:$0xff] }
 0x670   : > { %16634 = vst [vmem:[#allocation25_spill] sm:$0xff] %v14441_v24  ;;  %v5544_v59 = vmax.f32 %v5461_v42, %v5512_v41  ;;  %v5469_v49 = vpop.f32.mrf.mxu2  ;;  %v5734_v35 = vrot.slane %v14467_v13, 1 }
 0x671   : > { %16635 = vst [vmem:[#allocation41_spill] sm:$0xff] %v14443_v63  ;;  %v5350_v53 = vpop.f32.mrf.mxu3  ;;  %v5240_v21 = vpop.f32.mrf.mxu1  ;;  %v5612_v63 = vld [vmem:[#allocation2 + $0xd0] sm:$0x3] }
 0x672   : > { %5576 = vst.msk [vmem:[#allocation2 + $0x121] sm:$0xff] %vm363_vm0, %v5544_v59  ;;  %v5351_v16 = vadd.f32 %v5350_v53, %v5238_v27  ;;  %v5241_v12 = vadd.f32 %v14229_v39, %v5240_v21 }
 0x674   : > { %v5464_v8 = vadd.f32 %v5463_v28, %v5351_v16  ;;  %5968 = vrot.lane.b32.xlu2 %v14448_v9, %s9641_s22 }
 0x675   : > { %6444 = vrot.lane.b32.xlu1 %v14431_v6, %s9643_s12  ;;  %6350 = vrot.lane.b32.xlu0 %v14451_v40, %s9642_s11 }
 0x676   : > { %v5513_v42 = vmul.f32 0.2, %v5464_v8  ;;  %v14459_v41 = vpop.permute.xlu2 %6048 }
 0x677   : > { %16637 = vst [vmem:[#allocation66_spill] sm:$0xff] %v14459_v41  ;;  %v14461_v59 = vpop.permute.xlu1 %6236  ;;  %v14463_v27 = vpop.permute.xlu0 %6148 }
 0x678   : > { %16638 = vst [vmem:[#allocation23_spill] sm:$0xff] %v14461_v59  ;;  %v5545_v28 = vmax.f32 %v5464_v8, %v5513_v42 }
 0x679   : > { %16639 = vst [vmem:[#allocation46_spill] sm:$0xff] %v14463_v27  ;;  %v5353_v53 = vpop.f32.mrf.mxu3  ;;  %v5243_v16 = vpop.f32.mrf.mxu1 }
 0x67a   : > { %5577 = vst.msk [vmem:[#allocation2 + $0x129] sm:$0xff] %vm363_vm0, %v5545_v28  ;;  %v5354_v55 = vadd.f32 %v5353_v53, %v5241_v12  ;;  %v5737_v12 = vrot.slane %v5612_v63, 1  ;;  %v5472_v53 = vpop.f32.mrf.mxu2  ;;  %v5244_v27 = vadd.f32 %v14229_v39, %v5243_v16 }
 0x67c   : > { %v5467_v6 = vadd.f32 %v5466_v36, %v5354_v55  ;;  %6060 = vrot.lane.b32.xlu2 %v14448_v9, %s9642_s11  ;;  %v5735_v36 = vrot.slane %v14448_v9, 1 }
 0x67d   : > { %5966 = vrot.lane.b32.xlu1 %v14467_v13, %s9641_s22  ;;  %6442 = vrot.lane.b32.xlu0 %v14451_v40, %s9643_s12 }
 0x67e   : > { %v5514_v8 = vmul.f32 0.2, %v5467_v6  ;;  %v14475_v21 = vpop.permute.xlu2 %6152  ;;  %v14485_v40 = vsel %vm809_vm5, %v5735_v36, %v5737_v12 }
 0x67f   : > { %v14477_v42 = vpop.permute.xlu1 %6340  ;;  %v14479_v28 = vpop.permute.xlu0 %6234 }
 0x680   : > { %16640 = vst [vmem:[#allocation47_spill] sm:$0xff] %v14477_v42  ;;  %v5546_v55 = vmax.f32 %v5467_v6, %v5514_v8 }
 0x681   : > { %16641 = vst [vmem:[#allocation67_spill] sm:$0xff] %v14479_v28  ;;  %v5356_v41 = vpop.f32.mrf.mxu3  ;;  %v5246_v24 = vpop.f32.mrf.mxu1 }
 0x682   : > { %5578 = vst.msk [vmem:[#allocation2 + $0x139] sm:$0xff] %vm363_vm0, %v5546_v55  ;;  %v5357_v57 = vadd.f32 %v5356_v41, %v5244_v27  ;;  %v5247_v27 = vadd.f32 %v14229_v39, %v5246_v24  ;;  %v5475_v3 = vpop.f32.mrf.mxu2 }
 0x684   : > { %v5470_v37 = vadd.f32 %v5469_v49, %v5357_v57  ;;  %6164 = vrot.lane.b32.xlu2 %v14485_v40, %s9643_s12  ;;  %v5857_v57 = vrot.slane %v14448_v9, 2  ;;  %v5859_v49 = vrot.slane %v5612_v63, 2 }
 0x685   : > { %6058 = vrot.lane.b32.xlu1 %v14467_v13, %s9642_s11  ;;  %6252 = vrot.lane.b32.xlu0 %v14485_v40, %s9641_s22 }
 0x686   : > { %v5515_v6 = vmul.f32 0.2, %v5470_v37  ;;  %v14493_v16 = vpop.permute.xlu2 %6238 }
 0x687   : > { %16642 = vst [vmem:[#allocation27_spill] sm:$0xff] %v14493_v16  ;;  %v14495_v8 = vpop.permute.xlu1 %6432  ;;  %v14497_v55 = vpop.permute.xlu0 %6338  ;;  %v14504_v16 = vsel %vm809_vm5, %v5734_v35, %v5735_v36 }
 0x688   : > { %16643 = vst [vmem:[#allocation5_spill] sm:$0xff] %v14495_v8  ;;  %v5547_v41 = vmax.f32 %v5470_v37, %v5515_v6 }
 0x689   : > { %16644 = vst [vmem:[#allocation39_spill] sm:$0xff] %v14497_v55  ;;  %v5359_v12 = vpop.f32.mrf.mxu3  ;;  %v5249_v42 = vpop.f32.mrf.mxu1  ;;  %v14507_v55 = vsel %vm932_vm4, %v5857_v57, %v5859_v49 }
 0x68a   : > { %5579 = vst.msk [vmem:[#allocation2 + $0x141] sm:$0xff] %vm363_vm0, %v5547_v41  ;;  %v5360_v19 = vadd.f32 %v5359_v12, %v5247_v27  ;;  %v5250_v36 = vadd.f32 %v14229_v39, %v5249_v42  ;;  %v5856_v41 = vrot.slane %v14467_v13, 2  ;;  %v5478_v12 = vpop.f32.mrf.mxu2 }
 0x68b   : > { %16645 = vst [vmem:[#allocation6_spill] sm:$0xff] %v14507_v55 }
 0x68c   : > { %v5473_v8 = vadd.f32 %v5472_v53, %v5360_v19  ;;  %6250 = vrot.lane.b32.xlu2 %v14504_v16, %s9641_s22  ;;  %v14525_v49 = vsel %vm932_vm4, %v5856_v41, %v5857_v57 }
 0x68d   : > { %6162 = vrot.lane.b32.xlu1 %v14504_v16, %s9643_s12  ;;  %6356 = vrot.lane.b32.xlu0 %v14507_v55, %s9642_s11  ;;  %16648 = vst [vmem:[#allocation15_spill] sm:$0xff] %v14525_v49 }
 0x68e   : > { %v5516_v37 = vmul.f32 0.2, %v5473_v8  ;;  %v14515_v24 = vpop.permute.xlu2 %6342 }
 0x68f   : > { %v14517_v63 = vpop.permute.xlu1 %5954  ;;  %v14519_v35 = vpop.permute.xlu0 %6430 }
 0x690   : > { %16646 = vst [vmem:[#allocation48_spill] sm:$0xff] %v14517_v63  ;;  %v5548_v19 = vmax.f32 %v5473_v8, %v5516_v37  ;;  %v14543_v63 = vld [vmem:[#allocation2 + $0xd8] sm:$0xff] }
 0x691   : > { %16647 = vst [vmem:[#allocation28_spill] sm:$0xff] %v14519_v35  ;;  %v5362_v53 = vpop.f32.mrf.mxu3  ;;  %v5252_v6 = vpop.f32.mrf.mxu1  ;;  %v5739_v7 = vrot.slane %v14543_v63, 1 }
 0x692   : > { %5580 = vst.msk [vmem:[#allocation2 + $0x151] sm:$0xff] %vm363_vm0, %v5548_v19  ;;  %v5363_v27 = vadd.f32 %v5362_v53, %v5250_v36 }
 0x694   : > { %v5476_v59 = vadd.f32 %v5475_v3, %v5363_v27  ;;  %6354 = vrot.lane.b32.xlu2 %v14525_v49, %s9642_s11  ;;  %v5253_v3 = vadd.f32 %v14229_v39, %v5252_v6 }
 0x695   : > { %5972 = vrot.lane.b32.xlu1 %v14527_v10, %s9641_s22  ;;  %6448 = vrot.lane.b32.xlu0 %v14507_v55, %s9643_s12  ;;  %v5615_v55 = vld [vmem:[#allocation2 + $0xe8] sm:$0x3] }
 0x696   : > { %v5517_v42 = vmul.f32 0.2, %v5476_v59  ;;  %v14535_v8 = vpop.permute.xlu2 %6434 }
 0x697   : > { %16649 = vst [vmem:[#allocation60_spill] sm:$0xff] %v14535_v8  ;;  %v14537_v37 = vpop.permute.xlu1 %6046  ;;  %v14539_v57 = vpop.permute.xlu0 %6240 }
 0x698   : > { %16650 = vst [vmem:[#allocation74_spill] sm:$0xff] %v14537_v37  ;;  %v5549_v19 = vmax.f32 %v5476_v59, %v5517_v42  ;;  %v5481_v59 = vpop.f32.mrf.mxu2 }
 0x699   : > { %16651 = vst [vmem:[#allocation75_spill] sm:$0xff] %v14539_v57  ;;  %v5365_v36 = vpop.f32.mrf.mxu3  ;;  %v5255_v53 = vpop.f32.mrf.mxu1 }
 0x69a   : > { %5581 = vst.msk [vmem:[#allocation2 + $0x159] sm:$0xff] %vm363_vm0, %v5549_v19  ;;  %v5366_v41 = vadd.f32 %v5365_v36, %v5253_v3  ;;  %v5742_v3 = vrot.slane %v5615_v55, 1 }
 0x69c   : > { %v5479_v27 = vadd.f32 %v5478_v12, %v5366_v41  ;;  %6446 = vrot.lane.b32.xlu2 %v14525_v49, %s9643_s12  ;;  %v5740_v12 = vrot.slane %v14527_v10, 1  ;;  %v5256_v41 = vadd.f32 %v14229_v39, %v5255_v53 }
 0x69d   : > { %6064 = vrot.lane.b32.xlu1 %v14527_v10, %s9642_s11  ;;  %5970 = vrot.lane.b32.xlu0 %v14543_v63, %s9641_s22 }
 0x69e   : > { %v5518_v6 = vmul.f32 0.2, %v5479_v27  ;;  %v14551_v42 = vpop.permute.xlu2 %6244  ;;  %v14561_v37 = vsel %vm809_vm5, %v5740_v12, %v5742_v3  ;;  %v5862_v3 = vrot.slane %v14527_v10, 2  ;;  %v14583_v51 = vsel %vm809_vm5, %v5739_v7, %v5740_v12 }
 0x69f   : > { %16652 = vst [vmem:[#allocation76_spill] sm:$0xff] %v14551_v42  ;;  %v14553_v8 = vpop.permute.xlu1 %6150  ;;  %v14555_v19 = vpop.permute.xlu0 %6344 }
 0x6a0   : > { %v5550_v36 = vmax.f32 %v5479_v27, %v5518_v6  ;;  %v5484_v6 = vpop.f32.mrf.mxu2 }
 0x6a1   : > { %v5368_v49 = vpop.f32.mrf.mxu3  ;;  %v5258_v57 = vpop.f32.mrf.mxu1 }
 0x6a2   : > { %5582 = vst.msk [vmem:[#allocation2 + $0x169] sm:$0xff] %vm363_vm0, %v5550_v36  ;;  %v5369_v35 = vadd.f32 %v5368_v49, %v5256_v41  ;;  %v5259_v41 = vadd.f32 %v14229_v39, %v5258_v57 }
 0x6a4   : > { %v5482_v31 = vadd.f32 %v5481_v59, %v5369_v35  ;;  %6256 = vrot.lane.b32.xlu2 %v14561_v37, %s9641_s22  ;;  %v5864_v35 = vrot.slane %v5615_v55, 2 }
 0x6a5   : > { %6168 = vrot.lane.b32.xlu1 %v14561_v37, %s9643_s12  ;;  %6062 = vrot.lane.b32.xlu0 %v14543_v63, %s9642_s11 }
 0x6a6   : > { %v5519_v27 = vmul.f32 0.2, %v5482_v31  ;;  %v14569_v53 = vpop.permute.xlu2 %6348  ;;  %v14580_v48 = vsel %vm932_vm4, %v5862_v3, %v5864_v35 }
 0x6a7   : > { %v14571_v36 = vpop.permute.xlu1 %5960  ;;  %v14573_v49 = vpop.permute.xlu0 %6436  ;;  %16654 = vst [vmem:[#allocation78_spill] sm:$0xff] %v14580_v48 }
 0x6a8   : > { %16653 = vst [vmem:[#allocation77_spill] sm:$0xff] %v14573_v49  ;;  %v5551_v59 = vmax.f32 %v5482_v31, %v5519_v27 }
 0x6a9   : > { %v5371_v42 = vpop.f32.mrf.mxu3  ;;  %v5261_v55 = vpop.f32.mrf.mxu1 }
 0x6aa   : > { %5583 = vst.msk [vmem:[#allocation2 + $0x171] sm:$0xff] %vm363_vm0, %v5551_v59  ;;  %v5372_v44 = vadd.f32 %v5371_v42, %v5259_v41  ;;  %v5262_v7 = vadd.f32 %v14229_v39, %v5261_v55  ;;  %v5861_v59 = vrot.slane %v14543_v63, 2 }
 0x6ac   : > { %v5485_v43 = vadd.f32 %v5484_v6, %v5372_v44  ;;  %6360 = vrot.lane.b32.xlu2 %v14580_v48, %s9642_s11  ;;  %v5487_v6 = vpop.f32.mrf.mxu2  ;;  %v14601_v49 = vsel %vm932_vm4, %v5861_v59, %v5862_v3  ;;  %v5745_v59 = vrot.slane %v14603_v17, 1 }
 0x6ad   : > { %6254 = vrot.lane.b32.xlu1 %v14583_v51, %s9641_s22  ;;  %6166 = vrot.lane.b32.xlu0 %v14583_v51, %s9643_s12  ;;  %16656 = vst [vmem:[#allocation80_spill] sm:$0xff] %v14601_v49 }
 0x6ae   : > { %v5520_v31 = vmul.f32 0.2, %v5485_v43  ;;  %v14591_v57 = vpop.permute.xlu2 %6440 }
 0x6af   : > { %v14593_v42 = vpop.permute.xlu1 %6052  ;;  %v14595_v27 = vpop.permute.xlu0 %5958 }
 0x6b0   : > { %16655 = vst [vmem:[#allocation79_spill] sm:$0xff] %v14593_v42  ;;  %v5552_v44 = vmax.f32 %v5485_v43, %v5520_v31 }
 0x6b1   : > { %v5374_v12 = vpop.f32.mrf.mxu3 }
 0x6b2   : > { %5584 = vst.msk [vmem:[#allocation2 + $0x181] sm:$0xff] %vm363_vm0, %v5552_v44  ;;  %v5375_v35 = vadd.f32 %v5374_v12, %v5262_v7  ;;  %v14618_v7 = vld [vmem:[#allocation2 + $0xf0] sm:$0xff]  ;;  %v5618_v44 = vld [vmem:[#allocation2 + $0x100] sm:$0x3] }
 0x6b3   : > { %v5869_v42 = vrot.slane %v5618_v44, 2  ;;  %v5866_v47 = vrot.slane %v14618_v7, 2 }
 0x6b4   : > { %v5488_v41 = vadd.f32 %v5487_v6, %v5375_v35  ;;  %6452 = vrot.lane.b32.xlu2 %v14580_v48, %s9643_s12 }
 0x6b5   : > { %6358 = vrot.lane.b32.xlu1 %v14601_v49, %s9642_s11  ;;  %5976 = vrot.lane.b32.xlu0 %v14603_v17, %s9641_s22 }
 0x6b6   : > { %v5521_v39 = vmul.f32 0.2, %v5488_v41  ;;  %v14611_v43 = vpop.permute.xlu2 %5962 }
 0x6b7   : > { %v14613_v55 = vpop.permute.xlu1 %6156  ;;  %v14615_v31 = vpop.permute.xlu0 %6050 }
 0x6b8   : > { %16657 = vst [vmem:[#allocation81_spill] sm:$0xff] %v14615_v31  ;;  %v5553_v3 = vmax.f32 %v5488_v41, %v5521_v39  ;;  %v5747_v41 = vrot.slane %v5618_v44, 1  ;;  %v5867_v31 = vrot.slane %v14603_v17, 2 }
 0x6ba   : > { %5585 = vst.msk [vmem:[#allocation2 + $0x189] sm:$0xff] %vm363_vm0, %v5553_v3  ;;  %v14632_v39 = vsel %vm809_vm5, %v5745_v59, %v5747_v41  ;;  %v5744_v41 = vrot.slane %v14618_v7, 1  ;;  %v14652_v2 = vsel %vm932_vm4, %v5867_v31, %v5869_v42  ;;  %v6525_v42 = vsel %vm363_vm0, %v14170_v54, %v14571_v36 }
 0x6bb   : > { %16659 = vst [vmem:[#allocation83_spill] sm:$0xff] %v14652_v2 }
 0x6bc   : > { %5974 = vrot.lane.b32.xlu2 %v14618_v7, %s9641_s22 }
 0x6bd   : > { %6450 = vrot.lane.b32.xlu1 %v14601_v49, %s9643_s12  ;;  %6068 = vrot.lane.b32.xlu0 %v14603_v17, %s9642_s11 }
 0x6be   : > { %v6055_v12 = vpop.permute.xlu2 %6054 }
 0x6bf   : > { %v14626_v6 = vpop.permute.xlu1 %6242  ;;  %v14628_v35 = vpop.permute.xlu0 %6154 }
 0x6c0   : > { %16658 = vst [vmem:[#allocation82_spill] sm:$0xff] %v14626_v6  ;;  %v14649_v6 = vsel %vm809_vm5, %v5744_v41, %v5745_v59  ;;  %v14663_v59 = vld [vmem:[#allocation2 + $0x110] sm:$0xff]  ;;  %v14669_v41 = vsel %vm932_vm4, %v5866_v47, %v5867_v31  ;;  %v14683_v47 = vld [vmem:[%s16176_s8] sm:$0x7] }
 0x6c1   : > { %16660 = vst [vmem:[#allocation84_spill] sm:$0xff] %v14669_v41  ;;  %v14690_v36 = vperm.slane %v14683_v47, 0  ;;  %v14693_v31 = vperm.slane %v14683_v47, 1 }
 0x6c4   : > { %6066 = vrot.lane.b32.xlu2 %v14618_v7, %s9642_s11 }
 0x6c5   : > { %6260 = vrot.lane.b32.xlu1 %v14632_v39, %s9641_s22  ;;  %6172 = vrot.lane.b32.xlu0 %v14632_v39, %s9643_s12 }
 0x6c6   : > { %v14640_v3 = vpop.permute.xlu2 %6158 }
 0x6c7   : > { %v14642_v49 = vpop.permute.xlu1 %6346  ;;  %v14644_v48 = vpop.permute.xlu0 %5964 }
 0x6cc   : > { %6170 = vrot.lane.b32.xlu2 %v14649_v6, %s9643_s12 }
 0x6cd   : > { %6364 = vrot.lane.b32.xlu1 %v14652_v2, %s9642_s11  ;;  %6258 = vrot.lane.b32.xlu0 %v14649_v6, %s9641_s22 }
 0x6ce   : > { %v14660_v52 = vpop.permute.xlu2 %5968 }
 0x6cf   : > { %v6439_v44 = vpop.permute.xlu1 %6438  ;;  %v6057_v28 = vpop.permute.xlu0 %6056 }
 0x6d0   : > { %v6557_v20 = vsel %vm1631_vm6, %v6525_v42, %v6057_v28 }
 0x6d1   : > { %v6589_v54 = vsel %vm1664_vm7, %v6557_v20, %v14475_v21  ;;  %v14704_v20 = vld [vmem:[#allocation2 + $0x108] sm:$0xff] }
 0x6d2   : > { %v6747_v62 = vmul.f32 %v14690_v36, %v6589_v54 }
 0x6d4   : > { %5980 = vrot.lane.b32.xlu2 %v14663_v59, %s9641_s22 }
 0x6d5   : > { %6456 = vrot.lane.b32.xlu1 %v14652_v2, %s9643_s12  ;;  %6362 = vrot.lane.b32.xlu0 %v14669_v41, %s9642_s11 }
 0x6d6   : > { %v6061_v58 = vpop.permute.xlu2 %6060 }
 0x6d7   : > { %v6249_v38 = vpop.permute.xlu1 %6248  ;;  %v14678_v22 = vpop.permute.xlu0 %6160 }
 0x6d8   : > { %v6621_v28 = vsel %vm363_vm0, %v14333_v5, %v6249_v38  ;;  %v6524_v38 = vsel %vm363_vm0, %v14201_v23, %v14595_v27  ;;  %v5621_v5 = vld [vmem:[#allocation2 + $0x118] sm:$0x3]  ;;  %v5750_v27 = vrot.slane %v14663_v59, 1 }
 0x6d9   : > { %v6653_v42 = vsel %vm1631_vm6, %v6621_v28, %v14555_v19  ;;  %v6556_v21 = vsel %vm1631_vm6, %v6524_v38, %v6055_v12  ;;  %v5752_v54 = vrot.slane %v5621_v5, 1 }
 0x6da   : > { %v6685_v2 = vsel %vm1664_vm7, %v6653_v42, %v14591_v57  ;;  %v6588_v28 = vsel %vm1664_vm7, %v6556_v21, %v14553_v8  ;;  %v5872_v21 = vrot.slane %v14663_v59, 2 }
 0x6db   : > { %v6748_v61 = vmul.f32 %v14693_v31, %v6685_v2 }
 0x6dc   : > { %6072 = vrot.lane.b32.xlu2 %v14663_v59, %s9642_s11 }
 0x6dd   : > { %5978 = vrot.lane.b32.xlu1 %v14704_v20, %s9641_s22  ;;  %6454 = vrot.lane.b32.xlu0 %v14669_v41, %s9643_s12  ;;  %v14713_v19 = vadd.f32 %v6748_v61, %v6747_v62  ;;  %v6744_v62 = vmul.f32 %v14690_v36, %v6588_v28  ;;  %v14730_v41 = vsel %vm809_vm5, %v5750_v27, %v5752_v54  ;;  %v5749_v54 = vrot.slane %v14704_v20, 1 }
 0x6de   : > { %v14715_v2 = vpop.permute.xlu2 %6164 }
 0x6df   : > { %16661 = vst [vmem:[#allocation85_spill] sm:$0xff] %v14713_v19  ;;  %v14717_v57 = vpop.permute.xlu1 %6352  ;;  %v6247_v23 = vpop.permute.xlu0 %6246  ;;  %v14745_v28 = vsel %vm809_vm5, %v5749_v54, %v5750_v27  ;;  %v14772_v54 = vld [vmem:[#allocation2 + $0x128] sm:$0xff] }
 0x6e0   : > { %v6620_v12 = vsel %vm363_vm0, %v14355_v0, %v6247_v23  ;;  %v5874_v23 = vrot.slane %v5621_v5, 2 }
 0x6e1   : > { %v6652_v42 = vsel %vm1631_vm6, %v6620_v12, %v14515_v24 }
 0x6e2   : > { %v6684_v61 = vsel %vm1664_vm7, %v6652_v42, %v6439_v44  ;;  %v14750_v42 = vsel %vm932_vm4, %v5872_v21, %v5874_v23  ;;  %v6527_v23 = vsel %vm363_vm0, %v14298_v26, %v14644_v48 }
 0x6e3   : > { %v6745_v38 = vmul.f32 %v14693_v31, %v6684_v61  ;;  %16662 = vst [vmem:[#allocation86_spill] sm:$0xff] %v14750_v42  ;;  %v6559_v19 = vsel %vm1631_vm6, %v6527_v23, %v6061_v58 }
 0x6e4   : > { %6176 = vrot.lane.b32.xlu2 %v14730_v41, %s9643_s12 }
 0x6e5   : > { %6070 = vrot.lane.b32.xlu1 %v14704_v20, %s9642_s11  ;;  %6264 = vrot.lane.b32.xlu0 %v14730_v41, %s9641_s22  ;;  %v14738_v0 = vadd.f32 %v6745_v38, %v6744_v62  ;;  %v5871_v38 = vrot.slane %v14704_v20, 2 }
 0x6e6   : > { %v6251_v24 = vpop.permute.xlu2 %6250 }
 0x6e7   : > { %v6445_v8 = vpop.permute.xlu1 %6444  ;;  %v14740_v44 = vpop.permute.xlu0 %6350  ;;  %v6622_v12 = vsel %vm363_vm0, %v14428_v60, %v6251_v24  ;;  %v14767_v24 = vsel %vm932_vm4, %v5871_v38, %v5872_v21  ;;  %v6526_v21 = vsel %vm363_vm0, %v14314_v11, %v14611_v43 }
 0x6e8   : > { %v6654_v60 = vsel %vm1631_vm6, %v6622_v12, %v14642_v49  ;;  %16663 = vst [vmem:[#allocation87_spill] sm:$0xff] %v14767_v24  ;;  %v6591_v12 = vsel %vm1664_vm7, %v6559_v19, %v14613_v55  ;;  %v14800_v19 = vld [vmem:[#allocation2 + $0x120] sm:$0xff] }
 0x6ec   : > { %6262 = vrot.lane.b32.xlu2 %v14745_v28, %s9641_s22 }
 0x6ed   : > { %6174 = vrot.lane.b32.xlu1 %v14745_v28, %s9643_s12  ;;  %6368 = vrot.lane.b32.xlu0 %v14750_v42, %s9642_s11 }
 0x6ee   : > { %v14758_v5 = vpop.permute.xlu2 %6354 }
 0x6ef   : > { %v14760_v61 = vpop.permute.xlu1 %5966  ;;  %v6443_v27 = vpop.permute.xlu0 %6442 }
 0x6f0   : > { %v6686_v62 = vsel %vm1664_vm7, %v6654_v60, %v6443_v27 }
 0x6f1   : > { %v6751_v23 = vmul.f32 %v14693_v31, %v6686_v62 }
 0x6f4   : > { %6366 = vrot.lane.b32.xlu2 %v14767_v24, %s9642_s11 }
 0x6f5   : > { %5984 = vrot.lane.b32.xlu1 %v14772_v54, %s9641_s22  ;;  %6460 = vrot.lane.b32.xlu0 %v14750_v42, %s9643_s12  ;;  %v6753_v42 = vmul.f32 %v14690_v36, %v6591_v12 }
 0x6f6   : > { %v14781_v49 = vpop.permute.xlu2 %6446 }
 0x6f7   : > { %v6059_v48 = vpop.permute.xlu1 %6058  ;;  %v6253_v26 = vpop.permute.xlu0 %6252 }
 0x6f8   : > { %v6558_v27 = vsel %vm1631_vm6, %v6526_v21, %v6059_v48  ;;  %v6623_v58 = vsel %vm363_vm0, %v14409_v1, %v6253_v26  ;;  %v5624_v1 = vld [vmem:[#allocation2 + $0x130] sm:$0x3]  ;;  %v5755_v26 = vrot.slane %v14772_v54, 1 }
 0x6f9   : > { %v6590_v60 = vsel %vm1664_vm7, %v6558_v27, %v14628_v35  ;;  %v6655_v38 = vsel %vm1631_vm6, %v6623_v58, %v14569_v53  ;;  %v5757_v12 = vrot.slane %v5624_v1, 1 }
 0x6fa   : > { %v6750_v11 = vmul.f32 %v14690_v36, %v6590_v60  ;;  %v6687_v43 = vsel %vm1664_vm7, %v6655_v38, %v6445_v8  ;;  %v5877_v38 = vrot.slane %v14772_v54, 2 }
 0x6fb   : > { %v6754_v55 = vmul.f32 %v14693_v31, %v6687_v43  ;;  %v14820_v58 = vsel %vm809_vm5, %v5755_v26, %v5757_v12 }
 0x6fc   : > { %6458 = vrot.lane.b32.xlu2 %v14767_v24, %s9643_s12  ;;  %v14804_v35 = vadd.f32 %v6751_v23, %v6750_v11  ;;  %v5754_v11 = vrot.slane %v14800_v19, 1 }
 0x6fd   : > { %6076 = vrot.lane.b32.xlu1 %v14772_v54, %s9642_s11  ;;  %5982 = vrot.lane.b32.xlu0 %v14800_v19, %s9641_s22  ;;  %v14810_v53 = vadd.f32 %v6754_v55, %v6753_v42 }
 0x6fe   : > { %v6257_v8 = vpop.permute.xlu2 %6256  ;;  %v14839_v55 = vsel %vm809_vm5, %v5754_v11, %v5755_v26  ;;  %v5876_v11 = vrot.slane %v14800_v19, 2 }
 0x6ff   : > { %16664 = vst [vmem:[#allocation88_spill] sm:$0xff] %v14810_v53  ;;  %v6163_v62 = vpop.permute.xlu1 %6162  ;;  %v14812_v21 = vpop.permute.xlu0 %6356  ;;  %v6625_v48 = vsel %vm363_vm0, %v14485_v40, %v6257_v8  ;;  %v6529_v8 = vsel %vm363_vm0, %v14375_v50, %v14660_v52  ;;  %v14861_v53 = vld [vmem:[#allocation2 + $0x140] sm:$0xff] }
 0x700   : > { %v6657_v27 = vsel %vm1631_vm6, %v6625_v48, %v14717_v57  ;;  %v5879_v57 = vrot.slane %v5624_v1, 2  ;;  %v14859_v24 = vsel %vm932_vm4, %v5876_v11, %v5877_v38  ;;  %v5760_v11 = vrot.slane %v14861_v53, 1 }
 0x701   : > { %16666 = vst [vmem:[#allocation90_spill] sm:$0xff] %v14859_v24 }
 0x702   : > { %v14836_v43 = vsel %vm932_vm4, %v5877_v38, %v5879_v57 }
 0x703   : > { %16665 = vst [vmem:[#allocation89_spill] sm:$0xff] %v14836_v43 }
 0x704   : > { %6268 = vrot.lane.b32.xlu2 %v14820_v58, %s9641_s22 }
 0x705   : > { %6180 = vrot.lane.b32.xlu1 %v14820_v58, %s9643_s12  ;;  %6074 = vrot.lane.b32.xlu0 %v14800_v19, %s9642_s11 }
 0x706   : > { %v14828_v42 = vpop.permute.xlu2 %6360 }
 0x707   : > { %v14830_v40 = vpop.permute.xlu1 %5972  ;;  %v6449_v60 = vpop.permute.xlu0 %6448 }
 0x708   : > { %v6689_v23 = vsel %vm1664_vm7, %v6657_v27, %v6449_v60 }
 0x709   : > { %v6760_v60 = vmul.f32 %v14693_v31, %v6689_v23 }
 0x70c   : > { %6372 = vrot.lane.b32.xlu2 %v14836_v43, %s9642_s11 }
 0x70d   : > { %6266 = vrot.lane.b32.xlu1 %v14839_v55, %s9641_s22  ;;  %6178 = vrot.lane.b32.xlu0 %v14839_v55, %s9643_s12 }
 0x70e   : > { %v14847_v1 = vpop.permute.xlu2 %6452 }
 0x70f   : > { %v6065_v48 = vpop.permute.xlu1 %6064  ;;  %v5971_v12 = vpop.permute.xlu0 %5970 }
 0x710   : > { %v6561_v26 = vsel %vm1631_vm6, %v6529_v8, %v6065_v48  ;;  %v14877_v48 = vld [vmem:[#allocation2 + $0x138] sm:$0xff] }
 0x711   : > { %v6593_v27 = vsel %vm1664_vm7, %v6561_v26, %v14678_v22  ;;  %v6528_v22 = vsel %vm363_vm0, %v14391_v33, %v14760_v61  ;;  %16668 = vst [vmem:[#allocation92_spill] sm:$0xff] %v14877_v48  ;;  %v5627_v26 = vld [vmem:[#allocation2 + $0x148] sm:$0x3] }
 0x712   : > { %v6759_v57 = vmul.f32 %v14690_v36, %v6593_v27  ;;  %v6530_v27 = vsel %vm363_vm0, %v14467_v13, %v5971_v12 }
 0x714   : > { %6464 = vrot.lane.b32.xlu2 %v14836_v43, %s9643_s12  ;;  %v14865_v52 = vadd.f32 %v6760_v60, %v6759_v57  ;;  %v5762_v43 = vrot.slane %v5627_v26, 1 }
 0x715   : > { %6370 = vrot.lane.b32.xlu1 %v14859_v24, %s9642_s11  ;;  %5988 = vrot.lane.b32.xlu0 %v14861_v53, %s9641_s22 }
 0x716   : > { %16667 = vst [vmem:[#allocation91_spill] sm:$0xff] %v14865_v52  ;;  %v14871_v50 = vpop.permute.xlu2 %5974 }
 0x717   : > { %v6169_v38 = vpop.permute.xlu1 %6168  ;;  %v6063_v23 = vpop.permute.xlu0 %6062 }
 0x718   : > { %v6560_v8 = vsel %vm1631_vm6, %v6528_v22, %v6063_v23 }
 0x719   : > { %v6592_v22 = vsel %vm1664_vm7, %v6560_v8, %v14640_v3  ;;  %v5884_v8 = vrot.slane %v5627_v26, 2  ;;  %v6531_v26 = vsel %vm363_vm0, %v14448_v9, %v14830_v40 }
 0x71a   : > { %v6756_v52 = vmul.f32 %v14690_v36, %v6592_v22 }
 0x71c   : > { %5986 = vrot.lane.b32.xlu2 %v14877_v48, %s9641_s22 }
 0x71d   : > { %6462 = vrot.lane.b32.xlu1 %v14859_v24, %s9643_s12  ;;  %6080 = vrot.lane.b32.xlu0 %v14861_v53, %s9642_s11 }
 0x71e   : > { %v6067_v33 = vpop.permute.xlu2 %6066 }
 0x71f   : > { %v6255_v61 = vpop.permute.xlu1 %6254  ;;  %v14887_v60 = vpop.permute.xlu0 %6166  ;;  %v6562_v57 = vsel %vm1631_vm6, %v6530_v27, %v6067_v33  ;;  %v14903_v33 = vsel %vm809_vm5, %v5760_v11, %v5762_v43  ;;  %v5759_v43 = vrot.slane %v14877_v48, 1 }
 0x720   : > { %v6624_v23 = vsel %vm363_vm0, %v14504_v16, %v6255_v61  ;;  %v6594_v24 = vsel %vm1664_vm7, %v6562_v57, %v6163_v62  ;;  %v5882_v62 = vrot.slane %v14861_v53, 2 }
 0x721   : > { %v6656_v13 = vsel %vm1631_vm6, %v6624_v23, %v14740_v44  ;;  %v14918_v61 = vsel %vm809_vm5, %v5759_v43, %v5760_v11 }
 0x722   : > { %v6688_v12 = vsel %vm1664_vm7, %v6656_v13, %v14781_v49  ;;  %v14921_v57 = vsel %vm932_vm4, %v5882_v62, %v5884_v8  ;;  %v5881_v13 = vrot.slane %v14877_v48, 2 }
 0x723   : > { %v6757_v27 = vmul.f32 %v14693_v31, %v6688_v12  ;;  %16670 = vst [vmem:[#allocation94_spill] sm:$0xff] %v14921_v57  ;;  %v14936_v12 = vld [vmem:[#allocation2 + $0x158] sm:$0xff] }
 0x724   : > { %6078 = vrot.lane.b32.xlu2 %v14877_v48, %s9642_s11  ;;  %16671 = vst [vmem:[#allocation95_spill] sm:$0xff] %v14936_v12 }
 0x725   : > { %6272 = vrot.lane.b32.xlu1 %v14903_v33, %s9641_s22  ;;  %6184 = vrot.lane.b32.xlu0 %v14903_v33, %s9643_s12  ;;  %v14911_v16 = vadd.f32 %v6757_v27, %v6756_v52  ;;  %v14939_v27 = vsel %vm932_vm4, %v5881_v13, %v5882_v62 }
 0x726   : > { %v14913_v3 = vpop.permute.xlu2 %6170 }
 0x727   : > { %16669 = vst [vmem:[#allocation93_spill] sm:$0xff] %v14911_v16  ;;  %v6359_v44 = vpop.permute.xlu1 %6358  ;;  %v5977_v49 = vpop.permute.xlu0 %5976  ;;  %v14963_v16 = vld [vmem:[#allocation2 + $0x150] sm:$0xff] }
 0x728   : > { %v6533_v9 = vsel %vm363_vm0, %v14527_v10, %v5977_v49  ;;  %16672 = vst [vmem:[#allocation96_spill] sm:$0xff] %v14963_v16 }
 0x72c   : > { %6182 = vrot.lane.b32.xlu2 %v14918_v61, %s9643_s12 }
 0x72d   : > { %6376 = vrot.lane.b32.xlu1 %v14921_v57, %s9642_s11  ;;  %6270 = vrot.lane.b32.xlu0 %v14918_v61, %s9641_s22 }
 0x72e   : > { %v14929_v52 = vpop.permute.xlu2 %5980 }
 0x72f   : > { %v6451_v11 = vpop.permute.xlu1 %6450  ;;  %v6069_v22 = vpop.permute.xlu0 %6068 }
 0x730   : > { %v6563_v23 = vsel %vm1631_vm6, %v6531_v26, %v6069_v22 }
 0x731   : > { %v6595_v62 = vsel %vm1664_vm7, %v6563_v23, %v14715_v2  ;;  %v5630_v2 = vld [vmem:[#allocation2 + $0x160] sm:$0x3] }
 0x732   : > { %v6765_v49 = vmul.f32 %v14690_v36, %v6595_v62  ;;  %v5767_v23 = vrot.slane %v5630_v2, 1 }
 0x734   : > { %5992 = vrot.lane.b32.xlu2 %v14936_v12, %s9641_s22 }
 0x735   : > { %6468 = vrot.lane.b32.xlu1 %v14921_v57, %s9643_s12  ;;  %6374 = vrot.lane.b32.xlu0 %v14939_v27, %s9642_s11 }
 0x736   : > { %v6073_v40 = vpop.permute.xlu2 %6072 }
 0x737   : > { %v6261_v8 = vpop.permute.xlu1 %6260  ;;  %v14949_v43 = vpop.permute.xlu0 %6172  ;;  %v6565_v26 = vsel %vm1631_vm6, %v6533_v9, %v6073_v40 }
 0x738   : > { %v6627_v22 = vsel %vm363_vm0, %v14561_v37, %v6261_v8  ;;  %v6597_v13 = vsel %vm1664_vm7, %v6565_v26, %v6169_v38  ;;  %v6762_v26 = vmul.f32 %v14690_v36, %v6594_v24 }
 0x739   : > { %v6659_v48 = vsel %vm1631_vm6, %v6627_v22, %v14812_v21 }
 0x73a   : > { %v6691_v10 = vsel %vm1664_vm7, %v6659_v48, %v14847_v1  ;;  %v5765_v48 = vrot.slane %v14936_v12, 1 }
 0x73b   : > { %v6766_v57 = vmul.f32 %v14693_v31, %v6691_v10  ;;  %v5887_v10 = vrot.slane %v14936_v12, 2 }
 0x73c   : > { %6084 = vrot.lane.b32.xlu2 %v14936_v12, %s9642_s11  ;;  %v14986_v62 = vsel %vm809_vm5, %v5765_v48, %v5767_v23  ;;  %v5764_v23 = vrot.slane %v14963_v16, 1 }
 0x73d   : > { %5990 = vrot.lane.b32.xlu1 %v14963_v16, %s9641_s22  ;;  %6466 = vrot.lane.b32.xlu0 %v14939_v27, %s9643_s12  ;;  %v14971_v37 = vadd.f32 %v6766_v57, %v6765_v49  ;;  %v5889_v49 = vrot.slane %v5630_v2, 2 }
 0x73e   : > { %v14973_v21 = vpop.permute.xlu2 %6176 }
 0x73f   : > { %v14975_v1 = vpop.permute.xlu1 %6364  ;;  %v6259_v38 = vpop.permute.xlu0 %6258 }
 0x740   : > { %v6626_v9 = vsel %vm363_vm0, %v14583_v51, %v6259_v38 }
 0x741   : > { %v6658_v40 = vsel %vm1631_vm6, %v6626_v9, %v14758_v5  ;;  %v15004_v9 = vsel %vm809_vm5, %v5764_v23, %v5765_v48 }
 0x742   : > { %v6690_v8 = vsel %vm1664_vm7, %v6658_v40, %v6451_v11  ;;  %v15007_v40 = vsel %vm932_vm4, %v5887_v10, %v5889_v49 }
 0x743   : > { %v6763_v57 = vmul.f32 %v14693_v31, %v6690_v8  ;;  %16673 = vst [vmem:[#allocation97_spill] sm:$0xff] %v15007_v40  ;;  %v5886_v8 = vrot.slane %v14963_v16, 2 }
 0x744   : > { %6188 = vrot.lane.b32.xlu2 %v14986_v62, %s9643_s12 }
 0x745   : > { %6082 = vrot.lane.b32.xlu1 %v14963_v16, %s9642_s11  ;;  %6276 = vrot.lane.b32.xlu0 %v14986_v62, %s9641_s22  ;;  %v14994_v51 = vadd.f32 %v6763_v57, %v6762_v26  ;;  %v15022_v26 = vsel %vm932_vm4, %v5886_v8, %v5887_v10  ;;  %v15024_v57 = vld [vmem:[#allocation2 + $0x170] sm:$0xff] }
 0x746   : > { %v6263_v5 = vpop.permute.xlu2 %6262  ;;  %16674 = vst [vmem:[#allocation98_spill] sm:$0xff] %v15022_v26 }
 0x747   : > { %v6457_v11 = vpop.permute.xlu1 %6456  ;;  %v14996_v22 = vpop.permute.xlu0 %6362  ;;  %v6628_v24 = vsel %vm363_vm0, %v14649_v6, %v6263_v5  ;;  %16675 = vst [vmem:[#allocation99_spill] sm:$0xff] %v15024_v57 }
 0x748   : > { %v6660_v38 = vsel %vm1631_vm6, %v6628_v24, %v6359_v44  ;;  %v6532_v24 = vsel %vm363_vm0, %v14543_v63, %v14871_v50  ;;  %v6771_v63 = vmul.f32 %v14690_v36, %v6597_v13 }
 0x74c   : > { %6274 = vrot.lane.b32.xlu2 %v15004_v9, %s9641_s22 }
 0x74d   : > { %6186 = vrot.lane.b32.xlu1 %v15004_v9, %s9643_s12  ;;  %6380 = vrot.lane.b32.xlu0 %v15007_v40, %s9642_s11 }
 0x74e   : > { %v15015_v6 = vpop.permute.xlu2 %6366 }
 0x74f   : > { %v15017_v44 = vpop.permute.xlu1 %5978  ;;  %v6455_v2 = vpop.permute.xlu0 %6454 }
 0x750   : > { %v6692_v48 = vsel %vm1664_vm7, %v6660_v38, %v6455_v2 }
 0x751   : > { %v6769_v12 = vmul.f32 %v14693_v31, %v6692_v48 }
 0x754   : > { %6378 = vrot.lane.b32.xlu2 %v15022_v26, %s9642_s11 }
 0x755   : > { %5996 = vrot.lane.b32.xlu1 %v15024_v57, %s9641_s22  ;;  %6472 = vrot.lane.b32.xlu0 %v15007_v40, %s9643_s12 }
 0x756   : > { %v15032_v5 = vpop.permute.xlu2 %6458 }
 0x757   : > { %v6071_v49 = vpop.permute.xlu1 %6070  ;;  %v6265_v10 = vpop.permute.xlu0 %6264 }
 0x758   : > { %v6564_v38 = vsel %vm1631_vm6, %v6532_v24, %v6071_v49  ;;  %v6629_v23 = vsel %vm363_vm0, %v14632_v39, %v6265_v10  ;;  %v15049_v24 = vld [vmem:[#allocation2 + $0x168] sm:$0xff]  ;;  %v5633_v39 = vld [vmem:[#allocation2 + $0x178] sm:$0x3]  ;;  %v5770_v49 = vrot.slane %v15024_v57, 1 }
 0x759   : > { %v6596_v2 = vsel %vm1664_vm7, %v6564_v38, %v14887_v60  ;;  %v6661_v8 = vsel %vm1631_vm6, %v6629_v23, %v14828_v42  ;;  %16676 = vst [vmem:[#allocation100_spill] sm:$0xff] %v15049_v24  ;;  %v5772_v10 = vrot.slane %v5633_v39, 1 }
 0x75a   : > { %v6768_v16 = vmul.f32 %v14690_v36, %v6596_v2  ;;  %v6693_v40 = vsel %vm1664_vm7, %v6661_v8, %v6457_v11  ;;  %v5892_v2 = vrot.slane %v15024_v57, 2 }
 0x75b   : > { %v6772_v50 = vmul.f32 %v14693_v31, %v6693_v40 }
 0x75c   : > { %6470 = vrot.lane.b32.xlu2 %v15022_v26, %s9643_s12  ;;  %v15053_v60 = vadd.f32 %v6769_v12, %v6768_v16  ;;  %v15069_v12 = vsel %vm809_vm5, %v5770_v49, %v5772_v10 }
 0x75d   : > { %6088 = vrot.lane.b32.xlu1 %v15024_v57, %s9642_s11  ;;  %5994 = vrot.lane.b32.xlu0 %v15049_v24, %s9641_s22  ;;  %v15059_v42 = vadd.f32 %v6772_v50, %v6771_v63  ;;  %16677 = vst [vmem:[#allocation101_spill] sm:$0xff] %v15069_v12  ;;  %v5769_v63 = vrot.slane %v15049_v24, 1  ;;  %v5635_v57 = vld [vmem:[#allocation2 + $0x188] sm:$0xff] }
 0x75e   : > { %v6269_v11 = vpop.permute.xlu2 %6268 }
 0x75f   : > { %v6175_v13 = vpop.permute.xlu1 %6174  ;;  %v15061_v48 = vpop.permute.xlu0 %6368  ;;  %v6631_v40 = vsel %vm363_vm0, %v14730_v41, %v6269_v11  ;;  %v15088_v11 = vsel %vm809_vm5, %v5769_v63, %v5770_v49 }
 0x760   : > { %v6663_v16 = vsel %vm1631_vm6, %v6631_v40, %v14975_v1  ;;  %v5894_v1 = vrot.slane %v5633_v39, 2  ;;  %16679 = vst [vmem:[#allocation103_spill] sm:$0xff] %v15088_v11  ;;  %v6535_v40 = vsel %vm363_vm0, %v14603_v17, %v14929_v52 }
 0x762   : > { %v15085_v50 = vsel %vm932_vm4, %v5892_v2, %v5894_v1 }
 0x763   : > { %16678 = vst [vmem:[#allocation102_spill] sm:$0xff] %v15085_v50 }
 0x764   : > { %6280 = vrot.lane.b32.xlu2 %v15069_v12, %s9641_s22 }
 0x765   : > { %6192 = vrot.lane.b32.xlu1 %v15069_v12, %s9643_s12  ;;  %6086 = vrot.lane.b32.xlu0 %v15049_v24, %s9642_s11  ;;  %v5891_v12 = vrot.slane %v15049_v24, 2 }
 0x766   : > { %v15077_v38 = vpop.permute.xlu2 %6372 }
 0x767   : > { %v15079_v41 = vpop.permute.xlu1 %5984  ;;  %v6461_v23 = vpop.permute.xlu0 %6460 }
 0x768   : > { %v6695_v8 = vsel %vm1664_vm7, %v6663_v16, %v6461_v23 }
 0x769   : > { %v6778_v1 = vmul.f32 %v14693_v31, %v6695_v8 }
 0x76c   : > { %6384 = vrot.lane.b32.xlu2 %v15085_v50, %s9642_s11 }
 0x76d   : > { %6278 = vrot.lane.b32.xlu1 %v15088_v11, %s9641_s22  ;;  %6190 = vrot.lane.b32.xlu0 %v15088_v11, %s9643_s12  ;;  %v15108_v11 = vsel %vm932_vm4, %v5891_v12, %v5892_v2 }
 0x76e   : > { %v15096_v39 = vpop.permute.xlu2 %6464  ;;  %16680 = vst [vmem:[#allocation104_spill] sm:$0xff] %v15108_v11 }
 0x76f   : > { %v6077_v10 = vpop.permute.xlu1 %6076  ;;  %v5983_v16 = vpop.permute.xlu0 %5982 }
 0x770   : > { %v6567_v49 = vsel %vm1631_vm6, %v6535_v40, %v6077_v10  ;;  %v5634_v40 = vld [vmem:[#allocation2 + $0x180] sm:$0xff]  ;;  %v5636_v10 = vld [vmem:[#allocation2 + $0x190] sm:$0x3] }
 0x771   : > { %v6599_v23 = vsel %vm1664_vm7, %v6567_v49, %v14949_v43  ;;  %v6534_v43 = vsel %vm363_vm0, %v14618_v7, %v15017_v44  ;;  %v6536_v49 = vsel %vm363_vm0, %v14704_v20, %v5983_v16  ;;  %v5774_v16 = vrot.slane %v5634_v40, 1 }
 0x772   : > { %v6777_v63 = vmul.f32 %v14690_v36, %v6599_v23 }
 0x774   : > { %6476 = vrot.lane.b32.xlu2 %v15085_v50, %s9643_s12  ;;  %v15112_v17 = vadd.f32 %v6778_v1, %v6777_v63  ;;  %v5775_v1 = vrot.slane %v5635_v57, 1 }
 0x775   : > { %6382 = vrot.lane.b32.xlu1 %v15108_v11, %s9642_s11  ;;  %6000 = vrot.lane.b32.xlu0 %v5635_v57, %s9641_s22 }
 0x776   : > { %v15117_v52 = vpop.permute.xlu2 %5986 }
 0x777   : > { %v6181_v8 = vpop.permute.xlu1 %6180  ;;  %v6075_v12 = vpop.permute.xlu0 %6074 }
 0x778   : > { %v6566_v2 = vsel %vm1631_vm6, %v6534_v43, %v6075_v12 }
 0x779   : > { %v6598_v43 = vsel %vm1664_vm7, %v6566_v2, %v14913_v3  ;;  %v5899_v2 = vrot.slane %v5636_v10, 2 }
 0x77a   : > { %v6774_v26 = vmul.f32 %v14690_v36, %v6598_v43 }
 0x77c   : > { %5998 = vrot.lane.b32.xlu2 %v5634_v40, %s9641_s22 }
 0x77d   : > { %6474 = vrot.lane.b32.xlu1 %v15108_v11, %s9643_s12  ;;  %6092 = vrot.lane.b32.xlu0 %v5635_v57, %s9642_s11  ;;  %v5777_v11 = vrot.slane %v5636_v10, 1 }
 0x77e   : > { %v6079_v23 = vpop.permute.xlu2 %6078 }
 0x77f   : > { %v6267_v63 = vpop.permute.xlu1 %6266  ;;  %v15129_v7 = vpop.permute.xlu0 %6178  ;;  %v6568_v44 = vsel %vm1631_vm6, %v6536_v49, %v6079_v23  ;;  %v15146_v3 = vsel %vm809_vm5, %v5775_v1, %v5777_v11  ;;  %v5897_v11 = vrot.slane %v5635_v57, 2  ;;  %v5896_v23 = vrot.slane %v5634_v40, 2 }
 0x780   : > { %v6630_v12 = vsel %vm363_vm0, %v14745_v28, %v6267_v63  ;;  %v15137_v24 = vsel %vm1664_vm7, %v6568_v44, %v6175_v13  ;;  %16681 = vst [vmem:[#allocation105_spill] sm:$0xff] %v15146_v3  ;;  %v15149_v28 = vsel %vm809_vm5, %v5774_v16, %v5775_v1  ;;  %v6537_v57 = vsel %vm363_vm0, %v14663_v59, %v15079_v41 }
 0x781   : > { %v6662_v20 = vsel %vm1631_vm6, %v6630_v12, %v14996_v22  ;;  %16682 = vst [vmem:[#allocation106_spill] sm:$0xff] %v15149_v28  ;;  %v15163_v1 = vsel %vm932_vm4, %v5897_v11, %v5899_v2  ;;  %v15166_v63 = vsel %vm932_vm4, %v5896_v23, %v5897_v11  ;;  %v15184_v11 = vperm.slane %v14683_v47, 2  ;;  %v9618_v23 = vld [vmem:[#allocation2] sm:$0xff] }
 0x782   : > { %v6694_v50 = vsel %vm1664_vm7, %v6662_v20, %v15032_v5  ;;  %16683 = vst [vmem:[#allocation107_spill] sm:$0xff] %v15163_v1  ;;  %v6514_v47 = vsel %vm363_vm0, %v9618_v23, %v14091_v56  ;;  %v6611_v56 = vsel %vm363_vm0, %v13786_v15, %v14309_v46 }
 0x783   : > { %v6775_v49 = vmul.f32 %v14693_v31, %v6694_v50  ;;  %16684 = vst [vmem:[#allocation108_spill] sm:$0xff] %v15166_v63 }
 0x784   : > { %6090 = vrot.lane.b32.xlu2 %v5634_v40, %s9642_s11 }
 0x785   : > { %6284 = vrot.lane.b32.xlu1 %v15146_v3, %s9641_s22  ;;  %6282 = vrot.lane.b32.xlu0 %v15149_v28, %s9641_s22  ;;  %v15156_v22 = vadd.f32 %v6775_v49, %v6774_v26  ;;  %v9623_v28 = vld [vmem:[#allocation2 + $0x38] sm:$0xff]  ;;  %s7874_s22 = sshll.u32 %s16842_s18, 8 }
 0x786   : > { %v15158_v5 = vpop.permute.xlu2 %6182 }
 0x787   : > { %v15160_v13 = vpop.permute.xlu1 %6370  ;;  %v5989_v50 = vpop.permute.xlu0 %5988 }
 0x788   : > { %v6539_v43 = vsel %vm363_vm0, %v14772_v54, %v5989_v50 }
 0x78d   : > { %6480 = vrot.lane.b32.xlu1 %v15163_v1, %s9643_s12  ;;  %6478 = vrot.lane.b32.xlu0 %v15166_v63, %s9643_s12  ;;  %v16721_v63 = vld [vmem:[#allocation41_spill] sm:$0xff]  ;;  %s15655_s12 = scalar_lea.vmem %s16178_s10, %s7874_s22 }
 0x78e   : > { %v15172_v26 = vpop.permute.xlu2 %5992 }
 0x78f   : > { %v6463_v10 = vpop.permute.xlu1 %6462  ;;  %v6081_v40 = vpop.permute.xlu0 %6080 }
 0x790   : > { %v6569_v44 = vsel %vm1631_vm6, %v6537_v57, %v6081_v40 }
 0x791   : > { %v6601_v2 = vsel %vm1664_vm7, %v6569_v44, %v14973_v21 }
 0x792   : > { %v6783_v57 = vmul.f32 %v14690_v36, %v6601_v2  ;;  %v16688_v2 = vld [vmem:[#allocation29_spill] sm:$0xff] }
 0x796   : > { %v6085_v12 = vpop.permute.xlu2 %6084 }
 0x797   : > { %v6273_v20 = vpop.permute.xlu1 %6272  ;;  %v15180_v16 = vpop.permute.xlu0 %6184  ;;  %v6571_v49 = vsel %vm1631_vm6, %v6539_v43, %v6085_v12  ;;  %v16686_v43 = vld [vmem:[#allocation22_spill] sm:$0xff] }
 0x798   : > { %v6633_v59 = vsel %vm363_vm0, %v14820_v58, %v6273_v20  ;;  %v15191_v41 = vsel %vm1664_vm7, %v6571_v49, %v6181_v8  ;;  %v6719_v58 = vmul.f32 %v15184_v11, %v13905_v14  ;;  %v6546_v8 = vsel %vm1631_vm6, %v6514_v47, %v14311_v30 }
 0x799   : > { %v6665_v54 = vsel %vm1631_vm6, %v6633_v59, %v15061_v48  ;;  %v6610_v48 = vsel %vm363_vm0, %v13780_v18, %v14251_v25  ;;  %v6578_v14 = vsel %vm1664_vm7, %v6546_v8, %v16686_v43  ;;  %v6716_v20 = vmul.f32 %v15184_v11, %v13930_v45  ;;  %v16693_v8 = vld [vmem:[#allocation49_spill] sm:$0xff] }
 0x79a   : > { %v6697_v50 = vsel %vm1664_vm7, %v6665_v54, %v15096_v39  ;;  %v9619_v39 = vld [vmem:[#allocation2 + $0x8] sm:$0xff]  ;;  %v6725_v18 = vmul.f32 %v15184_v11, %v14023_v29  ;;  %v15228_v46 = vsel %vm363_vm0, %v6719_v58, 0.0  ;;  %v6642_v59 = vsel %vm1631_vm6, %v6610_v48, %v16688_v2  ;;  %v16696_v43 = vld [vmem:[#allocation9_spill] sm:$0xff] }
 0x79b   : > { %v6784_v21 = vmul.f32 %v14693_v31, %v6697_v50  ;;  %v6515_v44 = vsel %vm363_vm0, %v9619_v39, %v14189_v34  ;;  %v9620_v34 = vld [vmem:[#allocation2 + $0x20] sm:$0xff]  ;;  %v6714_v47 = vmul.f32 %v14690_v36, %v6578_v14  ;;  %v16692_v58 = vld [vmem:[#allocation36_spill] sm:$0xff] }
 0x79c   : > { %v6517_v49 = vsel %vm363_vm0, %v9620_v34, %v14155_v32  ;;  %v16689_v54 = vld [vmem:[#allocation51_spill] sm:$0xff]  ;;  %v6612_v48 = vsel %vm363_vm0, %v16693_v8, %v16692_v58  ;;  %v6811_v34 = vsel %vm363_vm0, %v6716_v20, 0.0  ;;  %v16702_v58 = vld [vmem:[#allocation26_spill] sm:$0xff]  ;;  %v16703_v8 = vld [vmem:[#allocation56_spill] sm:$0xff] }
 0x79d   : > { %v15205_v40 = vadd.f32 %v6784_v21, %v6783_v57  ;;  %v6643_v45 = vsel %vm1631_vm6, %v6611_v56, %v16689_v54  ;;  %v16690_v50 = vld [vmem:[#allocation59_spill] sm:$0xff] }
 0x79e   : > { %v15225_v15 = vpop.permute.xlu2 %6188  ;;  %v6674_v23 = vsel %vm1664_vm7, %v6642_v59, %v16690_v50  ;;  %v16691_v32 = vld [vmem:[#allocation19_spill] sm:$0xff]  ;;  %v15265_v59 = vsel %vm363_vm0, %v6725_v18, 0.0  ;;  %v9621_v50 = vld [vmem:[#allocation2 + $0x18] sm:$0xff] }
 0x79f   : > { %16685 = vst [vmem:[#allocation109_spill] sm:$0xff] %v15205_v40  ;;  %v15217_v12 = vpop.permute.xlu1 %6376  ;;  %v6271_v30 = vpop.permute.xlu0 %6270  ;;  %v6549_v21 = vsel %vm1631_vm6, %v6517_v49, %v16691_v32  ;;  %v16699_v49 = vld [vmem:[#allocation71_spill] sm:$0xff] }
 0x7a0   : > { %v6632_v25 = vsel %vm363_vm0, %v14839_v55, %v6271_v30  ;;  %16687 = vst [vmem:[#allocation22_spill] sm:$0xff] %v15225_v15  ;;  %v6547_v55 = vsel %vm1631_vm6, %v6515_v44, %v14184_v4  ;;  %v16694_v4 = vld [vmem:[#allocation8_spill] sm:$0xff]  ;;  %v16695_v44 = vld [vmem:[#allocation14_spill] sm:$0xff]  ;;  %v6722_v2 = vmul.f32 %v15184_v11, %v16699_v49  ;;  %v6581_v20 = vsel %vm1664_vm7, %v6549_v21, %v16702_v58 }
 0x7a1   : > { %v6664_v29 = vsel %vm1631_vm6, %v6632_v25, %v15015_v6  ;;  %v6780_v6 = vmul.f32 %v14690_v36, %v15137_v24  ;;  %v6675_v39 = vsel %vm1664_vm7, %v6643_v45, %v16694_v4  ;;  %v6613_v14 = vsel %vm363_vm0, %v16696_v43, %v16695_v44  ;;  %v16698_v30 = vld [vmem:[#allocation52_spill] sm:$0xff]  ;;  %v16700_v45 = vld [vmem:[#allocation61_spill] sm:$0xff]  ;;  %v16704_v44 = vld [vmem:[#allocation54_spill] sm:$0xff] }
 0x7a2   : > { %v6696_v57 = vsel %vm1664_vm7, %v6664_v29, %v6463_v10  ;;  %v16697_v10 = vld [vmem:[#allocation67_spill] sm:$0xff]  ;;  %v6715_v24 = vmul.f32 %v14693_v31, %v6674_v23  ;;  %v6579_v29 = vsel %vm1664_vm7, %v6547_v55, %v16700_v45  ;;  %v6644_v4 = vsel %vm1631_vm6, %v6612_v48, %v16703_v8  ;;  %v9622_v21 = vld [vmem:[#allocation2 + $0x30] sm:$0xff]  ;;  %v16707_v45 = vld [vmem:[#allocation30_spill] sm:$0xff] }
 0x7a3   : > { %v6781_v56 = vmul.f32 %v14693_v31, %v6696_v57  ;;  %v6614_v25 = vsel %vm363_vm0, %v16698_v30, %v16697_v10  ;;  %v16701_v57 = vld [vmem:[#allocation58_spill] sm:$0xff]  ;;  %v6718_v23 = vmul.f32 %v14693_v31, %v6675_v39  ;;  %v6645_v18 = vsel %vm1631_vm6, %v6613_v14, %v16704_v44  ;;  %v16706_v30 = vld [vmem:[#allocation32_spill] sm:$0xff]  ;;  %v16711_v8 = vld [vmem:[#allocation65_spill] sm:$0xff] }
 0x7a4   : > { %v6516_v32 = vsel %vm363_vm0, %v9621_v50, %v16701_v57  ;;  %v6810_v10 = vadd.f32 %v6715_v24, %v6714_v47  ;;  %v6677_v49 = vsel %vm1664_vm7, %v6645_v18, %v16706_v30  ;;  %v6518_v48 = vsel %vm363_vm0, %v9622_v21, %v16707_v45  ;;  %v16708_v50 = vld [vmem:[#allocation63_spill] sm:$0xff]  ;;  %v16710_v14 = vld [vmem:[#allocation70_spill] sm:$0xff] }
 0x7a5   : > { %v15267_v54 = vadd.f32 %v6781_v56, %v6780_v6  ;;  %v16705_v6 = vld [vmem:[#allocation45_spill] sm:$0xff]  ;;  %v6548_v39 = vsel %vm1631_vm6, %v6516_v32, %v16708_v50  ;;  %v16709_v57 = vld [vmem:[#allocation23_spill] sm:$0xff]  ;;  %v6676_v44 = vsel %vm1664_vm7, %v6644_v4, %v16711_v8  ;;  %v6821_v18 = vsel %vm363_vm0, %v6722_v2, 0.0  ;;  %v16714_v21 = vld [vmem:[#allocation38_spill] sm:$0xff] }
 0x7a6   : > { %v6646_v56 = vsel %vm1631_vm6, %v6614_v25, %v16705_v6  ;;  %v6615_v58 = vsel %vm363_vm0, %v16710_v14, %v16709_v57  ;;  %v6723_v25 = vmul.f32 %v14690_v36, %v6581_v20  ;;  %v16712_v47 = vld [vmem:[#allocation7_spill] sm:$0xff]  ;;  %v16713_v6 = vld [vmem:[#allocation10_spill] sm:$0xff]  ;;  %v6728_v32 = vmul.f32 %v15184_v11, %v16714_v21  ;;  %v16715_v50 = vld [vmem:[#allocation25_spill] sm:$0xff]  ;;  %v6275_v20 = vpop.permute.xlu2 %6274 }
 0x7a7   : > { %v15282_v43 = vpop.permute.xlu1 %6468  ;;  %v15284_v55 = vpop.permute.xlu0 %6374  ;;  %v6550_v24 = vsel %vm1631_vm6, %v6518_v48, %v16712_v47  ;;  %v6731_v30 = vmul.f32 %v15184_v11, %v16713_v6  ;;  %v6717_v45 = vmul.f32 %v14690_v36, %v6579_v29  ;;  %v6678_v57 = vsel %vm1664_vm7, %v6646_v56, %v16715_v50  ;;  %v16716_v4 = vld [vmem:[#allocation12_spill] sm:$0xff]  ;;  %v16717_v48 = vld [vmem:[#allocation33_spill] sm:$0xff]  ;;  %v16718_v6 = vld [vmem:[#allocation62_spill] sm:$0xff] }
 0x7a8   : > { %v6724_v14 = vmul.f32 %v14693_v31, %v6677_v49  ;;  %v6580_v8 = vsel %vm1664_vm7, %v6548_v39, %v16716_v4  ;;  %v6647_v2 = vsel %vm1631_vm6, %v6615_v58, %v16717_v48  ;;  %v6812_v47 = vadd.f32 %v6811_v34, %v6810_v10  ;;  %v16719_v29 = vld [vmem:[#allocation34_spill] sm:$0xff]  ;;  %v9624_v50 = vld [vmem:[#allocation2 + $0x48] sm:$0xff] }
 0x7a9   : > { %v6519_v3 = vsel %vm363_vm0, %v9623_v28, %v16718_v6  ;;  %v6721_v21 = vmul.f32 %v14693_v31, %v6676_v44  ;;  %v6582_v1 = vsel %vm1664_vm7, %v6550_v24, %v16719_v29  ;;  %v6815_v56 = vadd.f32 %v6718_v23, %v6717_v45  ;;  %v16720_v15 = vld [vmem:[#allocation42_spill] sm:$0xff]  ;;  %v9625_v28 = vld [vmem:[#allocation2 + $0x50] sm:$0xff]  ;;  %v16728_v29 = vld [vmem:[#allocation11_spill] sm:$0xff] }
 0x7aa   : > { %v6520_v49 = vsel %vm363_vm0, %v9624_v50, %v16720_v15  ;;  %v6551_v39 = vsel %vm1631_vm6, %v6519_v3, %v16721_v63  ;;  %v6727_v58 = vmul.f32 %v14693_v31, %v6678_v57  ;;  %v6825_v34 = vadd.f32 %v6724_v14, %v6723_v25  ;;  %v16722_v4 = vld [vmem:[#allocation24_spill] sm:$0xff]  ;;  %v16724_v24 = vld [vmem:[#allocation74_spill] sm:$0xff]  ;;  %v16726_v63 = vld [vmem:[#allocation27_spill] sm:$0xff] }
 0x7ab   : > { %v6720_v10 = vmul.f32 %v14690_v36, %v6580_v8  ;;  %v6521_v44 = vsel %vm363_vm0, %v9625_v28, %v16722_v4  ;;  %v16723_v48 = vld [vmem:[#allocation20_spill] sm:$0xff]  ;;  %v6552_v45 = vsel %vm1631_vm6, %v6520_v49, %v16724_v24  ;;  %v6726_v15 = vmul.f32 %v14690_v36, %v6582_v1  ;;  %v16725_v6 = vld [vmem:[#allocation66_spill] sm:$0xff]  ;;  %v16727_v57 = vld [vmem:[#allocation37_spill] sm:$0xff] }
 0x7ac   : > { %v6679_v23 = vsel %vm1664_vm7, %v6647_v2, %v16723_v48  ;;  %v6553_v3 = vsel %vm1631_vm6, %v6521_v44, %v16725_v6  ;;  %v6616_v25 = vsel %vm363_vm0, %v16727_v57, %v16726_v63  ;;  %v6583_v2 = vsel %vm1664_vm7, %v6551_v39, %v16728_v29  ;;  %v16729_v50 = vld [vmem:[#allocation75_spill] sm:$0xff]  ;;  %v16730_v28 = vld [vmem:[#allocation53_spill] sm:$0xff]  ;;  %v16731_v44 = vld [vmem:[#allocation64_spill] sm:$0xff] }
 0x7ad   : > { %6813 = vadd.xlane.f32.xlu2 %v6812_v47  ;;  %v6831_v47 = vsel %vm363_vm0, %v6728_v32, 0.0  ;;  %v6617_v49 = vsel %vm363_vm0, %v16730_v28, %v16729_v50  ;;  %v6820_v1 = vadd.f32 %v6721_v21, %v6720_v10  ;;  %v6836_v4 = vsel %vm363_vm0, %v6731_v30, 0.0  ;;  %v16732_v6 = vld [vmem:[#allocation17_spill] sm:$0xff]  ;;  %v16733_v32 = vld [vmem:[#allocation35_spill] sm:$0xff]  ;;  %v16734_v39 = vld [vmem:[#allocation72_spill] sm:$0xff] }
 0x7ae   : > { %v6734_v48 = vmul.f32 %v15184_v11, %v16731_v44  ;;  %v6730_v24 = vmul.f32 %v14693_v31, %v6679_v23  ;;  %v6584_v63 = vsel %vm1664_vm7, %v6552_v45, %v16732_v6  ;;  %v6830_v57 = vadd.f32 %v6727_v58, %v6726_v15  ;;  %v16735_v10 = vld [vmem:[#allocation28_spill] sm:$0xff]  ;;  %v16736_v23 = vld [vmem:[#allocation31_spill] sm:$0xff]  ;;  %v16737_v15 = vld [vmem:[#allocation13_spill] sm:$0xff] }
 0x7af   : > { %v15336_v14 = vpop.permute.xlu1 %5990  ;;  %v6467_v8 = vpop.permute.xlu0 %6466  ;;  %v6585_v40 = vsel %vm1664_vm7, %v6553_v3, %v16733_v32  ;;  %v6648_v29 = vsel %vm1631_vm6, %v6616_v25, %v16734_v39  ;;  %v6827_v50 = vadd.f32 %v15265_v59, %v6825_v34  ;;  %v6817_v21 = vadd.f32 %v15228_v46, %v6815_v56  ;;  %v9626_v45 = vld [vmem:[#allocation2 + $0x68] sm:$0xff]  ;;  %v16738_v59 = vld [vmem:[#allocation82_spill] sm:$0xff]  ;;  %v16739_v34 = vld [vmem:[#allocation57_spill] sm:$0xff] }
 0x7b0   : > { %v6729_v30 = vmul.f32 %v14690_v36, %v6583_v2  ;;  %v6680_v28 = vsel %vm1664_vm7, %v6648_v29, %v16735_v10  ;;  %v6649_v44 = vsel %vm1631_vm6, %v6617_v49, %v16736_v23  ;;  %v6634_v58 = vsel %vm363_vm0, %v14918_v61, %v6275_v20  ;;  %v15369_v56 = vpop.permute.xlu2 %6378  ;;  %v9627_v32 = vld [vmem:[#allocation2 + $0x60] sm:$0xff]  ;;  %v16740_v49 = vld [vmem:[#allocation48_spill] sm:$0xff]  ;;  %v16741_v10 = vld [vmem:[#allocation5_spill] sm:$0xff] }
 0x7b1   : > { %v6523_v3 = vsel %vm363_vm0, %v9626_v45, %v16737_v15  ;;  %v6732_v25 = vmul.f32 %v14690_v36, %v6584_v63  ;;  %v6618_v46 = vsel %vm363_vm0, %v16739_v34, %v16738_v59  ;;  %v6822_v2 = vadd.f32 %v6821_v18, %v6820_v1  ;;  %v16742_v23 = vld [vmem:[#allocation79_spill] sm:$0xff]  ;;  %v16746_v59 = vld [vmem:[#allocation46_spill] sm:$0xff]  ;;  %v16748_v34 = vld [vmem:[#allocation60_spill] sm:$0xff] }
 0x7b2   : > { %v6735_v6 = vmul.f32 %v14690_v36, %v6585_v40  ;;  %v6522_v39 = vsel %vm363_vm0, %v9627_v32, %v16740_v49  ;;  %v6832_v61 = vadd.f32 %v6831_v47, %v6830_v57  ;;  %v6835_v20 = vadd.f32 %v6730_v24, %v6729_v30  ;;  %v16743_v1 = vld [vmem:[#allocation39_spill] sm:$0xff] }
 0x7b3   : > { %v6733_v29 = vmul.f32 %v14693_v31, %v6680_v28  ;;  %v6681_v63 = vsel %vm1664_vm7, %v6649_v44, %v16741_v10  ;;  %v6555_v45 = vsel %vm1631_vm6, %v6523_v3, %v16742_v23  ;;  %v6666_v18 = vsel %vm1631_vm6, %v6634_v58, %v15160_v13  ;;  %v16744_v28 = vld [vmem:[#allocation76_spill] sm:$0xff]  ;;  %v16745_v44 = vld [vmem:[#allocation55_spill] sm:$0xff]  ;;  %v16751_v23 = vld [vmem:[#allocation18_spill] sm:$0xff] }
 0x7b4   : > { %v6650_v40 = vsel %vm1631_vm6, %v6618_v46, %v16743_v1  ;;  %v6698_v47 = vsel %vm1664_vm7, %v6666_v18, %v6467_v8  ;;  %v6841_v30 = vsel %vm363_vm0, %v6734_v48, 0.0  ;;  %v6619_v15 = vsel %vm363_vm0, %v16745_v44, %v16744_v28  ;;  %v16749_v49 = vld [vmem:[#allocation47_spill] sm:$0xff] }
 0x7b5   : > { %6828 = vadd.xlane.f32.xlu2 %v6827_v50  ;;  %v6538_v50 = vsel %vm363_vm0, %v14800_v19, %v15117_v52  ;;  %v6840_v3 = vadd.f32 %v6733_v29, %v6732_v25  ;;  %v6587_v19 = vsel %vm1664_vm7, %v6555_v45, %v16746_v59  ;;  %v16747_v52 = vld [vmem:[#allocation81_spill] sm:$0xff]  ;;  %v6682_v46 = vsel %vm1664_vm7, %v6650_v40, %v16748_v34  ;;  %v16755_v34 = vld [vmem:[#allocation40_spill] sm:$0xff] }
 0x7b6   : > { %v6554_v8 = vsel %vm1631_vm6, %v6522_v39, %v16747_v52  ;;  %v6736_v32 = vmul.f32 %v14693_v31, %v6681_v63  ;;  %v6651_v39 = vsel %vm1631_vm6, %v6619_v15, %v16749_v49  ;;  %v16750_v29 = vld [vmem:[#allocation77_spill] sm:$0xff]  ;;  %v6837_v18 = vadd.f32 %v6836_v4, %v6835_v20 }
 0x7b7   : > { %6823 = vadd.xlane.f32.xlu1 %v6822_v2  ;;  %v6083_v24 = vpop.permute.xlu1 %6082  ;;  %6818 = vadd.xlane.f32.xlu0 %v6817_v21  ;;  %v6277_v57 = vpop.permute.xlu0 %6276  ;;  %v6787_v2 = vmul.f32 %v14693_v31, %v6698_v47  ;;  %v6683_v10 = vsel %vm1664_vm7, %v6651_v39, %v16750_v29  ;;  %v6586_v45 = vsel %vm1664_vm7, %v6554_v8, %v16751_v23  ;;  %v16754_v15 = vld [vmem:[#allocation21_spill] sm:$0xff] }
 0x7b8   : > { %v6570_v13 = vsel %vm1631_vm6, %v6538_v50, %v6083_v24  ;;  %v6635_v58 = vsel %vm363_vm0, %v14903_v33, %v6277_v57  ;;  %v6739_v63 = vmul.f32 %v14693_v31, %v6682_v46  ;;  %v6842_v40 = vadd.f32 %v6841_v30, %v6840_v3  ;;  %v15426_v24 = vpop.permute.xlu2 %6470 }
 0x7b9   : > { %v6602_v21 = vsel %vm1664_vm7, %v6570_v13, %v15129_v7  ;;  %v6667_v48 = vsel %vm1631_vm6, %v6635_v58, %v15077_v38  ;;  %v6789_v7 = vmul.f32 %v14690_v36, %v15191_v41  ;;  %v16752_v41 = vld [vmem:[#allocation44_spill] sm:$0xff]  ;;  %v6742_v57 = vmul.f32 %v14693_v31, %v6683_v10 }
 0x7ba   : > { %v6786_v33 = vmul.f32 %v14690_v36, %v6602_v21  ;;  %v6699_v25 = vsel %vm1664_vm7, %v6667_v48, %v15282_v43  ;;  %v6741_v43 = vmul.f32 %v14690_v36, %v6587_v19  ;;  %v6737_v47 = vmul.f32 %v15184_v11, %v16752_v41 }
 0x7bb   : > { %v6790_v38 = vmul.f32 %v14693_v31, %v6699_v25  ;;  %v6738_v28 = vmul.f32 %v14690_v36, %v6586_v45  ;;  %v6845_v44 = vadd.f32 %v6736_v32, %v6735_v6  ;;  %v6740_v13 = vmul.f32 %v15184_v11, %v16754_v15  ;;  %v16757_v32 = vld [vmem:[#allocation15_spill] sm:$0xff]  ;;  %v16758_v45 = vld [vmem:[#allocation85_spill] sm:$0xff] }
 0x7bc   : > { %v15418_v1 = vadd.f32 %v6787_v2, %v6786_v33  ;;  %v6855_v3 = vadd.f32 %v6742_v57, %v6741_v43  ;;  %v6846_v59 = vsel %vm363_vm0, %v6737_v47, 0.0  ;;  %v6746_v6 = vmul.f32 %v15184_v11, %v16755_v34  ;;  %v16756_v33 = vld [vmem:[#allocation73_spill] sm:$0xff]  ;;  %v16765_v34 = vld [vmem:[#allocation84_spill] sm:$0xff] }
 0x7bd   : > { %6833 = vadd.xlane.f32.xlu2 %v6832_v61  ;;  %v15422_v50 = vadd.f32 %v6790_v38, %v6789_v7  ;;  %v16753_v61 = vld [vmem:[#allocation69_spill] sm:$0xff]  ;;  %v6850_v58 = vadd.f32 %v6739_v63, %v6738_v28  ;;  %v6847_v19 = vadd.f32 %v6846_v59, %v6845_v44  ;;  %v6851_v52 = vsel %vm363_vm0, %v6740_v13, 0.0  ;;  %v16759_v63 = vld [vmem:[#allocation6_spill] sm:$0xff]  ;;  %v16761_v44 = vld [vmem:[#allocation80_spill] sm:$0xff] }
 0x7be   : > { %v6743_v30 = vmul.f32 %v15184_v11, %v16753_v61  ;;  %v6749_v25 = vmul.f32 %v15184_v11, %v16756_v33  ;;  %v6752_v49 = vmul.f32 %v15184_v11, %v16757_v32  ;;  %v6861_v7 = vsel %vm363_vm0, %v6746_v6, 0.0  ;;  %v16760_v28 = vld [vmem:[#allocation78_spill] sm:$0xff] }
 0x7bf   : > { %v15430_v4 = vpop.permute.xlu1 %6186  ;;  %6838 = vadd.xlane.f32.xlu0 %v6837_v18  ;;  %v15432_v20 = vpop.permute.xlu0 %6380  ;;  %6843 = vadd.xlane.f32.xlu1 %v6842_v40  ;;  %v6852_v21 = vadd.f32 %v6851_v52, %v6850_v58  ;;  %v6862_v29 = vadd.f32 %v6861_v7, %v14738_v0  ;;  %v6755_v40 = vmul.f32 %v15184_v11, %v16759_v63  ;;  %v16762_v58 = vld [vmem:[#allocation88_spill] sm:$0xff] }
 0x7c0   : > { %v6856_v8 = vsel %vm363_vm0, %v6743_v30, 0.0  ;;  %v6281_v39 = vpop.permute.xlu2 %6280  ;;  %v6866_v10 = vsel %vm363_vm0, %v6749_v25, 0.0  ;;  %v6871_v23 = vsel %vm363_vm0, %v6752_v49, 0.0  ;;  %v6758_v61 = vmul.f32 %v15184_v11, %v16761_v44  ;;  %v16766_v25 = vld [vmem:[#allocation83_spill] sm:$0xff] }
 0x7c1   : > { %v6857_v48 = vadd.f32 %v6856_v8, %v6855_v3  ;;  %v6637_v38 = vsel %vm363_vm0, %v14986_v62, %v6281_v39  ;;  %v6867_v18 = vadd.f32 %v6866_v10, %v16758_v45  ;;  %v6872_v43 = vadd.f32 %v6871_v23, %v14804_v35  ;;  %v16763_v8 = vld [vmem:[#allocation93_spill] sm:$0xff]  ;;  %v16767_v49 = vld [vmem:[#allocation87_spill] sm:$0xff] }
 0x7c2   : > { %v6669_v41 = vsel %vm1631_vm6, %v6637_v38, %v15217_v12  ;;  %v6541_v62 = vsel %vm363_vm0, %v14861_v53, %v15172_v26  ;;  %v6761_v35 = vmul.f32 %v15184_v11, %v16760_v28  ;;  %v6876_v13 = vsel %vm363_vm0, %v6755_v40, 0.0 }
 0x7c3   : > { %v6877_v3 = vadd.f32 %v6876_v13, %v16762_v58  ;;  %v6881_v59 = vsel %vm363_vm0, %v6758_v61, 0.0  ;;  %v6764_v6 = vmul.f32 %v15184_v11, %v16765_v34  ;;  %v6767_v32 = vmul.f32 %v15184_v11, %v16766_v25  ;;  %v16775_v25 = vld [vmem:[#allocation97_spill] sm:$0xff] }
 0x7c4   : > { %v6770_v39 = vmul.f32 %v15184_v11, %v16767_v49 }
 0x7c5   : > { %6848 = vadd.xlane.f32.xlu2 %v6847_v19  ;;  %v6886_v19 = vsel %vm363_vm0, %v6761_v35, 0.0  ;;  %v6891_v7 = vsel %vm363_vm0, %v6764_v6, 0.0  ;;  %v6896_v10 = vsel %vm363_vm0, %v6767_v32, 0.0 }
 0x7c6   : > { %v6892_v38 = vadd.f32 %v6891_v7, %v14994_v51  ;;  %v6901_v23 = vsel %vm363_vm0, %v6770_v39, 0.0  ;;  %v6897_v45 = vadd.f32 %v6896_v10, %v14971_v37  ;;  %v16769_v51 = vld [vmem:[#allocation89_spill] sm:$0xff]  ;;  %v16777_v7 = vld [vmem:[#allocation104_spill] sm:$0xff] }
 0x7c7   : > { %v15443_v46 = vpop.permute.xlu1 %5996  ;;  %v6473_v2 = vpop.permute.xlu0 %6472  ;;  %6853 = vadd.xlane.f32.xlu0 %v6852_v21  ;;  %6858 = vadd.xlane.f32.xlu1 %v6857_v48  ;;  %v6882_v21 = vadd.f32 %v6881_v59, %v16763_v8 }
 0x7c8   : > { %v6701_v0 = vsel %vm1664_vm7, %v6669_v41, %v6473_v2  ;;  %v15475_v26 = vpop.permute.xlu2 %6384 }
 0x7c9   : > { %v6796_v53 = vmul.f32 %v14693_v31, %v6701_v0  ;;  %v16770_v0 = vld [vmem:[#allocation90_spill] sm:$0xff] }
 0x7cd   : > { %6863 = vadd.xlane.f32.xlu2 %v6862_v29 }
 0x7cf   : > { %v6089_v47 = vpop.permute.xlu1 %6088  ;;  %v15465_v57 = vpop.permute.xlu0 %5994  ;;  %6868 = vadd.xlane.f32.xlu0 %v6867_v18  ;;  %6873 = vadd.xlane.f32.xlu1 %v6872_v43  ;;  %v6902_v18 = vadd.f32 %v6901_v23, %v15053_v60  ;;  %v16768_v43 = vld [vmem:[#allocation86_spill] sm:$0xff] }
 0x7d0   : > { %v6573_v30 = vsel %vm1631_vm6, %v6541_v62, %v6089_v47  ;;  %v15496_v29 = vpop.permute.xlu2 %6476  ;;  %v6773_v63 = vmul.f32 %v15184_v11, %v16768_v43  ;;  %v6779_v62 = vmul.f32 %v15184_v11, %v16769_v51  ;;  %v6776_v47 = vmul.f32 %v15184_v11, %v16770_v0 }
 0x7d1   : > { %v6605_v12 = vsel %vm1664_vm7, %v6573_v30, %v15180_v16  ;;  %v16764_v16 = vld [vmem:[#allocation91_spill] sm:$0xff] }
 0x7d2   : > { %v6795_v15 = vmul.f32 %v14690_v36, %v6605_v12  ;;  %v6887_v48 = vadd.f32 %v6886_v19, %v16764_v16  ;;  %v6906_v28 = vsel %vm363_vm0, %v6773_v63, 0.0  ;;  %v6911_v35 = vsel %vm363_vm0, %v6776_v47, 0.0  ;;  %v16779_v63 = vld [vmem:[#allocation95_spill] sm:$0xff] }
 0x7d3   : > { %v6907_v37 = vadd.f32 %v6906_v28, %v15059_v42  ;;  %v6916_v44 = vsel %vm363_vm0, %v6779_v62, 0.0  ;;  %v6912_v61 = vadd.f32 %v6911_v35, %v15156_v22  ;;  %v6782_v12 = vmul.f32 %v15184_v11, %v14939_v27  ;;  %v9629_v35 = vld [vmem:[#allocation2 + $0x198] sm:$0xff] }
 0x7d4   : > { %v15482_v52 = vadd.f32 %v6796_v53, %v6795_v15  ;;  %v6917_v30 = vadd.f32 %v6916_v44, %v15112_v17  ;;  %v16773_v17 = vld [vmem:[#allocation92_spill] sm:$0xff] }
 0x7d5   : > { %6878 = vadd.xlane.f32.xlu2 %v6877_v3  ;;  %v16772_v3 = vld [vmem:[#allocation98_spill] sm:$0xff]  ;;  %v6540_v59 = vsel %vm363_vm0, %v16773_v17, %v15336_v14  ;;  %v6921_v19 = vsel %vm363_vm0, %v6782_v12, 0.0  ;;  %v16774_v14 = vld [vmem:[#allocation109_spill] sm:$0xff]  ;;  %v9630_v44 = vld [vmem:[#allocation2 + $0x1a8] sm:$0x3] }
 0x7d6   : > { %v6788_v22 = vmul.f32 %v15184_v11, %v16772_v3  ;;  %v6922_v8 = vadd.f32 %v6921_v19, %v15267_v54  ;;  %v16783_v17 = vld [vmem:[#allocation101_spill] sm:$0xff]  ;;  %v16785_v19 = vld [vmem:[#allocation107_spill] sm:$0xff] }
 0x7d7   : > { %v15488_v2 = vpop.permute.xlu1 %6192  ;;  %v6087_v33 = vpop.permute.xlu0 %6086  ;;  %6883 = vadd.xlane.f32.xlu0 %v6882_v21  ;;  %6888 = vadd.xlane.f32.xlu1 %v6887_v48 }
 0x7d8   : > { %v5999_v53 = vpop.permute.xlu2 %5998  ;;  %v6572_v27 = vsel %vm1631_vm6, %v6540_v59, %v6087_v33  ;;  %v6931_v48 = vsel %vm363_vm0, %v6788_v22, 0.0 }
 0x7d9   : > { %v6604_v21 = vsel %vm1664_vm7, %v6572_v27, %v15158_v5  ;;  %v6932_v33 = vadd.f32 %v6931_v48, %v15418_v1  ;;  %v16776_v5 = vld [vmem:[#allocation102_spill] sm:$0xff]  ;;  %v16778_v1 = vld [vmem:[#allocation96_spill] sm:$0xff]  ;;  %v16784_v27 = vld [vmem:[#allocation103_spill] sm:$0xff] }
 0x7da   : > { %v6792_v32 = vmul.f32 %v14690_v36, %v6604_v21  ;;  %v6797_v39 = vmul.f32 %v15184_v11, %v16776_v5  ;;  %v16790_v5 = vld [vmem:[#allocation50_spill] sm:$0xff] }
 0x7dc   : > { %v6946_v0 = vsel %vm363_vm0, %v6797_v39, 0.0  ;;  %v16791_v39 = vld [vmem:[#allocation16_spill] sm:$0xff] }
 0x7dd   : > { %6893 = vadd.xlane.f32.xlu2 %v6892_v38  ;;  %v6794_v38 = vmul.f32 %v15184_v11, %v16777_v7 }
 0x7df   : > { %v6279_v40 = vpop.permute.xlu1 %6278  ;;  %v15504_v41 = vpop.permute.xlu0 %6190  ;;  %6898 = vadd.xlane.f32.xlu0 %v6897_v45  ;;  %6903 = vadd.xlane.f32.xlu1 %v6902_v18  ;;  %v6542_v18 = vsel %vm363_vm0, %v16778_v1, %v15465_v57  ;;  %v6941_v62 = vsel %vm363_vm0, %v6794_v38, 0.0 }
 0x7e0   : > { %v6636_v60 = vsel %vm363_vm0, %v15004_v9, %v6279_v40  ;;  %v16771_v9 = vld [vmem:[#allocation94_spill] sm:$0xff]  ;;  %v6091_v10 = vpop.permute.xlu2 %6090  ;;  %v6543_v40 = vsel %vm363_vm0, %v16779_v63, %v15443_v46 }
 0x7e1   : > { %v6668_v15 = vsel %vm1631_vm6, %v6636_v60, %v15284_v55  ;;  %v6785_v58 = vmul.f32 %v15184_v11, %v16771_v9  ;;  %v6574_v51 = vsel %vm1631_vm6, %v6542_v18, %v6091_v10  ;;  %v9628_v60 = vld [vmem:[#allocation2 + $0x1a0] sm:$0xff] }
 0x7e2   : > { %v6700_v55 = vsel %vm1664_vm7, %v6668_v15, %v15426_v24  ;;  %v6791_v24 = vmul.f32 %v15184_v11, %v16775_v25  ;;  %v5902_v57 = vrot.slane %v9628_v60, 2  ;;  %v6606_v12 = vsel %vm1664_vm7, %v6574_v51, %v15430_v4  ;;  %v16786_v4 = vld [vmem:[#allocation100_spill] sm:$0xff] }
 0x7e3   : > { %v6926_v16 = vsel %vm363_vm0, %v6785_v58, 0.0  ;;  %v6793_v34 = vmul.f32 %v14693_v31, %v6700_v55  ;;  %v16781_v58 = vld [vmem:[#allocation99_spill] sm:$0xff]  ;;  %v6544_v21 = vsel %vm363_vm0, %v16786_v4, %v5999_v53  ;;  %v6798_v48 = vmul.f32 %v14690_v36, %v6606_v12  ;;  %v15622_v12 = vld [vmem:[#allocation4] ss:$0 sm:$0xff] }
 0x7e4   : > { %v6927_v6 = vadd.f32 %v6926_v16, %v16774_v14  ;;  %v6936_v45 = vsel %vm363_vm0, %v6791_v24, 0.0 }
 0x7e5   : > { %6908 = vadd.xlane.f32.xlu2 %v6907_v37  ;;  %v6940_v23 = vadd.f32 %v6793_v34, %v6792_v32  ;;  %v6937_v43 = vadd.f32 %v6936_v45, %v15422_v50  ;;  %v6947_v37 = vadd.f32 %v6946_v0, %v15482_v52  ;;  %v5901_v50 = vrot.slane %v9629_v35, 2  ;;  %v16782_v52 = vld [vmem:[#allocation22_spill] sm:$0xff]  ;;  %v16788_v32 = vld [vmem:[#allocation68_spill] sm:$0xff] }
 0x7e7   : > { %v15522_v42 = vpop.permute.xlu1 %6382  ;;  %v6001_v13 = vpop.permute.xlu0 %6000  ;;  %6913 = vadd.xlane.f32.xlu0 %v6912_v61  ;;  %6918 = vadd.xlane.f32.xlu1 %v6917_v30  ;;  %v6942_v28 = vadd.f32 %v6941_v62, %v6940_v23  ;;  %v5904_v61 = vrot.slane %v9630_v44, 2  ;;  %v16780_v30 = vld [vmem:[#allocation108_spill] sm:$0xff] }
 0x7e8   : > { %v6800_v46 = vmul.f32 %v15184_v11, %v16780_v30  ;;  %v6545_v3 = vsel %vm363_vm0, %v16781_v58, %v6001_v13 }
 0x7e9   : > { %v5905_v45 = vsel %vm932_vm4, %v5902_v57, %v5904_v61 }
 0x7ea   : > { %v6809_v60 = vmul.f32 %v15184_v11, %v5905_v45 }
 0x7ec   : > { %v6966_v61 = vsel %vm363_vm0, %v6809_v60, 0.0 }
 0x7ed   : > { %6923 = vadd.xlane.f32.xlu2 %v6922_v8  ;;  %v6803_v8 = vmul.f32 %v15184_v11, %v16785_v19 }
 0x7ef   : > { %v6475_v54 = vpop.permute.xlu1 %6474  ;;  %v6093_v49 = vpop.permute.xlu0 %6092  ;;  %6928 = vadd.xlane.f32.xlu0 %v6927_v6  ;;  %6933 = vadd.xlane.f32.xlu1 %v6932_v33  ;;  %v5903_v6 = vsel %vm932_vm4, %v5901_v50, %v5902_v57  ;;  %v16787_v33 = vld [vmem:[#allocation43_spill] sm:$0xff]  ;;  %v6956_v18 = vsel %vm363_vm0, %v6803_v8, 0.0 }
 0x7f0   : > { %v6575_v47 = vsel %vm1631_vm6, %v6543_v40, %v6093_v49  ;;  %v6577_v25 = vsel %vm1631_vm6, %v6545_v3, %v16787_v33  ;;  %v6806_v63 = vmul.f32 %v15184_v11, %v5903_v6 }
 0x7f1   : > { %v6607_v22 = vsel %vm1664_vm7, %v6575_v47, %v16782_v52  ;;  %v6609_v1 = vsel %vm1664_vm7, %v6577_v25, %v15488_v2 }
 0x7f2   : > { %v6801_v53 = vmul.f32 %v14690_v36, %v6607_v22  ;;  %v6807_v57 = vmul.f32 %v14690_v36, %v6609_v1 }
 0x7f5   : > { %6938 = vadd.xlane.f32.xlu2 %v6937_v43  ;;  %v6951_v43 = vsel %vm363_vm0, %v6800_v46, 0.0 }
 0x7f7   : > { %v6285_v15 = vpop.permute.xlu1 %6284  ;;  %v6283_v9 = vpop.permute.xlu0 %6282  ;;  %6943 = vadd.xlane.f32.xlu0 %v6942_v28  ;;  %6948 = vadd.xlane.f32.xlu1 %v6947_v37 }
 0x7f8   : > { %v6639_v59 = vsel %vm363_vm0, %v16783_v17, %v6285_v15  ;;  %v6638_v55 = vsel %vm363_vm0, %v16784_v27, %v6283_v9 }
 0x7f9   : > { %v6671_v16 = vsel %vm1631_vm6, %v6639_v59, %v15432_v20  ;;  %v6670_v13 = vsel %vm1631_vm6, %v6638_v55, %v15369_v56  ;;  %v16789_v56 = vld [vmem:[#allocation105_spill] sm:$0xff] }
 0x7fa   : > { %v6703_v34 = vsel %vm1664_vm7, %v6671_v16, %v15496_v29  ;;  %v6702_v14 = vsel %vm1664_vm7, %v6670_v13, %v6475_v54  ;;  %v6641_v49 = vsel %vm363_vm0, %v16789_v56, %v16788_v32  ;;  %v6576_v29 = vsel %vm1631_vm6, %v6544_v21, %v16790_v5  ;;  %v16792_v54 = vld [vmem:[#allocation106_spill] sm:$0xff] }
 0x7fb   : > { %v6802_v24 = vmul.f32 %v14693_v31, %v6703_v34  ;;  %v6799_v20 = vmul.f32 %v14693_v31, %v6702_v14  ;;  %v6640_v7 = vsel %vm363_vm0, %v16792_v54, %v16791_v39  ;;  %v6608_v38 = vsel %vm1664_vm7, %v6576_v29, %v15504_v41 }
 0x7fc   : > { %v6673_v40 = vsel %vm1631_vm6, %v6641_v49, %v15475_v26  ;;  %v6672_v51 = vsel %vm1631_vm6, %v6640_v7, %v15522_v42  ;;  %v6804_v28 = vmul.f32 %v14690_v36, %v6608_v38  ;;  %v6961_v42 = vsel %vm363_vm0, %v6806_v63, 0.0 }
 0x7fd   : > { %v6955_v10 = vadd.f32 %v6802_v24, %v6801_v53  ;;  %v6950_v23 = vadd.f32 %v6799_v20, %v6798_v48 }
 0x7ff   : > { %v6481_v41 = vpop.permute.xlu1 %6480  ;;  %v6479_v62 = vpop.permute.xlu0 %6478  ;;  %v6957_v0 = vadd.f32 %v6956_v18, %v6955_v10  ;;  %v6952_v47 = vadd.f32 %v6951_v43, %v6950_v23 }
 0x800   : > { %v6705_v2 = vsel %vm1664_vm7, %v6673_v40, %v6481_v41  ;;  %v6704_v37 = vsel %vm1664_vm7, %v6672_v51, %v6479_v62 }
 0x801   : > { %v6808_v35 = vmul.f32 %v14693_v31, %v6705_v2  ;;  %v6805_v26 = vmul.f32 %v14693_v31, %v6704_v37  ;;  %6958 = vadd.xlane.f32.xlu0 %v6957_v0  ;;  %6953 = vadd.xlane.f32.xlu2 %v6952_v47 }
 0x803   : > { %v6965_v50 = vadd.f32 %v6808_v35, %v6807_v57  ;;  %v6960_v44 = vadd.f32 %v6805_v26, %v6804_v28 }
 0x805   : > { %v6962_v30 = vadd.f32 %v6961_v42, %v6960_v44  ;;  %v6967_v46 = vadd.f32 %v6966_v61, %v6965_v50 }
 0x807   : > { %6963 = vadd.xlane.f32.xlu1 %v6962_v30 }
 0x809   : > { %6968 = vadd.xlane.f32.xlu2 %v6967_v46 }
 0x820   : > { %v6814_v11 = vpop.xlane.xlu2 %6813 }
 0x821   : > { %v6974_v36 = vadd.f32 %v15622_v12, %v6814_v11 }
 0x823   : > { %v7006_v15 = vmul.f32 0.2, %v6974_v36 }
 0x825   : > { %v7038_v9 = vmax.f32 %v6974_v36, %v7006_v15 }
 0x827   : > { %v7070_v31 = vsub.f32 0.0, %v7038_v9 }
 0x828   : > { %v6829_v58 = vpop.xlane.xlu2 %6828 }
 0x829   : > { %v7102_v3 = vmul.f32 1.442695, %v7070_v31  ;;  %v6977_v52 = vadd.f32 %v15622_v12, %v6829_v58 }
 0x82a   : > { %v6824_v22 = vpop.xlane.xlu1 %6823  ;;  %v6819_v17 = vpop.xlane.xlu0 %6818 }
 0x82b   : > { %9385 = vpow2.f32 %v7102_v3  ;;  %v7009_v59 = vmul.f32 0.2, %v6977_v52  ;;  %v6976_v27 = vadd.f32 %v15622_v12, %v6824_v22  ;;  %v6975_v55 = vadd.f32 %v15622_v12, %v6819_v17 }
 0x82d   : > { %v7041_v19 = vmax.f32 %v6977_v52, %v7009_v59  ;;  %v7008_v8 = vmul.f32 0.2, %v6976_v27  ;;  %v7007_v4 = vmul.f32 0.2, %v6975_v55 }
 0x82f   : > { %v7073_v21 = vsub.f32 0.0, %v7041_v19  ;;  %v7040_v16 = vmax.f32 %v6976_v27, %v7008_v8  ;;  %v7039_v13 = vmax.f32 %v6975_v55, %v7007_v4 }
 0x830   : > { %v6834_v48 = vpop.xlane.xlu2 %6833 }
 0x831   : > { %v9386_v34 = vpop.eup %9385  ;;  %v7108_v14 = vmul.f32 1.442695, %v7073_v21  ;;  %v7072_v6 = vsub.f32 0.0, %v7040_v16  ;;  %v7071_v33 = vsub.f32 0.0, %v7039_v13  ;;  %v6978_v25 = vadd.f32 %v15622_v12, %v6834_v48 }
 0x832   : > { %v7166_v53 = vadd.f32 1.0, %v9386_v34  ;;  %v6839_v24 = vpop.xlane.xlu0 %6838  ;;  %v6844_v20 = vpop.xlane.xlu1 %6843 }
 0x833   : > { %9387 = vpow2.f32 %v7108_v14  ;;  %v7106_v32 = vmul.f32 1.442695, %v7072_v6  ;;  %v7104_v56 = vmul.f32 1.442695, %v7071_v33  ;;  %v7010_v49 = vmul.f32 0.2, %v6978_v25 }
 0x834   : > { %9389 = vrcp.f32 %v7166_v53  ;;  %v6979_v29 = vadd.f32 %v15622_v12, %v6839_v24  ;;  %v6980_v39 = vadd.f32 %v15622_v12, %v6844_v20  ;;  %v7207_v0 = vand.u32 2147483647, %v7166_v53 }
 0x835   : > { %9391 = vpow2.f32 %v7106_v32  ;;  %v7042_v5 = vmax.f32 %v6978_v25, %v7010_v49  ;;  %v7209_v47 = vand.u32 2147483648, %v7166_v53  ;;  %vm7203_vm9 = vweird.f32 %v7166_v53 }
 0x836   : > { %9393 = vpow2.f32 %v7104_v56  ;;  %v7011_v7 = vmul.f32 0.2, %v6979_v29  ;;  %v7012_v38 = vmul.f32 0.2, %v6980_v39  ;;  %vm15644_vm11 = vcmp.eq.f32.partialorder %v7207_v0, 8.507059e+37 }
 0x837   : > { %v7074_v54 = vsub.f32 0.0, %v7042_v5  ;;  %v7210_v44 = vor.u32 1.1754944e-38, %v7209_v47 }
 0x838   : > { %v7043_v45 = vmax.f32 %v6979_v29, %v7011_v7  ;;  %v6849_v1 = vpop.xlane.xlu2 %6848  ;;  %v7044_v63 = vmax.f32 %v6980_v39, %v7012_v38 }
 0x839   : > { %v9388_v10 = vpop.eup %9387  ;;  %v7110_v23 = vmul.f32 1.442695, %v7074_v54  ;;  %v15635_v28 = vadd.f32 %v15622_v12, %v6849_v1 }
 0x83a   : > { %v9390_v18 = vpop.eup %9389  ;;  %v15631_v43 = vadd.f32 1.0, %v9388_v10  ;;  %v7075_v41 = vsub.f32 0.0, %v7043_v45  ;;  %v7076_v35 = vsub.f32 0.0, %v7044_v63  ;;  %v6854_v27 = vpop.xlane.xlu0 %6853 }
 0x83b   : > { %v9392_v40 = vpop.eup %9391  ;;  %v7199_v51 = vmul.f32 %v9390_v18, %v7166_v53  ;;  %9395 = vpow2.f32 %v7110_v23  ;;  %vm7204_vm10 = vweird.f32 %v9390_v18  ;;  %v7013_v11 = vmul.f32 0.2, %v15635_v28  ;;  %v6859_v32 = vpop.xlane.xlu1 %6858 }
 0x83c   : > { %v9394_v62 = vpop.eup %9393  ;;  %9397 = vrcp.f32 %v15631_v43  ;;  %v15637_v37 = vadd.f32 1.0, %v9392_v40  ;;  %v7112_v57 = vmul.f32 1.442695, %v7075_v41  ;;  %v7252_v42 = vand.u32 2147483647, %v15631_v43  ;;  %vm7205_vm13 = vmor %vm7203_vm9, %vm7204_vm10 }
 0x83d   : > { %v7200_v2 = vsub.f32 1.0, %v7199_v51  ;;  %v15639_v60 = vadd.f32 1.0, %v9394_v62  ;;  %v7254_v61 = vand.u32 2147483648, %v15631_v43  ;;  %vm7248_vm12 = vweird.f32 %v15631_v43 }
 0x83e   : > { %9399 = vrcp.f32 %v15637_v37  ;;  %v7237_v15 = vand.u32 2147483647, %v15637_v37  ;;  %v7239_v9 = vand.u32 2147483648, %v15637_v37  ;;  %v7114_v58 = vmul.f32 1.442695, %v7076_v35 }
 0x83f   : > { %v7201_v26 = vmul.f32 %v9390_v18, %v7200_v2  ;;  %9401 = vrcp.f32 %v15639_v60  ;;  %vm15663_vm14 = vcmp.eq.f32.partialorder %v7252_v42, 8.507059e+37  ;;  %v7222_v17 = vand.u32 2147483647, %v15639_v60 }
 0x840   : > { %9403 = vpow2.f32 %v7112_v57  ;;  %v7224_v59 = vand.u32 2147483648, %v15639_v60  ;;  %v7255_v19 = vor.u32 1.1754944e-38, %v7254_v61  ;;  %vm7233_vm15 = vweird.f32 %v15637_v37  ;;  %v6864_v29 = vpop.xlane.xlu2 %6863 }
 0x841   : > { %v9396_v30 = vpop.eup %9395  ;;  %v7202_v46 = vadd.f32 %v9390_v18, %v7201_v26  ;;  %vm7218_vm0 = vweird.f32 %v15639_v60  ;;  %v7045_v21 = vmax.f32 %v15635_v28, %v7013_v11  ;;  %vm15678_vm2 = vcmp.eq.f32.partialorder %v7237_v15, 8.507059e+37 }
 0x842   : > { %v9398_v36 = vpop.eup %9397  ;;  %v15660_v31 = vadd.f32 1.0, %v9396_v30  ;;  %v7240_v34 = vor.u32 1.1754944e-38, %v7239_v9  ;;  %v15683_v14 = vadd.f32 %v15622_v12, %v6854_v27  ;;  %vm15686_vm3 = vcmp.eq.f32.partialorder %v7222_v17, 8.507059e+37  ;;  %v6869_v61 = vpop.xlane.xlu0 %6868 }
 0x843   : > { %v7206_v3 = vsel %vm7205_vm13, %v9390_v18, %v7202_v46  ;;  %v7244_v52 = vmul.f32 %v9398_v36, %v15631_v43  ;;  %vm7249_vm1 = vweird.f32 %v9398_v36  ;;  %v7225_v24 = vor.u32 1.1754944e-38, %v7224_v59 }
 0x844   : > { %v7211_v55 = vsel %vm15644_vm11, %v7210_v44, %v7206_v3  ;;  %9405 = vrcp.f32 %v15660_v31  ;;  %v9400_v8 = vpop.eup %9399  ;;  %v7267_v20 = vand.u32 2147483647, %v15660_v31  ;;  %v7269_v49 = vand.u32 2147483648, %v15660_v31  ;;  %vm7250_vm7 = vmor %vm7248_vm12, %vm7249_vm1  ;;  %v6874_v3 = vpop.xlane.xlu1 %6873 }
 0x845   : > { %7679 = vst.msk [vmem:[%s15655_s12] sm:$0xff] %vm7678_vm8, %v7211_v55  ;;  %v7245_v4 = vsub.f32 1.0, %v7244_v52  ;;  %9407 = vpow2.f32 %v7114_v58  ;;  %v9402_v16 = vpop.eup %9401  ;;  %v7229_v13 = vmul.f32 %v9400_v8, %v15637_v37  ;;  %vm7234_vm4 = vweird.f32 %v9400_v8 }
 0x846   : > { %v9404_v6 = vpop.eup %9403  ;;  %v7214_v25 = vmul.f32 %v9402_v16, %v15639_v60  ;;  %vm7219_vm5 = vweird.f32 %v9402_v16  ;;  %vm7263_vm6 = vweird.f32 %v15660_v31  ;;  %v7077_v7 = vsub.f32 0.0, %v7045_v21  ;;  %vm7235_vm9 = vmor %vm7233_vm15, %vm7234_vm4 }
 0x847   : > { %v7246_v33 = vmul.f32 %v9398_v36, %v7245_v4  ;;  %v7230_v56 = vsub.f32 1.0, %v7229_v13  ;;  %v15692_v5 = vadd.f32 1.0, %v9404_v6  ;;  %v7014_v23 = vmul.f32 0.2, %v15683_v14  ;;  %vm7220_vm10 = vmor %vm7218_vm0, %vm7219_vm5 }
 0x848   : > { %v7215_v54 = vsub.f32 1.0, %v7214_v25  ;;  %v6983_v45 = vadd.f32 %v15622_v12, %v6859_v32  ;;  %v6984_v51 = vadd.f32 %v15622_v12, %v6864_v29  ;;  %v7116_v57 = vmul.f32 1.442695, %v7077_v7  ;;  %v6879_v59 = vpop.xlane.xlu2 %6878 }
 0x849   : > { %v7247_v39 = vadd.f32 %v9398_v36, %v7246_v33  ;;  %v7231_v10 = vmul.f32 %v9400_v8, %v7230_v56  ;;  %9409 = vrcp.f32 %v15692_v5  ;;  %v7282_v43 = vand.u32 2147483647, %v15692_v5 }
 0x84a   : > { %v9406_v38 = vpop.eup %9405  ;;  %v7216_v63 = vmul.f32 %v9402_v16, %v7215_v54  ;;  %v7284_v0 = vand.u32 2147483648, %v15692_v5  ;;  %v7046_v26 = vmax.f32 %v15683_v14, %v7014_v23  ;;  %v7015_v42 = vmul.f32 0.2, %v6983_v45 }
 0x84b   : > { %v9408_v1 = vpop.eup %9407  ;;  %v7251_v18 = vsel %vm7250_vm7, %v9398_v36, %v7247_v39  ;;  %v7259_v40 = vmul.f32 %v9406_v38, %v15660_v31  ;;  %v7232_v62 = vadd.f32 %v9400_v8, %v7231_v10  ;;  %vm7264_vm11 = vweird.f32 %v9406_v38 }
 0x84c   : > { %v7256_v41 = vsel %vm15663_vm14, %v7255_v19, %v7251_v18  ;;  %v7217_v47 = vadd.f32 %v9402_v16, %v7216_v63  ;;  %v15712_v2 = vadd.f32 1.0, %v9408_v1  ;;  %vm15725_vm12 = vcmp.eq.f32.partialorder %v7267_v20, 8.507059e+37  ;;  %vm7265_vm15 = vmor %vm7263_vm6, %vm7264_vm11 }
 0x84d   : > { %7682 = vst.msk [vmem:[%s15655_s12 + $0x18] sm:$0xff] %vm7678_vm8, %v7256_v41  ;;  %v7260_v28 = vsub.f32 1.0, %v7259_v40  ;;  %v7236_v35 = vsel %vm7235_vm9, %v9400_v8, %v7232_v62  ;;  %v7270_v11 = vor.u32 1.1754944e-38, %v7269_v49  ;;  %vm7278_vm13 = vweird.f32 %v15692_v5 }
 0x84e   : > { %v7241_v37 = vsel %vm15678_vm2, %v7240_v34, %v7236_v35  ;;  %v7221_v50 = vsel %vm7220_vm10, %v9402_v16, %v7217_v47  ;;  %9411 = vrcp.f32 %v15712_v2  ;;  %vm15733_vm14 = vcmp.eq.f32.partialorder %v7282_v43, 8.507059e+37 }
 0x84f   : > { %v7261_v44 = vmul.f32 %v9406_v38, %v7260_v28  ;;  %v9410_v30 = vpop.eup %9409  ;;  %7681 = vst.msk [vmem:[%s15655_s12 + $0x10] sm:$0xff] %vm7678_vm8, %v7241_v37  ;;  %v7226_v60 = vsel %vm15686_vm3, %v7225_v24, %v7221_v50  ;;  %v7285_v58 = vor.u32 1.1754944e-38, %v7284_v0  ;;  %9413 = vpow2.f32 %v7116_v57 }
 0x850   : > { %7680 = vst.msk [vmem:[%s15655_s12 + $0x8] sm:$0xff] %vm7678_vm8, %v7226_v60  ;;  %v7274_v15 = vmul.f32 %v9410_v30, %v15692_v5  ;;  %vm7279_vm0 = vweird.f32 %v9410_v30  ;;  %v7297_v52 = vand.u32 2147483647, %v15712_v2  ;;  %v7078_v22 = vsub.f32 0.0, %v7046_v26 }
 0x851   : > { %v7262_v36 = vadd.f32 %v9406_v38, %v7261_v44  ;;  %v7047_v17 = vmax.f32 %v6983_v45, %v7015_v42  ;;  %v7016_v19 = vmul.f32 0.2, %v6984_v51  ;;  %v6985_v8 = vadd.f32 %v15622_v12, %v6869_v61  ;;  %vm7280_vm1 = vmor %vm7278_vm13, %vm7279_vm0  ;;  %v6884_v45 = vpop.xlane.xlu0 %6883 }
 0x852   : > { %v7275_v55 = vsub.f32 1.0, %v7274_v15  ;;  %v7118_v21 = vmul.f32 1.442695, %v7078_v22  ;;  %v6986_v31 = vadd.f32 %v15622_v12, %v6874_v3  ;;  %v6987_v6 = vadd.f32 %v15622_v12, %v6879_v59 }
 0x853   : > { %v7266_v27 = vsel %vm7265_vm15, %v9406_v38, %v7262_v36  ;;  %v7079_v16 = vsub.f32 0.0, %v7047_v17  ;;  %v7048_v34 = vmax.f32 %v6984_v51, %v7016_v19  ;;  %v7017_v14 = vmul.f32 0.2, %v6985_v8 }
 0x854   : > { %v7271_v4 = vsel %vm15725_vm12, %v7270_v11, %v7266_v27  ;;  %v9412_v13 = vpop.eup %9411  ;;  %v7276_v48 = vmul.f32 %v9410_v30, %v7275_v55  ;;  %v7299_v25 = vand.u32 2147483648, %v15712_v2  ;;  %9415 = vpow2.f32 %v7118_v21 }
 0x855   : > { %7683 = vst.msk [vmem:[%s15655_s12 + $0x20] sm:$0xff] %vm7678_vm8, %v7271_v4  ;;  %v7289_v33 = vmul.f32 %v9412_v13, %v15712_v2  ;;  %v7120_v53 = vmul.f32 1.442695, %v7079_v16  ;;  %v9414_v24 = vpop.eup %9413  ;;  %v7080_v32 = vsub.f32 0.0, %v7048_v34  ;;  %v7049_v56 = vmax.f32 %v6985_v8, %v7017_v14  ;;  %v6889_v4 = vpop.xlane.xlu1 %6888 }
 0x856   : > { %v7277_v20 = vadd.f32 %v9410_v30, %v7276_v48  ;;  %v7018_v49 = vmul.f32 0.2, %v6986_v31  ;;  %v15753_v39 = vadd.f32 1.0, %v9414_v24  ;;  %v7019_v54 = vmul.f32 0.2, %v6987_v6 }
 0x857   : > { %v7290_v29 = vsub.f32 1.0, %v7289_v33  ;;  %9417 = vpow2.f32 %v7120_v53  ;;  %v7122_v38 = vmul.f32 1.442695, %v7080_v32  ;;  %v7081_v10 = vsub.f32 0.0, %v7049_v56  ;;  %v6894_v33 = vpop.xlane.xlu2 %6893 }
 0x858   : > { %v7281_v7 = vsel %vm7280_vm1, %v9410_v30, %v7277_v20  ;;  %v7050_v23 = vmax.f32 %v6986_v31, %v7018_v49  ;;  %vm7294_vm2 = vweird.f32 %v9412_v13  ;;  %9419 = vrcp.f32 %v15753_v39 }
 0x859   : > { %v7286_v1 = vsel %vm15733_vm14, %v7285_v58, %v7281_v7  ;;  %v7291_v18 = vmul.f32 %v9412_v13, %v7290_v29  ;;  %vm7293_vm3 = vweird.f32 %v15712_v2  ;;  %9421 = vpow2.f32 %v7122_v38 }
 0x85a   : > { %7684 = vst.msk [vmem:[%s15655_s12 + $0x28] sm:$0xff] %vm7678_vm8, %v7286_v1  ;;  %v7124_v5 = vmul.f32 1.442695, %v7081_v10  ;;  %v9416_v63 = vpop.eup %9415  ;;  %v7082_v51 = vsub.f32 0.0, %v7050_v23  ;;  %v7051_v41 = vmax.f32 %v6987_v6, %v7019_v54  ;;  %v6988_v62 = vadd.f32 %v15622_v12, %v6884_v45  ;;  %vm7295_vm4 = vmor %vm7293_vm3, %vm7294_vm2 }
 0x85b   : > { %v7292_v40 = vadd.f32 %v9412_v13, %v7291_v18  ;;  %v7300_v43 = vor.u32 1.1754944e-38, %v7299_v25  ;;  %v15762_v0 = vadd.f32 1.0, %v9416_v63  ;;  %vm7298_vm5 = vcmp.eq.f32.partialorder %v7297_v52, 8.507059e+37 }
 0x85c   : > { %9423 = vpow2.f32 %v7124_v5  ;;  %v7126_v57 = vmul.f32 1.442695, %v7082_v51  ;;  %v7083_v35 = vsub.f32 0.0, %v7051_v41  ;;  %v7312_v26 = vand.u32 2147483647, %v15753_v39  ;;  %v6899_v41 = vpop.xlane.xlu0 %6898 }
 0x85d   : > { %v9418_v47 = vpop.eup %9417  ;;  %v7296_v28 = vsel %vm7295_vm4, %v9412_v13, %v7292_v40  ;;  %v7314_v42 = vand.u32 2147483648, %v15753_v39  ;;  %9425 = vrcp.f32 %v15762_v0  ;;  %v7020_v61 = vmul.f32 0.2, %v6988_v62 }
 0x85e   : > { %v7301_v2 = vsel %vm7298_vm5, %v7300_v43, %v7296_v28  ;;  %v9420_v37 = vpop.eup %9419  ;;  %v15769_v50 = vadd.f32 1.0, %v9418_v47  ;;  %v7128_v44 = vmul.f32 1.442695, %v7083_v35  ;;  %9427 = vpow2.f32 %v7126_v57 }
 0x85f   : > { %7685 = vst.msk [vmem:[%s15655_s12 + $0x30] sm:$0xff] %vm7678_vm8, %v7301_v2  ;;  %v9422_v30 = vpop.eup %9421  ;;  %v7304_v60 = vmul.f32 %v9420_v37, %v15753_v39  ;;  %v7327_v46 = vand.u32 2147483647, %v15762_v0  ;;  %v7329_v11 = vand.u32 2147483648, %v15762_v0  ;;  %vm7308_vm6 = vweird.f32 %v15753_v39 }
 0x860   : > { %9429 = vrcp.f32 %v15769_v50  ;;  %v15776_v9 = vadd.f32 1.0, %v9422_v30  ;;  %vm15778_vm7 = vcmp.eq.f32.partialorder %v7312_v26, 8.507059e+37  ;;  %v7315_v3 = vor.u32 1.1754944e-38, %v7314_v42  ;;  %v6904_v30 = vpop.xlane.xlu1 %6903 }
 0x861   : > { %v7305_v15 = vsub.f32 1.0, %v7304_v60  ;;  %9431 = vpow2.f32 %v7128_v44  ;;  %v7052_v22 = vmax.f32 %v6988_v62, %v7020_v61  ;;  %vm7309_vm9 = vweird.f32 %v9420_v37 }
 0x862   : > { %v9424_v36 = vpop.eup %9423  ;;  %v7342_v27 = vand.u32 2147483647, %v15769_v50  ;;  %9433 = vrcp.f32 %v15776_v9  ;;  %vm7323_vm10 = vweird.f32 %v15762_v0  ;;  %vm15788_vm11 = vcmp.eq.f32.partialorder %v7327_v46, 8.507059e+37  ;;  %vm7310_vm12 = vmor %vm7308_vm6, %vm7309_vm9 }
 0x863   : > { %v15782_v52 = vadd.f32 1.0, %v9424_v36  ;;  %v9426_v17 = vpop.eup %9425  ;;  %v7306_v59 = vmul.f32 %v9420_v37, %v7305_v15  ;;  %v7330_v8 = vor.u32 1.1754944e-38, %v7329_v11  ;;  %v7344_v31 = vand.u32 2147483648, %v15769_v50  ;;  %v6909_v15 = vpop.xlane.xlu2 %6908 }
 0x864   : > { %v7319_v55 = vmul.f32 %v9426_v17, %v15762_v0  ;;  %v9428_v21 = vpop.eup %9427  ;;  %v7359_v13 = vand.u32 2147483648, %v15776_v9  ;;  %vm7338_vm13 = vweird.f32 %v15769_v50  ;;  %v7357_v14 = vand.u32 2147483647, %v15776_v9 }
 0x865   : > { %v7307_v16 = vadd.f32 %v9420_v37, %v7306_v59  ;;  %9435 = vrcp.f32 %v15782_v52  ;;  %v7084_v6 = vsub.f32 0.0, %v7052_v22  ;;  %vm7324_vm14 = vweird.f32 %v9426_v17 }
 0x866   : > { %v9430_v48 = vpop.eup %9429  ;;  %v7320_v34 = vsub.f32 1.0, %v7319_v55  ;;  %vm15800_vm15 = vcmp.eq.f32.partialorder %v7342_v27, 8.507059e+37  ;;  %v15805_v32 = vadd.f32 %v15622_v12, %v6889_v4  ;;  %v7372_v29 = vand.u32 2147483647, %v15782_v52  ;;  %vm7325_vm3 = vmor %vm7323_vm10, %vm7324_vm14 }
 0x867   : > { %v9432_v25 = vpop.eup %9431  ;;  %v7311_v53 = vsel %vm7310_vm12, %v9420_v37, %v7307_v16  ;;  %v7334_v24 = vmul.f32 %v9430_v48, %v15769_v50  ;;  %v15810_v39 = vadd.f32 1.0, %v9428_v21  ;;  %v7345_v38 = vor.u32 1.1754944e-38, %v7344_v31 }
 0x868   : > { %v7316_v56 = vsel %vm15778_vm7, %v7315_v3, %v7311_v53  ;;  %v7321_v49 = vmul.f32 %v9426_v17, %v7320_v34  ;;  %v9434_v54 = vpop.eup %9433  ;;  %vm7353_vm0 = vweird.f32 %v15776_v9  ;;  %v7360_v10 = vor.u32 1.1754944e-38, %v7359_v13 }
 0x869   : > { %7686 = vst.msk [vmem:[%s15655_s12 + $0x38] sm:$0xff] %vm7678_vm8, %v7316_v56  ;;  %v7335_v7 = vsub.f32 1.0, %v7334_v24  ;;  %v7349_v45 = vmul.f32 %v9434_v54, %v15776_v9  ;;  %vm15816_vm1 = vcmp.eq.f32.partialorder %v7357_v14, 8.507059e+37  ;;  %vm7368_vm2 = vweird.f32 %v15782_v52 }
 0x86a   : > { %v7322_v23 = vadd.f32 %v9426_v17, %v7321_v49  ;;  %9437 = vrcp.f32 %v15810_v39  ;;  %v15822_v18 = vadd.f32 1.0, %v9432_v25  ;;  %vm7339_vm4 = vweird.f32 %v9430_v48 }
 0x86b   : > { %v9436_v5 = vpop.eup %9435  ;;  %v7336_v63 = vmul.f32 %v9430_v48, %v7335_v7  ;;  %v7374_v40 = vand.u32 2147483648, %v15782_v52  ;;  %v7130_v51 = vmul.f32 1.442695, %v7084_v6  ;;  %v7350_v43 = vsub.f32 1.0, %v7349_v45  ;;  %vm7340_vm6 = vmor %vm7338_vm13, %vm7339_vm4  ;;  %v6919_v45 = vpop.xlane.xlu1 %6918 }
 0x86c   : > { %v7326_v62 = vsel %vm7325_vm3, %v9426_v17, %v7322_v23  ;;  %v7364_v47 = vmul.f32 %v9436_v5, %v15782_v52  ;;  %vm15829_vm5 = vcmp.eq.f32.partialorder %v7372_v29, 8.507059e+37  ;;  %v6990_v57 = vadd.f32 %v15622_v12, %v6894_v33  ;;  %v6914_v33 = vpop.xlane.xlu0 %6913 }
 0x86d   : > { %v7331_v0 = vsel %vm15788_vm11, %v7330_v8, %v7326_v62  ;;  %v7337_v35 = vadd.f32 %v9430_v48, %v7336_v63  ;;  %v7387_v2 = vand.u32 2147483647, %v15810_v39  ;;  %v7389_v26 = vand.u32 2147483648, %v15810_v39  ;;  %v6924_v63 = vpop.xlane.xlu2 %6923 }
 0x86e   : > { %7687 = vst.msk [vmem:[%s15655_s12 + $0x40] sm:$0xff] %vm7678_vm8, %v7331_v0  ;;  %v7351_v42 = vmul.f32 %v9434_v54, %v7350_v43  ;;  %vm7354_vm7 = vweird.f32 %v9434_v54  ;;  %v7365_v37 = vsub.f32 1.0, %v7364_v47  ;;  %9439 = vrcp.f32 %v15822_v18 }
 0x86f   : > { %v7341_v44 = vsel %vm7340_vm6, %v9430_v48, %v7337_v35  ;;  %vm7369_vm9 = vweird.f32 %v9436_v5  ;;  %v7375_v61 = vor.u32 1.1754944e-38, %v7374_v40  ;;  %9441 = vpow2.f32 %v7130_v51  ;;  %vm7355_vm10 = vmor %vm7353_vm0, %vm7354_vm7 }
 0x870   : > { %v9438_v60 = vpop.eup %9437  ;;  %v7346_v46 = vsel %vm15800_vm15, %v7345_v38, %v7341_v44  ;;  %v7352_v11 = vadd.f32 %v9434_v54, %v7351_v42  ;;  %v7366_v36 = vmul.f32 %v9436_v5, %v7365_v37  ;;  %v7021_v50 = vmul.f32 0.2, %v15805_v32  ;;  %vm7370_vm13 = vmor %vm7368_vm2, %vm7369_vm9 }
 0x871   : > { %7688 = vst.msk [vmem:[%s15655_s12 + $0x48] sm:$0xff] %vm7678_vm8, %v7346_v46  ;;  %v7379_v58 = vmul.f32 %v9438_v60, %v15810_v39  ;;  %vm7383_vm11 = vweird.f32 %v15810_v39  ;;  %vm15853_vm12 = vcmp.eq.f32.partialorder %v7387_v2, 8.507059e+37  ;;  %v7390_v22 = vor.u32 1.1754944e-38, %v7389_v26 }
 0x872   : > { %v7356_v17 = vsel %vm7355_vm10, %v9434_v54, %v7352_v11  ;;  %v7367_v59 = vadd.f32 %v9436_v5, %v7366_v36  ;;  %v7053_v27 = vmax.f32 %v15805_v32, %v7021_v50  ;;  %v7022_v55 = vmul.f32 0.2, %v6990_v57 }
 0x873   : > { %v7361_v19 = vsel %vm15816_vm1, %v7360_v10, %v7356_v17  ;;  %v7380_v9 = vsub.f32 1.0, %v7379_v58  ;;  %v6991_v8 = vadd.f32 %v15622_v12, %v6899_v41  ;;  %v6992_v4 = vadd.f32 %v15622_v12, %v6904_v30 }
 0x874   : > { %v9440_v21 = vpop.eup %9439  ;;  %7689 = vst.msk [vmem:[%s15655_s12 + $0x50] sm:$0xff] %vm7678_vm8, %v7361_v19  ;;  %v7371_v16 = vsel %vm7370_vm13, %v9436_v5, %v7367_v59  ;;  %v7402_v31 = vand.u32 2147483647, %v15822_v18  ;;  %v7085_v13 = vsub.f32 0.0, %v7053_v27  ;;  %v7054_v48 = vmax.f32 %v6990_v57, %v7022_v55 }
 0x875   : > { %v9442_v34 = vpop.eup %9441  ;;  %v7376_v14 = vsel %vm15829_vm5, %v7375_v61, %v7371_v16  ;;  %v7381_v52 = vmul.f32 %v9438_v60, %v7380_v9  ;;  %vm7384_vm14 = vweird.f32 %v9438_v60  ;;  %v7394_v6 = vmul.f32 %v9440_v21, %v15822_v18 }
 0x876   : > { %7690 = vst.msk [vmem:[%s15655_s12 + $0x58] sm:$0xff] %vm7678_vm8, %v7376_v14  ;;  %v15873_v25 = vadd.f32 1.0, %v9442_v34  ;;  %v7132_v53 = vmul.f32 1.442695, %v7085_v13  ;;  %v7086_v24 = vsub.f32 0.0, %v7054_v48  ;;  %v6993_v20 = vadd.f32 %v15622_v12, %v6909_v15  ;;  %vm7385_vm15 = vmor %vm7383_vm11, %vm7384_vm14  ;;  %v6929_v48 = vpop.xlane.xlu0 %6928 }
 0x877   : > { %v7382_v32 = vadd.f32 %v9438_v60, %v7381_v52  ;;  %v7395_v56 = vsub.f32 1.0, %v7394_v6  ;;  %v7023_v49 = vmul.f32 0.2, %v6991_v8  ;;  %v7024_v29 = vmul.f32 0.2, %v6992_v4 }
 0x878   : > { %vm7399_vm0 = vweird.f32 %v9440_v21  ;;  %v7404_v54 = vand.u32 2147483648, %v15822_v18  ;;  %9443 = vrcp.f32 %v15873_v25  ;;  %v6994_v7 = vadd.f32 %v15622_v12, %v6914_v33 }
 0x879   : > { %v7386_v38 = vsel %vm7385_vm15, %v9438_v60, %v7382_v32  ;;  %v7396_v10 = vmul.f32 %v9440_v21, %v7395_v56  ;;  %9445 = vpow2.f32 %v7132_v53  ;;  %v7134_v23 = vmul.f32 1.442695, %v7086_v24 }
 0x87a   : > { %v7391_v1 = vsel %vm15853_vm12, %v7390_v22, %v7386_v38  ;;  %vm7398_vm1 = vweird.f32 %v15822_v18  ;;  %vm15884_vm2 = vcmp.eq.f32.partialorder %v7402_v31, 8.507059e+37  ;;  %v7055_v5 = vmax.f32 %v6991_v8, %v7023_v49 }
 0x87b   : > { %7691 = vst.msk [vmem:[%s15655_s12 + $0x60] sm:$0xff] %vm7678_vm8, %v7391_v1  ;;  %v7397_v40 = vadd.f32 %v9440_v21, %v7396_v10  ;;  %9447 = vpow2.f32 %v7134_v23  ;;  %v7056_v51 = vmax.f32 %v6992_v4, %v7024_v29  ;;  %v7025_v41 = vmul.f32 0.2, %v6993_v20  ;;  %vm7400_vm3 = vmor %vm7398_vm1, %vm7399_vm0 }
 0x87c   : > { %v7405_v62 = vor.u32 1.1754944e-38, %v7404_v54  ;;  %v7087_v43 = vsub.f32 0.0, %v7055_v5  ;;  %v7026_v47 = vmul.f32 0.2, %v6994_v7  ;;  %v6995_v18 = vadd.f32 %v15622_v12, %v6919_v45 }
 0x87d   : > { %v7401_v28 = vsel %vm7400_vm3, %v9440_v21, %v7397_v40  ;;  %v7088_v57 = vsub.f32 0.0, %v7056_v51  ;;  %v7057_v0 = vmax.f32 %v6993_v20, %v7025_v41  ;;  %v15893_v35 = vadd.f32 %v15622_v12, %v6924_v63 }
 0x87e   : > { %v9444_v2 = vpop.eup %9443  ;;  %v7406_v26 = vsel %vm15884_vm2, %v7405_v62, %v7401_v28  ;;  %v7136_v42 = vmul.f32 1.442695, %v7087_v43  ;;  %v7058_v37 = vmax.f32 %v6994_v7, %v7026_v47  ;;  %v7027_v44 = vmul.f32 0.2, %v6995_v18 }
 0x87f   : > { %v9446_v61 = vpop.eup %9445  ;;  %7692 = vst.msk [vmem:[%s15655_s12 + $0x68] sm:$0xff] %vm7678_vm8, %v7406_v26  ;;  %v7409_v30 = vmul.f32 %v9444_v2, %v15873_v25  ;;  %v7138_v60 = vmul.f32 1.442695, %v7088_v57  ;;  %v7089_v46 = vsub.f32 0.0, %v7057_v0  ;;  %v7419_v3 = vand.u32 2147483648, %v15873_v25  ;;  %v6934_v0 = vpop.xlane.xlu1 %6933 }
 0x880   : > { %v15900_v11 = vadd.f32 1.0, %v9446_v61  ;;  %9449 = vpow2.f32 %v7136_v42  ;;  %v7090_v36 = vsub.f32 0.0, %v7058_v37  ;;  %v7059_v50 = vmax.f32 %v6995_v18, %v7027_v44 }
 0x881   : > { %v9448_v15 = vpop.eup %9447  ;;  %v7410_v58 = vsub.f32 1.0, %v7409_v30  ;;  %9451 = vpow2.f32 %v7138_v60  ;;  %v7140_v22 = vmul.f32 1.442695, %v7089_v46  ;;  %vm7414_vm4 = vweird.f32 %v9444_v2 }
 0x882   : > { %v7417_v17 = vand.u32 2147483647, %v15873_v25  ;;  %9453 = vrcp.f32 %v15900_v11  ;;  %v7028_v59 = vmul.f32 0.2, %v15893_v35  ;;  %v15906_v55 = vadd.f32 1.0, %v9448_v15 }
 0x883   : > { %v7411_v27 = vmul.f32 %v9444_v2, %v7410_v58  ;;  %9455 = vpow2.f32 %v7140_v22  ;;  %v7142_v19 = vmul.f32 1.442695, %v7090_v36  ;;  %v7091_v9 = vsub.f32 0.0, %v7059_v50 }
 0x884   : > { %vm7413_vm5 = vweird.f32 %v15873_v25  ;;  %v7420_v4 = vor.u32 1.1754944e-38, %v7419_v3  ;;  %9457 = vrcp.f32 %v15906_v55  ;;  %v7432_v16 = vand.u32 2147483647, %v15900_v11 }
 0x885   : > { %v7412_v8 = vadd.f32 %v9444_v2, %v7411_v27  ;;  %vm7415_vm6 = vmor %vm7413_vm5, %vm7414_vm4  ;;  %v7434_v31 = vand.u32 2147483648, %v15900_v11  ;;  %9459 = vpow2.f32 %v7142_v19  ;;  %v7144_v13 = vmul.f32 1.442695, %v7091_v9 }
 0x886   : > { %v9450_v21 = vpop.eup %9449  ;;  %vm7418_vm7 = vcmp.eq.f32.partialorder %v7417_v17, 8.507059e+37  ;;  %v7060_v6 = vmax.f32 %v15893_v35, %v7028_v59  ;;  %v7447_v53 = vand.u32 2147483647, %v15906_v55  ;;  %vm7428_vm9 = vweird.f32 %v15900_v11 }
 0x887   : > { %v9452_v34 = vpop.eup %9451  ;;  %v7416_v14 = vsel %vm7415_vm6, %v9444_v2, %v7412_v8  ;;  %v15912_v52 = vadd.f32 1.0, %v9450_v21  ;;  %9461 = vpow2.f32 %v7144_v13  ;;  %v15924_v56 = vadd.f32 %v15622_v12, %v6929_v48  ;;  %v6944_v21 = vpop.xlane.xlu0 %6943 }
 0x888   : > { %v9454_v33 = vpop.eup %9453  ;;  %v7421_v25 = vsel %vm7418_vm7, %v7420_v4, %v7416_v14  ;;  %v15916_v24 = vadd.f32 1.0, %v9452_v34  ;;  %vm15926_vm10 = vcmp.eq.f32.partialorder %v7432_v16, 8.507059e+37  ;;  %v7435_v29 = vor.u32 1.1754944e-38, %v7434_v31 }
 0x889   : > { %v9456_v20 = vpop.eup %9455  ;;  %7693 = vst.msk [vmem:[%s15655_s12 + $0x70] sm:$0xff] %vm7678_vm8, %v7421_v25  ;;  %v7424_v32 = vmul.f32 %v9454_v33, %v15900_v11  ;;  %9463 = vrcp.f32 %v15912_v52  ;;  %v7449_v54 = vand.u32 2147483648, %v15906_v55  ;;  %vm7443_vm11 = vweird.f32 %v15906_v55 }
 0x88a   : > { %9465 = vrcp.f32 %v15916_v24  ;;  %v9458_v7 = vpop.eup %9457  ;;  %v15933_v10 = vadd.f32 1.0, %v9456_v20  ;;  %v7092_v23 = vsub.f32 0.0, %v7060_v6  ;;  %vm7429_vm12 = vweird.f32 %v9454_v33  ;;  %v6939_v20 = vpop.xlane.xlu2 %6938 }
 0x88b   : > { %v7425_v38 = vsub.f32 1.0, %v7424_v32  ;;  %v9460_v45 = vpop.eup %9459  ;;  %v7439_v12 = vmul.f32 %v9458_v7, %v15906_v55  ;;  %vm15936_vm13 = vcmp.eq.f32.partialorder %v7447_v53, 8.507059e+37  ;;  %v7462_v39 = vand.u32 2147483647, %v15912_v52  ;;  %vm7430_vm1 = vmor %vm7428_vm9, %vm7429_vm12  ;;  %v15998_v53 = vld [vmem:[#allocation4] ss:$0 sm:$0xff] }
 0x88c   : > { %v7464_v5 = vand.u32 2147483648, %v15912_v52  ;;  %v7477_v40 = vand.u32 2147483647, %v15916_v24  ;;  %v7479_v51 = vand.u32 2147483648, %v15916_v24  ;;  %9467 = vrcp.f32 %v15933_v10 }
 0x88d   : > { %v7426_v63 = vmul.f32 %v9454_v33, %v7425_v38  ;;  %v9462_v41 = vpop.eup %9461  ;;  %v7440_v62 = vsub.f32 1.0, %v7439_v12  ;;  %v7450_v43 = vor.u32 1.1754944e-38, %v7449_v54  ;;  %vm7458_vm14 = vweird.f32 %v15912_v52 }
 0x88e   : > { %v15947_v47 = vmul.f32 0.2, %v15924_v56  ;;  %vm7444_vm15 = vweird.f32 %v9458_v7  ;;  %vm7473_vm0 = vweird.f32 %v15916_v24  ;;  %v15950_v57 = vadd.f32 1.0, %v9460_v45 }
 0x88f   : > { %v9464_v18 = vpop.eup %9463  ;;  %v7427_v28 = vadd.f32 %v9454_v33, %v7426_v63  ;;  %v7441_v2 = vmul.f32 %v9458_v7, %v7440_v62  ;;  %vm15956_vm2 = vcmp.eq.f32.partialorder %v7462_v39, 8.507059e+37  ;;  %v7465_v37 = vor.u32 1.1754944e-38, %v7464_v5  ;;  %vm7445_vm5 = vmor %vm7443_vm11, %vm7444_vm15 }
 0x890   : > { %v9466_v35 = vpop.eup %9465  ;;  %v7454_v26 = vmul.f32 %v9464_v18, %v15912_v52  ;;  %v7492_v44 = vand.u32 2147483647, %v15933_v10  ;;  %vm15962_vm3 = vcmp.eq.f32.partialorder %v7477_v40, 8.507059e+37  ;;  %v7480_v46 = vor.u32 1.1754944e-38, %v7479_v51 }
 0x891   : > { %v7431_v61 = vsel %vm7430_vm1, %v9454_v33, %v7427_v28  ;;  %v7469_v30 = vmul.f32 %v9466_v35, %v15916_v24  ;;  %v15966_v11 = vadd.f32 1.0, %v9462_v41  ;;  %v7442_v50 = vadd.f32 %v9458_v7, %v7441_v2  ;;  %v6949_v24 = vpop.xlane.xlu1 %6948 }
 0x892   : > { %v7436_v36 = vsel %vm15926_vm10, %v7435_v29, %v7431_v61  ;;  %v7455_v15 = vsub.f32 1.0, %v7454_v26  ;;  %vm7488_vm4 = vweird.f32 %v15933_v10  ;;  %9469 = vrcp.f32 %v15950_v57  ;;  %v9468_v58 = vpop.eup %9467 }
 0x893   : > { %7694 = vst.msk [vmem:[%s15655_s12 + $0x78] sm:$0xff] %vm7678_vm8, %v7436_v36  ;;  %vm7459_vm6 = vweird.f32 %v9464_v18  ;;  %v7470_v3 = vsub.f32 1.0, %v7469_v30  ;;  %v7494_v22 = vand.u32 2147483648, %v15933_v10  ;;  %v7146_v17 = vmul.f32 1.442695, %v7092_v23  ;;  %v6954_v36 = vpop.xlane.xlu2 %6953 }
 0x894   : > { %v7446_v59 = vsel %vm7445_vm5, %v9458_v7, %v7442_v50  ;;  %v7456_v27 = vmul.f32 %v9464_v18, %v7455_v15  ;;  %v7484_v19 = vmul.f32 %v9468_v58, %v15933_v10  ;;  %vm15979_vm7 = vcmp.eq.f32.partialorder %v7492_v44, 8.507059e+37  ;;  %vm7460_vm10 = vmor %vm7458_vm14, %vm7459_vm6 }
 0x895   : > { %v7451_v8 = vsel %vm15936_vm13, %v7450_v43, %v7446_v59  ;;  %v7471_v4 = vmul.f32 %v9466_v35, %v7470_v3  ;;  %vm7474_vm9 = vweird.f32 %v9466_v35  ;;  %v7507_v55 = vand.u32 2147483647, %v15950_v57 }
 0x896   : > { %7695 = vst.msk [vmem:[%s15655_s12 + $0x80] sm:$0xff] %vm7678_vm8, %v7451_v8  ;;  %v7457_v16 = vadd.f32 %v9464_v18, %v7456_v27  ;;  %v7485_v31 = vsub.f32 1.0, %v7484_v19  ;;  %v7509_v13 = vand.u32 2147483648, %v15950_v57  ;;  %9471 = vrcp.f32 %v15966_v11  ;;  %vm7475_vm12 = vmor %vm7473_vm0, %vm7474_vm9 }
 0x897   : > { %v7472_v48 = vadd.f32 %v9466_v35, %v7471_v4  ;;  %vm7489_vm11 = vweird.f32 %v9468_v58  ;;  %v7495_v34 = vor.u32 1.1754944e-38, %v7494_v22  ;;  %9473 = vpow2.f32 %v7146_v17 }
 0x898   : > { %v9470_v14 = vpop.eup %9469  ;;  %v7461_v6 = vsel %vm7460_vm10, %v9464_v18, %v7457_v16  ;;  %v7486_v33 = vmul.f32 %v9468_v58, %v7485_v31  ;;  %v7061_v25 = vmax.f32 %v15924_v56, %v15947_v47  ;;  %v6998_v52 = vadd.f32 %v15998_v53, %v6934_v0  ;;  %vm7490_vm15 = vmor %vm7488_vm4, %vm7489_vm11  ;;  %v6959_v47 = vpop.xlane.xlu0 %6958 }
 0x899   : > { %v7466_v32 = vsel %vm15956_vm2, %v7465_v37, %v7461_v6  ;;  %v7476_v49 = vsel %vm7475_vm12, %v9466_v35, %v7472_v48  ;;  %v7499_v29 = vmul.f32 %v9470_v14, %v15950_v57  ;;  %vm7503_vm13 = vweird.f32 %v15950_v57 }
 0x89a   : > { %7696 = vst.msk [vmem:[%s15655_s12 + $0x88] sm:$0xff] %vm7678_vm8, %v7466_v32  ;;  %v7481_v54 = vsel %vm15962_vm3, %v7480_v46, %v7476_v49  ;;  %v7487_v56 = vadd.f32 %v9468_v58, %v7486_v33  ;;  %vm16009_vm14 = vcmp.eq.f32.partialorder %v7507_v55, 8.507059e+37  ;;  %v7510_v38 = vor.u32 1.1754944e-38, %v7509_v13 }
 0x89b   : > { %7697 = vst.msk [vmem:[%s15655_s12 + $0x90] sm:$0xff] %vm7678_vm8, %v7481_v54  ;;  %v7500_v23 = vsub.f32 1.0, %v7499_v29  ;;  %v7093_v45 = vsub.f32 0.0, %v7061_v25  ;;  %v7030_v12 = vmul.f32 0.2, %v6998_v52  ;;  %v6999_v1 = vadd.f32 %v15998_v53, %v6939_v20 }
 0x89c   : > { %v9472_v39 = vpop.eup %9471  ;;  %v7491_v5 = vsel %vm7490_vm15, %v9468_v58, %v7487_v56  ;;  %v7522_v63 = vand.u32 2147483647, %v15966_v11  ;;  %v7000_v40 = vadd.f32 %v15998_v53, %v6944_v21  ;;  %v7001_v51 = vadd.f32 %v15998_v53, %v6949_v24 }
 0x89d   : > { %v9474_v41 = vpop.eup %9473  ;;  %v7496_v62 = vsel %vm15979_vm7, %v7495_v34, %v7491_v5  ;;  %v7501_v10 = vmul.f32 %v9470_v14, %v7500_v23  ;;  %vm7504_vm0 = vweird.f32 %v9470_v14  ;;  %v7514_v43 = vmul.f32 %v9472_v39, %v15966_v11 }
 0x89e   : > { %7698 = vst.msk [vmem:[%s15655_s12 + $0x98] sm:$0xff] %vm7678_vm8, %v7496_v62  ;;  %v16027_v18 = vadd.f32 1.0, %v9474_v41  ;;  %v7148_v28 = vmul.f32 1.442695, %v7093_v45  ;;  %v7062_v0 = vmax.f32 %v6998_v52, %v7030_v12  ;;  %v7031_v35 = vmul.f32 0.2, %v6999_v1  ;;  %vm7505_vm1 = vmor %vm7503_vm13, %vm7504_vm0  ;;  %v6969_v12 = vpop.xlane.xlu2 %6968 }
 0x89f   : > { %v7502_v2 = vadd.f32 %v9470_v14, %v7501_v10  ;;  %v7515_v26 = vsub.f32 1.0, %v7514_v43  ;;  %v7032_v42 = vmul.f32 0.2, %v7000_v40  ;;  %v7033_v37 = vmul.f32 0.2, %v7001_v51 }
 0x8a0   : > { %vm7519_vm2 = vweird.f32 %v9472_v39  ;;  %v7524_v44 = vand.u32 2147483648, %v15966_v11  ;;  %9475 = vrcp.f32 %v16027_v18  ;;  %v7003_v61 = vadd.f32 %v15998_v53, %v6959_v47 }
 0x8a1   : > { %v7506_v30 = vsel %vm7505_vm1, %v9470_v14, %v7502_v2  ;;  %v7516_v60 = vmul.f32 %v9472_v39, %v7515_v26  ;;  %9477 = vpow2.f32 %v7148_v28  ;;  %v7094_v46 = vsub.f32 0.0, %v7062_v0 }
 0x8a2   : > { %v7511_v50 = vsel %vm16009_vm14, %v7510_v38, %v7506_v30  ;;  %vm7518_vm3 = vweird.f32 %v15966_v11  ;;  %vm16037_vm4 = vcmp.eq.f32.partialorder %v7522_v63, 8.507059e+37  ;;  %v7063_v15 = vmax.f32 %v6999_v1, %v7031_v35  ;;  %v6964_v11 = vpop.xlane.xlu1 %6963 }
 0x8a3   : > { %7699 = vst.msk [vmem:[%s15655_s12 + $0xa0] sm:$0xff] %vm7678_vm8, %v7511_v50  ;;  %v7517_v58 = vadd.f32 %v9472_v39, %v7516_v60  ;;  %v7150_v3 = vmul.f32 1.442695, %v7094_v46  ;;  %v7064_v22 = vmax.f32 %v7000_v40, %v7032_v42  ;;  %v7065_v17 = vmax.f32 %v7001_v51, %v7033_v37  ;;  %vm7520_vm5 = vmor %vm7518_vm3, %vm7519_vm2 }
 0x8a4   : > { %v7525_v59 = vor.u32 1.1754944e-38, %v7524_v44  ;;  %v7095_v27 = vsub.f32 0.0, %v7063_v15  ;;  %v7035_v19 = vmul.f32 0.2, %v7003_v61  ;;  %v7002_v9 = vadd.f32 %v15998_v53, %v6954_v36 }
 0x8a5   : > { %v7521_v8 = vsel %vm7520_vm5, %v9472_v39, %v7517_v58  ;;  %9479 = vpow2.f32 %v7150_v3  ;;  %v7096_v4 = vsub.f32 0.0, %v7064_v22  ;;  %v7097_v55 = vsub.f32 0.0, %v7065_v17 }
 0x8a6   : > { %v9476_v21 = vpop.eup %9475  ;;  %v7526_v16 = vsel %vm16037_vm4, %v7525_v59, %v7521_v8  ;;  %v7152_v31 = vmul.f32 1.442695, %v7095_v27  ;;  %v7067_v13 = vmax.f32 %v7003_v61, %v7035_v19  ;;  %v7034_v48 = vmul.f32 0.2, %v7002_v9 }
 0x8a7   : > { %v9478_v34 = vpop.eup %9477  ;;  %7700 = vst.msk [vmem:[%s15655_s12 + $0xa8] sm:$0xff] %vm7678_vm8, %v7526_v16  ;;  %v7529_v14 = vmul.f32 %v9476_v21, %v16027_v18  ;;  %v7154_v6 = vmul.f32 1.442695, %v7096_v4  ;;  %v7156_v33 = vmul.f32 1.442695, %v7097_v55  ;;  %v7004_v25 = vadd.f32 %v15998_v53, %v6964_v11 }
 0x8a8   : > { %v16051_v52 = vadd.f32 1.0, %v9478_v34  ;;  %9481 = vpow2.f32 %v7152_v31  ;;  %v7099_v20 = vsub.f32 0.0, %v7067_v13  ;;  %v7066_v32 = vmax.f32 %v7002_v9, %v7034_v48 }
 0x8a9   : > { %v7530_v49 = vsub.f32 1.0, %v7529_v14  ;;  %9483 = vpow2.f32 %v7154_v6  ;;  %vm7534_vm6 = vweird.f32 %v9476_v21  ;;  %v7537_v29 = vand.u32 2147483647, %v16027_v18 }
 0x8aa   : > { %v7539_v24 = vand.u32 2147483648, %v16027_v18  ;;  %9485 = vrcp.f32 %v16051_v52  ;;  %v7160_v7 = vmul.f32 1.442695, %v7099_v20  ;;  %v7098_v38 = vsub.f32 0.0, %v7066_v32 }
 0x8ab   : > { %v9480_v54 = vpop.eup %9479  ;;  %v7531_v56 = vmul.f32 %v9476_v21, %v7530_v49  ;;  %9487 = vpow2.f32 %v7156_v33  ;;  %v7036_v45 = vmul.f32 0.2, %v7004_v25  ;;  %vm7533_vm7 = vweird.f32 %v16027_v18 }
 0x8ac   : > { %v16056_v23 = vadd.f32 1.0, %v9480_v54  ;;  %9489 = vpow2.f32 %v7160_v7  ;;  %v7158_v39 = vmul.f32 1.442695, %v7098_v38  ;;  %vm7535_vm9 = vmor %vm7533_vm7, %vm7534_vm6  ;;  %vm7538_vm10 = vcmp.eq.f32.partialorder %v7537_v29, 8.507059e+37 }
 0x8ad   : > { %v7532_v1 = vadd.f32 %v9476_v21, %v7531_v56  ;;  %v7540_v63 = vor.u32 1.1754944e-38, %v7539_v24  ;;  %v7552_v40 = vand.u32 2147483647, %v16051_v52  ;;  %v7554_v62 = vand.u32 2147483648, %v16051_v52 }
 0x8ae   : > { %v9482_v5 = vpop.eup %9481  ;;  %9491 = vrcp.f32 %v16056_v23  ;;  %v16066_v43 = vadd.f32 %v15998_v53, %v6969_v12  ;;  %v7068_v0 = vmax.f32 %v7004_v25, %v7036_v45  ;;  %v7567_v26 = vand.u32 2147483647, %v16056_v23 }
 0x8af   : > { %v9484_v51 = vpop.eup %9483  ;;  %v7536_v41 = vsel %vm7535_vm9, %v9476_v21, %v7532_v1  ;;  %v16063_v10 = vadd.f32 1.0, %v9482_v5  ;;  %9493 = vpow2.f32 %v7158_v39  ;;  %v7569_v42 = vand.u32 2147483648, %v16056_v23 }
 0x8b0   : > { %v9486_v47 = vpop.eup %9485  ;;  %v7541_v18 = vsel %vm7538_vm10, %v7540_v63, %v7536_v41  ;;  %v16068_v28 = vadd.f32 1.0, %v9484_v51  ;;  %vm7548_vm11 = vweird.f32 %v16051_v52  ;;  %vm16077_vm12 = vcmp.eq.f32.partialorder %v7552_v40, 8.507059e+37 }
 0x8b1   : > { %v9488_v35 = vpop.eup %9487  ;;  %7701 = vst.msk [vmem:[%s15655_s12 + $0xb0] sm:$0xff] %vm7678_vm8, %v7541_v18  ;;  %v7544_v2 = vmul.f32 %v9486_v47, %v16051_v52  ;;  %9495 = vrcp.f32 %v16063_v10  ;;  %v7555_v61 = vor.u32 1.1754944e-38, %v7554_v62  ;;  %v16085_v60 = vmul.f32 0.2, %v16066_v43 }
 0x8b2   : > { %9497 = vrcp.f32 %v16068_v28  ;;  %v9490_v37 = vpop.eup %9489  ;;  %v16082_v30 = vadd.f32 1.0, %v9488_v35  ;;  %vm7563_vm13 = vweird.f32 %v16056_v23  ;;  %v7582_v36 = vand.u32 2147483647, %v16063_v10 }
 0x8b3   : > { %v7545_v44 = vsub.f32 1.0, %v7544_v2  ;;  %v16089_v50 = vadd.f32 1.0, %v9490_v37  ;;  %v7100_v57 = vsub.f32 0.0, %v7068_v0  ;;  %vm7549_vm14 = vweird.f32 %v9486_v47 }
 0x8b4   : > { %v9492_v46 = vpop.eup %9491  ;;  %vm16092_vm15 = vcmp.eq.f32.partialorder %v7567_v26, 8.507059e+37  ;;  %v7570_v22 = vor.u32 1.1754944e-38, %v7569_v42  ;;  %vm7578_vm0 = vweird.f32 %v16063_v10  ;;  %v7584_v59 = vand.u32 2147483648, %v16063_v10  ;;  %vm7550_vm1 = vmor %vm7548_vm11, %vm7549_vm14 }
 0x8b5   : > { %v7546_v15 = vmul.f32 %v9486_v47, %v7545_v44  ;;  %v7559_v58 = vmul.f32 %v9492_v46, %v16056_v23  ;;  %v9494_v17 = vpop.eup %9493  ;;  %v7597_v27 = vand.u32 2147483647, %v16068_v28  ;;  %9499 = vrcp.f32 %v16082_v30 }
 0x8b6   : > { %v7599_v8 = vand.u32 2147483648, %v16068_v28  ;;  %9501 = vrcp.f32 %v16089_v50  ;;  %vm16106_vm2 = vcmp.eq.f32.partialorder %v7582_v36, 8.507059e+37  ;;  %vm7593_vm3 = vweird.f32 %v16068_v28 }
 0x8b7   : > { %v9496_v19 = vpop.eup %9495  ;;  %v7547_v9 = vadd.f32 %v9486_v47, %v7546_v15  ;;  %v7560_v11 = vsub.f32 1.0, %v7559_v58  ;;  %v7162_v16 = vmul.f32 1.442695, %v7100_v57  ;;  %vm7564_vm4 = vweird.f32 %v9492_v46 }
 0x8b8   : > { %v9498_v4 = vpop.eup %9497  ;;  %v7574_v55 = vmul.f32 %v9496_v19, %v16063_v10  ;;  %v7585_v6 = vor.u32 1.1754944e-38, %v7584_v59  ;;  %vm16114_vm5 = vcmp.eq.f32.partialorder %v7597_v27, 8.507059e+37  ;;  %v7600_v20 = vor.u32 1.1754944e-38, %v7599_v8  ;;  %vm7565_vm6 = vmor %vm7563_vm13, %vm7564_vm4 }
 0x8b9   : > { %v7551_v31 = vsel %vm7550_vm1, %v9486_v47, %v7547_v9  ;;  %v7561_v13 = vmul.f32 %v9492_v46, %v7560_v11  ;;  %v7589_v48 = vmul.f32 %v9498_v4, %v16068_v28  ;;  %v16120_v32 = vadd.f32 1.0, %v9494_v17 }
 0x8ba   : > { %v7556_v34 = vsel %vm16077_vm12, %v7555_v61, %v7551_v31  ;;  %v7575_v14 = vsub.f32 1.0, %v7574_v55  ;;  %vm7579_vm7 = vweird.f32 %v9496_v19  ;;  %v7612_v24 = vand.u32 2147483647, %v16082_v30 }
 0x8bb   : > { %7702 = vst.msk [vmem:[%s15655_s12 + $0xb8] sm:$0xff] %vm7678_vm8, %v7556_v34  ;;  %v7562_v25 = vadd.f32 %v9492_v46, %v7561_v13  ;;  %v7590_v52 = vsub.f32 1.0, %v7589_v48  ;;  %v9500_v49 = vpop.eup %9499  ;;  %9503 = vpow2.f32 %v7162_v16  ;;  %vm7594_vm9 = vweird.f32 %v9498_v4  ;;  %vm7580_vm10 = vmor %vm7578_vm0, %vm7579_vm7 }
 0x8bc   : > { %v7576_v29 = vmul.f32 %v9496_v19, %v7575_v14  ;;  %v9502_v54 = vpop.eup %9501  ;;  %v7604_v38 = vmul.f32 %v9500_v49, %v16082_v30  ;;  %v7069_v23 = vmax.f32 %v16066_v43, %v16085_v60  ;;  %v7614_v63 = vand.u32 2147483648, %v16082_v30  ;;  %vm7595_vm11 = vmor %vm7593_vm3, %vm7594_vm9 }
 0x8bd   : > { %v7566_v56 = vsel %vm7565_vm6, %v9492_v46, %v7562_v25  ;;  %v7591_v7 = vmul.f32 %v9498_v4, %v7590_v52  ;;  %v7634_v1 = vmul.f32 %v9502_v54, %v16089_v50  ;;  %9505 = vrcp.f32 %v16120_v32 }
 0x8be   : > { %v7571_v45 = vsel %vm16092_vm15, %v7570_v22, %v7566_v56  ;;  %v7577_v12 = vadd.f32 %v9496_v19, %v7576_v29  ;;  %v7605_v5 = vsub.f32 1.0, %v7604_v38  ;;  %v7642_v41 = vand.u32 2147483647, %v16089_v50 }
 0x8bf   : > { %7703 = vst.msk [vmem:[%s15655_s12 + $0xc0] sm:$0xff] %vm7678_vm8, %v7571_v45  ;;  %v7592_v39 = vadd.f32 %v9498_v4, %v7591_v7  ;;  %v7635_v51 = vsub.f32 1.0, %v7634_v1  ;;  %v7644_v62 = vand.u32 2147483648, %v16089_v50  ;;  %vm7609_vm12 = vweird.f32 %v9500_v49 }
 0x8c0   : > { %v7581_v40 = vsel %vm7580_vm10, %v9496_v19, %v7577_v12  ;;  %v7606_v47 = vmul.f32 %v9500_v49, %v7605_v5  ;;  %vm7639_vm13 = vweird.f32 %v9502_v54  ;;  %v7101_v28 = vsub.f32 0.0, %v7069_v23 }
 0x8c1   : > { %v7586_v10 = vsel %vm16106_vm2, %v7585_v6, %v7581_v40  ;;  %v7596_v43 = vsel %vm7595_vm11, %v9498_v4, %v7592_v39  ;;  %v9504_v18 = vpop.eup %9503  ;;  %v7636_v35 = vmul.f32 %v9502_v54, %v7635_v51  ;;  %vm7608_vm14 = vweird.f32 %v16082_v30 }
 0x8c2   : > { %7704 = vst.msk [vmem:[%s15655_s12 + $0xc8] sm:$0xff] %vm7678_vm8, %v7586_v10  ;;  %v7601_v0 = vsel %vm16114_vm5, %v7600_v20, %v7596_v43  ;;  %v7607_v2 = vadd.f32 %v9500_v49, %v7606_v47  ;;  %v7196_v26 = vadd.f32 1.0, %v9504_v18  ;;  %vm7610_vm15 = vmor %vm7608_vm14, %vm7609_vm12  ;;  %v7615_v42 = vor.u32 1.1754944e-38, %v7614_v63 }
 0x8c3   : > { %7705 = vst.msk [vmem:[%s15655_s12 + $0xd0] sm:$0xff] %vm7678_vm8, %v7601_v0  ;;  %v7637_v53 = vadd.f32 %v9502_v54, %v7636_v35  ;;  %vm7638_vm0 = vweird.f32 %v16089_v50  ;;  %v7164_v37 = vmul.f32 1.442695, %v7101_v28  ;;  %v9506_v44 = vpop.eup %9505  ;;  %vm7613_vm1 = vcmp.eq.f32.partialorder %v7612_v24, 8.507059e+37 }
 0x8c4   : > { %v7611_v61 = vsel %vm7610_vm15, %v9500_v49, %v7607_v2  ;;  %vm7640_vm2 = vmor %vm7638_vm0, %vm7639_vm13  ;;  %v7645_v60 = vor.u32 1.1754944e-38, %v7644_v62  ;;  %9507 = vrcp.f32 %v7196_v26  ;;  %vm7643_vm3 = vcmp.eq.f32.partialorder %v7642_v41, 8.507059e+37 }
 0x8c5   : > { %v7616_v46 = vsel %vm7613_vm1, %v7615_v42, %v7611_v61  ;;  %v7641_v36 = vsel %vm7640_vm2, %v9502_v54, %v7637_v53  ;;  %v7619_v30 = vmul.f32 %v9506_v44, %v16120_v32  ;;  %9509 = vpow2.f32 %v7164_v37 }
 0x8c6   : > { %7706 = vst.msk [vmem:[%s15655_s12 + $0xd8] sm:$0xff] %vm7678_vm8, %v7616_v46  ;;  %v7646_v57 = vsel %vm7643_vm3, %v7645_v60, %v7641_v36  ;;  %v7629_v50 = vand.u32 2147483648, %v16120_v32  ;;  %vm7624_vm4 = vweird.f32 %v9506_v44  ;;  %v7627_v3 = vand.u32 2147483647, %v16120_v32 }
 0x8c7   : > { %7708 = vst.msk [vmem:[%s15655_s12 + $0xe8] sm:$0xff] %vm7678_vm8, %v7646_v57  ;;  %v7620_v15 = vsub.f32 1.0, %v7619_v30  ;;  %vm7623_vm5 = vweird.f32 %v16120_v32  ;;  %v7659_v55 = vand.u32 2147483648, %v7196_v26  ;;  %v7657_v16 = vand.u32 2147483647, %v7196_v26 }
 0x8c8   : > { %vm7625_vm6 = vmor %vm7623_vm5, %vm7624_vm4  ;;  %v7630_v19 = vor.u32 1.1754944e-38, %v7629_v50  ;;  %vm7628_vm7 = vcmp.eq.f32.partialorder %v7627_v3, 8.507059e+37  ;;  %vm7653_vm10 = vweird.f32 %v7196_v26 }
 0x8c9   : > { %v7621_v58 = vmul.f32 %v9506_v44, %v7620_v15  ;;  %v7660_v13 = vor.u32 1.1754944e-38, %v7659_v55  ;;  %vm7658_vm12 = vcmp.eq.f32.partialorder %v7657_v16, 8.507059e+37 }
 0x8ca   : > { %v9508_v22 = vpop.eup %9507 }
 0x8cb   : > { %v7622_v17 = vadd.f32 %v9506_v44, %v7621_v58  ;;  %v7649_v59 = vmul.f32 %v9508_v22, %v7196_v26  ;;  %v9510_v27 = vpop.eup %9509  ;;  %vm7654_vm9 = vweird.f32 %v9508_v22 }
 0x8cc   : > { %v7197_v8 = vadd.f32 1.0, %v9510_v27  ;;  %vm7655_vm11 = vmor %vm7653_vm10, %vm7654_vm9 }
 0x8cd   : > { %v7626_v9 = vsel %vm7625_vm6, %v9506_v44, %v7622_v17  ;;  %v7650_v11 = vsub.f32 1.0, %v7649_v59 }
 0x8ce   : > { %v7631_v4 = vsel %vm7628_vm7, %v7630_v19, %v7626_v9  ;;  %9511 = vrcp.f32 %v7197_v8  ;;  %v7674_v25 = vand.u32 2147483648, %v7197_v8  ;;  %v7672_v20 = vand.u32 2147483647, %v7197_v8 }
 0x8cf   : > { %7707 = vst.msk [vmem:[%s15655_s12 + $0xe0] sm:$0xff] %vm7678_vm8, %v7631_v4  ;;  %v7651_v21 = vmul.f32 %v9508_v22, %v7650_v11  ;;  %vm7668_vm14 = vweird.f32 %v7197_v8 }
 0x8d0   : > { %v7675_v49 = vor.u32 1.1754944e-38, %v7674_v25  ;;  %vm7673_vm0 = vcmp.eq.f32.partialorder %v7672_v20, 8.507059e+37 }
 0x8d1   : > { %v7652_v31 = vadd.f32 %v9508_v22, %v7651_v21 }
 0x8d3   : > { %v7656_v48 = vsel %vm7655_vm11, %v9508_v22, %v7652_v31 }
 0x8d4   : > { %v7661_v34 = vsel %vm7658_vm12, %v7660_v13, %v7656_v48  ;;  %v9512_v14 = vpop.eup %9511 }
 0x8d5   : > { %7709 = vst.msk [vmem:[%s15655_s12 + $0xf0] sm:$0xff] %vm7678_vm8, %v7661_v34  ;;  %v7664_v6 = vmul.f32 %v9512_v14, %v7197_v8  ;;  %vm7669_vm13 = vweird.f32 %v9512_v14 }
 0x8d6   : > { %vm7670_vm15 = vmor %vm7668_vm14, %vm7669_vm13 }
 0x8d7   : > { %v7665_v33 = vsub.f32 1.0, %v7664_v6 }
 0x8d9   : > { %v7666_v52 = vmul.f32 %v9512_v14, %v7665_v33 }
 0x8db   : > { %v7667_v32 = vadd.f32 %v9512_v14, %v7666_v52 }
 0x8dd   : > { %v7671_v29 = vsel %vm7670_vm15, %v9512_v14, %v7667_v32 }
 0x8de   : > { %v7676_v24 = vsel %vm7673_vm0, %v7675_v49, %v7671_v29 }
 0x8df   : > { %7710 = vst.msk [vmem:[%s15655_s12 + $0xf8] sm:$0xff] %vm7678_vm8, %v7676_v24 }
 0x8e0 PF: > { %s23_s17 = sadd.s32 1, %s9638_s17  }
 0x8e1   : > { %p20_p4 = scmp.ge.s32.totalorder %s23_s17, 4  }
 0x8e3   :  { %22 = sbr.rel (!%p20_p4) target bundleno = 3 (0x3), region = 91 }

</bundles_post_ra>
